<compile_context>
chip_gen: v7x
topology: tpu7x:2x2x1
jax: 0.10.0
libtpu: 0.0.40
codegen_flags: <defaults>
</compile_context>

<pallas_src>
import functools

import jax
import jax.numpy as jnp
from jax.experimental import pallas as pl
from jax.experimental.pallas import tpu as pltpu

LEAK = 0.01  # F.leaky_relu / nn.LeakyReLU default negative slope


def _lrelu(y):
    return jnp.where(y > 0, y, LEAK * y)


# --------------------------------------------------------------------------
# Kernel 1: "stem" — all spatially-constant per-batch matmuls fused.
#   out[b] = tile_over_W( (cat(t2,v2) @ c_tv + b) @ W_in_tv + b_in )  (1, W*NC)
# --------------------------------------------------------------------------
def _stem_kernel(time_ref, vec_ref, ftw_ref, ftb_ref, ctw_ref, ctb_ref,
                 cvw_ref, cvb_ref, ctvw_t_ref, ctvw_v_ref, ctvb_ref,
                 wtv_ref, binb_ref, tile_ref, out_ref):
    f32 = jnp.float32
    t = _lrelu(jnp.dot(time_ref[...], ftw_ref[...], preferred_element_type=f32)
               + ftb_ref[...])
    t2 = jnp.dot(t, ctw_ref[...], preferred_element_type=f32) + ctb_ref[...]
    v2 = jnp.dot(vec_ref[...], cvw_ref[...], preferred_element_type=f32) + cvb_ref[...]
    tv = (jnp.dot(t2, ctvw_t_ref[...], preferred_element_type=f32)
          + jnp.dot(v2, ctvw_v_ref[...], preferred_element_type=f32)
          + ctvb_ref[...])
    tvc = jnp.dot(tv, wtv_ref[...], preferred_element_type=f32) + binb_ref[...]
    # lane-tile (B, NC) -> (B, W*NC) via MXU (tile_mat = eye(NC) tiled W times)
    out_ref[...] = jnp.dot(tvc, tile_ref[...],
                           preferred_element_type=f32).astype(out_ref.dtype)


# --------------------------------------------------------------------------
# Kernel 2: fused trunk — input 1x1 conv, n_resblocks x (5x5 conv, 5x5 conv,
# SE + residual + LeakyReLU), fused heads (logits | sigmoid(points)) and value.
# Activation layout: (H, W*NC), lane-dense.  5x5 conv = 5 row-shifted matmuls
# against Toeplitz-band weights of shape (W*NC, W*NC).
# --------------------------------------------------------------------------
def _trunk_kernel(img_ref, tv_ref, wimg_ref, convw_ref, convb_ref,
                  sew1_ref, seb1_ref, sew2_ref, seb2_ref,
                  pool_ref, tile_ref, headw_ref, headb_ref, pmask_ref,
                  valw_ref, valb_ref,
                  heads_ref, value_ref, xpad_ref,
                  *, n_res, H, W, NC):
    f32 = jnp.float32
    WNC = W * NC
    # zero once: border rows (vertical conv padding) stay zero for the whole step
    xpad_ref[...] = jnp.zeros((H + 4, WNC), f32)

    # conv1x1_input: image part (block-diag weight) + broadcast time/vector part
    x = jnp.dot(img_ref[0], wimg_ref[...], preferred_element_type=f32) + tv_ref[0]

    for r in range(n_res):
        residual = x
        h = x
        for c in range(2):
            idx = r * 2 + c
            xpad_ref[2:2 + H, :] = h                                  # row pad only
            acc = jnp.broadcast_to(convb_ref[idx], (H, WNC))
            for s in range(5):                                        # 5 row shifts
                acc = acc + jnp.dot(xpad_ref[s:s + H, :],
                                    convw_ref[idx * 5 + s],
                                    preferred_element_type=f32)
            h = _lrelu(acc)
        # Squeeze-and-Excitation epilogue (+ residual + LeakyReLU), still in vregs
        pooled = jnp.dot(jnp.sum(h, axis=0, keepdims=True), pool_ref[...],
                         preferred_element_type=f32)                  # (1, NC) mean
        sq = jnp.maximum(
            jnp.dot(pooled, sew1_ref[r], preferred_element_type=f32) + seb1_ref[r],
            0.0)
        g = jax.nn.sigmoid(
            jnp.dot(sq, sew2_ref[r], preferred_element_type=f32) + seb2_ref[r])
        gfull = jnp.dot(g, tile_ref[...], preferred_element_type=f32)  # (1, W*NC)
        x = _lrelu(h * gfull + residual)

    # Fused heads: logits (A cols per pixel) + points (sigmoid, last col per pixel)
    head = jnp.dot(x, headw_ref[...], preferred_element_type=f32) + headb_ref[...]
    head = jnp.where(pmask_ref[...] > 0.5, jax.nn.sigmoid(head), head)
    heads_ref[...] = head[None].astype(heads_ref.dtype)

    # Value head on globally pooled features
    pooled_f = jnp.dot(jnp.sum(x, axis=0, keepdims=True), pool_ref[...],
                       preferred_element_type=f32)
    val = jnp.dot(pooled_f, valw_ref[...], preferred_element_type=f32) + valb_ref[...]
    value_ref[...] = jnp.broadcast_to(val, (1, 1, 128)).astype(value_ref.dtype)


def _fused_trunk(prep, img2d, tv_full3):
    B, H, WS = img2d.shape
    NC = prep["tile_mat"].shape[0]
    W = prep["tile_mat"].shape[1] // NC
    n_res = prep["se_w1"].shape[0]
    A1 = prep["head_w"].shape[1] // W
    WNC = W * NC

    def full(arr):
        shape = arr.shape
        return pl.BlockSpec(shape, lambda b: (0,) * len(shape))

    kernel = functools.partial(_trunk_kernel, n_res=n_res, H=H, W=W, NC=NC)
    return pl.pallas_call(
        kernel,
        grid=(B,),
        in_specs=[
            pl.BlockSpec((1, H, WS), lambda b: (b, 0, 0)),     # img2d
            pl.BlockSpec((1, 1, WNC), lambda b: (b, 0, 0)),    # tv_full
            full(prep["w_img"]), full(prep["conv_w"]), full(prep["conv_b"]),
            full(prep["se_w1"]), full(prep["se_b1"]),
            full(prep["se_w2"]), full(prep["se_b2"]),
            full(prep["pool_mat"]), full(prep["tile_mat"]),
            full(prep["head_w"]), full(prep["head_b"]), full(prep["pts_mask"]),
            full(prep["value_w"]), full(prep["value_b"]),
        ],
        out_specs=[
            pl.BlockSpec((1, H, W * A1), lambda b: (b, 0, 0)),
            pl.BlockSpec((1, 1, 128), lambda b: (b, 0, 0)),
        ],
        out_shape=(jax.ShapeDtypeStruct((B, H, W * A1), jnp.float32),
                   jax.ShapeDtypeStruct((B, 1, 128), jnp.float32)),
        scratch_shapes=[pltpu.VMEM((H + 4, WNC), jnp.float32)],
        compiler_params=pltpu.CompilerParams(
            dimension_semantics=("parallel",),
            vmem_limit_bytes=32 * 1024 * 1024,
        ),
    )(img2d, tv_full3, prep["w_img"], prep["conv_w"], prep["conv_b"],
      prep["se_w1"], prep["se_b1"], prep["se_w2"], prep["se_b2"],
      prep["pool_mat"], prep["tile_mat"], prep["head_w"], prep["head_b"],
      prep["pts_mask"], prep["value_w"], prep["value_b"])


# --------------------------------------------------------------------------
# Parameters (deterministic synthetic init, kernel-friendly layouts)
# --------------------------------------------------------------------------
def init_params(key, *, action_dim, n_resblocks, n_channels, embedding_time,
                dim_time, dim_vector, dim_image, reduction=16):
    keys = iter(jax.random.split(key, 128))

    def w(shape, scale=0.1):
        return (scale * jax.random.normal(next(keys), shape)).astype(jnp.float32)

    E, V, S, NC, A = embedding_time, dim_vector, dim_image, n_channels, action_dim
    Cr = max(NC // reduction, 1)
    p = {
        "fc_time_w": w((dim_time, E)), "fc_time_b": w((1, E)),
        "c_time_w": w((E, E)), "c_time_b": w((1, E)),
        "c_vec_w": w((V, V)), "c_vec_b": w((1, V)),
        "c_tv_w": w((E + V, E + V)), "c_tv_b": w((1, E + V)),
        "c_in_w": w((S + E + V, NC)), "c_in_b": w((1, NC)),
        "c_log_w": w((NC, A)), "c_log_b": w((1, A)),
        "c_pts_w": w((NC, 1)), "c_pts_b": w((1, 1)),
        "value_w": w((NC, 1)), "value_b": w((1, 1)),
        "res": [],
    }
    for _ in range(n_resblocks):
        p["res"].append({
            "conv1_w": w((5, 5, NC, NC)), "conv1_b": w((1, NC)),
            "conv2_w": w((5, 5, NC, NC)), "conv2_b": w((1, NC)),
            "se_w1": w((NC, Cr)), "se_b1": w((1, Cr)),
            "se_w2": w((Cr, NC)), "se_b2": w((1, NC)),
        })
    # TODO(synk): spectral_norm 1x1 conv is only used when train=True; the eval
    # (train=False) path implemented here never applies it.
    return p


def prepare_params(params):
    """Precompute kernel-friendly derived weights (run once, outside jit)."""
    f32 = jnp.float32
    c_in_w = params["c_in_w"].astype(f32)
    E = params["c_time_w"].shape[0]
    V = params["c_vec_w"].shape[0]
    S = c_in_w.shape[0] - (E + V)           # torch-cat quirk: C == H == W == S
    NC = c_in_w.shape[1]
    A = params["c_log_w"].shape[1]
    W = S
    eye_nc = jnp.eye(NC, dtype=f32)
    eye_w = jnp.eye(W, dtype=f32)

    def row_band(w_s):  # (5, Cin, Cout) -> (W*Cin, W*Cout) horizontal Toeplitz band
        Cin, Cout = w_s.shape[1], w_s.shape[2]
        zero = jnp.zeros((Cin, Cout), f32)
        rows = []
        for w_in in range(W):
            cols = []
            for w_out in range(W):
                dx = w_in - w_out + 2
                cols.append(w_s[dx] if 0 <= dx <= 4 else zero)
            rows.append(jnp.stack(cols, axis=1))           # (Cin, W, Cout)
        return jnp.stack(rows, axis=0).reshape(W * Cin, W * Cout)

    bands, cbias = [], []
    for rp in params["res"]:
        for wk, bk in (("conv1_w", "conv1_b"), ("conv2_w", "conv2_b")):
            wt = rp[wk].astype(f32)                        # (5, 5, NC, NC)
            bands.extend(row_band(wt[s]) for s in range(5))
            cbias.append(jnp.tile(rp[bk].astype(f32), (1, W)))

    head_w = jnp.concatenate([params["c_log_w"], params["c_pts_w"]], axis=1).astype(f32)
    head_b = jnp.concatenate([params["c_log_b"], params["c_pts_b"]], axis=1).astype(f32)
    pts_mask = jnp.tile((jnp.arange(A + 1) == A).astype(f32), (W,))[None, :]

    return {
        # stem (spatially-constant path)
        "fc_time_w": params["fc_time_w"], "fc_time_b": params["fc_time_b"],
        "c_time_w": params["c_time_w"], "c_time_b": params["c_time_b"],
        "c_vec_w": params["c_vec_w"], "c_vec_b": params["c_vec_b"],
        "c_tv_w_t": params["c_tv_w"][:E], "c_tv_w_v": params["c_tv_w"][E:],
        "c_tv_b": params["c_tv_b"],
        "w_in_tv": c_in_w[S:], "c_in_b": params["c_in_b"],
        # trunk
        "w_img": jnp.kron(eye_w, c_in_w[:S]),              # (W*S, W*NC)
        "conv_w": jnp.stack(bands, axis=0),                # (n_res*2*5, W*NC, W*NC)
        "conv_b": jnp.stack(cbias, axis=0),                # (n_res*2, 1, W*NC)
        "se_w1": jnp.stack([rp["se_w1"] for rp in params["res"]]),
        "se_b1": jnp.stack([rp["se_b1"] for rp in params["res"]]),
        "se_w2": jnp.stack([rp["se_w2"] for rp in params["res"]]),
        "se_b2": jnp.stack([rp["se_b2"] for rp in params["res"]]),
        "pool_mat": jnp.tile(eye_nc, (W, 1)) / float(S * W),  # mean over H*W
        "tile_mat": jnp.tile(eye_nc, (1, W)),               # (NC, W*NC) lane tiler
        "head_w": jnp.kron(eye_w, head_w),                  # (W*NC, W*(A+1))
        "head_b": jnp.tile(head_b, (1, W)),                 # (1, W*(A+1))
        "pts_mask": pts_mask,                               # (1, W*(A+1))
        "value_w": params["value_w"], "value_b": params["value_b"],
    }


# --------------------------------------------------------------------------
# Forward pass (train=False path of Pix2Pix_AC.forward)
# --------------------------------------------------------------------------
def pix2pix_ac_forward(prep, image, vector, time, position, mask_awake, action_mask):
    B, C, H, W = image.shape                   # requires C == H == W (torch cat quirk)
    NC = prep["tile_mat"].shape[0]
    A1 = prep["head_w"].shape[1] // W
    A = A1 - 1

    # spatially-constant path: (B, W*NC) tiled time/vector contribution incl. c_in bias
    tv_full = pl.pallas_call(
        _stem_kernel,
        out_shape=jax.ShapeDtypeStruct((B, W * NC), jnp.float32),
    )(time.astype(jnp.float32), vector.astype(jnp.float32),
      prep["fc_time_w"], prep["fc_time_b"], prep["c_time_w"], prep["c_time_b"],
      prep["c_vec_w"], prep["c_vec_b"], prep["c_tv_w_t"], prep["c_tv_w_v"],
      prep["c_tv_b"], prep["w_in_tv"], prep["c_in_b"], prep["tile_mat"])

    # image part in the lane-dense 2-D layout (h, w*S + c), matching torch's
    # image.permute(0,2,3,1) followed by the channel-dim concat.
    img2d = jnp.transpose(image.astype(jnp.float32), (0, 3, 1, 2)).reshape(B, H, W * C)

    heads, value_pad = _fused_trunk(prep, img2d, tv_full.reshape(B, 1, W * NC))

    maps = jnp.transpose(heads.reshape(B, H, W, A1), (0, 3, 1, 2))   # (B, A+1, H, W)
    logits_maps = maps[:, :A]
    points = maps[:, A:A1]
    value = value_pad[:, 0, 0]

    # gather per-batch positions (glue, matches torch advanced-indexing semantics)
    gathered = jax.vmap(lambda lm, pos: lm[:, pos[:, 0], pos[:, 1]])(logits_maps, position)
    logits = gathered * mask_awake[:, :, None]
    logits_masked = jnp.where(action_mask, logits, jnp.float32(1e-9))

    return logits_masked, value, logits_maps, points


# --------------------------------------------------------------------------
if __name__ == "__main__":
    B = 2
    dim_image = 8          # image must satisfy C == H == W == dim_image
    dim_time = 12
    dim_vector = 6
    embedding_time = 4
    n_channels = 32
    n_resblocks = 2
    action_dim = 6
    P = 5                  # number of gathered positions per batch element

    key = jax.random.PRNGKey(0)
    kp, ki, kv, kt, kpos, km, ka = jax.random.split(key, 7)

    params = init_params(kp, action_dim=action_dim, n_resblocks=n_resblocks,
                         n_channels=n_channels, embedding_time=embedding_time,
                         dim_time=dim_time, dim_vector=dim_vector, dim_image=dim_image)
    prep = prepare_params(params)

    image = jax.random.normal(ki, (B, dim_image, dim_image, dim_image), jnp.float32)
    vector = jax.random.normal(kv, (B, dim_vector), jnp.float32)
    time = jax.random.normal(kt, (B, dim_time), jnp.float32)
    position = jax.random.randint(kpos, (B, P, 2), 0, dim_image)
    mask_awake = (jax.random.uniform(km, (B, action_dim)) > 0.3).astype(jnp.float32)
    action_mask = jax.random.uniform(ka, (B, action_dim, P)) > 0.2

    fwd = jax.jit(pix2pix_ac_forward)
    logits_masked, value, logits_maps, points = fwd(
        prep, image, vector, time, position, mask_awake, action_mask)
    jax.block_until_ready((logits_masked, value, logits_maps, points))

    assert logits_masked.shape == (B, action_dim, P)
    assert value.shape == (B,)
    assert logits_maps.shape == (B, action_dim, dim_image, dim_image)
    assert points.shape == (B, 1, dim_image, dim_image)
    print("KERNEL_OK")
</pallas_src>

<mosaic_0001>
module attributes {stable_mosaic.version = 11 : i64} {
  func.func @_stem_kernel(%arg0: memref<2x12xf32, #tpu.memory_space<vmem>>, %arg1: memref<2x6xf32, #tpu.memory_space<vmem>>, %arg2: memref<12x4xf32, #tpu.memory_space<vmem>>, %arg3: memref<1x4xf32, #tpu.memory_space<vmem>>, %arg4: memref<4x4xf32, #tpu.memory_space<vmem>>, %arg5: memref<1x4xf32, #tpu.memory_space<vmem>>, %arg6: memref<6x6xf32, #tpu.memory_space<vmem>>, %arg7: memref<1x6xf32, #tpu.memory_space<vmem>>, %arg8: memref<4x10xf32, #tpu.memory_space<vmem>>, %arg9: memref<6x10xf32, #tpu.memory_space<vmem>>, %arg10: memref<1x10xf32, #tpu.memory_space<vmem>>, %arg11: memref<10x32xf32, #tpu.memory_space<vmem>>, %arg12: memref<1x32xf32, #tpu.memory_space<vmem>>, %arg13: memref<32x256xf32, #tpu.memory_space<vmem>>, %arg14: memref<2x256xf32, #tpu.memory_space<vmem>>) attributes {dimension_semantics = [], scalar_prefetch = 0 : i64, scratch_operands = 0 : i64, tpu.core_type = #tpu.core_type<tc>} {
    %c0 = arith.constant 0 : index
    %c0_0 = arith.constant 0 : index
    %0 = vector.load %arg0[%c0, %c0_0] : memref<2x12xf32, #tpu.memory_space<vmem>>, vector<2x12xf32>
    %c0_1 = arith.constant 0 : index
    %c0_2 = arith.constant 0 : index
    %1 = vector.load %arg2[%c0_1, %c0_2] : memref<12x4xf32, #tpu.memory_space<vmem>>, vector<12x4xf32>
    %cst = arith.constant dense<0.000000e+00> : vector<2x4xf32>
    %2 = tpu.matmul %0, %1, %cst {dimension_numbers = #tpu.dot_dimension_numbers<[1], [0], [0], [1], [0, 0, 1, 1], [], []>} : vector<2x12xf32>, vector<12x4xf32>, vector<2x4xf32> -> vector<2x4xf32>
    %c0_3 = arith.constant 0 : index
    %c0_4 = arith.constant 0 : index
    %3 = vector.load %arg3[%c0_3, %c0_4] : memref<1x4xf32, #tpu.memory_space<vmem>>, vector<1x4xf32>
    %4 = vector.broadcast %3 : vector<1x4xf32> to vector<2x4xf32>
    %5 = arith.addf %2, %4 : vector<2x4xf32>
    %cst_5 = arith.constant 0.000000e+00 : f32
    %6 = vector.broadcast %cst_5 : f32 to vector<2x4xf32>
    %7 = arith.cmpf ogt, %5, %6 : vector<2x4xf32>
    %cst_6 = arith.constant 0.00999999977 : f32
    %8 = vector.broadcast %cst_6 : f32 to vector<2x4xf32>
    %9 = arith.mulf %8, %5 : vector<2x4xf32>
    %10 = arith.select %7, %5, %9 : vector<2x4xi1>, vector<2x4xf32>
    %c0_7 = arith.constant 0 : index
    %c0_8 = arith.constant 0 : index
    %11 = vector.load %arg4[%c0_7, %c0_8] : memref<4x4xf32, #tpu.memory_space<vmem>>, vector<4x4xf32>
    %cst_9 = arith.constant dense<0.000000e+00> : vector<2x4xf32>
    %12 = tpu.matmul %10, %11, %cst_9 {dimension_numbers = #tpu.dot_dimension_numbers<[1], [0], [0], [1], [0, 0, 1, 1], [], []>} : vector<2x4xf32>, vector<4x4xf32>, vector<2x4xf32> -> vector<2x4xf32>
    %c0_10 = arith.constant 0 : index
    %c0_11 = arith.constant 0 : index
    %13 = vector.load %arg5[%c0_10, %c0_11] : memref<1x4xf32, #tpu.memory_space<vmem>>, vector<1x4xf32>
    %14 = vector.broadcast %13 : vector<1x4xf32> to vector<2x4xf32>
    %15 = arith.addf %12, %14 : vector<2x4xf32>
    %c0_12 = arith.constant 0 : index
    %c0_13 = arith.constant 0 : index
    %16 = vector.load %arg1[%c0_12, %c0_13] : memref<2x6xf32, #tpu.memory_space<vmem>>, vector<2x6xf32>
    %c0_14 = arith.constant 0 : index
    %c0_15 = arith.constant 0 : index
    %17 = vector.load %arg6[%c0_14, %c0_15] : memref<6x6xf32, #tpu.memory_space<vmem>>, vector<6x6xf32>
    %cst_16 = arith.constant dense<0.000000e+00> : vector<2x6xf32>
    %18 = tpu.matmul %16, %17, %cst_16 {dimension_numbers = #tpu.dot_dimension_numbers<[1], [0], [0], [1], [0, 0, 1, 1], [], []>} : vector<2x6xf32>, vector<6x6xf32>, vector<2x6xf32> -> vector<2x6xf32>
    %c0_17 = arith.constant 0 : index
    %c0_18 = arith.constant 0 : index
    %19 = vector.load %arg7[%c0_17, %c0_18] : memref<1x6xf32, #tpu.memory_space<vmem>>, vector<1x6xf32>
    %20 = vector.broadcast %19 : vector<1x6xf32> to vector<2x6xf32>
    %21 = arith.addf %18, %20 : vector<2x6xf32>
    %c0_19 = arith.constant 0 : index
    %c0_20 = arith.constant 0 : index
    %22 = vector.load %arg8[%c0_19, %c0_20] : memref<4x10xf32, #tpu.memory_space<vmem>>, vector<4x10xf32>
    %cst_21 = arith.constant dense<0.000000e+00> : vector<2x10xf32>
    %23 = tpu.matmul %15, %22, %cst_21 {dimension_numbers = #tpu.dot_dimension_numbers<[1], [0], [0], [1], [0, 0, 1, 1], [], []>} : vector<2x4xf32>, vector<4x10xf32>, vector<2x10xf32> -> vector<2x10xf32>
    %c0_22 = arith.constant 0 : index
    %c0_23 = arith.constant 0 : index
    %24 = vector.load %arg9[%c0_22, %c0_23] : memref<6x10xf32, #tpu.memory_space<vmem>>, vector<6x10xf32>
    %cst_24 = arith.constant dense<0.000000e+00> : vector<2x10xf32>
    %25 = tpu.matmul %21, %24, %cst_24 {dimension_numbers = #tpu.dot_dimension_numbers<[1], [0], [0], [1], [0, 0, 1, 1], [], []>} : vector<2x6xf32>, vector<6x10xf32>, vector<2x10xf32> -> vector<2x10xf32>
    %26 = arith.addf %23, %25 : vector<2x10xf32>
    %c0_25 = arith.constant 0 : index
    %c0_26 = arith.constant 0 : index
    %27 = vector.load %arg10[%c0_25, %c0_26] : memref<1x10xf32, #tpu.memory_space<vmem>>, vector<1x10xf32>
    %28 = vector.broadcast %27 : vector<1x10xf32> to vector<2x10xf32>
    %29 = arith.addf %26, %28 : vector<2x10xf32>
    %c0_27 = arith.constant 0 : index
    %c0_28 = arith.constant 0 : index
    %30 = vector.load %arg11[%c0_27, %c0_28] : memref<10x32xf32, #tpu.memory_space<vmem>>, vector<10x32xf32>
    %cst_29 = arith.constant dense<0.000000e+00> : vector<2x32xf32>
    %31 = tpu.matmul %29, %30, %cst_29 {dimension_numbers = #tpu.dot_dimension_numbers<[1], [0], [0], [1], [0, 0, 1, 1], [], []>} : vector<2x10xf32>, vector<10x32xf32>, vector<2x32xf32> -> vector<2x32xf32>
    %c0_30 = arith.constant 0 : index
    %c0_31 = arith.constant 0 : index
    %32 = vector.load %arg12[%c0_30, %c0_31] : memref<1x32xf32, #tpu.memory_space<vmem>>, vector<1x32xf32>
    %33 = vector.broadcast %32 : vector<1x32xf32> to vector<2x32xf32>
    %34 = arith.addf %31, %33 : vector<2x32xf32>
    %c0_32 = arith.constant 0 : index
    %c0_33 = arith.constant 0 : index
    %35 = vector.load %arg13[%c0_32, %c0_33] : memref<32x256xf32, #tpu.memory_space<vmem>>, vector<32x256xf32>
    %cst_34 = arith.constant dense<0.000000e+00> : vector<2x256xf32>
    %36 = tpu.matmul %34, %35, %cst_34 {dimension_numbers = #tpu.dot_dimension_numbers<[1], [0], [0], [1], [0, 0, 1, 1], [], []>} : vector<2x32xf32>, vector<32x256xf32>, vector<2x256xf32> -> vector<2x256xf32>
    %c0_35 = arith.constant 0 : index
    %c0_36 = arith.constant 0 : index
    %37 = vector.load %arg14[%c0_35, %c0_36] : memref<2x256xf32, #tpu.memory_space<vmem>>, vector<2x256xf32>
    tpu.vector_store %arg14[%c0_35, %c0_36], %36 {strides = array<i32>} : memref<2x256xf32, #tpu.memory_space<vmem>>, vector<2x256xf32>,
    return
  }
}

module attributes {stable_mosaic.version = 11 : i64} {
  func.func @_trunk_kernel(%arg0: i32, %arg1: memref<1x8x64xf32, #tpu.memory_space<vmem>>, %arg2: memref<1x1x256xf32, #tpu.memory_space<vmem>>, %arg3: memref<64x256xf32, #tpu.memory_space<vmem>>, %arg4: memref<20x256x256xf32, #tpu.memory_space<vmem>>, %arg5: memref<4x1x256xf32, #tpu.memory_space<vmem>>, %arg6: memref<2x32x2xf32, #tpu.memory_space<vmem>>, %arg7: memref<2x1x2xf32, #tpu.memory_space<vmem>>, %arg8: memref<2x2x32xf32, #tpu.memory_space<vmem>>, %arg9: memref<2x1x32xf32, #tpu.memory_space<vmem>>, %arg10: memref<256x32xf32, #tpu.memory_space<vmem>>, %arg11: memref<32x256xf32, #tpu.memory_space<vmem>>, %arg12: memref<256x56xf32, #tpu.memory_space<vmem>>, %arg13: memref<1x56xf32, #tpu.memory_space<vmem>>, %arg14: memref<1x56xf32, #tpu.memory_space<vmem>>, %arg15: memref<32x1xf32, #tpu.memory_space<vmem>>, %arg16: memref<1x1xf32, #tpu.memory_space<vmem>>, %arg17: memref<1x8x56xf32, #tpu.memory_space<vmem>>, %arg18: memref<1x1x128xf32, #tpu.memory_space<vmem>>, %arg19: memref<12x256xf32, #tpu.memory_space<vmem>>) attributes {dimension_semantics = [#tpu.dimension_semantics<parallel>], iteration_bounds = array<i64: 2>, scalar_prefetch = 0 : i64, scratch_operands = 1 : i64, tpu.core_type = #tpu.core_type<tc>, window_params = [{transform_indices = @transform_0, window_bounds = array<i64: 1, 8, 64>}, {transform_indices = @transform_1, window_bounds = array<i64: 1, 1, 256>}, {pipeline_mode = #tpu.pipeline_mode<synchronous>, transform_indices = @transform_2, window_bounds = array<i64: 64, 256>}, {pipeline_mode = #tpu.pipeline_mode<synchronous>, transform_indices = @transform_3, window_bounds = array<i64: 20, 256, 256>}, {pipeline_mode = #tpu.pipeline_mode<synchronous>, transform_indices = @transform_4, window_bounds = array<i64: 4, 1, 256>}, {pipeline_mode = #tpu.pipeline_mode<synchronous>, transform_indices = @transform_5, window_bounds = array<i64: 2, 32, 2>}, {pipeline_mode = #tpu.pipeline_mode<synchronous>, transform_indices = @transform_6, window_bounds = array<i64: 2, 1, 2>}, {pipeline_mode = #tpu.pipeline_mode<synchronous>, transform_indices = @transform_7, window_bounds = array<i64: 2, 2, 32>}, {pipeline_mode = #tpu.pipeline_mode<synchronous>, transform_indices = @transform_8, window_bounds = array<i64: 2, 1, 32>}, {pipeline_mode = #tpu.pipeline_mode<synchronous>, transform_indices = @transform_9, window_bounds = array<i64: 256, 32>}, {pipeline_mode = #tpu.pipeline_mode<synchronous>, transform_indices = @transform_10, window_bounds = array<i64: 32, 256>}, {pipeline_mode = #tpu.pipeline_mode<synchronous>, transform_indices = @transform_11, window_bounds = array<i64: 256, 56>}, {pipeline_mode = #tpu.pipeline_mode<synchronous>, transform_indices = @transform_12, window_bounds = array<i64: 1, 56>}, {pipeline_mode = #tpu.pipeline_mode<synchronous>, transform_indices = @transform_13, window_bounds = array<i64: 1, 56>}, {pipeline_mode = #tpu.pipeline_mode<synchronous>, transform_indices = @transform_14, window_bounds = array<i64: 32, 1>}, {pipeline_mode = #tpu.pipeline_mode<synchronous>, transform_indices = @transform_15, window_bounds = array<i64: 1, 1>}, {transform_indices = @transform_16, window_bounds = array<i64: 1, 8, 56>}, {transform_indices = @transform_17, window_bounds = array<i64: 1, 1, 128>}]} {
    %cst = arith.constant 0.000000e+00 : f32
    %0 = vector.broadcast %cst : f32 to vector<12x256xf32>
    %c0 = arith.constant 0 : index
    %c0_0 = arith.constant 0 : index
    %1 = vector.load %arg19[%c0, %c0_0] : memref<12x256xf32, #tpu.memory_space<vmem>>, vector<12x256xf32>
    tpu.vector_store %arg19[%c0, %c0_0], %0 {strides = array<i32>} : memref<12x256xf32, #tpu.memory_space<vmem>>, vector<12x256xf32>,
    %c0_1 = arith.constant 0 : index
    %c0_2 = arith.constant 0 : index
    %c0_3 = arith.constant 0 : index
    %2 = vector.load %arg1[%c0_1, %c0_2, %c0_3] : memref<1x8x64xf32, #tpu.memory_space<vmem>>, vector<1x8x64xf32>
    %3 = vector.shape_cast %2 : vector<1x8x64xf32> to vector<8x64xf32>
    %c0_4 = arith.constant 0 : index
    %c0_5 = arith.constant 0 : index
    %4 = vector.load %arg3[%c0_4, %c0_5] : memref<64x256xf32, #tpu.memory_space<vmem>>, vector<64x256xf32>
    %cst_6 = arith.constant dense<0.000000e+00> : vector<8x256xf32>
    %5 = tpu.matmul %3, %4, %cst_6 {dimension_numbers = #tpu.dot_dimension_numbers<[1], [0], [0], [1], [0, 0, 1, 1], [], []>} : vector<8x64xf32>, vector<64x256xf32>, vector<8x256xf32> -> vector<8x256xf32>
    %c0_7 = arith.constant 0 : index
    %c0_8 = arith.constant 0 : index
    %c0_9 = arith.constant 0 : index
    %6 = vector.load %arg2[%c0_7, %c0_8, %c0_9] : memref<1x1x256xf32, #tpu.memory_space<vmem>>, vector<1x1x256xf32>
    %7 = vector.shape_cast %6 : vector<1x1x256xf32> to vector<1x256xf32>
    %8 = vector.broadcast %7 : vector<1x256xf32> to vector<8x256xf32>
    %9 = arith.addf %5, %8 : vector<8x256xf32>
    %c2 = arith.constant 2 : index
    %c0_10 = arith.constant 0 : index
    %10 = vector.load %arg19[%c2, %c0_10] : memref<12x256xf32, #tpu.memory_space<vmem>>, vector<8x256xf32>
    tpu.vector_store %arg19[%c2, %c0_10], %9 {strides = array<i32>} : memref<12x256xf32, #tpu.memory_space<vmem>>, vector<8x256xf32>,
    %c0_11 = arith.constant 0 : index
    %c0_12 = arith.constant 0 : index
    %c0_13 = arith.constant 0 : index
    %11 = vector.load %arg5[%c0_11, %c0_12, %c0_13] : memref<4x1x256xf32, #tpu.memory_space<vmem>>, vector<1x1x256xf32>
    %12 = vector.shape_cast %11 : vector<1x1x256xf32> to vector<1x256xf32>
    %13 = vector.shape_cast %12 : vector<1x256xf32> to vector<1x256xf32>
    %14 = vector.broadcast %13 : vector<1x256xf32> to vector<8x256xf32>
    %c0_14 = arith.constant 0 : index
    %c0_15 = arith.constant 0 : index
    %15 = vector.load %arg19[%c0_14, %c0_15] : memref<12x256xf32, #tpu.memory_space<vmem>>, vector<8x256xf32>
    %c0_16 = arith.constant 0 : index
    %c0_17 = arith.constant 0 : index
    %c0_18 = arith.constant 0 : index
    %16 = vector.load %arg4[%c0_16, %c0_17, %c0_18] : memref<20x256x256xf32, #tpu.memory_space<vmem>>, vector<1x256x256xf32>
    %17 = vector.shape_cast %16 : vector<1x256x256xf32> to vector<256x256xf32>
    %cst_19 = arith.constant dense<0.000000e+00> : vector<8x256xf32>
    %18 = tpu.matmul %15, %17, %cst_19 {dimension_numbers = #tpu.dot_dimension_numbers<[1], [0], [0], [1], [0, 0, 1, 1], [], []>} : vector<8x256xf32>, vector<256x256xf32>, vector<8x256xf32> -> vector<8x256xf32>
    %19 = arith.addf %14, %18 : vector<8x256xf32>
    %c1 = arith.constant 1 : index
    %c0_20 = arith.constant 0 : index
    %20 = vector.load %arg19[%c1, %c0_20] : memref<12x256xf32, #tpu.memory_space<vmem>>, vector<8x256xf32>
    %c1_21 = arith.constant 1 : index
    %c0_22 = arith.constant 0 : index
    %c0_23 = arith.constant 0 : index
    %21 = vector.load %arg4[%c1_21, %c0_22, %c0_23] : memref<20x256x256xf32, #tpu.memory_space<vmem>>, vector<1x256x256xf32>
    %22 = vector.shape_cast %21 : vector<1x256x256xf32> to vector<256x256xf32>
    %cst_24 = arith.constant dense<0.000000e+00> : vector<8x256xf32>
    %23 = tpu.matmul %20, %22, %cst_24 {dimension_numbers = #tpu.dot_dimension_numbers<[1], [0], [0], [1], [0, 0, 1, 1], [], []>} : vector<8x256xf32>, vector<256x256xf32>, vector<8x256xf32> -> vector<8x256xf32>
    %24 = arith.addf %19, %23 : vector<8x256xf32>
    %c2_25 = arith.constant 2 : index
    %c0_26 = arith.constant 0 : index
    %25 = vector.load %arg19[%c2_25, %c0_26] : memref<12x256xf32, #tpu.memory_space<vmem>>, vector<8x256xf32>
    %c2_27 = arith.constant 2 : index
    %c0_28 = arith.constant 0 : index
    %c0_29 = arith.constant 0 : index
    %26 = vector.load %arg4[%c2_27, %c0_28, %c0_29] : memref<20x256x256xf32, #tpu.memory_space<vmem>>, vector<1x256x256xf32>
    %27 = vector.shape_cast %26 : vector<1x256x256xf32> to vector<256x256xf32>
    %cst_30 = arith.constant dense<0.000000e+00> : vector<8x256xf32>
    %28 = tpu.matmul %25, %27, %cst_30 {dimension_numbers = #tpu.dot_dimension_numbers<[1], [0], [0], [1], [0, 0, 1, 1], [], []>} : vector<8x256xf32>, vector<256x256xf32>, vector<8x256xf32> -> vector<8x256xf32>
    %29 = arith.addf %24, %28 : vector<8x256xf32>
    %c3 = arith.constant 3 : index
    %c0_31 = arith.constant 0 : index
    %30 = vector.load %arg19[%c3, %c0_31] : memref<12x256xf32, #tpu.memory_space<vmem>>, vector<8x256xf32>
    %c3_32 = arith.constant 3 : index
    %c0_33 = arith.constant 0 : index
    %c0_34 = arith.constant 0 : index
    %31 = vector.load %arg4[%c3_32, %c0_33, %c0_34] : memref<20x256x256xf32, #tpu.memory_space<vmem>>, vector<1x256x256xf32>
    %32 = vector.shape_cast %31 : vector<1x256x256xf32> to vector<256x256xf32>
    %cst_35 = arith.constant dense<0.000000e+00> : vector<8x256xf32>
    %33 = tpu.matmul %30, %32, %cst_35 {dimension_numbers = #tpu.dot_dimension_numbers<[1], [0], [0], [1], [0, 0, 1, 1], [], []>} : vector<8x256xf32>, vector<256x256xf32>, vector<8x256xf32> -> vector<8x256xf32>
    %34 = arith.addf %29, %33 : vector<8x256xf32>
    %c4 = arith.constant 4 : index
    %c0_36 = arith.constant 0 : index
    %35 = vector.load %arg19[%c4, %c0_36] : memref<12x256xf32, #tpu.memory_space<vmem>>, vector<8x256xf32>
    %c4_37 = arith.constant 4 : index
    %c0_38 = arith.constant 0 : index
    %c0_39 = arith.constant 0 : index
    %36 = vector.load %arg4[%c4_37, %c0_38, %c0_39] : memref<20x256x256xf32, #tpu.memory_space<vmem>>, vector<1x256x256xf32>
    %37 = vector.shape_cast %36 : vector<1x256x256xf32> to vector<256x256xf32>
    %cst_40 = arith.constant dense<0.000000e+00> : vector<8x256xf32>
    %38 = tpu.matmul %35, %37, %cst_40 {dimension_numbers = #tpu.dot_dimension_numbers<[1], [0], [0], [1], [0, 0, 1, 1], [], []>} : vector<8x256xf32>, vector<256x256xf32>, vector<8x256xf32> -> vector<8x256xf32>
    %39 = arith.addf %34, %38 : vector<8x256xf32>
    %cst_41 = arith.constant 0.000000e+00 : f32
    %40 = vector.broadcast %cst_41 : f32 to vector<8x256xf32>
    %41 = arith.cmpf ogt, %39, %40 : vector<8x256xf32>
    %cst_42 = arith.constant 0.00999999977 : f32
    %42 = vector.broadcast %cst_42 : f32 to vector<8x256xf32>
    %43 = arith.mulf %42, %39 : vector<8x256xf32>
    %44 = arith.select %41, %39, %43 : vector<8x256xi1>, vector<8x256xf32>
    %c2_43 = arith.constant 2 : index
    %c0_44 = arith.constant 0 : index
    %45 = vector.load %arg19[%c2_43, %c0_44] : memref<12x256xf32, #tpu.memory_space<vmem>>, vector<8x256xf32>
    tpu.vector_store %arg19[%c2_43, %c0_44], %44 {strides = array<i32>} : memref<12x256xf32, #tpu.memory_space<vmem>>, vector<8x256xf32>,
    %c1_45 = arith.constant 1 : index
    %c0_46 = arith.constant 0 : index
    %c0_47 = arith.constant 0 : index
    %46 = vector.load %arg5[%c1_45, %c0_46, %c0_47] : memref<4x1x256xf32, #tpu.memory_space<vmem>>, vector<1x1x256xf32>
    %47 = vector.shape_cast %46 : vector<1x1x256xf32> to vector<1x256xf32>
    %48 = vector.shape_cast %47 : vector<1x256xf32> to vector<1x256xf32>
    %49 = vector.broadcast %48 : vector<1x256xf32> to vector<8x256xf32>
    %c0_48 = arith.constant 0 : index
    %c0_49 = arith.constant 0 : index
    %50 = vector.load %arg19[%c0_48, %c0_49] : memref<12x256xf32, #tpu.memory_space<vmem>>, vector<8x256xf32>
    %c5 = arith.constant 5 : index
    %c0_50 = arith.constant 0 : index
    %c0_51 = arith.constant 0 : index
    %51 = vector.load %arg4[%c5, %c0_50, %c0_51] : memref<20x256x256xf32, #tpu.memory_space<vmem>>, vector<1x256x256xf32>
    %52 = vector.shape_cast %51 : vector<1x256x256xf32> to vector<256x256xf32>
    %cst_52 = arith.constant dense<0.000000e+00> : vector<8x256xf32>
    %53 = tpu.matmul %50, %52, %cst_52 {dimension_numbers = #tpu.dot_dimension_numbers<[1], [0], [0], [1], [0, 0, 1, 1], [], []>} : vector<8x256xf32>, vector<256x256xf32>, vector<8x256xf32> -> vector<8x256xf32>
    %54 = arith.addf %49, %53 : vector<8x256xf32>
    %c1_53 = arith.constant 1 : index
    %c0_54 = arith.constant 0 : index
    %55 = vector.load %arg19[%c1_53, %c0_54] : memref<12x256xf32, #tpu.memory_space<vmem>>, vector<8x256xf32>
    %c6 = arith.constant 6 : index
    %c0_55 = arith.constant 0 : index
    %c0_56 = arith.constant 0 : index
    %56 = vector.load %arg4[%c6, %c0_55, %c0_56] : memref<20x256x256xf32, #tpu.memory_space<vmem>>, vector<1x256x256xf32>
    %57 = vector.shape_cast %56 : vector<1x256x256xf32> to vector<256x256xf32>
    %cst_57 = arith.constant dense<0.000000e+00> : vector<8x256xf32>
    %58 = tpu.matmul %55, %57, %cst_57 {dimension_numbers = #tpu.dot_dimension_numbers<[1], [0], [0], [1], [0, 0, 1, 1], [], []>} : vector<8x256xf32>, vector<256x256xf32>, vector<8x256xf32> -> vector<8x256xf32>
    %59 = arith.addf %54, %58 : vector<8x256xf32>
    %c2_58 = arith.constant 2 : index
    %c0_59 = arith.constant 0 : index
    %60 = vector.load %arg19[%c2_58, %c0_59] : memref<12x256xf32, #tpu.memory_space<vmem>>, vector<8x256xf32>
    %c7 = arith.constant 7 : index
    %c0_60 = arith.constant 0 : index
    %c0_61 = arith.constant 0 : index
    %61 = vector.load %arg4[%c7, %c0_60, %c0_61] : memref<20x256x256xf32, #tpu.memory_space<vmem>>, vector<1x256x256xf32>
    %62 = vector.shape_cast %61 : vector<1x256x256xf32> to vector<256x256xf32>
    %cst_62 = arith.constant dense<0.000000e+00> : vector<8x256xf32>
    %63 = tpu.matmul %60, %62, %cst_62 {dimension_numbers = #tpu.dot_dimension_numbers<[1], [0], [0], [1], [0, 0, 1, 1], [], []>} : vector<8x256xf32>, vector<256x256xf32>, vector<8x256xf32> -> vector<8x256xf32>
    %64 = arith.addf %59, %63 : vector<8x256xf32>
    %c3_63 = arith.constant 3 : index
    %c0_64 = arith.constant 0 : index
    %65 = vector.load %arg19[%c3_63, %c0_64] : memref<12x256xf32, #tpu.memory_space<vmem>>, vector<8x256xf32>
    %c8 = arith.constant 8 : index
    %c0_65 = arith.constant 0 : index
    %c0_66 = arith.constant 0 : index
    %66 = vector.load %arg4[%c8, %c0_65, %c0_66] : memref<20x256x256xf32, #tpu.memory_space<vmem>>, vector<1x256x256xf32>
    %67 = vector.shape_cast %66 : vector<1x256x256xf32> to vector<256x256xf32>
    %cst_67 = arith.constant dense<0.000000e+00> : vector<8x256xf32>
    %68 = tpu.matmul %65, %67, %cst_67 {dimension_numbers = #tpu.dot_dimension_numbers<[1], [0], [0], [1], [0, 0, 1, 1], [], []>} : vector<8x256xf32>, vector<256x256xf32>, vector<8x256xf32> -> vector<8x256xf32>
    %69 = arith.addf %64, %68 : vector<8x256xf32>
    %c4_68 = arith.constant 4 : index
    %c0_69 = arith.constant 0 : index
    %70 = vector.load %arg19[%c4_68, %c0_69] : memref<12x256xf32, #tpu.memory_space<vmem>>, vector<8x256xf32>
    %c9 = arith.constant 9 : index
    %c0_70 = arith.constant 0 : index
    %c0_71 = arith.constant 0 : index
    %71 = vector.load %arg4[%c9, %c0_70, %c0_71] : memref<20x256x256xf32, #tpu.memory_space<vmem>>, vector<1x256x256xf32>
    %72 = vector.shape_cast %71 : vector<1x256x256xf32> to vector<256x256xf32>
    %cst_72 = arith.constant dense<0.000000e+00> : vector<8x256xf32>
    %73 = tpu.matmul %70, %72, %cst_72 {dimension_numbers = #tpu.dot_dimension_numbers<[1], [0], [0], [1], [0, 0, 1, 1], [], []>} : vector<8x256xf32>, vector<256x256xf32>, vector<8x256xf32> -> vector<8x256xf32>
    %74 = arith.addf %69, %73 : vector<8x256xf32>
    %cst_73 = arith.constant 0.000000e+00 : f32
    %75 = vector.broadcast %cst_73 : f32 to vector<8x256xf32>
    %76 = arith.cmpf ogt, %74, %75 : vector<8x256xf32>
    %cst_74 = arith.constant 0.00999999977 : f32
    %77 = vector.broadcast %cst_74 : f32 to vector<8x256xf32>
    %78 = arith.mulf %77, %74 : vector<8x256xf32>
    %79 = arith.select %76, %74, %78 : vector<8x256xi1>, vector<8x256xf32>
    %cst_75 = arith.constant dense<0.000000e+00> : vector<256xf32>
    %80 = vector.multi_reduction <add>, %79, %cst_75 [0] : vector<8x256xf32> to vector<256xf32>
    %81 = vector.shape_cast %80 : vector<256xf32> to vector<1x256xf32>
    %c0_76 = arith.constant 0 : index
    %c0_77 = arith.constant 0 : index
    %82 = vector.load %arg10[%c0_76, %c0_77] : memref<256x32xf32, #tpu.memory_space<vmem>>, vector<256x32xf32>
    %cst_78 = arith.constant dense<0.000000e+00> : vector<1x32xf32>
    %83 = tpu.matmul %81, %82, %cst_78 {dimension_numbers = #tpu.dot_dimension_numbers<[1], [0], [0], [1], [0, 0, 1, 1], [], []>} : vector<1x256xf32>, vector<256x32xf32>, vector<1x32xf32> -> vector<1x32xf32>
    %c0_79 = arith.constant 0 : index
    %c0_80 = arith.constant 0 : index
    %c0_81 = arith.constant 0 : index
    %84 = vector.load %arg6[%c0_79, %c0_80, %c0_81] : memref<2x32x2xf32, #tpu.memory_space<vmem>>, vector<1x32x2xf32>
    %85 = vector.shape_cast %84 : vector<1x32x2xf32> to vector<32x2xf32>
    %cst_82 = arith.constant dense<0.000000e+00> : vector<1x2xf32>
    %86 = tpu.matmul %83, %85, %cst_82 {dimension_numbers = #tpu.dot_dimension_numbers<[1], [0], [0], [1], [0, 0, 1, 1], [], []>} : vector<1x32xf32>, vector<32x2xf32>, vector<1x2xf32> -> vector<1x2xf32>
    %c0_83 = arith.constant 0 : index
    %c0_84 = arith.constant 0 : index
    %c0_85 = arith.constant 0 : index
    %87 = vector.load %arg7[%c0_83, %c0_84, %c0_85] : memref<2x1x2xf32, #tpu.memory_space<vmem>>, vector<1x1x2xf32>
    %88 = vector.shape_cast %87 : vector<1x1x2xf32> to vector<1x2xf32>
    %89 = arith.addf %86, %88 : vector<1x2xf32>
    %cst_86 = arith.constant 0.000000e+00 : f32
    %90 = vector.broadcast %cst_86 : f32 to vector<1x2xf32>
    %91 = arith.maximumf %89, %90 : vector<1x2xf32>
    %c0_87 = arith.constant 0 : index
    %c0_88 = arith.constant 0 : index
    %c0_89 = arith.constant 0 : index
    %92 = vector.load %arg8[%c0_87, %c0_88, %c0_89] : memref<2x2x32xf32, #tpu.memory_space<vmem>>, vector<1x2x32xf32>
    %93 = vector.shape_cast %92 : vector<1x2x32xf32> to vector<2x32xf32>
    %cst_90 = arith.constant dense<0.000000e+00> : vector<1x32xf32>
    %94 = tpu.matmul %91, %93, %cst_90 {dimension_numbers = #tpu.dot_dimension_numbers<[1], [0], [0], [1], [0, 0, 1, 1], [], []>} : vector<1x2xf32>, vector<2x32xf32>, vector<1x32xf32> -> vector<1x32xf32>
    %c0_91 = arith.constant 0 : index
    %c0_92 = arith.constant 0 : index
    %c0_93 = arith.constant 0 : index
    %95 = vector.load %arg9[%c0_91, %c0_92, %c0_93] : memref<2x1x32xf32, #tpu.memory_space<vmem>>, vector<1x1x32xf32>
    %96 = vector.shape_cast %95 : vector<1x1x32xf32> to vector<1x32xf32>
    %97 = arith.addf %94, %96 : vector<1x32xf32>
    %98 = arith.negf %97 : vector<1x32xf32>
    %99 = math.exp %98 : vector<1x32xf32>
    %cst_94 = arith.constant 1.000000e+00 : f32
    %100 = vector.broadcast %cst_94 : f32 to vector<1x32xf32>
    %101 = arith.addf %100, %99 : vector<1x32xf32>
    %102 = arith.divf %100, %101 : vector<1x32xf32>
    %c0_95 = arith.constant 0 : index
    %c0_96 = arith.constant 0 : index
    %103 = vector.load %arg11[%c0_95, %c0_96] : memref<32x256xf32, #tpu.memory_space<vmem>>, vector<32x256xf32>
    %cst_97 = arith.constant dense<0.000000e+00> : vector<1x256xf32>
    %104 = tpu.matmul %102, %103, %cst_97 {dimension_numbers = #tpu.dot_dimension_numbers<[1], [0], [0], [1], [0, 0, 1, 1], [], []>} : vector<1x32xf32>, vector<32x256xf32>, vector<1x256xf32> -> vector<1x256xf32>
    %105 = vector.broadcast %104 : vector<1x256xf32> to vector<8x256xf32>
    %106 = arith.mulf %79, %105 : vector<8x256xf32>
    %107 = arith.addf %106, %9 : vector<8x256xf32>
    %cst_98 = arith.constant 0.000000e+00 : f32
    %108 = vector.broadcast %cst_98 : f32 to vector<8x256xf32>
    %109 = arith.cmpf ogt, %107, %108 : vector<8x256xf32>
    %cst_99 = arith.constant 0.00999999977 : f32
    %110 = vector.broadcast %cst_99 : f32 to vector<8x256xf32>
    %111 = arith.mulf %110, %107 : vector<8x256xf32>
    %112 = arith.select %109, %107, %111 : vector<8x256xi1>, vector<8x256xf32>
    %c2_100 = arith.constant 2 : index
    %c0_101 = arith.constant 0 : index
    %113 = vector.load %arg19[%c2_100, %c0_101] : memref<12x256xf32, #tpu.memory_space<vmem>>, vector<8x256xf32>
    tpu.vector_store %arg19[%c2_100, %c0_101], %112 {strides = array<i32>} : memref<12x256xf32, #tpu.memory_space<vmem>>, vector<8x256xf32>,
    %c2_102 = arith.constant 2 : index
    %c0_103 = arith.constant 0 : index
    %c0_104 = arith.constant 0 : index
    %114 = vector.load %arg5[%c2_102, %c0_103, %c0_104] : memref<4x1x256xf32, #tpu.memory_space<vmem>>, vector<1x1x256xf32>
    %115 = vector.shape_cast %114 : vector<1x1x256xf32> to vector<1x256xf32>
    %116 = vector.shape_cast %115 : vector<1x256xf32> to vector<1x256xf32>
    %117 = vector.broadcast %116 : vector<1x256xf32> to vector<8x256xf32>
    %c0_105 = arith.constant 0 : index
    %c0_106 = arith.constant 0 : index
    %118 = vector.load %arg19[%c0_105, %c0_106] : memref<12x256xf32, #tpu.memory_space<vmem>>, vector<8x256xf32>
    %c10 = arith.constant 10 : index
    %c0_107 = arith.constant 0 : index
    %c0_108 = arith.constant 0 : index
    %119 = vector.load %arg4[%c10, %c0_107, %c0_108] : memref<20x256x256xf32, #tpu.memory_space<vmem>>, vector<1x256x256xf32>
    %120 = vector.shape_cast %119 : vector<1x256x256xf32> to vector<256x256xf32>
    %cst_109 = arith.constant dense<0.000000e+00> : vector<8x256xf32>
    %121 = tpu.matmul %118, %120, %cst_109 {dimension_numbers = #tpu.dot_dimension_numbers<[1], [0], [0], [1], [0, 0, 1, 1], [], []>} : vector<8x256xf32>, vector<256x256xf32>, vector<8x256xf32> -> vector<8x256xf32>
    %122 = arith.addf %117, %121 : vector<8x256xf32>
    %c1_110 = arith.constant 1 : index
    %c0_111 = arith.constant 0 : index
    %123 = vector.load %arg19[%c1_110, %c0_111] : memref<12x256xf32, #tpu.memory_space<vmem>>, vector<8x256xf32>
    %c11 = arith.constant 11 : index
    %c0_112 = arith.constant 0 : index
    %c0_113 = arith.constant 0 : index
    %124 = vector.load %arg4[%c11, %c0_112, %c0_113] : memref<20x256x256xf32, #tpu.memory_space<vmem>>, vector<1x256x256xf32>
    %125 = vector.shape_cast %124 : vector<1x256x256xf32> to vector<256x256xf32>
    %cst_114 = arith.constant dense<0.000000e+00> : vector<8x256xf32>
    %126 = tpu.matmul %123, %125, %cst_114 {dimension_numbers = #tpu.dot_dimension_numbers<[1], [0], [0], [1], [0, 0, 1, 1], [], []>} : vector<8x256xf32>, vector<256x256xf32>, vector<8x256xf32> -> vector<8x256xf32>
    %127 = arith.addf %122, %126 : vector<8x256xf32>
    %c2_115 = arith.constant 2 : index
    %c0_116 = arith.constant 0 : index
    %128 = vector.load %arg19[%c2_115, %c0_116] : memref<12x256xf32, #tpu.memory_space<vmem>>, vector<8x256xf32>
    %c12 = arith.constant 12 : index
    %c0_117 = arith.constant 0 : index
    %c0_118 = arith.constant 0 : index
    %129 = vector.load %arg4[%c12, %c0_117, %c0_118] : memref<20x256x256xf32, #tpu.memory_space<vmem>>, vector<1x256x256xf32>
    %130 = vector.shape_cast %129 : vector<1x256x256xf32> to vector<256x256xf32>
    %cst_119 = arith.constant dense<0.000000e+00> : vector<8x256xf32>
    %131 = tpu.matmul %128, %130, %cst_119 {dimension_numbers = #tpu.dot_dimension_numbers<[1], [0], [0], [1], [0, 0, 1, 1], [], []>} : vector<8x256xf32>, vector<256x256xf32>, vector<8x256xf32> -> vector<8x256xf32>
    %132 = arith.addf %127, %131 : vector<8x256xf32>
    %c3_120 = arith.constant 3 : index
    %c0_121 = arith.constant 0 : index
    %133 = vector.load %arg19[%c3_120, %c0_121] : memref<12x256xf32, #tpu.memory_space<vmem>>, vector<8x256xf32>
    %c13 = arith.constant 13 : index
    %c0_122 = arith.constant 0 : index
    %c0_123 = arith.constant 0 : index
    %134 = vector.load %arg4[%c13, %c0_122, %c0_123] : memref<20x256x256xf32, #tpu.memory_space<vmem>>, vector<1x256x256xf32>
    %135 = vector.shape_cast %134 : vector<1x256x256xf32> to vector<256x256xf32>
    %cst_124 = arith.constant dense<0.000000e+00> : vector<8x256xf32>
    %136 = tpu.matmul %133, %135, %cst_124 {dimension_numbers = #tpu.dot_dimension_numbers<[1], [0], [0], [1], [0, 0, 1, 1], [], []>} : vector<8x256xf32>, vector<256x256xf32>, vector<8x256xf32> -> vector<8x256xf32>
    %137 = arith.addf %132, %136 : vector<8x256xf32>
    %c4_125 = arith.constant 4 : index
    %c0_126 = arith.constant 0 : index
    %138 = vector.load %arg19[%c4_125, %c0_126] : memref<12x256xf32, #tpu.memory_space<vmem>>, vector<8x256xf32>
    %c14 = arith.constant 14 : index
    %c0_127 = arith.constant 0 : index
    %c0_128 = arith.constant 0 : index
    %139 = vector.load %arg4[%c14, %c0_127, %c0_128] : memref<20x256x256xf32, #tpu.memory_space<vmem>>, vector<1x256x256xf32>
    %140 = vector.shape_cast %139 : vector<1x256x256xf32> to vector<256x256xf32>
    %cst_129 = arith.constant dense<0.000000e+00> : vector<8x256xf32>
    %141 = tpu.matmul %138, %140, %cst_129 {dimension_numbers = #tpu.dot_dimension_numbers<[1], [0], [0], [1], [0, 0, 1, 1], [], []>} : vector<8x256xf32>, vector<256x256xf32>, vector<8x256xf32> -> vector<8x256xf32>
    %142 = arith.addf %137, %141 : vector<8x256xf32>
    %cst_130 = arith.constant 0.000000e+00 : f32
    %143 = vector.broadcast %cst_130 : f32 to vector<8x256xf32>
    %144 = arith.cmpf ogt, %142, %143 : vector<8x256xf32>
    %cst_131 = arith.constant 0.00999999977 : f32
    %145 = vector.broadcast %cst_131 : f32 to vector<8x256xf32>
    %146 = arith.mulf %145, %142 : vector<8x256xf32>
    %147 = arith.select %144, %142, %146 : vector<8x256xi1>, vector<8x256xf32>
    %c2_132 = arith.constant 2 : index
    %c0_133 = arith.constant 0 : index
    %148 = vector.load %arg19[%c2_132, %c0_133] : memref<12x256xf32, #tpu.memory_space<vmem>>, vector<8x256xf32>
    tpu.vector_store %arg19[%c2_132, %c0_133], %147 {strides = array<i32>} : memref<12x256xf32, #tpu.memory_space<vmem>>, vector<8x256xf32>,
    %c3_134 = arith.constant 3 : index
    %c0_135 = arith.constant 0 : index
    %c0_136 = arith.constant 0 : index
    %149 = vector.load %arg5[%c3_134, %c0_135, %c0_136] : memref<4x1x256xf32, #tpu.memory_space<vmem>>, vector<1x1x256xf32>
    %150 = vector.shape_cast %149 : vector<1x1x256xf32> to vector<1x256xf32>
    %151 = vector.shape_cast %150 : vector<1x256xf32> to vector<1x256xf32>
    %152 = vector.broadcast %151 : vector<1x256xf32> to vector<8x256xf32>
    %c0_137 = arith.constant 0 : index
    %c0_138 = arith.constant 0 : index
    %153 = vector.load %arg19[%c0_137, %c0_138] : memref<12x256xf32, #tpu.memory_space<vmem>>, vector<8x256xf32>
    %c15 = arith.constant 15 : index
    %c0_139 = arith.constant 0 : index
    %c0_140 = arith.constant 0 : index
    %154 = vector.load %arg4[%c15, %c0_139, %c0_140] : memref<20x256x256xf32, #tpu.memory_space<vmem>>, vector<1x256x256xf32>
    %155 = vector.shape_cast %154 : vector<1x256x256xf32> to vector<256x256xf32>
    %cst_141 = arith.constant dense<0.000000e+00> : vector<8x256xf32>
    %156 = tpu.matmul %153, %155, %cst_141 {dimension_numbers = #tpu.dot_dimension_numbers<[1], [0], [0], [1], [0, 0, 1, 1], [], []>} : vector<8x256xf32>, vector<256x256xf32>, vector<8x256xf32> -> vector<8x256xf32>
    %157 = arith.addf %152, %156 : vector<8x256xf32>
    %c1_142 = arith.constant 1 : index
    %c0_143 = arith.constant 0 : index
    %158 = vector.load %arg19[%c1_142, %c0_143] : memref<12x256xf32, #tpu.memory_space<vmem>>, vector<8x256xf32>
    %c16 = arith.constant 16 : index
    %c0_144 = arith.constant 0 : index
    %c0_145 = arith.constant 0 : index
    %159 = vector.load %arg4[%c16, %c0_144, %c0_145] : memref<20x256x256xf32, #tpu.memory_space<vmem>>, vector<1x256x256xf32>
    %160 = vector.shape_cast %159 : vector<1x256x256xf32> to vector<256x256xf32>
    %cst_146 = arith.constant dense<0.000000e+00> : vector<8x256xf32>
    %161 = tpu.matmul %158, %160, %cst_146 {dimension_numbers = #tpu.dot_dimension_numbers<[1], [0], [0], [1], [0, 0, 1, 1], [], []>} : vector<8x256xf32>, vector<256x256xf32>, vector<8x256xf32> -> vector<8x256xf32>
    %162 = arith.addf %157, %161 : vector<8x256xf32>
    %c2_147 = arith.constant 2 : index
    %c0_148 = arith.constant 0 : index
    %163 = vector.load %arg19[%c2_147, %c0_148] : memref<12x256xf32, #tpu.memory_space<vmem>>, vector<8x256xf32>
    %c17 = arith.constant 17 : index
    %c0_149 = arith.constant 0 : index
    %c0_150 = arith.constant 0 : index
    %164 = vector.load %arg4[%c17, %c0_149, %c0_150] : memref<20x256x256xf32, #tpu.memory_space<vmem>>, vector<1x256x256xf32>
    %165 = vector.shape_cast %164 : vector<1x256x256xf32> to vector<256x256xf32>
    %cst_151 = arith.constant dense<0.000000e+00> : vector<8x256xf32>
    %166 = tpu.matmul %163, %165, %cst_151 {dimension_numbers = #tpu.dot_dimension_numbers<[1], [0], [0], [1], [0, 0, 1, 1], [], []>} : vector<8x256xf32>, vector<256x256xf32>, vector<8x256xf32> -> vector<8x256xf32>
    %167 = arith.addf %162, %166 : vector<8x256xf32>
    %c3_152 = arith.constant 3 : index
    %c0_153 = arith.constant 0 : index
    %168 = vector.load %arg19[%c3_152, %c0_153] : memref<12x256xf32, #tpu.memory_space<vmem>>, vector<8x256xf32>
    %c18 = arith.constant 18 : index
    %c0_154 = arith.constant 0 : index
    %c0_155 = arith.constant 0 : index
    %169 = vector.load %arg4[%c18, %c0_154, %c0_155] : memref<20x256x256xf32, #tpu.memory_space<vmem>>, vector<1x256x256xf32>
    %170 = vector.shape_cast %169 : vector<1x256x256xf32> to vector<256x256xf32>
    %cst_156 = arith.constant dense<0.000000e+00> : vector<8x256xf32>
    %171 = tpu.matmul %168, %170, %cst_156 {dimension_numbers = #tpu.dot_dimension_numbers<[1], [0], [0], [1], [0, 0, 1, 1], [], []>} : vector<8x256xf32>, vector<256x256xf32>, vector<8x256xf32> -> vector<8x256xf32>
    %172 = arith.addf %167, %171 : vector<8x256xf32>
    %c4_157 = arith.constant 4 : index
    %c0_158 = arith.constant 0 : index
    %173 = vector.load %arg19[%c4_157, %c0_158] : memref<12x256xf32, #tpu.memory_space<vmem>>, vector<8x256xf32>
    %c19 = arith.constant 19 : index
    %c0_159 = arith.constant 0 : index
    %c0_160 = arith.constant 0 : index
    %174 = vector.load %arg4[%c19, %c0_159, %c0_160] : memref<20x256x256xf32, #tpu.memory_space<vmem>>, vector<1x256x256xf32>
    %175 = vector.shape_cast %174 : vector<1x256x256xf32> to vector<256x256xf32>
    %cst_161 = arith.constant dense<0.000000e+00> : vector<8x256xf32>
    %176 = tpu.matmul %173, %175, %cst_161 {dimension_numbers = #tpu.dot_dimension_numbers<[1], [0], [0], [1], [0, 0, 1, 1], [], []>} : vector<8x256xf32>, vector<256x256xf32>, vector<8x256xf32> -> vector<8x256xf32>
    %177 = arith.addf %172, %176 : vector<8x256xf32>
    %cst_162 = arith.constant 0.000000e+00 : f32
    %178 = vector.broadcast %cst_162 : f32 to vector<8x256xf32>
    %179 = arith.cmpf ogt, %177, %178 : vector<8x256xf32>
    %cst_163 = arith.constant 0.00999999977 : f32
    %180 = vector.broadcast %cst_163 : f32 to vector<8x256xf32>
    %181 = arith.mulf %180, %177 : vector<8x256xf32>
    %182 = arith.select %179, %177, %181 : vector<8x256xi1>, vector<8x256xf32>
    %cst_164 = arith.constant dense<0.000000e+00> : vector<256xf32>
    %183 = vector.multi_reduction <add>, %182, %cst_164 [0] : vector<8x256xf32> to vector<256xf32>
    %184 = vector.shape_cast %183 : vector<256xf32> to vector<1x256xf32>
    %c0_165 = arith.constant 0 : index
    %c0_166 = arith.constant 0 : index
    %185 = vector.load %arg10[%c0_165, %c0_166] : memref<256x32xf32, #tpu.memory_space<vmem>>, vector<256x32xf32>
    %cst_167 = arith.constant dense<0.000000e+00> : vector<1x32xf32>
    %186 = tpu.matmul %184, %185, %cst_167 {dimension_numbers = #tpu.dot_dimension_numbers<[1], [0], [0], [1], [0, 0, 1, 1], [], []>} : vector<1x256xf32>, vector<256x32xf32>, vector<1x32xf32> -> vector<1x32xf32>
    %c1_168 = arith.constant 1 : index
    %c0_169 = arith.constant 0 : index
    %c0_170 = arith.constant 0 : index
    %187 = vector.load %arg6[%c1_168, %c0_169, %c0_170] : memref<2x32x2xf32, #tpu.memory_space<vmem>>, vector<1x32x2xf32>
    %188 = vector.shape_cast %187 : vector<1x32x2xf32> to vector<32x2xf32>
    %cst_171 = arith.constant dense<0.000000e+00> : vector<1x2xf32>
    %189 = tpu.matmul %186, %188, %cst_171 {dimension_numbers = #tpu.dot_dimension_numbers<[1], [0], [0], [1], [0, 0, 1, 1], [], []>} : vector<1x32xf32>, vector<32x2xf32>, vector<1x2xf32> -> vector<1x2xf32>
    %c1_172 = arith.constant 1 : index
    %c0_173 = arith.constant 0 : index
    %c0_174 = arith.constant 0 : index
    %190 = vector.load %arg7[%c1_172, %c0_173, %c0_174] : memref<2x1x2xf32, #tpu.memory_space<vmem>>, vector<1x1x2xf32>
    %191 = vector.shape_cast %190 : vector<1x1x2xf32> to vector<1x2xf32>
    %192 = arith.addf %189, %191 : vector<1x2xf32>
    %cst_175 = arith.constant 0.000000e+00 : f32
    %193 = vector.broadcast %cst_175 : f32 to vector<1x2xf32>
    %194 = arith.maximumf %192, %193 : vector<1x2xf32>
    %c1_176 = arith.constant 1 : index
    %c0_177 = arith.constant 0 : index
    %c0_178 = arith.constant 0 : index
    %195 = vector.load %arg8[%c1_176, %c0_177, %c0_178] : memref<2x2x32xf32, #tpu.memory_space<vmem>>, vector<1x2x32xf32>
    %196 = vector.shape_cast %195 : vector<1x2x32xf32> to vector<2x32xf32>
    %cst_179 = arith.constant dense<0.000000e+00> : vector<1x32xf32>
    %197 = tpu.matmul %194, %196, %cst_179 {dimension_numbers = #tpu.dot_dimension_numbers<[1], [0], [0], [1], [0, 0, 1, 1], [], []>} : vector<1x2xf32>, vector<2x32xf32>, vector<1x32xf32> -> vector<1x32xf32>
    %c1_180 = arith.constant 1 : index
    %c0_181 = arith.constant 0 : index
    %c0_182 = arith.constant 0 : index
    %198 = vector.load %arg9[%c1_180, %c0_181, %c0_182] : memref<2x1x32xf32, #tpu.memory_space<vmem>>, vector<1x1x32xf32>
    %199 = vector.shape_cast %198 : vector<1x1x32xf32> to vector<1x32xf32>
    %200 = arith.addf %197, %199 : vector<1x32xf32>
    %201 = arith.negf %200 : vector<1x32xf32>
    %202 = math.exp %201 : vector<1x32xf32>
    %cst_183 = arith.constant 1.000000e+00 : f32
    %203 = vector.broadcast %cst_183 : f32 to vector<1x32xf32>
    %204 = arith.addf %203, %202 : vector<1x32xf32>
    %205 = arith.divf %203, %204 : vector<1x32xf32>
    %c0_184 = arith.constant 0 : index
    %c0_185 = arith.constant 0 : index
    %206 = vector.load %arg11[%c0_184, %c0_185] : memref<32x256xf32, #tpu.memory_space<vmem>>, vector<32x256xf32>
    %cst_186 = arith.constant dense<0.000000e+00> : vector<1x256xf32>
    %207 = tpu.matmul %205, %206, %cst_186 {dimension_numbers = #tpu.dot_dimension_numbers<[1], [0], [0], [1], [0, 0, 1, 1], [], []>} : vector<1x32xf32>, vector<32x256xf32>, vector<1x256xf32> -> vector<1x256xf32>
    %208 = vector.broadcast %207 : vector<1x256xf32> to vector<8x256xf32>
    %209 = arith.mulf %182, %208 : vector<8x256xf32>
    %210 = arith.addf %209, %112 : vector<8x256xf32>
    %cst_187 = arith.constant 0.000000e+00 : f32
    %211 = vector.broadcast %cst_187 : f32 to vector<8x256xf32>
    %212 = arith.cmpf ogt, %210, %211 : vector<8x256xf32>
    %cst_188 = arith.constant 0.00999999977 : f32
    %213 = vector.broadcast %cst_188 : f32 to vector<8x256xf32>
    %214 = arith.mulf %213, %210 : vector<8x256xf32>
    %215 = arith.select %212, %210, %214 : vector<8x256xi1>, vector<8x256xf32>
    %c0_189 = arith.constant 0 : index
    %c0_190 = arith.constant 0 : index
    %216 = vector.load %arg12[%c0_189, %c0_190] : memref<256x56xf32, #tpu.memory_space<vmem>>, vector<256x56xf32>
    %cst_191 = arith.constant dense<0.000000e+00> : vector<8x56xf32>
    %217 = tpu.matmul %215, %216, %cst_191 {dimension_numbers = #tpu.dot_dimension_numbers<[1], [0], [0], [1], [0, 0, 1, 1], [], []>} : vector<8x256xf32>, vector<256x56xf32>, vector<8x56xf32> -> vector<8x56xf32>
    %c0_192 = arith.constant 0 : index
    %c0_193 = arith.constant 0 : index
    %218 = vector.load %arg13[%c0_192, %c0_193] : memref<1x56xf32, #tpu.memory_space<vmem>>, vector<1x56xf32>
    %219 = vector.broadcast %218 : vector<1x56xf32> to vector<8x56xf32>
    %220 = arith.addf %217, %219 : vector<8x56xf32>
    %c0_194 = arith.constant 0 : index
    %c0_195 = arith.constant 0 : index
    %221 = vector.load %arg14[%c0_194, %c0_195] : memref<1x56xf32, #tpu.memory_space<vmem>>, vector<1x56xf32>
    %cst_196 = arith.constant 5.000000e-01 : f32
    %222 = vector.broadcast %cst_196 : f32 to vector<1x56xf32>
    %223 = arith.cmpf ogt, %221, %222 : vector<1x56xf32>
    %224 = arith.negf %220 : vector<8x56xf32>
    %225 = math.exp %224 : vector<8x56xf32>
    %cst_197 = arith.constant 1.000000e+00 : f32
    %226 = vector.broadcast %cst_197 : f32 to vector<8x56xf32>
    %227 = arith.addf %226, %225 : vector<8x56xf32>
    %228 = arith.divf %226, %227 : vector<8x56xf32>
    %229 = vector.shape_cast %223 : vector<1x56xi1> to vector<1x56xi1>
    %230 = vector.broadcast %229 : vector<1x56xi1> to vector<8x56xi1>
    %231 = arith.select %230, %228, %220 : vector<8x56xi1>, vector<8x56xf32>
    %232 = vector.shape_cast %231 : vector<8x56xf32> to vector<1x8x56xf32>
    %c0_198 = arith.constant 0 : index
    %c0_199 = arith.constant 0 : index
    %c0_200 = arith.constant 0 : index
    %233 = vector.load %arg17[%c0_198, %c0_199, %c0_200] : memref<1x8x56xf32, #tpu.memory_space<vmem>>, vector<1x8x56xf32>
    tpu.vector_store %arg17[%c0_198, %c0_199, %c0_200], %232 {strides = array<i32>} : memref<1x8x56xf32, #tpu.memory_space<vmem>>, vector<1x8x56xf32>,
    %cst_201 = arith.constant dense<0.000000e+00> : vector<256xf32>
    %234 = vector.multi_reduction <add>, %215, %cst_201 [0] : vector<8x256xf32> to vector<256xf32>
    %235 = vector.shape_cast %234 : vector<256xf32> to vector<1x256xf32>
    %c0_202 = arith.constant 0 : index
    %c0_203 = arith.constant 0 : index
    %236 = vector.load %arg10[%c0_202, %c0_203] : memref<256x32xf32, #tpu.memory_space<vmem>>, vector<256x32xf32>
    %cst_204 = arith.constant dense<0.000000e+00> : vector<1x32xf32>
    %237 = tpu.matmul %235, %236, %cst_204 {dimension_numbers = #tpu.dot_dimension_numbers<[1], [0], [0], [1], [0, 0, 1, 1], [], []>} : vector<1x256xf32>, vector<256x32xf32>, vector<1x32xf32> -> vector<1x32xf32>
    %c0_205 = arith.constant 0 : index
    %c0_206 = arith.constant 0 : index
    %238 = vector.load %arg15[%c0_205, %c0_206] : memref<32x1xf32, #tpu.memory_space<vmem>>, vector<32x1xf32>
    %cst_207 = arith.constant dense<0.000000e+00> : vector<1x1xf32>
    %239 = tpu.matmul %237, %238, %cst_207 {dimension_numbers = #tpu.dot_dimension_numbers<[1], [0], [0], [1], [0, 0, 1, 1], [], []>} : vector<1x32xf32>, vector<32x1xf32>, vector<1x1xf32> -> vector<1x1xf32>
    %c0_208 = arith.constant 0 : index
    %c0_209 = arith.constant 0 : index
    %240 = vector.load %arg16[%c0_208, %c0_209] : memref<1x1xf32, #tpu.memory_space<vmem>>, vector<1x1xf32>
    %241 = arith.addf %239, %240 : vector<1x1xf32>
    %242 = vector.shape_cast %241 : vector<1x1xf32> to vector<1x1x1xf32>
    %243 = vector.broadcast %242 : vector<1x1x1xf32> to vector<1x1x128xf32>
    %c0_210 = arith.constant 0 : index
    %c0_211 = arith.constant 0 : index
    %c0_212 = arith.constant 0 : index
    %244 = vector.load %arg18[%c0_210, %c0_211, %c0_212] : memref<1x1x128xf32, #tpu.memory_space<vmem>>, vector<1x1x128xf32>
    tpu.vector_store %arg18[%c0_210, %c0_211, %c0_212], %243 {strides = array<i32>} : memref<1x1x128xf32, #tpu.memory_space<vmem>>, vector<1x1x128xf32>,
    return
  }
  func.func @transform_0(%arg0: i32) -> (i32, i32, i32) {
    %c0_i32 = arith.constant 0 : i32
    %c0_i32_0 = arith.constant 0 : i32
    %c0_i32_1 = arith.constant 0 : i32
    return %arg0, %c0_i32, %c0_i32_0 : i32, i32, i32
  }
  func.func @transform_1(%arg0: i32) -> (i32, i32, i32) {
    %c0_i32 = arith.constant 0 : i32
    %c0_i32_0 = arith.constant 0 : i32
    %c0_i32_1 = arith.constant 0 : i32
    return %arg0, %c0_i32, %c0_i32_0 : i32, i32, i32
  }
  func.func @transform_2(%arg0: i32) -> (i32, i32) {
    %c0_i32 = arith.constant 0 : i32
    %c0_i32_0 = arith.constant 0 : i32
    %c0_i32_1 = arith.constant 0 : i32
    return %c0_i32, %c0_i32_0 : i32, i32
  }
  func.func @transform_3(%arg0: i32) -> (i32, i32, i32) {
    %c0_i32 = arith.constant 0 : i32
    %c0_i32_0 = arith.constant 0 : i32
    %c0_i32_1 = arith.constant 0 : i32
    %c0_i32_2 = arith.constant 0 : i32
    return %c0_i32, %c0_i32_0, %c0_i32_1 : i32, i32, i32
  }
  func.func @transform_4(%arg0: i32) -> (i32, i32, i32) {
    %c0_i32 = arith.constant 0 : i32
    %c0_i32_0 = arith.constant 0 : i32
    %c0_i32_1 = arith.constant 0 : i32
    %c0_i32_2 = arith.constant 0 : i32
    return %c0_i32, %c0_i32_0, %c0_i32_1 : i32, i32, i32
  }
  func.func @transform_5(%arg0: i32) -> (i32, i32, i32) {
    %c0_i32 = arith.constant 0 : i32
    %c0_i32_0 = arith.constant 0 : i32
    %c0_i32_1 = arith.constant 0 : i32
    %c0_i32_2 = arith.constant 0 : i32
    return %c0_i32, %c0_i32_0, %c0_i32_1 : i32, i32, i32
  }
  func.func @transform_6(%arg0: i32) -> (i32, i32, i32) {
    %c0_i32 = arith.constant 0 : i32
    %c0_i32_0 = arith.constant 0 : i32
    %c0_i32_1 = arith.constant 0 : i32
    %c0_i32_2 = arith.constant 0 : i32
    return %c0_i32, %c0_i32_0, %c0_i32_1 : i32, i32, i32
  }
  func.func @transform_7(%arg0: i32) -> (i32, i32, i32) {
    %c0_i32 = arith.constant 0 : i32
    %c0_i32_0 = arith.constant 0 : i32
    %c0_i32_1 = arith.constant 0 : i32
    %c0_i32_2 = arith.constant 0 : i32
    return %c0_i32, %c0_i32_0, %c0_i32_1 : i32, i32, i32
  }
  func.func @transform_8(%arg0: i32) -> (i32, i32, i32) {
    %c0_i32 = arith.constant 0 : i32
    %c0_i32_0 = arith.constant 0 : i32
    %c0_i32_1 = arith.constant 0 : i32
    %c0_i32_2 = arith.constant 0 : i32
    return %c0_i32, %c0_i32_0, %c0_i32_1 : i32, i32, i32
  }
  func.func @transform_9(%arg0: i32) -> (i32, i32) {
    %c0_i32 = arith.constant 0 : i32
    %c0_i32_0 = arith.constant 0 : i32
    %c0_i32_1 = arith.constant 0 : i32
    return %c0_i32, %c0_i32_0 : i32, i32
  }
  func.func @transform_10(%arg0: i32) -> (i32, i32) {
    %c0_i32 = arith.constant 0 : i32
    %c0_i32_0 = arith.constant 0 : i32
    %c0_i32_1 = arith.constant 0 : i32
    return %c0_i32, %c0_i32_0 : i32, i32
  }
  func.func @transform_11(%arg0: i32) -> (i32, i32) {
    %c0_i32 = arith.constant 0 : i32
    %c0_i32_0 = arith.constant 0 : i32
    %c0_i32_1 = arith.constant 0 : i32
    return %c0_i32, %c0_i32_0 : i32, i32
  }
  func.func @transform_12(%arg0: i32) -> (i32, i32) {
    %c0_i32 = arith.constant 0 : i32
    %c0_i32_0 = arith.constant 0 : i32
    %c0_i32_1 = arith.constant 0 : i32
    return %c0_i32, %c0_i32_0 : i32, i32
  }
  func.func @transform_13(%arg0: i32) -> (i32, i32) {
    %c0_i32 = arith.constant 0 : i32
    %c0_i32_0 = arith.constant 0 : i32
    %c0_i32_1 = arith.constant 0 : i32
    return %c0_i32, %c0_i32_0 : i32, i32
  }
  func.func @transform_14(%arg0: i32) -> (i32, i32) {
    %c0_i32 = arith.constant 0 : i32
    %c0_i32_0 = arith.constant 0 : i32
    %c0_i32_1 = arith.constant 0 : i32
    return %c0_i32, %c0_i32_0 : i32, i32
  }
  func.func @transform_15(%arg0: i32) -> (i32, i32) {
    %c0_i32 = arith.constant 0 : i32
    %c0_i32_0 = arith.constant 0 : i32
    %c0_i32_1 = arith.constant 0 : i32
    return %c0_i32, %c0_i32_0 : i32, i32
  }
  func.func @transform_16(%arg0: i32) -> (i32, i32, i32) {
    %c0_i32 = arith.constant 0 : i32
    %c0_i32_0 = arith.constant 0 : i32
    %c0_i32_1 = arith.constant 0 : i32
    return %arg0, %c0_i32, %c0_i32_0 : i32, i32, i32
  }
  func.func @transform_17(%arg0: i32) -> (i32, i32, i32) {
    %c0_i32 = arith.constant 0 : i32
    %c0_i32_0 = arith.constant 0 : i32
    %c0_i32_1 = arith.constant 0 : i32
    return %arg0, %c0_i32, %c0_i32_0 : i32, i32, i32
  }
}

</mosaic_0001>

<bundles_post_ra>
// kernel: pix2pix_ac_forward.2
= control target key start
LH: loop header
LB: loop body
LE: loop exit
PB: predicated region body
PF: predicated region fallthrough
CT: control target
= control target key end

     0   :  { %19 = vsyncpa [#allocation3], 0  ;;  %s1508_s0 = inlined_call_operand.hbm [shape: f32[2,12], index: 0, kind: input, shape index: {}]   ;;  %s1509_s1 = inlined_call_operand.hbm [shape: f32[2,6], index: 1, kind: input, shape index: {}]   ;;  %s1510_s2 = inlined_call_operand.vmem [shape: f32[12,4], index: 2, kind: input, shape index: {}]   ;;  %s1511_s3 = inlined_call_operand.hbm [shape: f32[1,4], index: 3, kind: input, shape index: {}]   ;;  %s1512_s4 = inlined_call_operand.hbm [shape: f32[4,4], index: 4, kind: input, shape index: {}]   ;;  %s1513_s5 = inlined_call_operand.hbm [shape: f32[1,4], index: 5, kind: input, shape index: {}]   ;;  %s1514_s6 = inlined_call_operand.hbm [shape: f32[6,6], index: 6, kind: input, shape index: {}]   ;;  %s1515_s7 = inlined_call_operand.hbm [shape: f32[1,6], index: 7, kind: input, shape index: {}]   ;;  %s1516_s8 = inlined_call_operand.hbm [shape: f32[4,10], index: 8, kind: input, shape index: {}]   ;;  %s1517_s9 = inlined_call_operand.hbm [shape: f32[6,10], index: 9, kind: input, shape index: {}]   ;;  %s1518_s10 = inlined_call_operand.hbm [shape: f32[1,10], index: 10, kind: input, shape index: {}]   ;;  %s1519_s11 = inlined_call_operand.hbm [shape: f32[10,32], index: 11, kind: input, shape index: {}]   ;;  %s1520_s12 = inlined_call_operand.hbm [shape: f32[1,32], index: 12, kind: input, shape index: {}]   ;;  %s1521_s13 = inlined_call_operand.hbm [shape: f32[32,256], index: 13, kind: input, shape index: {}]   ;;  %s1522_s14 = inlined_call_operand.vmem [shape: f32[2,256], index: 14, kind: output, shape index: {}]  }
   0x1   :  { %20 = vsyncpa [#allocation5], 0 }
   0x2   :  { %21 = vsyncpa [#allocation8], 0 }
   0x3   :  { %22 = vsyncpa [#allocation11], 0 }
   0x4   :  { %23 = vsyncpa [#allocation14], 0 }
   0x5   :  { %24 = vsyncpa [#allocation17], 0 }
   0x6   :  { %25 = vsyncpa [#allocation20], 0  ;;  %s1223_s29 = smov [#allocation4]   ;;  %s1224_s15 = smov [#allocation7]  }
   0x7   :  { %s42_s30 = sshll.u32 %s1223_s29, 4  ;;  %s64_s16 = sshll.u32 %s1224_s15, 4  ;;  %s43_s30 = int_to_ptr.vmem [resolvable:$true] %s42_s30  ;;  %s65_s16 = int_to_ptr.vmem [resolvable:$true] %s64_s16 }
   0x8   :  { %s923_s19 = scalar_lea.hbm %s1509_s1, 32 }
   0x9   :  { %p924_p0 = scmp.ne.s32.totalorder %s1509_s1, %s923_s19  ;;  %p927_p1 = scmp.lt.u32.totalorder %s923_s19, %s1509_s1 }
   0xb   :  { %p929_p2 = pnand %p927_p1, %p924_p0 }
   0xd   :  { %932 = shalt.err (!%p929_p2)
}
   0xe   :  { %s933_s24 = scalar_lea.vmem %s43_s30, 32  ;;  %p938_p4 = scmp.lt.s32.totalorder %s43_s30, %s43_s30 }
   0xf   :  { %p934_p3 = scmp.ne.s32.totalorder %s43_s30, %s933_s24  ;;  %p939_p5 = scmp.lt.s32.totalorder %s933_s24, %s933_s24 }
  0x11   :  { %p940_p6 = por %p939_p5, %p938_p4 }
  0x13   :  { %p941_p7 = pnand %p940_p6, %p934_p3 }
  0x15   :  { %944 = shalt.err (!%p941_p7)
}
  0x16   :  { %45 = dma.hbm_to_vmem [thread:$0]  %s1509_s1, 32, %s43_s30, [#allocation5]  }
  0x17   :  { %s945_s29 = scalar_lea.hbm %s1512_s4, 64 }
  0x18   :  { %p946_p8 = scmp.ne.s32.totalorder %s1512_s4, %s945_s29  ;;  %p949_p9 = scmp.lt.u32.totalorder %s945_s29, %s1512_s4 }
  0x1a   :  { %p951_p10 = pnand %p949_p9, %p946_p8 }
  0x1c   :  { %954 = shalt.err (!%p951_p10)
}
  0x1d   :  { %s955_s20 = scalar_lea.vmem %s65_s16, 64  ;;  %p960_p12 = scmp.lt.s32.totalorder %s65_s16, %s65_s16 }
  0x1e   :  { %p956_p11 = scmp.ne.s32.totalorder %s65_s16, %s955_s20  ;;  %p961_p13 = scmp.lt.s32.totalorder %s955_s20, %s955_s20 }
  0x20   :  { %p962_p0 = por %p961_p13, %p960_p12 }
  0x22   :  { %p963_p1 = pnand %p962_p0, %p956_p11 }
  0x24   :  { %966 = shalt.err (!%p963_p1)
}
  0x25   :  { %67 = dma.hbm_to_vmem [thread:$0]  %s1512_s4, 64, %s65_s16, [#allocation8]  }
  0x26   :  { %s1225_s21 = smov [#allocation10]   ;;  %s1226_s23 = smov [#allocation13]  }
  0x27   :  { %s84_s22 = sshll.u32 %s1225_s21, 4  ;;  %s104_s24 = sshll.u32 %s1226_s23, 4  ;;  %s85_s22 = int_to_ptr.vmem [resolvable:$true] %s84_s22  ;;  %s105_s24 = int_to_ptr.vmem [resolvable:$true] %s104_s24 }
  0x28   :  { %s967_s27 = scalar_lea.hbm %s1514_s6, 128 }
  0x29   :  { %p968_p2 = scmp.ne.s32.totalorder %s1514_s6, %s967_s27  ;;  %p971_p3 = scmp.lt.u32.totalorder %s967_s27, %s1514_s6 }
  0x2b   :  { %p973_p4 = pnand %p971_p3, %p968_p2 }
  0x2d   :  { %976 = shalt.err (!%p973_p4)
}
  0x2e   :  { %s977_s4 = scalar_lea.vmem %s85_s22, 128  ;;  %p982_p6 = scmp.lt.s32.totalorder %s85_s22, %s85_s22 }
  0x2f   :  { %p978_p5 = scmp.ne.s32.totalorder %s85_s22, %s977_s4  ;;  %p983_p7 = scmp.lt.s32.totalorder %s977_s4, %s977_s4 }
  0x31   :  { %p984_p8 = por %p983_p7, %p982_p6 }
  0x33   :  { %p985_p9 = pnand %p984_p8, %p978_p5 }
  0x35   :  { %988 = shalt.err (!%p985_p9)
}
  0x36   :  { %87 = dma.hbm_to_vmem [thread:$0]  %s1514_s6, 128, %s85_s22, [#allocation11]  }
  0x37   :  { %s989_s1 = scalar_lea.hbm %s1516_s8, 64 }
  0x38   :  { %p990_p10 = scmp.ne.s32.totalorder %s1516_s8, %s989_s1  ;;  %p993_p11 = scmp.lt.u32.totalorder %s989_s1, %s1516_s8 }
  0x3a   :  { %p995_p12 = pnand %p993_p11, %p990_p10 }
  0x3c   :  { %998 = shalt.err (!%p995_p12)
}
  0x3d   :  { %s999_s26 = scalar_lea.vmem %s105_s24, 64  ;;  %p1004_p0 = scmp.lt.s32.totalorder %s105_s24, %s105_s24 }
  0x3e   :  { %p1000_p13 = scmp.ne.s32.totalorder %s105_s24, %s999_s26  ;;  %p1005_p1 = scmp.lt.s32.totalorder %s999_s26, %s999_s26 }
  0x40   :  { %p1006_p2 = por %p1005_p1, %p1004_p0 }
  0x42   :  { %p1007_p3 = pnand %p1006_p2, %p1000_p13 }
  0x44   :  { %1010 = shalt.err (!%p1007_p3)
}
  0x45   :  { %107 = dma.hbm_to_vmem [thread:$0]  %s1516_s8, 64, %s105_s24, [#allocation14]  }
  0x46   :  { %s1227_s27 = smov [#allocation16]   ;;  %s1228_s29 = smov [#allocation19]  }
  0x47   :  { %s124_s28 = sshll.u32 %s1227_s27, 4  ;;  %s146_s15 = sshll.u32 %s1228_s29, 4  ;;  %s125_s28 = int_to_ptr.vmem [resolvable:$true] %s124_s28  ;;  %s147_s15 = int_to_ptr.vmem [resolvable:$true] %s146_s15 }
  0x48   :  { %s1011_s16 = scalar_lea.hbm %s1518_s10, 16 }
  0x49   :  { %p1012_p4 = scmp.ne.s32.totalorder %s1518_s10, %s1011_s16  ;;  %p1015_p5 = scmp.lt.u32.totalorder %s1011_s16, %s1518_s10 }
  0x4b   :  { %p1017_p6 = pnand %p1015_p5, %p1012_p4 }
  0x4d   :  { %1020 = shalt.err (!%p1017_p6)
}
  0x4e   :  { %s1021_s8 = scalar_lea.vmem %s125_s28, 16  ;;  %s1025_s24 = scalar_lea.vmem %s125_s28, 32 }
  0x4f   :  { %p1022_p7 = scmp.ne.s32.totalorder %s125_s28, %s1021_s8  ;;  %p1026_p8 = scmp.lt.s32.totalorder %s125_s28, %s125_s28 }
  0x50   :  { %p1027_p9 = scmp.lt.s32.totalorder %s1025_s24, %s1021_s8 }
  0x52   :  { %p1028_p10 = por %p1027_p9, %p1026_p8 }
  0x54   :  { %p1029_p11 = pnand %p1028_p10, %p1022_p7 }
  0x56   :  { %1032 = shalt.err (!%p1029_p11)
}
  0x57   :  { %127 = dma.hbm_to_vmem [thread:$0]  %s1518_s10, 16, %s125_s28, [#allocation17]  }
  0x58   :  { %s1033_s26 = scalar_lea.hbm %s1520_s12, 16 }
  0x59   :  { %p1034_p12 = scmp.ne.s32.totalorder %s1520_s12, %s1033_s26  ;;  %p1037_p13 = scmp.lt.u32.totalorder %s1033_s26, %s1520_s12 }
  0x5b   :  { %p1039_p0 = pnand %p1037_p13, %p1034_p12 }
  0x5d   :  { %1042 = shalt.err (!%p1039_p0)
}
  0x5e   :  { %s1043_s17 = scalar_lea.vmem %s147_s15, 16  ;;  %s1047_s4 = scalar_lea.vmem %s147_s15, 32 }
  0x5f   :  { %p1044_p1 = scmp.ne.s32.totalorder %s147_s15, %s1043_s17  ;;  %p1048_p2 = scmp.lt.s32.totalorder %s147_s15, %s147_s15 }
  0x60   :  { %p1049_p3 = scmp.lt.s32.totalorder %s1047_s4, %s1043_s17 }
  0x62   :  { %p1050_p4 = por %p1049_p3, %p1048_p2 }
  0x64   :  { %p1051_p5 = pnand %p1050_p4, %p1044_p1 }
  0x66   :  { %1054 = shalt.err (!%p1051_p5)
}
  0x67   :  { %149 = dma.hbm_to_vmem [thread:$0]  %s1520_s12, 16, %s147_s15, [#allocation20]  }
  0x68   :  { %s1229_s16 = smov [#allocation2]   ;;  %s1230_s19 = smov [#allocation6]  }
  0x69   :  { %s32_s18 = sshll.u32 %s1229_s16, 4  ;;  %s54_s20 = sshll.u32 %s1230_s19, 4  ;;  %s33_s18 = int_to_ptr.vmem [resolvable:$true] %s32_s18  ;;  %s55_s20 = int_to_ptr.vmem [resolvable:$true] %s54_s20 }
  0x6a   :  { %s1055_s24 = scalar_lea.hbm %s1508_s0, 32 }
  0x6b   :  { %p1056_p6 = scmp.ne.s32.totalorder %s1508_s0, %s1055_s24  ;;  %p1059_p7 = scmp.lt.u32.totalorder %s1055_s24, %s1508_s0 }
  0x6d   :  { %p1061_p8 = pnand %p1059_p7, %p1056_p6 }
  0x6f   :  { %1064 = shalt.err (!%p1061_p8)
}
  0x70   :  { %s1065_s12 = scalar_lea.vmem %s33_s18, 32  ;;  %p1070_p10 = scmp.lt.s32.totalorder %s33_s18, %s33_s18 }
  0x71   :  { %p1066_p9 = scmp.ne.s32.totalorder %s33_s18, %s1065_s12  ;;  %p1071_p11 = scmp.lt.s32.totalorder %s1065_s12, %s1065_s12 }
  0x73   :  { %p1072_p12 = por %p1071_p11, %p1070_p10 }
  0x75   :  { %p1073_p13 = pnand %p1072_p12, %p1066_p9 }
  0x77   :  { %1076 = shalt.err (!%p1073_p13)
}
  0x78   :  { %35 = dma.hbm_to_vmem [thread:$0]  %s1508_s0, 32, %s33_s18, [#allocation3]  }
  0x79   :  { %s1077_s27 = scalar_lea.hbm %s1511_s3, 16 }
  0x7a   :  { %p1078_p0 = scmp.ne.s32.totalorder %s1511_s3, %s1077_s27  ;;  %p1081_p1 = scmp.lt.u32.totalorder %s1077_s27, %s1511_s3 }
  0x7c   :  { %p1083_p2 = pnand %p1081_p1, %p1078_p0 }
  0x7e   :  { %1086 = shalt.err (!%p1083_p2)
}
  0x7f   :  { %s1087_s28 = scalar_lea.vmem %s55_s20, 16  ;;  %s1091_s16 = scalar_lea.vmem %s55_s20, 32 }
  0x80   :  { %p1088_p3 = scmp.ne.s32.totalorder %s55_s20, %s1087_s28  ;;  %p1092_p4 = scmp.lt.s32.totalorder %s55_s20, %s55_s20 }
  0x81   :  { %p1093_p5 = scmp.lt.s32.totalorder %s1091_s16, %s1087_s28 }
  0x83   :  { %p1094_p6 = por %p1093_p5, %p1092_p4 }
  0x85   :  { %p1095_p7 = pnand %p1094_p6, %p1088_p3 }
  0x87   :  { %1098 = shalt.err (!%p1095_p7)
}
  0x88   :  { %57 = dma.hbm_to_vmem [thread:$0]  %s1511_s3, 16, %s55_s20, [#allocation5]  }
  0x89   :  { %s1231_s19 = smov [#allocation9]   ;;  %s1232_s8 = smov [#allocation12]  }
  0x8a   :  { %s74_s1 = sshll.u32 %s1231_s19, 4  ;;  %s94_s24 = sshll.u32 %s1232_s8, 4  ;;  %s75_s1 = int_to_ptr.vmem [resolvable:$true] %s74_s1  ;;  %s95_s24 = int_to_ptr.vmem [resolvable:$true] %s94_s24 }
  0x8b   :  { %s1099_s23 = scalar_lea.hbm %s1513_s5, 16 }
  0x8c   :  { %p1100_p8 = scmp.ne.s32.totalorder %s1513_s5, %s1099_s23  ;;  %p1103_p9 = scmp.lt.u32.totalorder %s1099_s23, %s1513_s5 }
  0x8e   :  { %p1105_p10 = pnand %p1103_p9, %p1100_p8 }
  0x90   :  { %1108 = shalt.err (!%p1105_p10)
}
  0x91   :  { %s1109_s3 = scalar_lea.vmem %s75_s1, 16  ;;  %s1113_s20 = scalar_lea.vmem %s75_s1, 32 }
  0x92   :  { %p1110_p11 = scmp.ne.s32.totalorder %s75_s1, %s1109_s3  ;;  %p1114_p12 = scmp.lt.s32.totalorder %s75_s1, %s75_s1 }
  0x93   :  { %p1115_p13 = scmp.lt.s32.totalorder %s1113_s20, %s1109_s3 }
  0x95   :  { %p1116_p0 = por %p1115_p13, %p1114_p12 }
  0x97   :  { %p1117_p1 = pnand %p1116_p0, %p1110_p11 }
  0x99   :  { %1120 = shalt.err (!%p1117_p1)
}
  0x9a   :  { %77 = dma.hbm_to_vmem [thread:$0]  %s1513_s5, 16, %s75_s1, [#allocation8]  }
  0x9b   :  { %s1121_s17 = scalar_lea.hbm %s1515_s7, 16 }
  0x9c   :  { %p1122_p2 = scmp.ne.s32.totalorder %s1515_s7, %s1121_s17  ;;  %p1125_p3 = scmp.lt.u32.totalorder %s1121_s17, %s1515_s7 }
  0x9e   :  { %p1127_p4 = pnand %p1125_p3, %p1122_p2 }
  0xa0   :  { %1130 = shalt.err (!%p1127_p4)
}
  0xa1   :  { %s1131_s0 = scalar_lea.vmem %s95_s24, 16  ;;  %s1135_s18 = scalar_lea.vmem %s95_s24, 32 }
  0xa2   :  { %p1132_p5 = scmp.ne.s32.totalorder %s95_s24, %s1131_s0  ;;  %p1136_p6 = scmp.lt.s32.totalorder %s95_s24, %s95_s24 }
  0xa3   :  { %p1137_p7 = scmp.lt.s32.totalorder %s1135_s18, %s1131_s0 }
  0xa5   :  { %p1138_p8 = por %p1137_p7, %p1136_p6 }
  0xa7   :  { %p1139_p9 = pnand %p1138_p8, %p1132_p5 }
  0xa9   :  { %1142 = shalt.err (!%p1139_p9)
}
  0xaa   :  { %97 = dma.hbm_to_vmem [thread:$0]  %s1515_s7, 16, %s95_s24, [#allocation11]  }
  0xab   :  { %s1233_s1 = smov [#allocation15]   ;;  %s1234_s30 = smov [#allocation18]  }
  0xac   :  { %s114_s8 = sshll.u32 %s1233_s1, 4  ;;  %s133_s21 = sshll.u32 %s1234_s30, 4  ;;  %s115_s8 = int_to_ptr.vmem [resolvable:$true] %s114_s8  ;;  %s1439_s21 = int_to_ptr.vmem [resolvable:$true] %s133_s21 }
  0xad   :  { %s1143_s12 = scalar_lea.hbm %s1517_s9, 128 }
  0xae   :  { %p1144_p10 = scmp.ne.s32.totalorder %s1517_s9, %s1143_s12  ;;  %p1147_p11 = scmp.lt.u32.totalorder %s1143_s12, %s1517_s9 }
  0xb0   :  { %p1149_p12 = pnand %p1147_p11, %p1144_p10 }
  0xb2   :  { %1152 = shalt.err (!%p1149_p12)
}
  0xb3   :  { %s1153_s7 = scalar_lea.vmem %s115_s8, 128  ;;  %p1158_p0 = scmp.lt.s32.totalorder %s115_s8, %s115_s8 }
  0xb4   :  { %p1154_p13 = scmp.ne.s32.totalorder %s115_s8, %s1153_s7  ;;  %p1159_p1 = scmp.lt.s32.totalorder %s1153_s7, %s1153_s7 }
  0xb6   :  { %p1160_p2 = por %p1159_p1, %p1158_p0 }
  0xb8   :  { %p1161_p3 = pnand %p1160_p2, %p1154_p13 }
  0xba   :  { %1164 = shalt.err (!%p1161_p3)
}
  0xbb   :  { %117 = dma.hbm_to_vmem [thread:$0]  %s1517_s9, 128, %s115_s8, [#allocation14]  }
  0xbc   :  { %s1165_s29 = scalar_lea.hbm %s1519_s11, 256 }
  0xbd   :  { %p1166_p4 = scmp.ne.s32.totalorder %s1519_s11, %s1165_s29  ;;  %p1169_p5 = scmp.lt.u32.totalorder %s1165_s29, %s1519_s11 }
  0xbf   :  { %p1171_p6 = pnand %p1169_p5, %p1166_p4 }
  0xc1   :  { %1174 = shalt.err (!%p1171_p6)
}
  0xc2   :  { %s1175_s16 = scalar_lea.vmem %s1439_s21, 256  ;;  %p1180_p8 = scmp.lt.s32.totalorder %s1439_s21, %s1439_s21 }
  0xc3   :  { %p1176_p7 = scmp.ne.s32.totalorder %s1439_s21, %s1175_s16  ;;  %p1181_p9 = scmp.lt.s32.totalorder %s1175_s16, %s1175_s16 }
  0xc5   :  { %p1182_p10 = por %p1181_p9, %p1180_p8 }
  0xc7   :  { %p1183_p11 = pnand %p1182_p10, %p1176_p7 }
  0xc9   :  { %1186 = shalt.err (!%p1183_p11)
}
  0xca   :  { %s1235_s9 = smov 128   ;;  %s1236_s0 = smov 8  }
  0xcb   :  { %139 = dma.hbm_to_vmem [thread:$0]  %s1519_s11, 256, %s1439_s21, [#allocation17], %s1235_s9, %s1235_s9, %s1236_s0  }
  0xcc   :  { %s1237_s19 = smov [#allocation21]   ;;  %s1187_s23 = scalar_lea.hbm %s1521_s13, 1024 }
  0xcd   :  { %s155_s1 = sshll.u32 %s1237_s19, 4  ;;  %p1188_p12 = scmp.ne.s32.totalorder %s1521_s13, %s1187_s23  ;;  %s156_s1 = int_to_ptr.vmem [resolvable:$true] %s155_s1 }
  0xce   :  { %p1191_p13 = scmp.lt.u32.totalorder %s1187_s23, %s1521_s13 }
  0xd0   :  { %p1193_p0 = pnand %p1191_p13, %p1188_p12 }
  0xd2   :  { %1196 = shalt.err (!%p1193_p0)
}
  0xd3   :  { %s1197_s3 = scalar_lea.vmem %s156_s1, 1024  ;;  %p1202_p2 = scmp.lt.s32.totalorder %s156_s1, %s156_s1 }
  0xd4   :  { %p1198_p1 = scmp.ne.s32.totalorder %s156_s1, %s1197_s3  ;;  %p1203_p3 = scmp.lt.s32.totalorder %s1197_s3, %s1197_s3 }
  0xd6   :  { %p1204_p4 = por %p1203_p3, %p1202_p2 }
  0xd8   :  { %p1205_p5 = pnand %p1204_p4, %p1198_p1 }
  0xda   :  { %1208 = shalt.err (!%p1205_p5)
}
  0xdb   :  { %s1238_s11 = smov 256   ;;  %s1239_s21 = smov 16  }
  0xdc   :  { %161 = dma.hbm_to_vmem [thread:$0]  %s1521_s13, 1024, %s156_s1, [#allocation20], %s1238_s11, %s1238_s11, %s1239_s21  }
  0xdd   :  { %1209 = dma.done.wait [#allocation3], 32  }
  0xde   :  { %1210 = vsyncadd [#allocation3], 4294967264 }
  0xdf   :  { %1211 = dma.done.wait [#allocation5], 48  }
  0xe0   :  { %1212 = vsyncadd [#allocation5], 4294967248 }
  0xe1   :  { %1213 = dma.done.wait [#allocation8], 80  }
  0xe2   :  { %1214 = vsyncadd [#allocation8], 4294967216 }
  0xe3   :  { %1215 = dma.done.wait [#allocation11], 144  }
  0xe4   :  { %1216 = vsyncadd [#allocation11], 4294967152 }
  0xe5   :  { %1217 = dma.done.wait [#allocation14], 192  }
  0xe6   :  { %1218 = vsyncadd [#allocation14], 4294967104 }
  0xe7   :  { %1219 = dma.done.wait [#allocation17], 272  }
  0xe8   :  { %1220 = vsyncadd [#allocation17], 4294967024 }
  0xe9   :  { %1221 = dma.done.wait [#allocation20], 1040  }
  0xea   :  { %1222 = vsyncadd [#allocation20], 4294966256  ;;  %v1240_v0 = vmov 0.0|0.0   ;;  %vm1241_vm0 = vmmov 0   ;;  %v1242_v1 = vmov 0.0   ;;  %vm215_vm1 = vcmask 1043456  }
  0xeb   :  { %886 = vmatprep.subr.bf16.mxu0 %v1240_v0  ;;  %856 = vmatprep.mubr.msk.f32.mxu0 %vm1241_vm0, %v1242_v1  ;;  %v202_v2 = vld [vmem:[%s1510_s2] sm:$0xff]  ;;  %v203_v3 = vld [vmem:[%s1510_s2 + $0x8] sm:$0xf]  ;;  %vm1243_vm2 = vmmov 1   ;;  %vm211_vm4 = vcmask 97280   ;;  %vm390_vm5 = vcmask 1045504  }
  0xec   :  { %864 = vmatprep.subr.mxu1 %v1242_v1  ;;  %866 = vmatprep.mubr.msk.f32.mxu1 %vm1241_vm0, %v1242_v1  ;;  %vm888_vm3 = vmpackc.low %vm215_vm1, %vm1243_vm2  ;;  %v887_v4 = vpack.c.bf16 %v203_v3, %v202_v2  ;;  %v201_v5 = vld [vmem:[#allocation2] sm:$0x3]  ;;  %v378_v6 = vld [vmem:[#allocation10] sm:$0x3f]  ;;  %vm386_vm6 = vcmask 48128   ;;  %vm300_vm8 = vcmask 31744  }
  0xed   :  { %v292_v7 = vld [vmem:[#allocation7] sm:$0xf]  ;;  %865 = vmatpush3.msk.msra.mxu1 %vm390_vm5, %v378_v6  ;;  %v377_v8 = vld [vmem:[#allocation4] sm:$0x3]  ;;  %v464_v9 = vld [vmem:[#allocation13] sm:$0xf] }
  0xee   :  { %889 = vmatpush3.bf16.msk.msra.mxu0 %vm888_vm3, %v887_v4  ;;  %867 = vmatmul.mubr.msk.f32.vlgmr.msra.gmra.mrb[0].mxu1 %vm386_vm6, %v377_v8  ;;  %v819_v10 = vld [vmem:[#allocation6] ss:$0 sm:$0xff]  ;;  %v465_v15 = vld [vmem:[#allocation15] sm:$0x3f]  ;;  %v825_v17 = vld [vmem:[#allocation12] ss:$0 sm:$0xff] }
  0xef   :  { %859 = vmatprep.subr.mxu0 %v1242_v1  ;;  %874 = vmatprep.subr.mxu1 %v1242_v1  ;;  %v822_v21 = vld [vmem:[#allocation9] ss:$0 sm:$0xff]  ;;  %vm639_vm9 = vcmask 1041408   ;;  %v627_v27 = vld [vmem:[#allocation18 + $0x8] sm:$0x3]  ;;  %v714_v30 = vld [vmem:[#allocation21 + $0x8] sm:$0xff] }
  0xf0   :  { %876 = vmatprep.mubr.msk.f32.mxu1 %vm1241_vm0, %v1242_v1  ;;  %875 = vmatpush3.msk.msra.mxu1 %vm215_vm1, %v464_v9  ;;  %vm892_vm10 = vmpackc.low %vm639_vm9, %vm1243_vm2  ;;  %v626_v26 = vld [vmem:[#allocation18] sm:$0xff]  ;;  %v716_v31 = vld [vmem:[#allocation21 + $0x18] sm:$0xff]  ;;  %vm635_vm11 = vcmask 80896   ;;  %vm721_vm12 = vcmask 261120  }
  0xf1   :  { %857 = vmatmul.mubr.msk.f32.vlgmr.msra.gmra.mrb[0].mxu0 %vm211_vm4, %v201_v5  ;;  %v891_v29 = vpack.c.bf16 %v627_v27, %v626_v26  ;;  %v713_v32 = vld [vmem:[#allocation21] sm:$0xff]  ;;  %v894_v33 = vpack.c.bf16 %v716_v31, %v714_v30  ;;  %v715_v34 = vld [vmem:[#allocation21 + $0x10] sm:$0xff]  ;;  %v718_v35 = vld [vmem:[#allocation21 + $0x28] sm:$0xff] }
  0xf2   :  { %861 = vmatprep.mubr.msk.f32.mxu0 %vm1241_vm0, %v1242_v1  ;;  %860 = vmatpush3.msk.msra.mxu0 %vm215_vm1, %v292_v7  ;;  %v720_v36 = vld [vmem:[#allocation21 + $0x38] sm:$0xff]  ;;  %v896_v37 = vpack.c.bf16 %v715_v34, %v713_v32  ;;  %v832_v40 = vld [vmem:[#allocation16] ss:$0 sm:$0xff]  ;;  %v717_v44 = vld [vmem:[#allocation21 + $0x20] sm:$0xff] }
  0xf3   :  { %869 = vmatprep.subr.mxu0 %v1242_v1  ;;  %v898_v38 = vpack.c.bf16 %v720_v36, %v718_v35  ;;  %895 = vmatprep.subr.bf16.mxu1 %v894_v33  ;;  %v719_v45 = vld [vmem:[#allocation21 + $0x30] sm:$0xff]  ;;  %v833_v47 = vld [vmem:[#allocation19] ss:$0 sm:$0xff] }
  0xf4   :  { %v900_v46 = vpack.c.bf16 %v719_v45, %v717_v44 }
 0x1c1   :  { %v460_v18 = vpop.f32.mrb[0].mxu1 }
 0x1c2   :  { %v461_v19 = vadd.f32 %v825_v17, %v460_v18  ;;  %v868_v20 = vpop.f32.mrb[1].mxu1 }
 0x1c4   :  { %v285_v11 = vpop.f32.mrb[0].mxu0 }
 0x1c5   :  { %v286_v12 = vadd.f32 %v819_v10, %v285_v11  ;;  %v858_v13 = vpop.f32.mrb[1].mxu0 }
 0x1c7   :  { %vm289_vm7 = vcmp.gt.f32.partialorder %v286_v12, 0.0  ;;  %v290_v14 = vmul.f32 0.01, %v286_v12 }
 0x1c9   :  { %v291_v16 = vsel %vm289_vm7, %v286_v12, %v290_v14 }
 0x1ca   :  { %862 = vmatmul.mubr.msk.f32.vlgmr.msra.gmra.mrb[2].mxu0 %vm300_vm8, %v291_v16 }
 0x1cb   :  { %870 = vmatpush3.msk.msra.mxu0 %vm390_vm5, %v465_v15  ;;  %871 = vmatprep.mubr.msk.f32.mxu0 %vm1241_vm0, %v1242_v1 }
 0x1cc   :  { %890 = vmatprep.subr.bf16.mxu0 %v1240_v0 }
 0x1ce   :  { %872 = vmatmul.mubr.msk.f32.vlgmr.msra.gmra.mrb[4].mxu0 %vm386_vm6, %v461_v19 }
 0x1cf   :  { %883 = vmatprep.mubr.msk.f32.mxu0 %vm1241_vm0, %v1242_v1  ;;  %893 = vmatpush3.bf16.msk.msra.mxu0 %vm892_vm10, %v891_v29 }
 0x29d   :  { %v373_v22 = vpop.f32.mrb[2].mxu0 }
 0x29e   :  { %v374_v23 = vadd.f32 %v822_v21, %v373_v22  ;;  %v863_v24 = vpop.f32.mrb[3].mxu0 }
 0x2a0   :  { %877 = vmatmul.mubr.msk.f32.vlgmr.msra.gmra.mrb[2].mxu1 %vm300_vm8, %v374_v23 }
 0x2a1   :  { %789 = vmatprep.mubr.f32.mxu1 %v1242_v1  ;;  %v538_v25 = vpop.f32.mrb[4].mxu0  ;;  %897 = vmatpush1.bf16.msra.mxu1 %v896_v37 }
 0x2a2   :  { %v873_v28 = vpop.f32.mrb[5].mxu0  ;;  %899 = vmatprep.subr.bf16.mxu1 %v898_v38 }
 0x2a5   :  { %901 = vmatpush1.bf16.msra.mxu1 %v900_v46 }
 0x373   :  { %v614_v39 = vpop.f32.mrb[2].mxu1 }
 0x374   :  { %v615_v41 = vadd.f32 %v614_v39, %v538_v25  ;;  %v878_v42 = vpop.f32.mrb[3].mxu1 }
 0x376   :  { %v625_v43 = vadd.f32 %v832_v40, %v615_v41 }
 0x378   :  { %884 = vmatmul.mubr.msk.f32.vlgmr.msra.gmra.mrb[6].mxu0 %vm635_vm11, %v625_v43 }
 0x44b   :  { %v709_v48 = vpop.f32.mrb[6].mxu0 }
 0x44c   :  { %v710_v49 = vadd.f32 %v833_v47, %v709_v48  ;;  %v885_v50 = vpop.f32.mrb[7].mxu0 }
 0x44e   :  { %836 = vmatmul.mubr.msk.f32.vlgmr.msra.gmra.mrb[4].mxu1 %vm721_vm12, %v710_v49 }
 0x521   :  { %v791_v51 = vpop.f32.mrb[4].mxu1 }
 0x522   :  { %v793_v52 = vpop.f32.mrb[5].mxu1 }
 0x523   :  { %v798_v53 = vcombine.low %v791_v51, %v793_v52 }
 0x525   :  { %837 = vst.sshfl [vmem:[%s1522_s14] sm:$0x33 pattern:$0x76325410] %v798_v53 }
 0x526   :  { %812 = vsyncpa [#allocation3], 1 }
 0x527   :  { %813 = vsyncpa [#allocation5], 1 }
 0x528   :  { %814 = vsyncpa [#allocation8], 1 }
 0x529   :  { %815 = vsyncpa [#allocation11], 1 }
 0x52a   :  { %816 = vsyncpa [#allocation14], 1 }
 0x52b   :  { %817 = vsyncpa [#allocation17], 1 }
 0x52c   :  { %818 = vsyncpa [#allocation20], 1 }

// kernel: pix2pix_ac_forward.3
= control target key start
LH: loop header
LB: loop body
LE: loop exit
PB: predicated region body
PF: predicated region fallthrough
CT: control target
= control target key end

     0   :  { %s8239_s0 = inlined_call_operand.vmem [shape: f32[2,8,64], index: 0, kind: input, shape index: {}]   ;;  %s8240_s1 = inlined_call_operand.vmem [shape: f32[2,1,256], index: 1, kind: input, shape index: {}]   ;;  %s8241_s2 = inlined_call_operand.hbm [shape: f32[64,256], index: 2, kind: input, shape index: {}]   ;;  %s8242_s3 = inlined_call_operand.hbm [shape: f32[20,256,256], index: 3, kind: input, shape index: {}]   ;;  %s8243_s4 = inlined_call_operand.hbm [shape: f32[4,1,256], index: 4, kind: input, shape index: {}]   ;;  %s8244_s5 = inlined_call_operand.vmem [shape: f32[2,32,2], index: 5, kind: input, shape index: {}]   ;;  %s8245_s6 = inlined_call_operand.hbm [shape: f32[2,1,2], index: 6, kind: input, shape index: {}]   ;;  %s8246_s7 = inlined_call_operand.hbm [shape: f32[2,2,32], index: 7, kind: input, shape index: {}]   ;;  %s8247_s8 = inlined_call_operand.hbm [shape: f32[2,1,32], index: 8, kind: input, shape index: {}]   ;;  %s8248_s9 = inlined_call_operand.vmem [shape: f32[256,32], index: 9, kind: input, shape index: {}]   ;;  %s8249_s10 = inlined_call_operand.hbm [shape: f32[32,256], index: 10, kind: input, shape index: {}]   ;;  %s8250_s11 = inlined_call_operand.vmem [shape: f32[256,56], index: 11, kind: input, shape index: {}]   ;;  %s8251_s12 = inlined_call_operand.hbm [shape: f32[1,56], index: 12, kind: input, shape index: {}]   ;;  %s8252_s13 = inlined_call_operand.hbm [shape: f32[1,56], index: 13, kind: input, shape index: {}]   ;;  %s8253_s14 = inlined_call_operand.vmem [shape: f32[32,1], index: 14, kind: input, shape index: {}]   ;;  %s8254_s15 = inlined_call_operand.<no memory space> [shape: f32[1,1], index: 15, kind: input, shape index: {}]   ;;  %s8255_s16 = inlined_call_operand.vmem [shape: f32[2,8,56], index: 16, kind: output, shape index: {0}]   ;;  %s8256_s17 = inlined_call_operand.vmem [shape: f32[2,1,128], index: 17, kind: output, shape index: {1}]  }
   0x1   :  { %8263 = sst [smem:[#allocation24_spill]] %s8239_s0  ;;  %v23_v0 = vstv %s8254_s15 }
   0x2   :  { %8264 = sst [smem:[#allocation25_spill]] %s8240_s1  ;;  %24 = vst [vmem:[#allocation3] sm:$0x1] %v23_v0 }
   0x3   :  { %8265 = sst [smem:[#allocation26_spill]] %s8242_s3 }
   0x4   :  { %8266 = sst [smem:[#allocation27_spill]] %s8255_s16 }
   0x5   :  { %8267 = sst [smem:[#allocation28_spill]] %s8256_s17 }
   0x6   :  { %25 = vsyncpa [#allocation5], 0 }
   0x7   :  { %26 = vsyncpa [#allocation7], 0 }
   0x8   :  { %27 = vsyncpa [#allocation10], 0 }
   0x9   :  { %28 = vsyncpa [#allocation13], 0 }
   0xa   :  { %29 = vsyncpa [#allocation16], 0  ;;  %s7470_s26 = smov 0  }
   0xb LB: > { %8268 = sst [smem:[#allocation23_spill]] %s7357_s26  ;;  %s7476_s27 = sadd.s32 4294967295, %s7357_s26   ;;  %s7357_s26 = sphi %s7470_s26, %s35_s26  }
   0xc   : > { %p5214_p0 = scmp.ge.s32.totalorder %s7357_s26, 1  ;;  %p438_p1 = scmp.lt.s32.totalorder %s7357_s26, 3 }
   0xd   : > { %p8260_p2 = scmp.eq.s32.totalorder %s7476_s27, 0  ;;  %s7359_s28 = smov [#allocation6]  }
   0xe   : > { %p7481_p3 = pnand %p5214_p0, %p438_p1  ;;  %s463_s29 = sshll.u32 %s7359_s28, 4  ;;  %s7485_s29 = int_to_ptr.vmem [resolvable:$true] %s463_s29 }
   0xf   : > { %s7360_s0 = smov [#allocation9]   ;;  %s7361_s19 = smov [#allocation12]  }
  0x10   : > { %s8269_s15 = scalar_select %p7481_p3, 1, 0 }
  0x11   : > { %p6994_p4 = pneg %p7481_p3  ;;  %s492_s30 = sshll.u32 %s7360_s0, 4  ;;  %s7489_s30 = int_to_ptr.vmem [resolvable:$true] %s492_s30 }
  0x12   : > { %s518_s1 = sshll.u32 %s7361_s19, 4  ;;  %s8271_s3 = sld [smem:[#allocation26_spill]]  ;;  %s7497_s1 = int_to_ptr.vmem [resolvable:$true] %s518_s1 }
  0x13   : > { %p7493_p5 = pnand %p8260_p2, %p6994_p4 }
  0x15   : > { %p7507_p7 = pneg %p7493_p5 }
  0x18   : > { %s7079_s22 = scalar_lea.hbm %s8271_s3, 163840 }
  0x19   : > { %p7080_p6 = scmp.ne.s32.totalorder %s8271_s3, %s7079_s22  ;;  %p7086_p10 = scmp.lt.u32.totalorder %s7079_s22, %s8271_s3 }
  0x1b   : > { %p7082_p8 = pnand %p7507_p7, %p7080_p6 }
  0x1d   : > { %p7083_p9 = pneg %p7082_p8 }
  0x1f   : > { %p7088_p11 = pnand %p7086_p10, %p7083_p9 }
  0x21   : > { %7091 = shalt.err (!%p7088_p11)
}
  0x22   : > { %s7092_s19 = scalar_lea.vmem %s7485_s29, 163840  ;;  %p7100_p1 = scmp.lt.s32.totalorder %s7485_s29, %s7485_s29 }
  0x23   : > { %p7093_p12 = scmp.ne.s32.totalorder %s7485_s29, %s7092_s19  ;;  %p7101_p4 = scmp.lt.s32.totalorder %s7092_s19, %s7092_s19 }
  0x25   : > { %p7095_p13 = pnand %p7093_p12, %p7507_p7  ;;  %p7102_p6 = por %p7101_p4, %p7100_p1 }
  0x27   : > { %p7096_p0 = pneg %p7095_p13 }
  0x29   : > { %p7103_p8 = pnand %p7102_p6, %p7096_p0 }
  0x2b   : > { %7106 = shalt.err (!%p7103_p8)
}
  0x2c   : > { %s8258_s20 = smov 256   ;;  %s8262_s21 = smov 16  }
  0x2d   : > { %7000 = dma.hbm_to_vmem [thread:$0]  (!%p7493_p5), %s8271_s3, 163840, %s7485_s29, [#allocation7], %s8258_s20, %s8258_s20, %s8262_s21  }
  0x2e   : > { %s7107_s0 = scalar_lea.hbm %s8245_s6, 32 }
  0x2f   : > { %p7108_p9 = scmp.ne.s32.totalorder %s8245_s6, %s7107_s0  ;;  %p7114_p12 = scmp.lt.u32.totalorder %s7107_s0, %s8245_s6 }
  0x31   : > { %p7110_p10 = pnand %p7108_p9, %p7507_p7 }
  0x33   : > { %p7111_p11 = pneg %p7110_p10 }
  0x35   : > { %p7116_p13 = pnand %p7114_p12, %p7111_p11 }
  0x37   : > { %7119 = shalt.err (!%p7116_p13)
}
  0x38   : > { %s7120_s29 = scalar_lea.vmem %s7489_s30, 32  ;;  %p7128_p6 = scmp.lt.s32.totalorder %s7489_s30, %s7489_s30 }
  0x39   : > { %p7121_p0 = scmp.ne.s32.totalorder %s7489_s30, %s7120_s29  ;;  %p7129_p8 = scmp.lt.s32.totalorder %s7120_s29, %s7120_s29 }
  0x3b   : > { %p7123_p1 = pnand %p7121_p0, %p7507_p7  ;;  %p7130_p9 = por %p7129_p8, %p7128_p6 }
  0x3d   : > { %p7124_p4 = pneg %p7123_p1 }
  0x3f   : > { %p7131_p10 = pnand %p7130_p9, %p7124_p4 }
  0x41   : > { %7134 = shalt.err (!%p7131_p10)
}
  0x42   : > { %s7364_s26 = smov 1   ;;  %s7135_s24 = scalar_lea.hbm %s8247_s8, 32 }
  0x43   : > { %7006 = dma.hbm_to_vmem [thread:$0]  (!%p7493_p5), %s8245_s6, 32, %s7489_s30, [#allocation10], %s8262_s21, %s8262_s21, %s7364_s26  }
  0x44   : > { %p7136_p11 = scmp.ne.s32.totalorder %s8247_s8, %s7135_s24  ;;  %p7142_p0 = scmp.lt.u32.totalorder %s7135_s24, %s8247_s8 }
  0x46   : > { %p7138_p12 = pnand %p7136_p11, %p7507_p7 }
  0x48   : > { %p7139_p13 = pneg %p7138_p12 }
  0x4a   : > { %p7144_p1 = pnand %p7142_p0, %p7139_p13 }
  0x4c   : > { %7147 = shalt.err (!%p7144_p1)
}
  0x4d   : > { %s7148_s30 = scalar_lea.vmem %s7497_s1, 32  ;;  %p7156_p9 = scmp.lt.s32.totalorder %s7497_s1, %s7497_s1 }
  0x4e   : > { %p7149_p4 = scmp.ne.s32.totalorder %s7497_s1, %s7148_s30  ;;  %p7157_p10 = scmp.lt.s32.totalorder %s7148_s30, %s7148_s30 }
  0x50   : > { %p7151_p6 = pnand %p7149_p4, %p7507_p7  ;;  %p7158_p11 = por %p7157_p10, %p7156_p9 }
  0x52   : > { %p7152_p8 = pneg %p7151_p6 }
  0x54   : > { %p7159_p12 = pnand %p7158_p11, %p7152_p8 }
  0x56   : > { %7162 = shalt.err (!%p7159_p12)
}
  0x57   : > { %7012 = dma.hbm_to_vmem [thread:$0]  (!%p7493_p5), %s8247_s8, 32, %s7497_s1, [#allocation13], %s8262_s21, %s8262_s21, %s7364_s26  }
  0x58   : > { %s7365_s22 = smov [#allocation15]   ;;  %s7366_s24 = smov [#allocation4]  }
  0x59   : > { %s551_s23 = sshll.u32 %s7365_s22, 4  ;;  %s450_s28 = sshll.u32 %s7366_s24, 4  ;;  %s552_s23 = int_to_ptr.vmem [resolvable:$true] %s551_s23  ;;  %s451_s28 = int_to_ptr.vmem [resolvable:$true] %s450_s28 }
  0x5a   : > { %s7163_s29 = scalar_lea.hbm %s8251_s12, 16 }
  0x5b   : > { %p7164_p13 = scmp.ne.s32.totalorder %s8251_s12, %s7163_s29  ;;  %p7170_p4 = scmp.lt.u32.totalorder %s7163_s29, %s8251_s12 }
  0x5d   : > { %p7166_p0 = pnand %p7164_p13, %p7507_p7 }
  0x5f   : > { %p7167_p1 = pneg %p7166_p0 }
  0x61   : > { %p7172_p6 = pnand %p7170_p4, %p7167_p1 }
  0x63   : > { %7175 = shalt.err (!%p7172_p6)
}
  0x64   : > { %s7176_s1 = scalar_lea.vmem %s552_s23, 16  ;;  %s7183_s26 = scalar_lea.vmem %s552_s23, 32 }
  0x65   : > { %p7177_p8 = scmp.ne.s32.totalorder %s552_s23, %s7176_s1  ;;  %p7184_p11 = scmp.lt.s32.totalorder %s552_s23, %s552_s23 }
  0x66   : > { %p7185_p12 = scmp.lt.s32.totalorder %s7183_s26, %s7176_s1 }
  0x67   : > { %p7179_p9 = pnand %p7177_p8, %p7507_p7 }
  0x68   : > { %p7186_p2 = por %p7185_p12, %p7184_p11 }
  0x69   : > { %p7180_p10 = pneg %p7179_p9 }
  0x6b   : > { %p7187_p3 = pnand %p7186_p2, %p7180_p10 }
  0x6d   : > { %7190 = shalt.err (!%p7187_p3)
}
  0x6e   : > { %7018 = dma.hbm_to_vmem [thread:$0]  (!%p7493_p5), %s8251_s12, 16, %s552_s23, [#allocation16]  }
  0x6f   : > { %s7191_s24 = scalar_lea.hbm %s8241_s2, 2048 }
  0x70   : > { %p7192_p13 = scmp.ne.s32.totalorder %s8241_s2, %s7191_s24  ;;  %p7198_p3 = scmp.lt.u32.totalorder %s7191_s24, %s8241_s2 }
  0x72   : > { %p7194_p0 = pnand %p7192_p13, %p7507_p7 }
  0x74   : > { %p7195_p2 = pneg %p7194_p0 }
  0x76   : > { %p7200_p1 = pnand %p7198_p3, %p7195_p2 }
  0x78   : > { %7203 = shalt.err (!%p7200_p1)
}
  0x79   : > { %s7204_s16 = scalar_lea.vmem %s451_s28, 2048  ;;  %p7212_p9 = scmp.lt.s32.totalorder %s451_s28, %s451_s28 }
  0x7a   : > { %p7205_p4 = scmp.ne.s32.totalorder %s451_s28, %s7204_s16  ;;  %p7213_p10 = scmp.lt.s32.totalorder %s7204_s16, %s7204_s16 }
  0x7c   : > { %p7207_p6 = pnand %p7205_p4, %p7507_p7  ;;  %p7214_p11 = por %p7213_p10, %p7212_p9 }
  0x7e   : > { %p7208_p8 = pneg %p7207_p6 }
  0x80   : > { %p7215_p12 = pnand %p7214_p11, %p7208_p8 }
  0x82   : > { %7218 = shalt.err (!%p7215_p12)
}
  0x83   : > { %s8273_s23 = smov 256   ;;  %s7367_s20 = smov [#allocation8]  }
  0x84   : > { %6997 = dma.hbm_to_vmem [thread:$0]  (!%p7493_p5), %s8241_s2, 2048, %s451_s28, [#allocation5], %s8273_s23, %s8273_s23, %s8262_s21  }
  0x85   : > { %s476_s17 = sshll.u32 %s7367_s20, 4  ;;  %s7219_s24 = scalar_lea.hbm %s8243_s4, 128  ;;  %s477_s17 = int_to_ptr.vmem [resolvable:$true] %s476_s17 }
  0x86   : > { %p7220_p13 = scmp.ne.s32.totalorder %s8243_s4, %s7219_s24  ;;  %p7226_p3 = scmp.lt.u32.totalorder %s7219_s24, %s8243_s4 }
  0x88   : > { %p7222_p0 = pnand %p7220_p13, %p7507_p7 }
  0x8a   : > { %p7223_p2 = pneg %p7222_p0 }
  0x8c   : > { %p7228_p1 = pnand %p7226_p3, %p7223_p2 }
  0x8e   : > { %7231 = shalt.err (!%p7228_p1)
}
  0x8f   : > { %s7232_s28 = scalar_lea.vmem %s477_s17, 128  ;;  %p7240_p9 = scmp.lt.s32.totalorder %s477_s17, %s477_s17 }
  0x90   : > { %p7233_p4 = scmp.ne.s32.totalorder %s477_s17, %s7232_s28  ;;  %p7241_p10 = scmp.lt.s32.totalorder %s7232_s28, %s7232_s28 }
  0x92   : > { %p7235_p6 = pnand %p7233_p4, %p7507_p7  ;;  %p7242_p11 = por %p7241_p10, %p7240_p9 }
  0x94   : > { %p7236_p8 = pneg %p7235_p6 }
  0x96   : > { %p7243_p12 = pnand %p7242_p11, %p7236_p8 }
  0x98   : > { %7246 = shalt.err (!%p7243_p12)
}
  0x99   : > { %s7368_s16 = smov 32   ;;  %s7369_s1 = smov 2  }
  0x9a   : > { %7003 = dma.hbm_to_vmem [thread:$0]  (!%p7493_p5), %s8243_s4, 128, %s477_s17, [#allocation7], %s7368_s16, %s7368_s16, %s7369_s1  }
  0x9b   : > { %s7370_s3 = smov [#allocation11]   ;;  %s7371_s24 = smov [#allocation14]  }
  0x9c   : > { %s505_s22 = sshll.u32 %s7370_s3, 4  ;;  %s534_s0 = sshll.u32 %s7371_s24, 4  ;;  %s506_s22 = int_to_ptr.vmem [resolvable:$true] %s505_s22  ;;  %s7638_s0 = int_to_ptr.vmem [resolvable:$true] %s534_s0 }
  0x9d   : > { %s7247_s30 = scalar_lea.hbm %s8246_s7, 64 }
  0x9e   : > { %p7248_p13 = scmp.ne.s32.totalorder %s8246_s7, %s7247_s30  ;;  %p7254_p3 = scmp.lt.u32.totalorder %s7247_s30, %s8246_s7 }
  0xa0   : > { %p7250_p0 = pnand %p7248_p13, %p7507_p7 }
  0xa2   : > { %p7251_p2 = pneg %p7250_p0 }
  0xa4   : > { %p7256_p1 = pnand %p7254_p3, %p7251_p2 }
  0xa6   : > { %7259 = shalt.err (!%p7256_p1)
}
  0xa7   : > { %s7260_s20 = scalar_lea.vmem %s506_s22, 64  ;;  %p7268_p9 = scmp.lt.s32.totalorder %s506_s22, %s506_s22 }
  0xa8   : > { %p7261_p4 = scmp.ne.s32.totalorder %s506_s22, %s7260_s20  ;;  %p7269_p10 = scmp.lt.s32.totalorder %s7260_s20, %s7260_s20 }
  0xaa   : > { %p7263_p6 = pnand %p7261_p4, %p7507_p7  ;;  %p7270_p11 = por %p7269_p10, %p7268_p9 }
  0xac   : > { %p7264_p8 = pneg %p7263_p6 }
  0xae   : > { %p7271_p12 = pnand %p7270_p11, %p7264_p8 }
  0xb0   : > { %7274 = shalt.err (!%p7271_p12)
}
  0xb1   : > { %7009 = dma.hbm_to_vmem [thread:$0]  (!%p7493_p5), %s8246_s7, 64, %s506_s22, [#allocation10], %s7368_s16, %s7368_s16, %s7369_s1  }
  0xb2   : > { %s7275_s29 = scalar_lea.hbm %s8249_s10, 1024 }
  0xb3   : > { %p7276_p13 = scmp.ne.s32.totalorder %s8249_s10, %s7275_s29  ;;  %p7282_p3 = scmp.lt.u32.totalorder %s7275_s29, %s8249_s10 }
  0xb5   : > { %p7278_p0 = pnand %p7276_p13, %p7507_p7 }
  0xb7   : > { %p7279_p2 = pneg %p7278_p0 }
  0xb9   : > { %p7284_p1 = pnand %p7282_p3, %p7279_p2 }
  0xbb   : > { %7287 = shalt.err (!%p7284_p1)
}
  0xbc   : > { %s7288_s16 = scalar_lea.vmem %s7638_s0, 1024  ;;  %p7296_p9 = scmp.lt.s32.totalorder %s7638_s0, %s7638_s0 }
  0xbd   : > { %p7289_p4 = scmp.ne.s32.totalorder %s7638_s0, %s7288_s16  ;;  %p7297_p10 = scmp.lt.s32.totalorder %s7288_s16, %s7288_s16 }
  0xbf   : > { %p7291_p6 = pnand %p7289_p4, %p7507_p7  ;;  %p7298_p11 = por %p7297_p10, %p7296_p9 }
  0xc1   : > { %p7292_p8 = pneg %p7291_p6 }
  0xc3   : > { %p7299_p12 = pnand %p7298_p11, %p7292_p8 }
  0xc5   : > { %7302 = shalt.err (!%p7299_p12)
}
  0xc6   : > { %s8274_s1 = smov 16   ;;  %s7372_s21 = smov [#allocation17]  }
  0xc7   : > { %7015 = dma.hbm_to_vmem [thread:$0]  (!%p7493_p5), %s8249_s10, 1024, %s7638_s0, [#allocation13], %s8273_s23, %s8273_s23, %s8274_s1  }
  0xc8   : > { %s562_s3 = sshll.u32 %s7372_s21, 4  ;;  %s7303_s29 = scalar_lea.hbm %s8252_s13, 16  ;;  %s563_s3 = int_to_ptr.vmem [resolvable:$true] %s562_s3 }
  0xc9   : > { %p7304_p13 = scmp.ne.s32.totalorder %s8252_s13, %s7303_s29  ;;  %p7310_p3 = scmp.lt.u32.totalorder %s7303_s29, %s8252_s13 }
  0xcb   : > { %p7306_p0 = pnand %p7304_p13, %p7507_p7 }
  0xcd   : > { %p7307_p2 = pneg %p7306_p0 }
  0xcf   : > { %p7312_p1 = pnand %p7310_p3, %p7307_p2 }
  0xd1   : > { %7315 = shalt.err (!%p7312_p1)
}
  0xd2   : > { %s7316_s23 = scalar_lea.vmem %s563_s3, 16  ;;  %s7323_s0 = scalar_lea.vmem %s563_s3, 32 }
  0xd3   : > { %p7317_p4 = scmp.ne.s32.totalorder %s563_s3, %s7316_s23  ;;  %p7324_p9 = scmp.lt.s32.totalorder %s563_s3, %s563_s3 }
  0xd4   : > { %p7325_p10 = scmp.lt.s32.totalorder %s7323_s0, %s7316_s23 }
  0xd5   : > { %p7319_p6 = pnand %p7317_p4, %p7507_p7 }
  0xd6   : > { %p7326_p11 = por %p7325_p10, %p7324_p9 }
  0xd7   : > { %p7320_p8 = pneg %p7319_p6 }
  0xd9   : > { %p7327_p12 = pnand %p7326_p11, %p7320_p8 }
  0xdb   : > { %7330 = shalt.err (!%p7327_p12)
}
  0xdc   : > { %7021 = dma.hbm_to_vmem [thread:$0]  (!%p7493_p5), %s8252_s13, 16, %s563_s3, [#allocation16]  }
  0xdd   : > { %p8275_p13 = scmp.ne.s32.totalorder %s8269_s15, 0 }
  0xde   : > { %p8276_p0 = scmp.eq.s32.totalorder (!%p8275_p13), %s7476_s27, 0 }
  0xdf   : > { %595 = sbr.rel (%p8275_p13) target bundleno = 4800 (0x12c0), region = 84 }
  0xe6   : > { %7336 = dma.done.wait (%p8276_p0), [#allocation5], 2048   ;;  %p8277_p7 = pmov %p8276_p0 }
  0xe7   : > { %p8278_p2 = pmov %p8276_p0 }
  0xe8   : > { %7338 = vsyncadd (%p8277_p7), [#allocation5], 4294965248 }
  0xe9   : > { %7340 = dma.done.wait (%p8278_p2), [#allocation7], 163968   ;;  %p8279_p3 = pmov %p8276_p0 }
  0xea   : > { %p8280_p1 = pmov %p8276_p0 }
  0xeb   : > { %7342 = vsyncadd (%p8279_p3), [#allocation7], 4294803328 }
  0xec   : > { %7344 = dma.done.wait (%p8280_p1), [#allocation10], 96   ;;  %p8281_p5 = pmov %p8276_p0 }
  0xed   : > { %p8282_p4 = pmov %p8276_p0 }
  0xee   : > { %7346 = vsyncadd (%p8281_p5), [#allocation10], 4294967200 }
  0xef   : > { %7348 = dma.done.wait (%p8282_p4), [#allocation13], 1056   ;;  %p8283_p6 = pmov %p8276_p0 }
  0xf0   : > { %p8284_p8 = pmov %p8276_p0 }
  0xf1   : > { %7350 = vsyncadd (%p8283_p6), [#allocation13], 4294966240 }
  0xf2   : > { %7352 = dma.done.wait (%p8284_p8), [#allocation16], 32   ;;  %p8285_p9 = pmov %p8276_p0 }
  0xf3   : > { %v7373_v1 = vmov 0.0   ;;  %v705_v2 = vld [vmem:[#allocation4 + $0x8] sm:$0xff]  ;;  %v707_v3 = vld [vmem:[#allocation4 + $0x18] sm:$0xff]  ;;  %v704_v4 = vld [vmem:[#allocation4] sm:$0xff]  ;;  %p684_p10 = scmp.lt.s32.totalorder %s7476_s27, 1  ;;  %s8286_s22 = sld [smem:[#allocation24_spill]] }
  0xf4   : > { %7354 = vsyncadd (%p8285_p9), [#allocation16], 4294967264  ;;  %800 = vmatprep.mubr.f32.mxu0 %v7373_v1  ;;  %699 = vst [vmem:[#allocation2] sm:$0xff] %v7373_v1  ;;  %v5460_v5 = vpack.c.bf16 %v707_v3, %v705_v2  ;;  %v706_v6 = vld [vmem:[#allocation4 + $0x10] sm:$0xff]  ;;  %v709_v7 = vld [vmem:[#allocation4 + $0x28] sm:$0xff]  ;;  %vm732_vm0 = vcmask 523264  }
  0xf5   : > { %700 = vst [vmem:[#allocation2 + $0x8] sm:$0xff] %v7373_v1  ;;  %701 = vst [vmem:[#allocation2 + $0x10] sm:$0xf] %v7373_v1  ;;  %v711_v8 = vld [vmem:[#allocation4 + $0x38] sm:$0xff]  ;;  %v5462_v9 = vpack.c.bf16 %v706_v6, %v704_v4  ;;  %v708_v11 = vld [vmem:[#allocation4 + $0x20] sm:$0xff]  ;;  %s8292_s27 = smov (!%p684_p10, %s7476_s27), 1 }
  0xf6   : > { %702 = vst [vmem:[#allocation2 + $0x18] sm:$0xf] %v7373_v1  ;;  %v5464_v10 = vpack.c.bf16 %v711_v8, %v709_v7  ;;  %v710_v12 = vld [vmem:[#allocation4 + $0x30] sm:$0xff]  ;;  %v713_v13 = vld [vmem:[#allocation4 + $0x48] sm:$0xff]  ;;  %5461 = vmatprep.subr.bf16.mxu0 %v5460_v5  ;;  %v715_v14 = vld [vmem:[#allocation4 + $0x58] sm:$0xff]  ;;  %s5235_s15 = sshll.u32 %s8292_s27, 3 }
  0xf7   : > { %5463 = vmatpush1.bf16.msra.mxu0 %v5462_v9  ;;  %v5466_v15 = vpack.c.bf16 %v710_v12, %v708_v11  ;;  %v712_v16 = vld [vmem:[#allocation4 + $0x40] sm:$0xff]  ;;  %v714_v17 = vld [vmem:[#allocation4 + $0x50] sm:$0xff]  ;;  %v5468_v18 = vpack.c.bf16 %v715_v14, %v713_v13  ;;  %v717_v19 = vld [vmem:[#allocation4 + $0x68] sm:$0xff]  ;;  %s5236_s21 = sshll.u32 %s8292_s27, 1  ;;  %s8287_s19 = sld [smem:[#allocation25_spill]]  ;;  %vm1041_vm1 = vcmask 1046528  }
  0xf8   : > { %5465 = vmatprep.subr.bf16.mxu0 %v5464_v10  ;;  %v719_v20 = vld [vmem:[#allocation4 + $0x78] sm:$0xff]  ;;  %v832_v21 = vld [vmem:[#allocation6 + $0x8] sm:$0xff]  ;;  %v831_v23 = vld [vmem:[#allocation6] sm:$0xff]  ;;  %v5470_v30 = vpack.c.bf16 %v714_v17, %v712_v16  ;;  %vm1196_vm2 = vcmask 1045504   ;;  %vm1351_vm3 = vcmask 1044480   ;;  %vm1506_vm4 = vcmask 1043456  }
  0xf9   : > { %v834_v22 = vld [vmem:[#allocation6 + $0x18] sm:$0xff]  ;;  %v833_v24 = vld [vmem:[#allocation6 + $0x10] sm:$0xff]  ;;  %v836_v27 = vld [vmem:[#allocation6 + $0x28] sm:$0xff]  ;;  %v5472_v35 = vpack.c.bf16 %v719_v20, %v717_v19  ;;  %s687_s20 = scalar_lea.vmem %s8286_s22, %s5235_s15  ;;  %vm7375_vm9 = vmmov 0   ;;  %vm2498_vm10 = vcmask 261120   ;;  %vm2579_vm11 = vcmask 1041408  }
  0xfa   : > { %v5476_v25 = vpack.c.bf16 %v834_v22, %v832_v21  ;;  %v5478_v26 = vpack.c.bf16 %v833_v24, %v831_v23  ;;  %v838_v28 = vld [vmem:[#allocation6 + $0x38] sm:$0xff]  ;;  %v835_v29 = vld [vmem:[#allocation6 + $0x20] sm:$0xff]  ;;  %v837_v32 = vld [vmem:[#allocation6 + $0x30] sm:$0xff]  ;;  %vm2575_vm12 = vcmask 15360   ;;  %s8288_s24 = sld [smem:[#allocation27_spill]]  ;;  %s8289_s28 = sld [smem:[#allocation28_spill]] }
  0xfb   : > { %5467 = vmatpush1.bf16.msra.mxu0 %v5466_v15  ;;  %v5480_v31 = vpack.c.bf16 %v838_v28, %v836_v27  ;;  %v840_v33 = vld [vmem:[#allocation6 + $0x48] sm:$0xff]  ;;  %v842_v34 = vld [vmem:[#allocation6 + $0x58] sm:$0xff]  ;;  %v716_v36 = vld [vmem:[#allocation4 + $0x60] sm:$0xff]  ;;  %v5482_v38 = vpack.c.bf16 %v837_v32, %v835_v29 }
  0xfc   : > { %5469 = vmatprep.subr.bf16.mxu0 %v5468_v18  ;;  %v718_v37 = vld [vmem:[#allocation4 + $0x70] sm:$0xff]  ;;  %5477 = vmatprep.subr.bf16.mxu1 %v5476_v25  ;;  %v5484_v39 = vpack.c.bf16 %v842_v34, %v840_v33  ;;  %v839_v40 = vld [vmem:[#allocation6 + $0x40] sm:$0xff]  ;;  %v844_v43 = vld [vmem:[#allocation6 + $0x68] sm:$0xff] }
  0xfd   : > { %5479 = vmatpush1.bf16.msra.mxu1 %v5478_v26  ;;  %v841_v41 = vld [vmem:[#allocation6 + $0x50] sm:$0xff]  ;;  %v5474_v42 = vpack.c.bf16 %v718_v37, %v716_v36  ;;  %v846_v44 = vld [vmem:[#allocation6 + $0x78] sm:$0xff]  ;;  %v843_v47 = vld [vmem:[#allocation6 + $0x60] sm:$0xff]  ;;  %s691_s29 = scalar_lea.vmem %s8287_s19, %s5236_s21 }
  0xfe   : > { %5481 = vmatprep.subr.bf16.mxu1 %v5480_v31  ;;  %v5486_v45 = vpack.c.bf16 %v841_v41, %v839_v40  ;;  %v5488_v46 = vpack.c.bf16 %v846_v44, %v844_v43  ;;  %v845_v48 = vld [vmem:[#allocation6 + $0x70] sm:$0xff]  ;;  %v703_v49 = vld [vmem:[%s687_s20] sm:$0xff]  ;;  %v848_v50 = vld [vmem:[#allocation6 + $0x88] sm:$0xff] }
  0xff   : > { %5471 = vmatpush1.bf16.msra.mxu0 %v5470_v30  ;;  %v850_v51 = vld [vmem:[#allocation6 + $0x98] sm:$0xff]  ;;  %v5490_v52 = vpack.c.bf16 %v845_v48, %v843_v47  ;;  %v847_v54 = vld [vmem:[#allocation6 + $0x80] sm:$0xff]  ;;  %v849_v55 = vld [vmem:[#allocation6 + $0x90] sm:$0xff] }
 0x100   : > { %5473 = vmatprep.subr.bf16.mxu0 %v5472_v35  ;;  %v5492_v53 = vpack.c.bf16 %v850_v51, %v848_v50  ;;  %v852_v56 = vld [vmem:[#allocation6 + $0xa8] sm:$0xff]  ;;  %v854_v57 = vld [vmem:[#allocation6 + $0xb8] sm:$0xff]  ;;  %v5494_v58 = vpack.c.bf16 %v849_v55, %v847_v54  ;;  %v851_v60 = vld [vmem:[#allocation6 + $0xa0] sm:$0xff]  ;;  %s695_s19 = scalar_lea.vmem %s8288_s24, %s5235_s15  ;;  %s698_s26 = scalar_lea.vmem %s8289_s28, %s8292_s27 }
 0x101   : > { %5483 = vmatpush1.bf16.msra.mxu1 %v5482_v38  ;;  %v5496_v59 = vpack.c.bf16 %v854_v57, %v852_v56  ;;  %v853_v61 = vld [vmem:[#allocation6 + $0xb0] sm:$0xff]  ;;  %v856_v62 = vld [vmem:[#allocation6 + $0xc8] sm:$0xff]  ;;  %v858_v63 = vld [vmem:[#allocation6 + $0xd8] sm:$0xff] }
 0x102   : > { %5485 = vmatprep.subr.bf16.mxu1 %v5484_v39  ;;  %v5498_v0 = vpack.c.bf16 %v853_v61, %v851_v60  ;;  %v5500_v2 = vpack.c.bf16 %v858_v63, %v856_v62  ;;  %v855_v3 = vld [vmem:[#allocation6 + $0xc0] sm:$0xff]  ;;  %v857_v4 = vld [vmem:[#allocation6 + $0xd0] sm:$0xff]  ;;  %v860_v5 = vld [vmem:[#allocation6 + $0xe8] sm:$0xff]  ;;  %v722_v63 = vlaneseq }
 0x103   : > { %5475 = vmatpush1.bf16.msra.mxu0 %v5474_v42  ;;  %v862_v6 = vld [vmem:[#allocation6 + $0xf8] sm:$0xff]  ;;  %v5502_v7 = vpack.c.bf16 %v857_v4, %v855_v3  ;;  %v859_v9 = vld [vmem:[#allocation6 + $0xe0] sm:$0xff]  ;;  %v861_v10 = vld [vmem:[#allocation6 + $0xf0] sm:$0xff] }
 0x104   : > { %v5504_v8 = vpack.c.bf16 %v862_v6, %v860_v5  ;;  %v864_v11 = vld [vmem:[#allocation6 + $0x108] sm:$0xff]  ;;  %v866_v12 = vld [vmem:[#allocation6 + $0x118] sm:$0xff]  ;;  %v5506_v13 = vpack.c.bf16 %v861_v10, %v859_v9  ;;  %v863_v15 = vld [vmem:[#allocation6 + $0x100] sm:$0xff] }
 0x105   : > { %5487 = vmatpush1.bf16.msra.mxu1 %v5486_v45  ;;  %v5508_v14 = vpack.c.bf16 %v866_v12, %v864_v11  ;;  %v865_v16 = vld [vmem:[#allocation6 + $0x110] sm:$0xff]  ;;  %v868_v17 = vld [vmem:[#allocation6 + $0x128] sm:$0xff]  ;;  %v870_v18 = vld [vmem:[#allocation6 + $0x138] sm:$0xff] }
 0x106   : > { %5238 = vmatmul.mubr.msk.f32.vlgmr.msra.gmra.mrb[0].mxu0 %vm732_vm0, %v703_v49  ;;  %5489 = vmatprep.subr.bf16.mxu1 %v5488_v46  ;;  %v5510_v19 = vpack.c.bf16 %v865_v16, %v863_v15  ;;  %v5512_v20 = vpack.c.bf16 %v870_v18, %v868_v17  ;;  %v867_v21 = vld [vmem:[#allocation6 + $0x120] sm:$0xff]  ;;  %v869_v22 = vld [vmem:[#allocation6 + $0x130] sm:$0xff]  ;;  %v872_v23 = vld [vmem:[#allocation6 + $0x148] sm:$0xff] }
 0x107   : > { %v874_v24 = vld [vmem:[#allocation6 + $0x158] sm:$0xff]  ;;  %v5514_v25 = vpack.c.bf16 %v869_v22, %v867_v21  ;;  %v871_v27 = vld [vmem:[#allocation6 + $0x140] sm:$0xff]  ;;  %v873_v28 = vld [vmem:[#allocation6 + $0x150] sm:$0xff] }
 0x108   : > { %v5516_v26 = vpack.c.bf16 %v874_v24, %v872_v23  ;;  %v876_v29 = vld [vmem:[#allocation6 + $0x168] sm:$0xff]  ;;  %v878_v30 = vld [vmem:[#allocation6 + $0x178] sm:$0xff]  ;;  %v5518_v31 = vpack.c.bf16 %v873_v28, %v871_v27  ;;  %v875_v33 = vld [vmem:[#allocation6 + $0x160] sm:$0xff] }
 0x109   : > { %5491 = vmatpush1.bf16.msra.mxu1 %v5490_v52  ;;  %v5520_v32 = vpack.c.bf16 %v878_v30, %v876_v29  ;;  %v877_v34 = vld [vmem:[#allocation6 + $0x170] sm:$0xff]  ;;  %v880_v35 = vld [vmem:[#allocation6 + $0x188] sm:$0xff]  ;;  %v882_v36 = vld [vmem:[#allocation6 + $0x198] sm:$0xff] }
 0x10a   : > { %5493 = vmatprep.subr.bf16.mxu1 %v5492_v53  ;;  %v5522_v37 = vpack.c.bf16 %v877_v34, %v875_v33  ;;  %v5524_v38 = vpack.c.bf16 %v882_v36, %v880_v35  ;;  %v879_v39 = vld [vmem:[#allocation6 + $0x180] sm:$0xff]  ;;  %v881_v40 = vld [vmem:[#allocation6 + $0x190] sm:$0xff]  ;;  %v884_v42 = vld [vmem:[#allocation6 + $0x1a8] sm:$0xff] }
 0x10b   : > { %v5526_v41 = vpack.c.bf16 %v881_v40, %v879_v39  ;;  %v886_v43 = vld [vmem:[#allocation6 + $0x1b8] sm:$0xff]  ;;  %v883_v45 = vld [vmem:[#allocation6 + $0x1a0] sm:$0xff]  ;;  %v885_v46 = vld [vmem:[#allocation6 + $0x1b0] sm:$0xff] }
 0x10c   : > { %v5528_v44 = vpack.c.bf16 %v886_v43, %v884_v42  ;;  %v5530_v47 = vpack.c.bf16 %v885_v46, %v883_v45  ;;  %v888_v48 = vld [vmem:[#allocation6 + $0x1c8] sm:$0xff]  ;;  %v890_v49 = vld [vmem:[#allocation6 + $0x1d8] sm:$0xff]  ;;  %v887_v51 = vld [vmem:[#allocation6 + $0x1c0] sm:$0xff] }
 0x10d   : > { %5495 = vmatpush1.bf16.msra.mxu1 %v5494_v58  ;;  %v5532_v50 = vpack.c.bf16 %v890_v49, %v888_v48  ;;  %v889_v52 = vld [vmem:[#allocation6 + $0x1d0] sm:$0xff]  ;;  %v892_v54 = vld [vmem:[#allocation6 + $0x1e8] sm:$0xff]  ;;  %v894_v55 = vld [vmem:[#allocation6 + $0x1f8] sm:$0xff] }
 0x10e   : > { %5497 = vmatprep.subr.bf16.mxu1 %v5496_v59  ;;  %v5534_v53 = vpack.c.bf16 %v889_v52, %v887_v51  ;;  %v891_v56 = vld [vmem:[#allocation6 + $0x1e0] sm:$0xff]  ;;  %v5536_v57 = vpack.c.bf16 %v894_v55, %v892_v54  ;;  %v893_v58 = vld [vmem:[#allocation6 + $0x1f0] sm:$0xff]  ;;  %v974_v60 = vld [vmem:[#allocation6 + $0x208] sm:$0xff] }
 0x10f   : > { %v5538_v59 = vpack.c.bf16 %v893_v58, %v891_v56  ;;  %v976_v61 = vld [vmem:[#allocation6 + $0x218] sm:$0xff]  ;;  %v978_v15 = vld [vmem:[#allocation6 + $0x228] sm:$0xff]  ;;  %v977_v18 = vld [vmem:[#allocation6 + $0x220] sm:$0xff] }
 0x110   : > { %v5540_v62 = vpack.c.bf16 %v976_v61, %v974_v60  ;;  %v720_v3 = vld [vmem:[%s691_s29] sm:$0x3]  ;;  %v982_v27 = vld [vmem:[#allocation6 + $0x248] sm:$0xff]  ;;  %v983_v33 = vld [vmem:[#allocation6 + $0x250] sm:$0xff] }
 0x111   : > { %5499 = vmatpush1.bf16.msra.mxu1 %v5498_v0  ;;  %v723_v0 = vshrl.u32 %v722_v63, 7  ;;  %v980_v16 = vld [vmem:[#allocation6 + $0x238] sm:$0xff]  ;;  %v986_v34 = vld [vmem:[#allocation6 + $0x268] sm:$0xff]  ;;  %v987_v39 = vld [vmem:[#allocation6 + $0x270] sm:$0xff] }
 0x112   : > { %5501 = vmatprep.subr.bf16.mxu1 %v5500_v2  ;;  %v5544_v23 = vpack.c.bf16 %v980_v16, %v978_v15  ;;  %v984_v28 = vld [vmem:[#allocation6 + $0x258] sm:$0xff]  ;;  %v990_v40 = vld [vmem:[#allocation6 + $0x288] sm:$0xff]  ;;  %v991_v45 = vld [vmem:[#allocation6 + $0x290] sm:$0xff] }
 0x113   : > { %v7743_v2 = vsub.s32 0, %v723_v0  ;;  %v7745_v4 = vsub.s32 1, %v723_v0  ;;  %v988_v35 = vld [vmem:[#allocation6 + $0x278] sm:$0xff]  ;;  %v994_v46 = vld [vmem:[#allocation6 + $0x2a8] sm:$0xff]  ;;  %v995_v51 = vld [vmem:[#allocation6 + $0x2b0] sm:$0xff] }
 0x114   : > { %v998_v52 = vld [vmem:[#allocation6 + $0x2c8] sm:$0xff]  ;;  %v997_v56 = vld [vmem:[#allocation6 + $0x2c0] sm:$0xff]  ;;  %v1003_v63 = vld [vmem:[#allocation6 + $0x2f0] sm:$0xff] }
 0x115   : > { %5503 = vmatpush1.bf16.msra.mxu1 %v5502_v7  ;;  %v725_v5 = vrot.slane %v720_v3, %v7743_v2  ;;  %v729_v6 = vrot.slane %v720_v3, %v7745_v4  ;;  %v1002_v58 = vld [vmem:[#allocation6 + $0x2e8] sm:$0xff]  ;;  %v1008_v3 = vld [vmem:[#allocation6 + $0x318] sm:$0xff]  ;;  %v1009_v15 = vld [vmem:[#allocation6 + $0x320] sm:$0xff] }
 0x116   : > { %5505 = vmatprep.subr.bf16.mxu1 %v5504_v8  ;;  %v1006_v0 = vld [vmem:[#allocation6 + $0x308] sm:$0xff]  ;;  %v1011_v16 = vld [vmem:[#allocation6 + $0x330] sm:$0xff] }
 0x119   : > { %5507 = vmatpush1.bf16.msra.mxu1 %v5506_v13  ;;  %v973_v13 = vld [vmem:[#allocation6 + $0x200] sm:$0xff] }
 0x11a   : > { %5509 = vmatprep.subr.bf16.mxu1 %v5508_v14  ;;  %v975_v14 = vld [vmem:[#allocation6 + $0x210] sm:$0xff] }
 0x11b   : > { %v5542_v17 = vpack.c.bf16 %v975_v14, %v973_v13 }
 0x11d   : > { %5511 = vmatpush1.bf16.msra.mxu1 %v5510_v19  ;;  %v979_v19 = vld [vmem:[#allocation6 + $0x230] sm:$0xff] }
 0x11e   : > { %5513 = vmatprep.subr.bf16.mxu1 %v5512_v20  ;;  %v5546_v30 = vpack.c.bf16 %v979_v19, %v977_v18  ;;  %v1016_v18 = vld [vmem:[#allocation6 + $0x358] sm:$0xff]  ;;  %v5578_v19 = vpack.c.bf16 %v1011_v16, %v1009_v15  ;;  %v1137_v15 = vld [vmem:[#allocation6 + $0x448] sm:$0xff] }
 0x11f   : > { %v1139_v16 = vld [vmem:[#allocation6 + $0x458] sm:$0xff] }
 0x121   : > { %5515 = vmatpush1.bf16.msra.mxu1 %v5514_v25 }
 0x122   : > { %5517 = vmatprep.subr.bf16.mxu1 %v5516_v26 }
 0x125   : > { %5519 = vmatpush1.bf16.msra.mxu1 %v5518_v31  ;;  %v5548_v31 = vpack.c.bf16 %v984_v28, %v982_v27  ;;  %v1017_v27 = vld [vmem:[#allocation6 + $0x360] sm:$0xff]  ;;  %v1019_v28 = vld [vmem:[#allocation6 + $0x370] sm:$0xff] }
 0x126   : > { %5521 = vmatprep.subr.bf16.mxu1 %v5520_v32  ;;  %v981_v32 = vld [vmem:[#allocation6 + $0x240] sm:$0xff] }
 0x127   : > { %v5550_v36 = vpack.c.bf16 %v983_v33, %v981_v32  ;;  %v1021_v33 = vld [vmem:[#allocation6 + $0x380] sm:$0xff] }
 0x129   : > { %5523 = vmatpush1.bf16.msra.mxu1 %v5522_v37  ;;  %v5552_v37 = vpack.c.bf16 %v988_v35, %v986_v34  ;;  %v1023_v34 = vld [vmem:[#allocation6 + $0x390] sm:$0xff]  ;;  %v1026_v35 = vld [vmem:[#allocation6 + $0x3a8] sm:$0xff] }
 0x12a   : > { %5525 = vmatprep.subr.bf16.mxu1 %v5524_v38  ;;  %v985_v38 = vld [vmem:[#allocation6 + $0x260] sm:$0xff] }
 0x12b   : > { %v5554_v42 = vpack.c.bf16 %v987_v39, %v985_v38  ;;  %v1025_v39 = vld [vmem:[#allocation6 + $0x3a0] sm:$0xff] }
 0x12d   : > { %5527 = vmatpush1.bf16.msra.mxu1 %v5526_v41  ;;  %v992_v41 = vld [vmem:[#allocation6 + $0x298] sm:$0xff] }
 0x12e   : > { %5529 = vmatprep.subr.bf16.mxu1 %v5528_v44  ;;  %v5556_v43 = vpack.c.bf16 %v992_v41, %v990_v40  ;;  %v989_v44 = vld [vmem:[#allocation6 + $0x280] sm:$0xff]  ;;  %v1027_v40 = vld [vmem:[#allocation6 + $0x3b0] sm:$0xff]  ;;  %v1030_v41 = vld [vmem:[#allocation6 + $0x3c8] sm:$0xff] }
 0x12f   : > { %v5558_v48 = vpack.c.bf16 %v991_v45, %v989_v44  ;;  %v1029_v45 = vld [vmem:[#allocation6 + $0x3c0] sm:$0xff] }
 0x131   : > { %5531 = vmatpush1.bf16.msra.mxu1 %v5530_v47  ;;  %v996_v47 = vld [vmem:[#allocation6 + $0x2b8] sm:$0xff] }
 0x132   : > { %5533 = vmatprep.subr.bf16.mxu1 %v5532_v50  ;;  %v5560_v49 = vpack.c.bf16 %v996_v47, %v994_v46  ;;  %v993_v50 = vld [vmem:[#allocation6 + $0x2a0] sm:$0xff]  ;;  %v1031_v46 = vld [vmem:[#allocation6 + $0x3d0] sm:$0xff]  ;;  %v1034_v47 = vld [vmem:[#allocation6 + $0x3e8] sm:$0xff] }
 0x133   : > { %v5562_v54 = vpack.c.bf16 %v995_v51, %v993_v50  ;;  %v1033_v51 = vld [vmem:[#allocation6 + $0x3e0] sm:$0xff] }
 0x135   : > { %5535 = vmatpush1.bf16.msra.mxu1 %v5534_v53  ;;  %v1000_v53 = vld [vmem:[#allocation6 + $0x2d8] sm:$0xff] }
 0x136   : > { %5537 = vmatprep.subr.bf16.mxu1 %v5536_v57  ;;  %v5564_v55 = vpack.c.bf16 %v1000_v53, %v998_v52  ;;  %v999_v57 = vld [vmem:[#allocation6 + $0x2d0] sm:$0xff]  ;;  %v1129_v53 = vld [vmem:[#allocation6 + $0x408] sm:$0xff] }
 0x137   : > { %v5566_v60 = vpack.c.bf16 %v999_v57, %v997_v56  ;;  %v1035_v52 = vld [vmem:[#allocation6 + $0x3f0] sm:$0xff] }
 0x138   : > { %v5602_v57 = vpack.c.bf16 %v1035_v52, %v1033_v51  ;;  %v1158_v51 = vld [vmem:[#allocation6 + $0x4f0] sm:$0xff]  ;;  %v1161_v52 = vld [vmem:[#allocation6 + $0x508] sm:$0xff] }
 0x139   : > { %5539 = vmatpush1.bf16.msra.mxu1 %v5538_v59  ;;  %v1004_v59 = vld [vmem:[#allocation6 + $0x2f8] sm:$0xff] }
 0x13a   : > { %5541 = vmatprep.subr.bf16.mxu1 %v5540_v62  ;;  %v5568_v61 = vpack.c.bf16 %v1004_v59, %v1002_v58  ;;  %v1001_v62 = vld [vmem:[#allocation6 + $0x2e0] sm:$0xff] }
 0x1d9   : > { %v802_v7 = vpop.f32.mrb[0].mxu0 }
 0x1da   : > { %v7749_v8 = vadd.f32 %v802_v7, %v725_v5  ;;  %v804_v9 = vpop.f32.mrb[1].mxu0  ;;  %v5570_v5 = vpack.c.bf16 %v1003_v63, %v1001_v62  ;;  %v1005_v7 = vld [vmem:[#allocation6 + $0x300] sm:$0xff]  ;;  %v1130_v62 = vld [vmem:[#allocation6 + $0x410] sm:$0xff] }
 0x1db   : > { %v7751_v10 = vadd.f32 %v804_v9, %v729_v6  ;;  %v5572_v6 = vpack.c.bf16 %v1008_v3, %v1006_v0  ;;  %v1007_v9 = vld [vmem:[#allocation6 + $0x310] sm:$0xff]  ;;  %v1133_v3 = vld [vmem:[#allocation6 + $0x428] sm:$0xff] }
 0x1dc   : > { %v809_v11 = vrot.slane %v7749_v8, 6  ;;  %v5574_v13 = vpack.c.bf16 %v1007_v9, %v1005_v7 }
 0x1dd   : > { %v810_v12 = vrot.slane %v7751_v10, 6 }
 0x1de   : > { %813 = vst [vmem:[#allocation2] sm:$0xfc] %v809_v11  ;;  %815 = vst [vmem:[#allocation2 + $0x10] sm:$0x3] %v809_v11  ;;  %v1010_v11 = vld [vmem:[#allocation6 + $0x328] sm:$0xff] }
 0x1df   : > { %814 = vst [vmem:[#allocation2 + $0x8] sm:$0xfc] %v810_v12  ;;  %816 = vst [vmem:[#allocation2 + $0x18] sm:$0x3] %v810_v12  ;;  %v1012_v12 = vld [vmem:[#allocation6 + $0x338] sm:$0xff] }
 0x1e0   : > { %v5576_v14 = vpack.c.bf16 %v1012_v12, %v1010_v11  ;;  %v1132_v12 = vld [vmem:[#allocation6 + $0x420] sm:$0xff] }
 0x1e5   : > { %v829_v24 = vld [vmem:[#allocation2] sm:$0xff]  ;;  %v970_v56 = vld [vmem:[#allocation2 + $0x10] sm:$0x1] }
 0x1e6   : > { %v830_v20 = vld [vmem:[#allocation2 + $0x8] sm:$0xff]  ;;  %v971_v22 = vld [vmem:[#allocation2 + $0x18] sm:$0x1]  ;;  %v1043_v0 = vrot.slane %v970_v56, 1 }
 0x1e7   : > { %v969_v21 = vld [vmem:[#allocation2 + $0x8] sm:$0xfe]  ;;  %959 = vmatprep.mubr.f32.mxu1 %v830_v20  ;;  %v1046_v26 = vrot.slane %v971_v22, 1  ;;  %v1015_v22 = vld [vmem:[#allocation6 + $0x350] sm:$0xff]  ;;  %v1160_v56 = vld [vmem:[#allocation6 + $0x500] sm:$0xff] }
 0x1e8   : > { %v1045_v25 = vrot.slane %v969_v21, 1  ;;  %960 = vmatmul.mubr.f32.vlgmr.msra.gmra.mrb[0].mxu1 %v829_v24  ;;  %v1013_v21 = vld [vmem:[#allocation6 + $0x340] sm:$0xff]  ;;  %v1020_v24 = vld [vmem:[#allocation6 + $0x378] sm:$0xff]  ;;  %v1124_v58 = vld [vmem:[#allocation2 + $0x8] sm:$0xfc] }
 0x1e9   : > { %5543 = vmatpush1.bf16.msra.mxu1 %v5542_v17  ;;  %v1014_v17 = vld [vmem:[#allocation6 + $0x348] sm:$0xff]  ;;  %v1126_v59 = vld [vmem:[#allocation2 + $0x18] sm:$0x3] }
 0x1ea   : > { %v1047_v29 = vsel %vm1041_vm1, %v1045_v25, %v1046_v26  ;;  %5545 = vmatprep.subr.bf16.mxu1 %v5544_v23  ;;  %v5580_v20 = vpack.c.bf16 %v1016_v18, %v1014_v17  ;;  %v1018_v23 = vld [vmem:[#allocation6 + $0x368] sm:$0xff]  ;;  %v5582_v25 = vpack.c.bf16 %v1015_v22, %v1013_v21  ;;  %v1201_v7 = vrot.slane %v1126_v59, 2  ;;  %v1138_v21 = vld [vmem:[#allocation6 + $0x450] sm:$0xff]  ;;  %v1167_v59 = vld [vmem:[#allocation6 + $0x538] sm:$0xff] }
 0x1eb   : > { %1114 = vmatprep.mubr.f32.mxu1 %v1047_v29  ;;  %v5584_v26 = vpack.c.bf16 %v1020_v24, %v1018_v23  ;;  %v1022_v29 = vld [vmem:[#allocation6 + $0x388] sm:$0xff]  ;;  %v1143_v23 = vld [vmem:[#allocation6 + $0x478] sm:$0xff] }
 0x1ec   : > { %v1141_v22 = vld [vmem:[#allocation6 + $0x468] sm:$0xff] }
 0x1ed   : > { %5547 = vmatpush1.bf16.msra.mxu1 %v5546_v30  ;;  %v1024_v30 = vld [vmem:[#allocation6 + $0x398] sm:$0xff] }
 0x1ee   : > { %5549 = vmatprep.subr.bf16.mxu1 %v5548_v31  ;;  %v5586_v31 = vpack.c.bf16 %v1019_v28, %v1017_v27  ;;  %v5588_v32 = vpack.c.bf16 %v1024_v30, %v1022_v29  ;;  %v1142_v27 = vld [vmem:[#allocation6 + $0x470] sm:$0xff]  ;;  %v1145_v28 = vld [vmem:[#allocation6 + $0x488] sm:$0xff]  ;;  %v1147_v29 = vld [vmem:[#allocation6 + $0x498] sm:$0xff] }
 0x1f1   : > { %5551 = vmatpush1.bf16.msra.mxu1 %v5550_v36  ;;  %v1028_v36 = vld [vmem:[#allocation6 + $0x3b8] sm:$0xff] }
 0x1f2   : > { %5553 = vmatprep.subr.bf16.mxu1 %v5552_v37  ;;  %v5590_v37 = vpack.c.bf16 %v1023_v34, %v1021_v33  ;;  %v5592_v38 = vpack.c.bf16 %v1028_v36, %v1026_v35  ;;  %v1146_v33 = vld [vmem:[#allocation6 + $0x490] sm:$0xff]  ;;  %v1149_v34 = vld [vmem:[#allocation6 + $0x4a8] sm:$0xff]  ;;  %v1151_v35 = vld [vmem:[#allocation6 + $0x4b8] sm:$0xff] }
 0x1f5   : > { %5555 = vmatpush1.bf16.msra.mxu1 %v5554_v42  ;;  %v1032_v42 = vld [vmem:[#allocation6 + $0x3d8] sm:$0xff] }
 0x1f6   : > { %5557 = vmatprep.subr.bf16.mxu1 %v5556_v43  ;;  %v5594_v43 = vpack.c.bf16 %v1027_v40, %v1025_v39  ;;  %v5596_v44 = vpack.c.bf16 %v1032_v42, %v1030_v41  ;;  %v1150_v39 = vld [vmem:[#allocation6 + $0x4b0] sm:$0xff]  ;;  %v1153_v40 = vld [vmem:[#allocation6 + $0x4c8] sm:$0xff]  ;;  %v1155_v41 = vld [vmem:[#allocation6 + $0x4d8] sm:$0xff] }
 0x1f9   : > { %5559 = vmatpush1.bf16.msra.mxu1 %v5558_v48  ;;  %v1036_v48 = vld [vmem:[#allocation6 + $0x3f8] sm:$0xff] }
 0x1fa   : > { %5561 = vmatprep.subr.bf16.mxu1 %v5560_v49  ;;  %v5598_v49 = vpack.c.bf16 %v1031_v46, %v1029_v45  ;;  %v5600_v50 = vpack.c.bf16 %v1036_v48, %v1034_v47  ;;  %v1154_v45 = vld [vmem:[#allocation6 + $0x4d0] sm:$0xff]  ;;  %v1157_v46 = vld [vmem:[#allocation6 + $0x4e8] sm:$0xff]  ;;  %v1159_v47 = vld [vmem:[#allocation6 + $0x4f8] sm:$0xff] }
 0x1fd   : > { %5563 = vmatpush1.bf16.msra.mxu1 %v5562_v54  ;;  %v1131_v54 = vld [vmem:[#allocation6 + $0x418] sm:$0xff] }
 0x1fe   : > { %5565 = vmatprep.subr.bf16.mxu1 %v5564_v55  ;;  %v968_v55 = vld [vmem:[#allocation2] sm:$0xfe] }
 0x1ff   : > { %v1042_v63 = vrot.slane %v968_v55, 1 }
 0x201   : > { %5567 = vmatpush1.bf16.msra.mxu1 %v5566_v60  ;;  %v5604_v60 = vpack.c.bf16 %v1131_v54, %v1129_v53  ;;  %v1163_v53 = vld [vmem:[#allocation6 + $0x518] sm:$0xff] }
 0x202   : > { %5569 = vmatprep.subr.bf16.mxu1 %v5568_v61  ;;  %v1128_v61 = vld [vmem:[#allocation6 + $0x400] sm:$0xff]  ;;  %v5636_v55 = vpack.c.bf16 %v1163_v53, %v1161_v52  ;;  %v1288_v53 = vld [vmem:[#allocation6 + $0x628] sm:$0xff] }
 0x203   : > { %v5606_v9 = vpack.c.bf16 %v1130_v62, %v1128_v61  ;;  %v1164_v62 = vld [vmem:[#allocation6 + $0x520] sm:$0xff] }
 0x205   : > { %5571 = vmatpush1.bf16.msra.mxu1 %v5570_v5  ;;  %v1135_v5 = vld [vmem:[#allocation6 + $0x438] sm:$0xff] }
 0x206   : > { %5573 = vmatprep.subr.bf16.mxu1 %v5572_v6  ;;  %v1200_v6 = vrot.slane %v1124_v58, 2  ;;  %v5608_v11 = vpack.c.bf16 %v1135_v5, %v1133_v3  ;;  %v1165_v58 = vld [vmem:[#allocation6 + $0x528] sm:$0xff]  ;;  %v1171_v3 = vld [vmem:[#allocation6 + $0x558] sm:$0xff] }
 0x207   : > { %v5640_v61 = vpack.c.bf16 %v1167_v59, %v1165_v58  ;;  %v1287_v59 = vld [vmem:[#allocation6 + $0x620] sm:$0xff] }
 0x208   : > { %v1202_v17 = vsel %vm1196_vm2, %v1200_v6, %v1201_v7  ;;  %v1168_v7 = vld [vmem:[#allocation6 + $0x540] sm:$0xff] }
 0x209   : > { %5575 = vmatpush1.bf16.msra.mxu1 %v5574_v13  ;;  %v1134_v13 = vld [vmem:[#allocation6 + $0x430] sm:$0xff] }
 0x20a   : > { %5577 = vmatprep.subr.bf16.mxu1 %v5576_v14  ;;  %v1044_v14 = vsel %vm1041_vm1, %v1042_v63, %v1043_v0  ;;  %v5610_v18 = vpack.c.bf16 %v1134_v13, %v1132_v12  ;;  %v1166_v63 = vld [vmem:[#allocation6 + $0x530] sm:$0xff]  ;;  %v1169_v0 = vld [vmem:[#allocation6 + $0x548] sm:$0xff]  ;;  %v1175_v12 = vld [vmem:[#allocation6 + $0x578] sm:$0xff] }
 0x20b   : > { %v5642_v5 = vpack.c.bf16 %v1166_v63, %v1164_v62  ;;  %v5644_v6 = vpack.c.bf16 %v1171_v3, %v1169_v0  ;;  %v1292_v62 = vld [vmem:[#allocation6 + $0x648] sm:$0xff]  ;;  %v1294_v63 = vld [vmem:[#allocation6 + $0x658] sm:$0xff]  ;;  %v1291_v3 = vld [vmem:[#allocation6 + $0x640] sm:$0xff] }
 0x20d   : > { %5579 = vmatpush1.bf16.msra.mxu1 %v5578_v19  ;;  %v5612_v19 = vpack.c.bf16 %v1139_v16, %v1137_v15  ;;  %v1172_v15 = vld [vmem:[#allocation6 + $0x560] sm:$0xff]  ;;  %v1174_v16 = vld [vmem:[#allocation6 + $0x570] sm:$0xff] }
 0x20e   : > { %5581 = vmatprep.subr.bf16.mxu1 %v5580_v20  ;;  %v1136_v20 = vld [vmem:[#allocation6 + $0x440] sm:$0xff] }
 0x20f   : > { %v5614_v24 = vpack.c.bf16 %v1138_v21, %v1136_v20  ;;  %v1176_v21 = vld [vmem:[#allocation6 + $0x580] sm:$0xff] }
 0x211   : > { %5583 = vmatpush1.bf16.msra.mxu1 %v5582_v25  ;;  %v5616_v25 = vpack.c.bf16 %v1143_v23, %v1141_v22  ;;  %v1178_v22 = vld [vmem:[#allocation6 + $0x590] sm:$0xff]  ;;  %v1181_v23 = vld [vmem:[#allocation6 + $0x5a8] sm:$0xff] }
 0x212   : > { %5585 = vmatprep.subr.bf16.mxu1 %v5584_v26  ;;  %v1140_v26 = vld [vmem:[#allocation6 + $0x460] sm:$0xff] }
 0x213   : > { %v5618_v30 = vpack.c.bf16 %v1142_v27, %v1140_v26  ;;  %v1180_v27 = vld [vmem:[#allocation6 + $0x5a0] sm:$0xff] }
 0x215   : > { %5587 = vmatpush1.bf16.msra.mxu1 %v5586_v31  ;;  %v5620_v31 = vpack.c.bf16 %v1147_v29, %v1145_v28  ;;  %v1182_v28 = vld [vmem:[#allocation6 + $0x5b0] sm:$0xff]  ;;  %v1185_v29 = vld [vmem:[#allocation6 + $0x5c8] sm:$0xff] }
 0x216   : > { %5589 = vmatprep.subr.bf16.mxu1 %v5588_v32  ;;  %v1144_v32 = vld [vmem:[#allocation6 + $0x480] sm:$0xff] }
 0x217   : > { %v5622_v36 = vpack.c.bf16 %v1146_v33, %v1144_v32  ;;  %v1184_v33 = vld [vmem:[#allocation6 + $0x5c0] sm:$0xff] }
 0x219   : > { %5591 = vmatpush1.bf16.msra.mxu1 %v5590_v37  ;;  %v5624_v37 = vpack.c.bf16 %v1151_v35, %v1149_v34  ;;  %v1186_v34 = vld [vmem:[#allocation6 + $0x5d0] sm:$0xff]  ;;  %v1189_v35 = vld [vmem:[#allocation6 + $0x5e8] sm:$0xff] }
 0x21a   : > { %5593 = vmatprep.subr.bf16.mxu1 %v5592_v38  ;;  %v1148_v38 = vld [vmem:[#allocation6 + $0x4a0] sm:$0xff] }
 0x21b   : > { %v5626_v42 = vpack.c.bf16 %v1150_v39, %v1148_v38  ;;  %v1188_v39 = vld [vmem:[#allocation6 + $0x5e0] sm:$0xff] }
 0x21d   : > { %5595 = vmatpush1.bf16.msra.mxu1 %v5594_v43  ;;  %v5628_v43 = vpack.c.bf16 %v1155_v41, %v1153_v40  ;;  %v1190_v40 = vld [vmem:[#allocation6 + $0x5f0] sm:$0xff]  ;;  %v1284_v41 = vld [vmem:[#allocation6 + $0x608] sm:$0xff] }
 0x21e   : > { %5597 = vmatprep.subr.bf16.mxu1 %v5596_v44  ;;  %v1152_v44 = vld [vmem:[#allocation6 + $0x4c0] sm:$0xff] }
 0x21f   : > { %v5630_v48 = vpack.c.bf16 %v1154_v45, %v1152_v44  ;;  %v1125_v44 = vld [vmem:[#allocation2 + $0x10] sm:$0x3]  ;;  %v5666_v45 = vpack.c.bf16 %v1190_v40, %v1188_v39  ;;  %v1299_v39 = vld [vmem:[#allocation6 + $0x680] sm:$0xff] }
 0x220   : > { %v1198_v52 = vrot.slane %v1125_v44, 2  ;;  %v1301_v44 = vld [vmem:[#allocation6 + $0x690] sm:$0xff] }
 0x221   : > { %5599 = vmatpush1.bf16.msra.mxu1 %v5598_v49  ;;  %v5632_v49 = vpack.c.bf16 %v1159_v47, %v1157_v46  ;;  %v1279_v46 = vld [vmem:[#allocation2 + $0x8] sm:$0xf8]  ;;  %v1281_v47 = vld [vmem:[#allocation2 + $0x18] sm:$0x7] }
 0x222   : > { %5601 = vmatprep.subr.bf16.mxu1 %v5600_v50  ;;  %v1156_v50 = vld [vmem:[#allocation6 + $0x4e0] sm:$0xff] }
 0x223   : > { %v5634_v54 = vpack.c.bf16 %v1158_v51, %v1156_v50  ;;  %v1285_v50 = vld [vmem:[#allocation6 + $0x610] sm:$0xff] }
 0x225   : > { %5603 = vmatpush1.bf16.msra.mxu1 %v5602_v57  ;;  %v1162_v57 = vld [vmem:[#allocation6 + $0x510] sm:$0xff] }
 0x226   : > { %5605 = vmatprep.subr.bf16.mxu1 %v5604_v60  ;;  %v5638_v60 = vpack.c.bf16 %v1162_v57, %v1160_v56  ;;  %v1356_v56 = vrot.slane %v1281_v47, 3  ;;  %v1304_v47 = vld [vmem:[#allocation6 + $0x6a8] sm:$0xff] }
 0x228   : > { %1115 = vmatmul.mubr.f32.vlgmr.msra.gmra.mrb[0].mxu1 %v1044_v14 }
 0x229   : > { %5607 = vmatpush1.bf16.msra.mxu1 %v5606_v9  ;;  %1269 = vmatprep.mubr.f32.mxu1 %v1202_v17  ;;  %v1170_v9 = vld [vmem:[#allocation6 + $0x550] sm:$0xff]  ;;  %v1177_v17 = vld [vmem:[#allocation6 + $0x588] sm:$0xff] }
 0x22a   : > { %5609 = vmatprep.subr.bf16.mxu1 %v5608_v11  ;;  %v1173_v11 = vld [vmem:[#allocation6 + $0x568] sm:$0xff]  ;;  %v5646_v13 = vpack.c.bf16 %v1170_v9, %v1168_v7  ;;  %v1623_v7 = vld [vmem:[#allocation6 + $0xa18] sm:$0xff]  ;;  %v1620_v9 = vld [vmem:[#allocation6 + $0xa00] sm:$0xff] }
 0x22b   : > { %v5648_v14 = vpack.c.bf16 %v1175_v12, %v1173_v11 }
 0x22d   : > { %5611 = vmatpush1.bf16.msra.mxu1 %v5610_v18  ;;  %v1179_v18 = vld [vmem:[#allocation6 + $0x598] sm:$0xff] }
 0x22e   : > { %5613 = vmatprep.subr.bf16.mxu1 %v5612_v19  ;;  %v5650_v19 = vpack.c.bf16 %v1174_v16, %v1172_v15  ;;  %v5652_v20 = vpack.c.bf16 %v1179_v18, %v1177_v17  ;;  %v1627_v15 = vld [vmem:[#allocation6 + $0xa38] sm:$0xff]  ;;  %v5676_v16 = vpack.c.bf16 %v1294_v63, %v1292_v62  ;;  %v1307_v63 = vld [vmem:[#allocation6 + $0x6c0] sm:$0xff] }
 0x231   : > { %5615 = vmatpush1.bf16.msra.mxu1 %v5614_v24  ;;  %v1183_v24 = vld [vmem:[#allocation6 + $0x5b8] sm:$0xff] }
 0x232   : > { %5617 = vmatprep.subr.bf16.mxu1 %v5616_v25  ;;  %v5654_v25 = vpack.c.bf16 %v1178_v22, %v1176_v21  ;;  %v5656_v26 = vpack.c.bf16 %v1183_v24, %v1181_v23  ;;  %v1629_v21 = vld [vmem:[#allocation6 + $0xa48] sm:$0xff]  ;;  %v1298_v23 = vld [vmem:[#allocation6 + $0x678] sm:$0xff] }
 0x233   : > { %v1296_v22 = vld [vmem:[#allocation6 + $0x668] sm:$0xff]  ;;  %v1631_v24 = vld [vmem:[#allocation6 + $0xa58] sm:$0xff] }
 0x235   : > { %5619 = vmatpush1.bf16.msra.mxu1 %v5618_v30  ;;  %v1187_v30 = vld [vmem:[#allocation6 + $0x5d8] sm:$0xff] }
 0x236   : > { %5621 = vmatprep.subr.bf16.mxu1 %v5620_v31  ;;  %v5658_v31 = vpack.c.bf16 %v1182_v28, %v1180_v27  ;;  %v5660_v32 = vpack.c.bf16 %v1187_v30, %v1185_v29  ;;  %v1295_v27 = vld [vmem:[#allocation6 + $0x660] sm:$0xff]  ;;  %v5804_v28 = vpack.c.bf16 %v1631_v24, %v1629_v21  ;;  %v1630_v30 = vld [vmem:[#allocation6 + $0xa50] sm:$0xff]  ;;  %v1316_v24 = vld [vmem:[#allocation6 + $0x708] sm:$0xff] }
 0x237   : > { %v1628_v29 = vld [vmem:[#allocation6 + $0xa40] sm:$0xff]  ;;  %v1313_v21 = vld [vmem:[#allocation6 + $0x6f0] sm:$0xff] }
 0x239   : > { %5623 = vmatpush1.bf16.msra.mxu1 %v5622_v36  ;;  %v1191_v36 = vld [vmem:[#allocation6 + $0x5f8] sm:$0xff] }
 0x23a   : > { %5625 = vmatprep.subr.bf16.mxu1 %v5624_v37  ;;  %v5662_v37 = vpack.c.bf16 %v1186_v34, %v1184_v33  ;;  %v5664_v38 = vpack.c.bf16 %v1191_v36, %v1189_v35  ;;  %v1633_v33 = vld [vmem:[#allocation6 + $0xa68] sm:$0xff]  ;;  %v1635_v34 = vld [vmem:[#allocation6 + $0xa78] sm:$0xff] }
 0x23b   : > { %v1300_v35 = vld [vmem:[#allocation6 + $0x688] sm:$0xff]  ;;  %v1302_v36 = vld [vmem:[#allocation6 + $0x698] sm:$0xff]  ;;  %v5808_v40 = vpack.c.bf16 %v1635_v34, %v1633_v33  ;;  %v1317_v33 = vld [vmem:[#allocation6 + $0x710] sm:$0xff] }
 0x23c   : > { %v1653_v34 = vld [vmem:[#allocation6 + $0xb08] sm:$0xff] }
 0x23d   : > { %5627 = vmatpush1.bf16.msra.mxu1 %v5626_v42  ;;  %v1286_v42 = vld [vmem:[#allocation6 + $0x618] sm:$0xff] }
 0x23e   : > { %5629 = vmatprep.subr.bf16.mxu1 %v5628_v43  ;;  %v1123_v43 = vld [vmem:[#allocation2] sm:$0xfc] }
 0x23f   : > { %v1197_v51 = vrot.slane %v1123_v43, 2  ;;  %v5684_v43 = vpack.c.bf16 %v1302_v36, %v1300_v35  ;;  %v1655_v35 = vld [vmem:[#allocation6 + $0xb18] sm:$0xff]  ;;  %v1320_v36 = vld [vmem:[#allocation6 + $0x728] sm:$0xff] }
 0x241   : > { %5631 = vmatpush1.bf16.msra.mxu1 %v5630_v48  ;;  %v5668_v48 = vpack.c.bf16 %v1286_v42, %v1284_v41  ;;  %v1632_v41 = vld [vmem:[#allocation6 + $0xa60] sm:$0xff]  ;;  %v1634_v42 = vld [vmem:[#allocation6 + $0xa70] sm:$0xff] }
 0x242   : > { %5633 = vmatprep.subr.bf16.mxu1 %v5632_v49  ;;  %v1283_v49 = vld [vmem:[#allocation6 + $0x600] sm:$0xff] }
 0x243   : > { %v5670_v57 = vpack.c.bf16 %v1285_v50, %v1283_v49  ;;  %v5810_v49 = vpack.c.bf16 %v1634_v42, %v1632_v41  ;;  %v5686_v50 = vpack.c.bf16 %v1301_v44, %v1299_v39  ;;  %v5828_v41 = vpack.c.bf16 %v1655_v35, %v1653_v34  ;;  %v1652_v42 = vld [vmem:[#allocation6 + $0xb00] sm:$0xff]  ;;  %v1341_v35 = vld [vmem:[#allocation6 + $0x7d0] sm:$0xff] }
 0x244   : > { %v1339_v34 = vld [vmem:[#allocation6 + $0x7c0] sm:$0xff] }
 0x245   : > { %5635 = vmatpush1.bf16.msra.mxu1 %v5634_v54  ;;  %v1290_v54 = vld [vmem:[#allocation6 + $0x638] sm:$0xff] }
 0x246   : > { %5637 = vmatprep.subr.bf16.mxu1 %v5636_v55  ;;  %v1355_v55 = vrot.slane %v1279_v46, 3  ;;  %v5672_v58 = vpack.c.bf16 %v1290_v54, %v1288_v53  ;;  %v1639_v46 = vld [vmem:[#allocation6 + $0xa98] sm:$0xff]  ;;  %v1636_v53 = vld [vmem:[#allocation6 + $0xa80] sm:$0xff]  ;;  %v1638_v54 = vld [vmem:[#allocation6 + $0xa90] sm:$0xff] }
 0x248   : > { %v1357_v0 = vsel %vm1351_vm3, %v1355_v55, %v1356_v56  ;;  %v1305_v56 = vld [vmem:[#allocation6 + $0x6b0] sm:$0xff] }
 0x249   : > { %5639 = vmatpush1.bf16.msra.mxu1 %v5638_v60  ;;  %v1289_v60 = vld [vmem:[#allocation6 + $0x630] sm:$0xff] }
 0x24a   : > { %5641 = vmatprep.subr.bf16.mxu1 %v5640_v61  ;;  %v1199_v61 = vsel %vm1196_vm2, %v1197_v51, %v1198_v52  ;;  %v5674_v11 = vpack.c.bf16 %v1289_v60, %v1287_v59  ;;  %v1303_v51 = vld [vmem:[#allocation6 + $0x6a0] sm:$0xff]  ;;  %v1308_v59 = vld [vmem:[#allocation6 + $0x6c8] sm:$0xff]  ;;  %v1310_v60 = vld [vmem:[#allocation6 + $0x6d8] sm:$0xff] }
 0x24b   : > { %v5690_v62 = vpack.c.bf16 %v1305_v56, %v1303_v51 }
 0x24d   : > { %5643 = vmatpush1.bf16.msra.mxu1 %v5642_v5  ;;  %v1293_v5 = vld [vmem:[#allocation6 + $0x650] sm:$0xff] }
 0x24e   : > { %5645 = vmatprep.subr.bf16.mxu1 %v5644_v6  ;;  %v1621_v6 = vld [vmem:[#allocation6 + $0xa08] sm:$0xff] }
 0x24f   : > { %v5796_v12 = vpack.c.bf16 %v1623_v7, %v1621_v6  ;;  %v5692_v6 = vpack.c.bf16 %v1310_v60, %v1308_v59  ;;  %v1309_v7 = vld [vmem:[#allocation6 + $0x6d0] sm:$0xff]  ;;  %v1663_v59 = vld [vmem:[#allocation6 + $0xb58] sm:$0xff]  ;;  %v1328_v60 = vld [vmem:[#allocation6 + $0x768] sm:$0xff] }
 0x251   : > { %5647 = vmatpush1.bf16.msra.mxu1 %v5646_v13  ;;  %v1622_v13 = vld [vmem:[#allocation6 + $0xa10] sm:$0xff]  ;;  %5797 = vmatprep.subr.bf16.mxu0 %v5796_v12  ;;  %v1312_v12 = vld [vmem:[#allocation6 + $0x6e8] sm:$0xff] }
 0x252   : > { %5649 = vmatprep.subr.bf16.mxu1 %v5648_v14  ;;  %v1625_v14 = vld [vmem:[#allocation6 + $0xa28] sm:$0xff]  ;;  %v5798_v17 = vpack.c.bf16 %v1622_v13, %v1620_v9  ;;  %v1314_v13 = vld [vmem:[#allocation6 + $0x6f8] sm:$0xff] }
 0x253   : > { %v5800_v18 = vpack.c.bf16 %v1627_v15, %v1625_v14  ;;  %v1645_v9 = vld [vmem:[#allocation6 + $0xac8] sm:$0xff]  ;;  %v5694_v15 = vpack.c.bf16 %v1309_v7, %v1307_v63 }
 0x254   : > { %5799 = vmatpush1.bf16.msra.mxu0 %v5798_v17 }
 0x255   : > { %5651 = vmatpush1.bf16.msra.mxu1 %v5650_v19  ;;  %v1624_v19 = vld [vmem:[#allocation6 + $0xa20] sm:$0xff]  ;;  %5801 = vmatprep.subr.bf16.mxu0 %v5800_v18 }
 0x256   : > { %5653 = vmatprep.subr.bf16.mxu1 %v5652_v20  ;;  %v1626_v20 = vld [vmem:[#allocation6 + $0xa30] sm:$0xff]  ;;  %v1644_v18 = vld [vmem:[#allocation6 + $0xac0] sm:$0xff] }
 0x259   : > { %5655 = vmatpush1.bf16.msra.mxu1 %v5654_v25  ;;  %v5802_v25 = vpack.c.bf16 %v1626_v20, %v1624_v19  ;;  %v1646_v19 = vld [vmem:[#allocation6 + $0xad0] sm:$0xff]  ;;  %v5696_v20 = vpack.c.bf16 %v1314_v13, %v1312_v12  ;;  %v1667_v12 = vld [vmem:[#allocation6 + $0xb78] sm:$0xff]  ;;  %v1332_v13 = vld [vmem:[#allocation6 + $0x788] sm:$0xff] }
 0x25a   : > { %5657 = vmatprep.subr.bf16.mxu1 %v5656_v26  ;;  %v5678_v26 = vpack.c.bf16 %v1293_v5, %v1291_v3  ;;  %v1640_v3 = vld [vmem:[#allocation6 + $0xaa0] sm:$0xff]  ;;  %v1642_v5 = vld [vmem:[#allocation6 + $0xab0] sm:$0xff] }
 0x25b   : > { %5803 = vmatpush1.bf16.msra.mxu0 %v5802_v25  ;;  %v5818_v14 = vpack.c.bf16 %v1642_v5, %v1640_v3  ;;  %v1318_v25 = vld [vmem:[#allocation6 + $0x718] sm:$0xff]  ;;  %v1660_v5 = vld [vmem:[#allocation6 + $0xb40] sm:$0xff] }
 0x25c   : > { %5805 = vmatprep.subr.bf16.mxu0 %v5804_v28  ;;  %v1315_v28 = vld [vmem:[#allocation6 + $0x700] sm:$0xff] }
 0x25d   : > { %5659 = vmatpush1.bf16.msra.mxu1 %v5658_v31  ;;  %v5680_v31 = vpack.c.bf16 %v1298_v23, %v1296_v22  ;;  %v1649_v22 = vld [vmem:[#allocation6 + $0xae8] sm:$0xff]  ;;  %v1651_v23 = vld [vmem:[#allocation6 + $0xaf8] sm:$0xff]  ;;  %v5702_v39 = vpack.c.bf16 %v1317_v33, %v1315_v28  ;;  %v1335_v28 = vld [vmem:[#allocation6 + $0x7a0] sm:$0xff] }
 0x25e   : > { %5661 = vmatprep.subr.bf16.mxu1 %v5660_v32  ;;  %v1297_v32 = vld [vmem:[#allocation6 + $0x670] sm:$0xff] }
 0x261   : > { %5663 = vmatpush1.bf16.msra.mxu1 %v5662_v37  ;;  %v5806_v37 = vpack.c.bf16 %v1630_v30, %v1628_v29  ;;  %v5824_v29 = vpack.c.bf16 %v1651_v23, %v1649_v22  ;;  %v1648_v30 = vld [vmem:[#allocation6 + $0xae0] sm:$0xff]  ;;  %v1333_v22 = vld [vmem:[#allocation6 + $0x790] sm:$0xff]  ;;  %v1336_v23 = vld [vmem:[#allocation6 + $0x7a8] sm:$0xff] }
 0x262   : > { %5665 = vmatprep.subr.bf16.mxu1 %v5664_v38  ;;  %v5682_v38 = vpack.c.bf16 %v1297_v32, %v1295_v27  ;;  %v5700_v32 = vpack.c.bf16 %v1318_v25, %v1316_v24  ;;  %v1338_v24 = vld [vmem:[#allocation6 + $0x7b8] sm:$0xff] }
 0x263   : > { %5807 = vmatpush1.bf16.msra.mxu0 %v5806_v37  ;;  %v1322_v37 = vld [vmem:[#allocation6 + $0x738] sm:$0xff] }
 0x264   : > { %5809 = vmatprep.subr.bf16.mxu0 %v5808_v40  ;;  %v1319_v40 = vld [vmem:[#allocation6 + $0x720] sm:$0xff]  ;;  %v5704_v44 = vpack.c.bf16 %v1322_v37, %v1320_v36  ;;  %v1344_v36 = vld [vmem:[#allocation6 + $0x7e8] sm:$0xff]  ;;  %v1346_v37 = vld [vmem:[#allocation6 + $0x7f8] sm:$0xff] }
 0x265   : > { %5667 = vmatpush1.bf16.msra.mxu1 %v5666_v45  ;;  %v1637_v45 = vld [vmem:[#allocation6 + $0xa88] sm:$0xff] }
 0x266   : > { %5669 = vmatprep.subr.bf16.mxu1 %v5668_v48  ;;  %v1306_v48 = vld [vmem:[#allocation6 + $0x6b8] sm:$0xff]  ;;  %v5812_v52 = vpack.c.bf16 %v1639_v46, %v1637_v45  ;;  %v1321_v45 = vld [vmem:[#allocation6 + $0x730] sm:$0xff]  ;;  %v1657_v46 = vld [vmem:[#allocation6 + $0xb28] sm:$0xff] }
 0x267   : > { %v5688_v55 = vpack.c.bf16 %v1306_v48, %v1304_v47  ;;  %5811 = vmatpush1.bf16.msra.mxu0 %v5810_v49  ;;  %v1659_v47 = vld [vmem:[#allocation6 + $0xb38] sm:$0xff]  ;;  %v1324_v48 = vld [vmem:[#allocation6 + $0x748] sm:$0xff]  ;;  %v5706_v51 = vpack.c.bf16 %v1321_v45, %v1319_v40  ;;  %v1343_v40 = vld [vmem:[#allocation6 + $0x7e0] sm:$0xff] }
 0x268   : > { %1270 = vmatmul.mubr.f32.vlgmr.msra.gmra.mrb[0].mxu1 %v1199_v61  ;;  %v5814_v61 = vpack.c.bf16 %v1638_v54, %v1636_v53  ;;  %5813 = vmatprep.subr.bf16.mxu0 %v5812_v52  ;;  %v1326_v49 = vld [vmem:[#allocation6 + $0x758] sm:$0xff]  ;;  %v1323_v52 = vld [vmem:[#allocation6 + $0x740] sm:$0xff]  ;;  %v5832_v53 = vpack.c.bf16 %v1659_v47, %v1657_v46  ;;  %v1280_v45 = vld [vmem:[#allocation2 + $0x10] sm:$0x7] }
 0x269   : > { %5671 = vmatpush1.bf16.msra.mxu1 %v5670_v57  ;;  %1424 = vmatprep.mubr.f32.mxu1 %v1357_v0  ;;  %v1641_v57 = vld [vmem:[#allocation6 + $0xaa8] sm:$0xff]  ;;  %v1656_v54 = vld [vmem:[#allocation6 + $0xb20] sm:$0xff]  ;;  %v5708_v56 = vpack.c.bf16 %v1326_v49, %v1324_v48  ;;  %v1436_v48 = vld [vmem:[#allocation2 + $0x18] sm:$0xf] }
 0x26a   : > { %5673 = vmatprep.subr.bf16.mxu1 %v5672_v58  ;;  %v1643_v58 = vld [vmem:[#allocation6 + $0xab8] sm:$0xff]  ;;  %v1434_v47 = vld [vmem:[#allocation2 + $0x8] sm:$0xf0] }
 0x26b   : > { %v5816_v0 = vpack.c.bf16 %v1643_v58, %v1641_v57  ;;  %5815 = vmatpush1.bf16.msra.mxu0 %v5814_v61  ;;  %v1325_v57 = vld [vmem:[#allocation6 + $0x750] sm:$0xff]  ;;  %v1661_v58 = vld [vmem:[#allocation6 + $0xb48] sm:$0xff]  ;;  %v1330_v61 = vld [vmem:[#allocation6 + $0x778] sm:$0xff] }
 0x26c   : > { %v5710_v63 = vpack.c.bf16 %v1325_v57, %v1323_v52  ;;  %v5836_v3 = vpack.c.bf16 %v1663_v59, %v1661_v58  ;;  %v5712_v7 = vpack.c.bf16 %v1330_v61, %v1328_v60  ;;  %v1511_v57 = vrot.slane %v1436_v48, 4  ;;  %v1442_v60 = vld [vmem:[#allocation6 + $0x820] sm:$0xff]  ;;  %v1444_v61 = vld [vmem:[#allocation6 + $0x830] sm:$0xff]  ;;  %v1477_v48 = vld [vmem:[#allocation6 + $0x938] sm:$0xff] }
 0x26d   : > { %5675 = vmatpush1.bf16.msra.mxu1 %v5674_v11  ;;  %v1647_v11 = vld [vmem:[#allocation6 + $0xad8] sm:$0xff]  ;;  %5817 = vmatprep.subr.bf16.mxu0 %v5816_v0  ;;  %v1327_v0 = vld [vmem:[#allocation6 + $0x760] sm:$0xff] }
 0x26e   : > { %5677 = vmatprep.subr.bf16.mxu1 %v5676_v16  ;;  %v1311_v16 = vld [vmem:[#allocation6 + $0x6e0] sm:$0xff]  ;;  %v5820_v17 = vpack.c.bf16 %v1647_v11, %v1645_v9  ;;  %v1329_v9 = vld [vmem:[#allocation6 + $0x770] sm:$0xff]  ;;  %v1665_v11 = vld [vmem:[#allocation6 + $0xb68] sm:$0xff] }
 0x26f   : > { %5819 = vmatpush1.bf16.msra.mxu0 %v5818_v14  ;;  %v5698_v27 = vpack.c.bf16 %v1313_v21, %v1311_v16  ;;  %v1334_v14 = vld [vmem:[#allocation6 + $0x798] sm:$0xff]  ;;  %v5714_v16 = vpack.c.bf16 %v1329_v9, %v1327_v0  ;;  %v1331_v21 = vld [vmem:[#allocation6 + $0x780] sm:$0xff]  ;;  %v1448_v9 = vld [vmem:[#allocation6 + $0x850] sm:$0xff] }
 0x270   : > { %5821 = vmatprep.subr.bf16.mxu0 %v5820_v17  ;;  %v5840_v17 = vpack.c.bf16 %v1667_v12, %v1665_v11  ;;  %v1449_v0 = vld [vmem:[#allocation6 + $0x858] sm:$0xff]  ;;  %v1451_v11 = vld [vmem:[#allocation6 + $0x868] sm:$0xff] }
 0x271   : > { %5679 = vmatpush1.bf16.msra.mxu1 %v5678_v26  ;;  %v5822_v26 = vpack.c.bf16 %v1646_v19, %v1644_v18  ;;  %v1664_v18 = vld [vmem:[#allocation6 + $0xb60] sm:$0xff]  ;;  %v1666_v19 = vld [vmem:[#allocation6 + $0xb70] sm:$0xff]  ;;  %v1453_v12 = vld [vmem:[#allocation6 + $0x878] sm:$0xff] }
 0x272   : > { %5681 = vmatprep.subr.bf16.mxu1 %v5680_v31  ;;  %v1650_v31 = vld [vmem:[#allocation6 + $0xaf0] sm:$0xff]  ;;  %v5842_v25 = vpack.c.bf16 %v1666_v19, %v1664_v18  ;;  %v1457_v18 = vld [vmem:[#allocation6 + $0x898] sm:$0xff] }
 0x273   : > { %5823 = vmatpush1.bf16.msra.mxu0 %v5822_v26  ;;  %v5718_v26 = vpack.c.bf16 %v1333_v22, %v1331_v21  ;;  %v1454_v21 = vld [vmem:[#allocation6 + $0x880] sm:$0xff]  ;;  %v1456_v22 = vld [vmem:[#allocation6 + $0x890] sm:$0xff] }
 0x274   : > { %5825 = vmatprep.subr.bf16.mxu0 %v5824_v29  ;;  %v1337_v29 = vld [vmem:[#allocation6 + $0x7b0] sm:$0xff] }
 0x275   : > { %5683 = vmatpush1.bf16.msra.mxu1 %v5682_v38  ;;  %v5826_v38 = vpack.c.bf16 %v1650_v31, %v1648_v30  ;;  %v1340_v30 = vld [vmem:[#allocation6 + $0x7c8] sm:$0xff]  ;;  %v1342_v31 = vld [vmem:[#allocation6 + $0x7d8] sm:$0xff] }
 0x276   : > { %5685 = vmatprep.subr.bf16.mxu1 %v5684_v43  ;;  %v1654_v43 = vld [vmem:[#allocation6 + $0xb10] sm:$0xff]  ;;  %v5724_v33 = vpack.c.bf16 %v1342_v31, %v1340_v30  ;;  %v1465_v30 = vld [vmem:[#allocation6 + $0x8d8] sm:$0xff] }
 0x277   : > { %5827 = vmatpush1.bf16.msra.mxu0 %v5826_v38  ;;  %v5726_v38 = vpack.c.bf16 %v1341_v35, %v1339_v34  ;;  %v1464_v34 = vld [vmem:[#allocation6 + $0x8d0] sm:$0xff]  ;;  %v1467_v35 = vld [vmem:[#allocation6 + $0x8e8] sm:$0xff] }
 0x278   : > { %5829 = vmatprep.subr.bf16.mxu0 %v5828_v41  ;;  %v1345_v41 = vld [vmem:[#allocation6 + $0x7f0] sm:$0xff] }
 0x279   : > { %5687 = vmatpush1.bf16.msra.mxu1 %v5686_v50  ;;  %v5830_v50 = vpack.c.bf16 %v1654_v43, %v1652_v42  ;;  %v1439_v42 = vld [vmem:[#allocation6 + $0x808] sm:$0xff]  ;;  %v1441_v43 = vld [vmem:[#allocation6 + $0x818] sm:$0xff]  ;;  %v5730_v46 = vpack.c.bf16 %v1345_v41, %v1343_v40  ;;  %v1468_v40 = vld [vmem:[#allocation6 + $0x8f0] sm:$0xff] }
 0x27a   : > { %5689 = vmatprep.subr.bf16.mxu1 %v5688_v55  ;;  %v1658_v55 = vld [vmem:[#allocation6 + $0xb30] sm:$0xff]  ;;  %v5732_v49 = vpack.c.bf16 %v1441_v43, %v1439_v42  ;;  %v1471_v41 = vld [vmem:[#allocation6 + $0x908] sm:$0xff]  ;;  %v1473_v42 = vld [vmem:[#allocation6 + $0x918] sm:$0xff] }
 0x27b   : > { %5831 = vmatpush1.bf16.msra.mxu0 %v5830_v50  ;;  %v1438_v50 = vld [vmem:[#allocation6 + $0x800] sm:$0xff] }
 0x27c   : > { %5833 = vmatprep.subr.bf16.mxu0 %v5832_v53  ;;  %v1353_v53 = vrot.slane %v1280_v45, 3  ;;  %v1470_v45 = vld [vmem:[#allocation6 + $0x900] sm:$0xff] }
 0x27d   : > { %5691 = vmatpush1.bf16.msra.mxu1 %v5690_v62  ;;  %v5834_v62 = vpack.c.bf16 %v1658_v55, %v1656_v54  ;;  %v1443_v54 = vld [vmem:[#allocation6 + $0x828] sm:$0xff]  ;;  %v1445_v55 = vld [vmem:[#allocation6 + $0x838] sm:$0xff] }
 0x27e   : > { %5693 = vmatprep.subr.bf16.mxu1 %v5692_v6  ;;  %v1662_v6 = vld [vmem:[#allocation6 + $0xb50] sm:$0xff]  ;;  %v5736_v59 = vpack.c.bf16 %v1445_v55, %v1443_v54  ;;  %v1481_v54 = vld [vmem:[#allocation6 + $0x958] sm:$0xff] }
 0x27f   : > { %5835 = vmatpush1.bf16.msra.mxu0 %v5834_v62 }
 0x280   : > { %5837 = vmatprep.subr.bf16.mxu0 %v5836_v3 }
 0x281   : > { %5695 = vmatpush1.bf16.msra.mxu1 %v5694_v15  ;;  %v5838_v15 = vpack.c.bf16 %v1662_v6, %v1660_v5  ;;  %v5738_v5 = vpack.c.bf16 %v1444_v61, %v1442_v60  ;;  %v1485_v60 = vld [vmem:[#allocation6 + $0x978] sm:$0xff] }
 0x282   : > { %5697 = vmatprep.subr.bf16.mxu1 %v5696_v20  ;;  %v5716_v20 = vpack.c.bf16 %v1334_v14, %v1332_v13  ;;  %v5744_v14 = vpack.c.bf16 %v1453_v12, %v1451_v11  ;;  %v1488_v11 = vld [vmem:[#allocation6 + $0x990] sm:$0xff]  ;;  %v1491_v12 = vld [vmem:[#allocation6 + $0x9a8] sm:$0xff] }
 0x283   : > { %5839 = vmatpush1.bf16.msra.mxu0 %v5838_v15  ;;  %v1450_v15 = vld [vmem:[#allocation6 + $0x860] sm:$0xff] }
 0x284   : > { %5841 = vmatprep.subr.bf16.mxu0 %v5840_v17  ;;  %v1455_v17 = vld [vmem:[#allocation6 + $0x888] sm:$0xff] }
 0x285   : > { %5699 = vmatpush1.bf16.msra.mxu1 %v5698_v27  ;;  %v5720_v27 = vpack.c.bf16 %v1338_v24, %v1336_v23  ;;  %v1459_v23 = vld [vmem:[#allocation6 + $0x8a8] sm:$0xff]  ;;  %v1461_v24 = vld [vmem:[#allocation6 + $0x8b8] sm:$0xff] }
 0x286   : > { %5701 = vmatprep.subr.bf16.mxu1 %v5700_v32  ;;  %v5722_v32 = vpack.c.bf16 %v1337_v29, %v1335_v28  ;;  %v1460_v28 = vld [vmem:[#allocation6 + $0x8b0] sm:$0xff]  ;;  %v1463_v29 = vld [vmem:[#allocation6 + $0x8c8] sm:$0xff] }
 0x287   : > { %5843 = vmatpush1.bf16.msra.mxu0 %v5842_v25  ;;  %v5750_v25 = vpack.c.bf16 %v1456_v22, %v1454_v21  ;;  %v1494_v22 = vld [vmem:[#allocation6 + $0x9c0] sm:$0xff] }
 0x289   : > { %5703 = vmatpush1.bf16.msra.mxu1 %v5702_v39  ;;  %v5728_v39 = vpack.c.bf16 %v1346_v37, %v1344_v36  ;;  %v1469_v36 = vld [vmem:[#allocation6 + $0x8f8] sm:$0xff] }
 0x28a   : > { %5705 = vmatprep.subr.bf16.mxu1 %v5704_v44  ;;  %v1278_v44 = vld [vmem:[#allocation2] sm:$0xf8] }
 0x28b   : > { %v1352_v52 = vrot.slane %v1278_v44, 3  ;;  %v5764_v44 = vpack.c.bf16 %v1473_v42, %v1471_v41  ;;  %v1673_v42 = vld [vmem:[#allocation6 + $0xba8] sm:$0xff] }
 0x28d   : > { %5707 = vmatpush1.bf16.msra.mxu1 %v5706_v51  ;;  %v1440_v51 = vld [vmem:[#allocation6 + $0x810] sm:$0xff]  ;;  %v1354_v62 = vsel %vm1351_vm3, %v1352_v52, %v1353_v53  ;;  %v1479_v53 = vld [vmem:[#allocation6 + $0x948] sm:$0xff] }
 0x28e   : > { %5709 = vmatprep.subr.bf16.mxu1 %v5708_v56  ;;  %v1510_v56 = vrot.slane %v1434_v47, 4  ;;  %v5734_v58 = vpack.c.bf16 %v1440_v51, %v1438_v50  ;;  %v1475_v47 = vld [vmem:[#allocation6 + $0x928] sm:$0xff]  ;;  %v1474_v51 = vld [vmem:[#allocation6 + $0x920] sm:$0xff]  ;;  %v1476_v52 = vld [vmem:[#allocation6 + $0x930] sm:$0xff] }
 0x28f   : > { %v5768_v50 = vpack.c.bf16 %v1477_v48, %v1475_v47  ;;  %v5770_v55 = vpack.c.bf16 %v1476_v52, %v1474_v51  ;;  %v1677_v47 = vld [vmem:[#allocation6 + $0xbc8] sm:$0xff]  ;;  %v1679_v48 = vld [vmem:[#allocation6 + $0xbd8] sm:$0xff]  ;;  %v1676_v51 = vld [vmem:[#allocation6 + $0xbc0] sm:$0xff] }
 0x290   : > { %v1512_v3 = vsel %vm1506_vm4, %v1510_v56, %v1511_v57  ;;  %v5772_v56 = vpack.c.bf16 %v1481_v54, %v1479_v53  ;;  %v1478_v57 = vld [vmem:[#allocation6 + $0x940] sm:$0xff]  ;;  %v1678_v52 = vld [vmem:[#allocation6 + $0xbd0] sm:$0xff]  ;;  %v1681_v53 = vld [vmem:[#allocation6 + $0xbe8] sm:$0xff] }
 0x291   : > { %5711 = vmatpush1.bf16.msra.mxu1 %v5710_v63  ;;  %v1447_v63 = vld [vmem:[#allocation6 + $0x848] sm:$0xff]  ;;  %v1683_v54 = vld [vmem:[#allocation6 + $0xbf8] sm:$0xff] }
 0x292   : > { %5713 = vmatprep.subr.bf16.mxu1 %v5712_v7  ;;  %v5740_v6 = vpack.c.bf16 %v1449_v0, %v1447_v63  ;;  %v1446_v7 = vld [vmem:[#allocation6 + $0x840] sm:$0xff]  ;;  %v1484_v0 = vld [vmem:[#allocation6 + $0x970] sm:$0xff] }
 0x293   : > { %v5742_v13 = vpack.c.bf16 %v1448_v9, %v1446_v7  ;;  %v1482_v63 = vld [vmem:[#allocation6 + $0x960] sm:$0xff] }
 0x294   : > { %v1486_v9 = vld [vmem:[#allocation6 + $0x980] sm:$0xff] }
 0x295   : > { %5715 = vmatpush1.bf16.msra.mxu1 %v5714_v16  ;;  %v1452_v16 = vld [vmem:[#allocation6 + $0x870] sm:$0xff] }
 0x296   : > { %5717 = vmatprep.subr.bf16.mxu1 %v5716_v20  ;;  %v5746_v19 = vpack.c.bf16 %v1452_v16, %v1450_v15  ;;  %v5748_v20 = vpack.c.bf16 %v1457_v18, %v1455_v17  ;;  %v1490_v16 = vld [vmem:[#allocation6 + $0x9a0] sm:$0xff]  ;;  %v1492_v17 = vld [vmem:[#allocation6 + $0x9b0] sm:$0xff]  ;;  %v1495_v18 = vld [vmem:[#allocation6 + $0x9c8] sm:$0xff] }
 0x299   : > { %5719 = vmatpush1.bf16.msra.mxu1 %v5718_v26  ;;  %v5752_v26 = vpack.c.bf16 %v1461_v24, %v1459_v23  ;;  %v1496_v23 = vld [vmem:[#allocation6 + $0x9d0] sm:$0xff]  ;;  %v1499_v24 = vld [vmem:[#allocation6 + $0x9e8] sm:$0xff] }
 0x29a   : > { %5721 = vmatprep.subr.bf16.mxu1 %v5720_v27  ;;  %v1458_v27 = vld [vmem:[#allocation6 + $0x8a0] sm:$0xff] }
 0x29b   : > { %v5754_v31 = vpack.c.bf16 %v1460_v28, %v1458_v27  ;;  %v1498_v28 = vld [vmem:[#allocation6 + $0x9e0] sm:$0xff] }
 0x29d   : > { %5723 = vmatpush1.bf16.msra.mxu1 %v5722_v32  ;;  %v5756_v32 = vpack.c.bf16 %v1465_v30, %v1463_v29  ;;  %v1500_v29 = vld [vmem:[#allocation6 + $0x9f0] sm:$0xff]  ;;  %v1433_v30 = vld [vmem:[#allocation2] sm:$0xf0] }
 0x29e   : > { %5725 = vmatprep.subr.bf16.mxu1 %v5724_v33  ;;  %v1462_v33 = vld [vmem:[#allocation6 + $0x8c0] sm:$0xff] }
 0x29f   : > { %v5758_v37 = vpack.c.bf16 %v1464_v34, %v1462_v33  ;;  %v1507_v33 = vrot.slane %v1433_v30, 4 }
 0x2a1   : > { %5727 = vmatpush1.bf16.msra.mxu1 %v5726_v38  ;;  %v5760_v38 = vpack.c.bf16 %v1469_v36, %v1467_v35  ;;  %v1669_v36 = vld [vmem:[#allocation6 + $0xb88] sm:$0xff] }
 0x2a2   : > { %5729 = vmatprep.subr.bf16.mxu1 %v5728_v39  ;;  %v1466_v39 = vld [vmem:[#allocation6 + $0x8e0] sm:$0xff] }
 0x2a3   : > { %v5762_v43 = vpack.c.bf16 %v1468_v40, %v1466_v39  ;;  %v1668_v39 = vld [vmem:[#allocation6 + $0xb80] sm:$0xff]  ;;  %v1670_v40 = vld [vmem:[#allocation6 + $0xb90] sm:$0xff] }
 0x2a4   : > { %v5846_v41 = vpack.c.bf16 %v1670_v40, %v1668_v39  ;;  %v1777_v39 = vld [vmem:[#allocation6 + $0xc78] sm:$0xff] }
 0x2a5   : > { %5731 = vmatpush1.bf16.msra.mxu1 %v5730_v46  ;;  %v1472_v46 = vld [vmem:[#allocation6 + $0x910] sm:$0xff] }
 0x2a6   : > { %5733 = vmatprep.subr.bf16.mxu1 %v5732_v49  ;;  %v5766_v49 = vpack.c.bf16 %v1472_v46, %v1470_v45  ;;  %v1674_v46 = vld [vmem:[#allocation6 + $0xbb0] sm:$0xff] }
 0x2a8   : > { %1425 = vmatmul.mubr.f32.vlgmr.msra.gmra.mrb[0].mxu1 %v1354_v62 }
 0x2a9   : > { %5735 = vmatpush1.bf16.msra.mxu1 %v5734_v58  ;;  %1579 = vmatprep.mubr.f32.mxu1 %v1512_v3  ;;  %v1480_v58 = vld [vmem:[#allocation6 + $0x950] sm:$0xff]  ;;  %v1487_v3 = vld [vmem:[#allocation6 + $0x988] sm:$0xff] }
 0x2aa   : > { %5737 = vmatprep.subr.bf16.mxu1 %v5736_v59  ;;  %v1483_v59 = vld [vmem:[#allocation6 + $0x968] sm:$0xff]  ;;  %v5774_v61 = vpack.c.bf16 %v1480_v58, %v1478_v57  ;;  %v1680_v57 = vld [vmem:[#allocation6 + $0xbe0] sm:$0xff]  ;;  %v1682_v58 = vld [vmem:[#allocation6 + $0xbf0] sm:$0xff] }
 0x2ab   : > { %v5776_v62 = vpack.c.bf16 %v1485_v60, %v1483_v59  ;;  %v1763_v59 = vld [vmem:[#allocation6 + $0xc08] sm:$0xff]  ;;  %v1765_v60 = vld [vmem:[#allocation6 + $0xc18] sm:$0xff] }
 0x2ad   : > { %5739 = vmatpush1.bf16.msra.mxu1 %v5738_v5  ;;  %v1489_v5 = vld [vmem:[#allocation6 + $0x998] sm:$0xff] }
 0x2ae   : > { %5741 = vmatprep.subr.bf16.mxu1 %v5740_v6  ;;  %v5778_v6 = vpack.c.bf16 %v1484_v0, %v1482_v63  ;;  %v5780_v7 = vpack.c.bf16 %v1489_v5, %v1487_v3  ;;  %v817_v63 = vld [vmem:[#allocation8] sm:$0x3] }
 0x2af   : > { %v822_v0 = vrot.slane %v817_v63, %v7743_v2  ;;  %v826_v3 = vrot.slane %v817_v63, %v7745_v4  ;;  %v1793_v63 = vld [vmem:[#allocation6 + $0xcf8] sm:$0xff] }
 0x2b1   : > { %5743 = vmatpush1.bf16.msra.mxu1 %v5742_v13  ;;  %v1493_v13 = vld [vmem:[#allocation6 + $0x9b8] sm:$0xff] }
 0x2b2   : > { %5745 = vmatprep.subr.bf16.mxu1 %v5744_v14  ;;  %v5782_v14 = vpack.c.bf16 %v1488_v11, %v1486_v9  ;;  %v5784_v15 = vpack.c.bf16 %v1493_v13, %v1491_v12 }
 0x2b5   : > { %5747 = vmatpush1.bf16.msra.mxu1 %v5746_v19  ;;  %v1497_v19 = vld [vmem:[#allocation6 + $0x9d8] sm:$0xff] }
 0x2b6   : > { %5749 = vmatprep.subr.bf16.mxu1 %v5748_v20  ;;  %v5786_v20 = vpack.c.bf16 %v1492_v17, %v1490_v16  ;;  %v5788_v21 = vpack.c.bf16 %v1497_v19, %v1495_v18  ;;  %v1762_v17 = vld [vmem:[#allocation6 + $0xc00] sm:$0xff]  ;;  %v1764_v18 = vld [vmem:[#allocation6 + $0xc10] sm:$0xff]  ;;  %v1767_v19 = vld [vmem:[#allocation6 + $0xc28] sm:$0xff] }
 0x2b9   : > { %5751 = vmatpush1.bf16.msra.mxu1 %v5750_v25  ;;  %v1501_v25 = vld [vmem:[#allocation6 + $0x9f8] sm:$0xff] }
 0x2ba   : > { %5753 = vmatprep.subr.bf16.mxu1 %v5752_v26  ;;  %v5790_v26 = vpack.c.bf16 %v1496_v23, %v1494_v22  ;;  %v5792_v27 = vpack.c.bf16 %v1501_v25, %v1499_v24  ;;  %v1766_v22 = vld [vmem:[#allocation6 + $0xc20] sm:$0xff]  ;;  %v1768_v23 = vld [vmem:[#allocation6 + $0xc30] sm:$0xff] }
 0x2bd   : > { %5755 = vmatpush1.bf16.msra.mxu1 %v5754_v31  ;;  %v1435_v31 = vld [vmem:[#allocation2 + $0x10] sm:$0xf] }
 0x2be   : > { %5757 = vmatprep.subr.bf16.mxu1 %v5756_v32  ;;  %v5794_v32 = vpack.c.bf16 %v1500_v29, %v1498_v28  ;;  %v1508_v34 = vrot.slane %v1435_v31, 4  ;;  %v1771_v31 = vld [vmem:[#allocation6 + $0xc48] sm:$0xff] }
 0x2c0   : > { %v1509_v35 = vsel %vm1506_vm4, %v1507_v33, %v1508_v34  ;;  %v5866_v34 = vpack.c.bf16 %v1768_v23, %v1766_v22  ;;  %v1805_v22 = vld [vmem:[#allocation6 + $0xd58] sm:$0xff] }
 0x2c1   : > { %5759 = vmatpush1.bf16.msra.mxu1 %v5758_v37  ;;  %v1671_v37 = vld [vmem:[#allocation6 + $0xb98] sm:$0xff] }
 0x2c2   : > { %5761 = vmatprep.subr.bf16.mxu1 %v5760_v38  ;;  %v5844_v38 = vpack.c.bf16 %v1671_v37, %v1669_v36  ;;  %v1770_v36 = vld [vmem:[#allocation6 + $0xc40] sm:$0xff]  ;;  %v1772_v37 = vld [vmem:[#allocation6 + $0xc50] sm:$0xff] }
 0x2c3   : > { %v5870_v40 = vpack.c.bf16 %v1772_v37, %v1770_v36  ;;  %v1810_v37 = vld [vmem:[#allocation6 + $0xd80] sm:$0xff] }
 0x2c4   : > { %5845 = vmatprep.subr.bf16.mxu0 %v5844_v38  ;;  %v1775_v38 = vld [vmem:[#allocation6 + $0xc68] sm:$0xff] }
 0x2c5   : > { %5763 = vmatpush1.bf16.msra.mxu1 %v5762_v43  ;;  %v1675_v43 = vld [vmem:[#allocation6 + $0xbb8] sm:$0xff]  ;;  %5847 = vmatpush1.bf16.msra.mxu0 %v5846_v41  ;;  %v5872_v41 = vpack.c.bf16 %v1777_v39, %v1775_v38  ;;  %v1812_v38 = vld [vmem:[#allocation6 + $0xd90] sm:$0xff]  ;;  %v1815_v39 = vld [vmem:[#allocation6 + $0xda8] sm:$0xff] }
 0x2c6   : > { %5765 = vmatprep.subr.bf16.mxu1 %v5764_v44  ;;  %v1672_v44 = vld [vmem:[#allocation6 + $0xba0] sm:$0xff]  ;;  %v5848_v45 = vpack.c.bf16 %v1675_v43, %v1673_v42  ;;  %v1776_v43 = vld [vmem:[#allocation6 + $0xc70] sm:$0xff] }
 0x2c7   : > { %v1774_v42 = vld [vmem:[#allocation6 + $0xc60] sm:$0xff] }
 0x2c8   : > { %5849 = vmatprep.subr.bf16.mxu0 %v5848_v45  ;;  %v1781_v45 = vld [vmem:[#allocation6 + $0xc98] sm:$0xff] }
 0x2c9   : > { %5767 = vmatpush1.bf16.msra.mxu1 %v5766_v49  ;;  %v5850_v49 = vpack.c.bf16 %v1674_v46, %v1672_v44  ;;  %v1779_v44 = vld [vmem:[#allocation6 + $0xc88] sm:$0xff]  ;;  %v5874_v46 = vpack.c.bf16 %v1776_v43, %v1774_v42  ;;  %v1814_v43 = vld [vmem:[#allocation6 + $0xda0] sm:$0xff] }
 0x2ca   : > { %5769 = vmatprep.subr.bf16.mxu1 %v5768_v50  ;;  %v5852_v50 = vpack.c.bf16 %v1679_v48, %v1677_v47  ;;  %v5876_v47 = vpack.c.bf16 %v1781_v45, %v1779_v44  ;;  %v1778_v48 = vld [vmem:[#allocation6 + $0xc80] sm:$0xff]  ;;  %v1816_v44 = vld [vmem:[#allocation6 + $0xdb0] sm:$0xff]  ;;  %v1819_v45 = vld [vmem:[#allocation6 + $0xdc8] sm:$0xff] }
 0x2cb   : > { %5851 = vmatpush1.bf16.msra.mxu0 %v5850_v49  ;;  %v1780_v49 = vld [vmem:[#allocation6 + $0xc90] sm:$0xff] }
 0x2cc   : > { %5853 = vmatprep.subr.bf16.mxu0 %v5852_v50  ;;  %v1783_v50 = vld [vmem:[#allocation6 + $0xca8] sm:$0xff] }
 0x2cd   : > { %5771 = vmatpush1.bf16.msra.mxu1 %v5770_v55  ;;  %v5854_v55 = vpack.c.bf16 %v1678_v52, %v1676_v51  ;;  %v1785_v51 = vld [vmem:[#allocation6 + $0xcb8] sm:$0xff]  ;;  %v5878_v52 = vpack.c.bf16 %v1780_v49, %v1778_v48  ;;  %v1818_v49 = vld [vmem:[#allocation6 + $0xdc0] sm:$0xff] }
 0x2ce   : > { %5773 = vmatprep.subr.bf16.mxu1 %v5772_v56  ;;  %v5856_v56 = vpack.c.bf16 %v1683_v54, %v1681_v53  ;;  %v5880_v53 = vpack.c.bf16 %v1785_v51, %v1783_v50  ;;  %v1782_v54 = vld [vmem:[#allocation6 + $0xca0] sm:$0xff]  ;;  %v1820_v50 = vld [vmem:[#allocation6 + $0xdd0] sm:$0xff]  ;;  %v1823_v51 = vld [vmem:[#allocation6 + $0xde8] sm:$0xff] }
 0x2cf   : > { %5855 = vmatpush1.bf16.msra.mxu0 %v5854_v55  ;;  %v1784_v55 = vld [vmem:[#allocation6 + $0xcb0] sm:$0xff] }
 0x2d0   : > { %5857 = vmatprep.subr.bf16.mxu0 %v5856_v56  ;;  %v1787_v56 = vld [vmem:[#allocation6 + $0xcc8] sm:$0xff] }
 0x2d1   : > { %5775 = vmatpush1.bf16.msra.mxu1 %v5774_v61  ;;  %v5858_v61 = vpack.c.bf16 %v1682_v58, %v1680_v57  ;;  %v1789_v57 = vld [vmem:[#allocation6 + $0xcd8] sm:$0xff]  ;;  %v5882_v58 = vpack.c.bf16 %v1784_v55, %v1782_v54  ;;  %v1822_v55 = vld [vmem:[#allocation6 + $0xde0] sm:$0xff] }
 0x2d2   : > { %5777 = vmatprep.subr.bf16.mxu1 %v5776_v62  ;;  %v5860_v62 = vpack.c.bf16 %v1765_v60, %v1763_v59  ;;  %v5884_v59 = vpack.c.bf16 %v1789_v57, %v1787_v56  ;;  %v1786_v60 = vld [vmem:[#allocation6 + $0xcc0] sm:$0xff]  ;;  %v1824_v56 = vld [vmem:[#allocation6 + $0xdf0] sm:$0xff]  ;;  %v1917_v57 = vld [vmem:[#allocation6 + $0xe08] sm:$0xff] }
 0x2d3   : > { %5859 = vmatpush1.bf16.msra.mxu0 %v5858_v61  ;;  %v1788_v61 = vld [vmem:[#allocation6 + $0xcd0] sm:$0xff] }
 0x2d4   : > { %5861 = vmatprep.subr.bf16.mxu0 %v5860_v62  ;;  %v1791_v62 = vld [vmem:[#allocation6 + $0xce8] sm:$0xff] }
 0x2d5   : > { %5779 = vmatpush1.bf16.msra.mxu1 %v5778_v6 }
 0x2d6   : > { %5781 = vmatprep.subr.bf16.mxu1 %v5780_v7 }
 0x2d9   : > { %5783 = vmatpush1.bf16.msra.mxu1 %v5782_v14 }
 0x2da   : > { %5785 = vmatprep.subr.bf16.mxu1 %v5784_v15 }
 0x2dd   : > { %5787 = vmatpush1.bf16.msra.mxu1 %v5786_v20  ;;  %v1769_v20 = vld [vmem:[#allocation6 + $0xc38] sm:$0xff] }
 0x2de   : > { %5789 = vmatprep.subr.bf16.mxu1 %v5788_v21  ;;  %v5862_v21 = vpack.c.bf16 %v1764_v18, %v1762_v17 }
 0x2e1   : > { %5791 = vmatpush1.bf16.msra.mxu1 %v5790_v26 }
 0x2e2   : > { %5793 = vmatprep.subr.bf16.mxu1 %v5792_v27  ;;  %v5864_v27 = vpack.c.bf16 %v1769_v20, %v1767_v19  ;;  %v1798_v19 = vld [vmem:[#allocation6 + $0xd20] sm:$0xff]  ;;  %v1800_v20 = vld [vmem:[#allocation6 + $0xd30] sm:$0xff] }
 0x2e3   : > { %v5898_v23 = vpack.c.bf16 %v1800_v20, %v1798_v19  ;;  %v1925_v19 = vld [vmem:[#allocation6 + $0xe48] sm:$0xff]  ;;  %v1927_v20 = vld [vmem:[#allocation6 + $0xe58] sm:$0xff] }
 0x2e5   : > { %5795 = vmatpush1.bf16.msra.mxu1 %v5794_v32  ;;  %v1773_v32 = vld [vmem:[#allocation6 + $0xc58] sm:$0xff] }
 0x2e8   : > { %1580 = vmatmul.mubr.f32.vlgmr.msra.gmra.mrb[0].mxu1 %v1509_v35  ;;  %v5868_v35 = vpack.c.bf16 %v1773_v32, %v1771_v31  ;;  %v1806_v31 = vld [vmem:[#allocation6 + $0xd60] sm:$0xff]  ;;  %v1808_v32 = vld [vmem:[#allocation6 + $0xd70] sm:$0xff] }
 0x3bb   : > { %v1581_v5 = vpop.f32.mrb[0].mxu1 }
 0x3bc   : > { %v6918_v6 = vadd.f32 %v1581_v5, %v822_v0  ;;  %v1583_v7 = vpop.f32.mrb[1].mxu1  ;;  %v5886_v0 = vpack.c.bf16 %v1788_v61, %v1786_v60  ;;  %v1790_v5 = vld [vmem:[#allocation6 + $0xce0] sm:$0xff]  ;;  %v5922_v61 = vpack.c.bf16 %v1824_v56, %v1822_v55  ;;  %v1946_v55 = vld [vmem:[#allocation6 + $0xef0] sm:$0xff]  ;;  %v1949_v56 = vld [vmem:[#allocation6 + $0xf08] sm:$0xff] }
 0x3bd   : > { %v6919_v9 = vadd.f32 %v1583_v7, %v826_v3  ;;  %v5888_v3 = vpack.c.bf16 %v1793_v63, %v1791_v62  ;;  %v1795_v7 = vld [vmem:[#allocation6 + $0xd08] sm:$0xff] }
 0x3be   : > { %vm1588_vm5 = vcmp.gt.f32.partialorder %v6918_v6, 0.0  ;;  %v1590_v11 = vmul.f32 0.01, %v6918_v6 }
 0x3bf   : > { %vm1589_vm6 = vcmp.gt.f32.partialorder %v6919_v9, 0.0  ;;  %v1591_v12 = vmul.f32 0.01, %v6919_v9 }
 0x3c0   : > { %v1592_v13 = vsel %vm1588_vm5, %v6918_v6, %v1590_v11  ;;  %v1792_v6 = vld [vmem:[#allocation6 + $0xcf0] sm:$0xff] }
 0x3c1   : > { %v1596_v14 = vrot.slane %v1592_v13, 6  ;;  %v1593_v15 = vsel %vm1589_vm6, %v6919_v9, %v1591_v12  ;;  %v1797_v9 = vld [vmem:[#allocation6 + $0xd18] sm:$0xff]  ;;  %v5890_v11 = vpack.c.bf16 %v1792_v6, %v1790_v5  ;;  %v1794_v13 = vld [vmem:[#allocation6 + $0xd00] sm:$0xff]  ;;  %v1918_v5 = vld [vmem:[#allocation6 + $0xe10] sm:$0xff] }
 0x3c2   : > { %v1597_v16 = vrot.slane %v1593_v15, 6  ;;  %v5892_v12 = vpack.c.bf16 %v1797_v9, %v1795_v7  ;;  %v1799_v15 = vld [vmem:[#allocation6 + $0xd28] sm:$0xff] }
 0x3c3   : > { %1602 = vst [vmem:[#allocation2 + $0x10] sm:$0x3] %v1596_v14  ;;  %1600 = vst [vmem:[#allocation2] sm:$0xfc] %v1596_v14  ;;  %v1796_v14 = vld [vmem:[#allocation6 + $0xd10] sm:$0xff]  ;;  %v1921_v9 = vld [vmem:[#allocation6 + $0xe28] sm:$0xff] }
 0x3c4   : > { %1603 = vst [vmem:[#allocation2 + $0x18] sm:$0x3] %v1597_v16  ;;  %1601 = vst [vmem:[#allocation2 + $0x8] sm:$0xfc] %v1597_v16  ;;  %v1801_v16 = vld [vmem:[#allocation6 + $0xd38] sm:$0xff]  ;;  %v5894_v17 = vpack.c.bf16 %v1796_v14, %v1794_v13 }
 0x3c5   : > { %v5896_v18 = vpack.c.bf16 %v1801_v16, %v1799_v15  ;;  %v1920_v16 = vld [vmem:[#allocation6 + $0xe20] sm:$0xff] }
 0x3ca   : > { %v1617_v28 = vld [vmem:[#allocation2] sm:$0xff]  ;;  %v1759_v60 = vld [vmem:[#allocation2 + $0x10] sm:$0x1] }
 0x3cb   : > { %v1618_v24 = vld [vmem:[#allocation2 + $0x8] sm:$0xff]  ;;  %v1760_v26 = vld [vmem:[#allocation2 + $0x18] sm:$0x1]  ;;  %v1831_v7 = vrot.slane %v1759_v60, 1 }
 0x3cc   : > { %v1758_v25 = vld [vmem:[#allocation2 + $0x8] sm:$0xfe]  ;;  %1748 = vmatprep.mubr.f32.mxu0 %v1618_v24  ;;  %v1834_v30 = vrot.slane %v1760_v26, 1  ;;  %v1804_v26 = vld [vmem:[#allocation6 + $0xd50] sm:$0xff]  ;;  %v1948_v60 = vld [vmem:[#allocation6 + $0xf00] sm:$0xff] }
 0x3cd   : > { %v1833_v29 = vrot.slane %v1758_v25, 1  ;;  %1749 = vmatmul.mubr.f32.vlgmr.msra.gmra.mrb[2].mxu0 %v1617_v28  ;;  %v1802_v25 = vld [vmem:[#allocation6 + $0xd40] sm:$0xff]  ;;  %v1809_v28 = vld [vmem:[#allocation6 + $0xd78] sm:$0xff]  ;;  %v1912_v62 = vld [vmem:[#allocation2 + $0x8] sm:$0xfc] }
 0x3ce   : > { %5863 = vmatpush1.bf16.msra.mxu0 %v5862_v21  ;;  %v1803_v21 = vld [vmem:[#allocation6 + $0xd48] sm:$0xff]  ;;  %v1914_v63 = vld [vmem:[#allocation2 + $0x18] sm:$0x3] }
 0x3cf   : > { %v1835_v33 = vsel %vm1041_vm1, %v1833_v29, %v1834_v30  ;;  %5865 = vmatprep.subr.bf16.mxu0 %v5864_v27  ;;  %v5900_v24 = vpack.c.bf16 %v1805_v22, %v1803_v21  ;;  %v1807_v27 = vld [vmem:[#allocation6 + $0xd68] sm:$0xff]  ;;  %v5902_v29 = vpack.c.bf16 %v1804_v26, %v1802_v25  ;;  %v1988_v13 = vrot.slane %v1914_v63, 2  ;;  %v1926_v25 = vld [vmem:[#allocation6 + $0xe50] sm:$0xff]  ;;  %v1955_v63 = vld [vmem:[#allocation6 + $0xf38] sm:$0xff] }
 0x3d0   : > { %1902 = vmatprep.mubr.f32.mxu0 %v1835_v33  ;;  %v5904_v30 = vpack.c.bf16 %v1809_v28, %v1807_v27  ;;  %v1811_v33 = vld [vmem:[#allocation6 + $0xd88] sm:$0xff]  ;;  %v1931_v27 = vld [vmem:[#allocation6 + $0xe78] sm:$0xff] }
 0x3d1   : > { %v1929_v26 = vld [vmem:[#allocation6 + $0xe68] sm:$0xff] }
 0x3d2   : > { %5867 = vmatpush1.bf16.msra.mxu0 %v5866_v34  ;;  %v1813_v34 = vld [vmem:[#allocation6 + $0xd98] sm:$0xff] }
 0x3d3   : > { %5869 = vmatprep.subr.bf16.mxu0 %v5868_v35  ;;  %v5906_v35 = vpack.c.bf16 %v1808_v32, %v1806_v31  ;;  %v5908_v36 = vpack.c.bf16 %v1813_v34, %v1811_v33  ;;  %v1930_v31 = vld [vmem:[#allocation6 + $0xe70] sm:$0xff]  ;;  %v1933_v32 = vld [vmem:[#allocation6 + $0xe88] sm:$0xff]  ;;  %v1935_v33 = vld [vmem:[#allocation6 + $0xe98] sm:$0xff] }
 0x3d6   : > { %5871 = vmatpush1.bf16.msra.mxu0 %v5870_v40  ;;  %v1817_v40 = vld [vmem:[#allocation6 + $0xdb8] sm:$0xff] }
 0x3d7   : > { %5873 = vmatprep.subr.bf16.mxu0 %v5872_v41  ;;  %v5910_v41 = vpack.c.bf16 %v1812_v38, %v1810_v37  ;;  %v5912_v42 = vpack.c.bf16 %v1817_v40, %v1815_v39  ;;  %v1934_v37 = vld [vmem:[#allocation6 + $0xe90] sm:$0xff]  ;;  %v1937_v38 = vld [vmem:[#allocation6 + $0xea8] sm:$0xff]  ;;  %v1939_v39 = vld [vmem:[#allocation6 + $0xeb8] sm:$0xff] }
 0x3da   : > { %5875 = vmatpush1.bf16.msra.mxu0 %v5874_v46  ;;  %v1821_v46 = vld [vmem:[#allocation6 + $0xdd8] sm:$0xff] }
 0x3db   : > { %5877 = vmatprep.subr.bf16.mxu0 %v5876_v47  ;;  %v5914_v47 = vpack.c.bf16 %v1816_v44, %v1814_v43  ;;  %v5916_v48 = vpack.c.bf16 %v1821_v46, %v1819_v45  ;;  %v1938_v43 = vld [vmem:[#allocation6 + $0xeb0] sm:$0xff]  ;;  %v1941_v44 = vld [vmem:[#allocation6 + $0xec8] sm:$0xff]  ;;  %v1943_v45 = vld [vmem:[#allocation6 + $0xed8] sm:$0xff] }
 0x3de   : > { %5879 = vmatpush1.bf16.msra.mxu0 %v5878_v52  ;;  %v1825_v52 = vld [vmem:[#allocation6 + $0xdf8] sm:$0xff] }
 0x3df   : > { %5881 = vmatprep.subr.bf16.mxu0 %v5880_v53  ;;  %v5918_v53 = vpack.c.bf16 %v1820_v50, %v1818_v49  ;;  %v5920_v54 = vpack.c.bf16 %v1825_v52, %v1823_v51  ;;  %v1942_v49 = vld [vmem:[#allocation6 + $0xed0] sm:$0xff]  ;;  %v1945_v50 = vld [vmem:[#allocation6 + $0xee8] sm:$0xff]  ;;  %v1947_v51 = vld [vmem:[#allocation6 + $0xef8] sm:$0xff] }
 0x3e2   : > { %5883 = vmatpush1.bf16.msra.mxu0 %v5882_v58  ;;  %v1919_v58 = vld [vmem:[#allocation6 + $0xe18] sm:$0xff] }
 0x3e3   : > { %5885 = vmatprep.subr.bf16.mxu0 %v5884_v59  ;;  %v1757_v59 = vld [vmem:[#allocation2] sm:$0xfe] }
 0x3e4   : > { %v1830_v6 = vrot.slane %v1757_v59, 1 }
 0x3e6   : > { %5887 = vmatpush1.bf16.msra.mxu0 %v5886_v0  ;;  %v5924_v0 = vpack.c.bf16 %v1919_v58, %v1917_v57  ;;  %v1951_v57 = vld [vmem:[#allocation6 + $0xf18] sm:$0xff] }
 0x3e7   : > { %5889 = vmatprep.subr.bf16.mxu0 %v5888_v3  ;;  %v1916_v3 = vld [vmem:[#allocation6 + $0xe00] sm:$0xff]  ;;  %v5956_v59 = vpack.c.bf16 %v1951_v57, %v1949_v56  ;;  %v2075_v57 = vld [vmem:[#allocation6 + $0x1028] sm:$0xff] }
 0x3e8   : > { %v5926_v14 = vpack.c.bf16 %v1918_v5, %v1916_v3  ;;  %v1952_v5 = vld [vmem:[#allocation6 + $0xf20] sm:$0xff] }
 0x3ea   : > { %5891 = vmatpush1.bf16.msra.mxu0 %v5890_v11  ;;  %v1923_v11 = vld [vmem:[#allocation6 + $0xe38] sm:$0xff] }
 0x3eb   : > { %5893 = vmatprep.subr.bf16.mxu0 %v5892_v12  ;;  %v1987_v12 = vrot.slane %v1912_v62, 2  ;;  %v5928_v15 = vpack.c.bf16 %v1923_v11, %v1921_v9  ;;  %v1953_v62 = vld [vmem:[#allocation6 + $0xf28] sm:$0xff]  ;;  %v1959_v9 = vld [vmem:[#allocation6 + $0xf58] sm:$0xff] }
 0x3ec   : > { %v5960_v3 = vpack.c.bf16 %v1955_v63, %v1953_v62  ;;  %v2074_v63 = vld [vmem:[#allocation6 + $0x1020] sm:$0xff] }
 0x3ed   : > { %v1989_v21 = vsel %vm1196_vm2, %v1987_v12, %v1988_v13  ;;  %v1956_v13 = vld [vmem:[#allocation6 + $0xf40] sm:$0xff] }
 0x3ee   : > { %5895 = vmatpush1.bf16.msra.mxu0 %v5894_v17  ;;  %v1922_v17 = vld [vmem:[#allocation6 + $0xe30] sm:$0xff] }
 0x3ef   : > { %5897 = vmatprep.subr.bf16.mxu0 %v5896_v18  ;;  %v1832_v18 = vsel %vm1041_vm1, %v1830_v6, %v1831_v7  ;;  %v5930_v22 = vpack.c.bf16 %v1922_v17, %v1920_v16  ;;  %v1954_v6 = vld [vmem:[#allocation6 + $0xf30] sm:$0xff]  ;;  %v1957_v7 = vld [vmem:[#allocation6 + $0xf48] sm:$0xff]  ;;  %v1963_v16 = vld [vmem:[#allocation6 + $0xf78] sm:$0xff] }
 0x3f0   : > { %v5962_v11 = vpack.c.bf16 %v1954_v6, %v1952_v5  ;;  %v5964_v12 = vpack.c.bf16 %v1959_v9, %v1957_v7  ;;  %v2079_v5 = vld [vmem:[#allocation6 + $0x1048] sm:$0xff]  ;;  %v2081_v6 = vld [vmem:[#allocation6 + $0x1058] sm:$0xff]  ;;  %v2078_v9 = vld [vmem:[#allocation6 + $0x1040] sm:$0xff] }
 0x3f2   : > { %5899 = vmatpush1.bf16.msra.mxu0 %v5898_v23  ;;  %v5932_v23 = vpack.c.bf16 %v1927_v20, %v1925_v19  ;;  %v1960_v19 = vld [vmem:[#allocation6 + $0xf60] sm:$0xff]  ;;  %v1962_v20 = vld [vmem:[#allocation6 + $0xf70] sm:$0xff] }
 0x3f3   : > { %5901 = vmatprep.subr.bf16.mxu0 %v5900_v24  ;;  %v1924_v24 = vld [vmem:[#allocation6 + $0xe40] sm:$0xff] }
 0x3f4   : > { %v5934_v28 = vpack.c.bf16 %v1926_v25, %v1924_v24  ;;  %v1964_v25 = vld [vmem:[#allocation6 + $0xf80] sm:$0xff] }
 0x3f6   : > { %5903 = vmatpush1.bf16.msra.mxu0 %v5902_v29  ;;  %v5936_v29 = vpack.c.bf16 %v1931_v27, %v1929_v26  ;;  %v1966_v26 = vld [vmem:[#allocation6 + $0xf90] sm:$0xff]  ;;  %v1969_v27 = vld [vmem:[#allocation6 + $0xfa8] sm:$0xff] }
 0x3f7   : > { %5905 = vmatprep.subr.bf16.mxu0 %v5904_v30  ;;  %v1928_v30 = vld [vmem:[#allocation6 + $0xe60] sm:$0xff] }
 0x3f8   : > { %v5938_v34 = vpack.c.bf16 %v1930_v31, %v1928_v30  ;;  %v1968_v31 = vld [vmem:[#allocation6 + $0xfa0] sm:$0xff] }
 0x3fa   : > { %5907 = vmatpush1.bf16.msra.mxu0 %v5906_v35  ;;  %v5940_v35 = vpack.c.bf16 %v1935_v33, %v1933_v32  ;;  %v1970_v32 = vld [vmem:[#allocation6 + $0xfb0] sm:$0xff]  ;;  %v1973_v33 = vld [vmem:[#allocation6 + $0xfc8] sm:$0xff] }
 0x3fb   : > { %5909 = vmatprep.subr.bf16.mxu0 %v5908_v36  ;;  %v1932_v36 = vld [vmem:[#allocation6 + $0xe80] sm:$0xff] }
 0x3fc   : > { %v5942_v40 = vpack.c.bf16 %v1934_v37, %v1932_v36  ;;  %v1972_v37 = vld [vmem:[#allocation6 + $0xfc0] sm:$0xff] }
 0x3fe   : > { %5911 = vmatpush1.bf16.msra.mxu0 %v5910_v41  ;;  %v5944_v41 = vpack.c.bf16 %v1939_v39, %v1937_v38  ;;  %v1974_v38 = vld [vmem:[#allocation6 + $0xfd0] sm:$0xff]  ;;  %v1977_v39 = vld [vmem:[#allocation6 + $0xfe8] sm:$0xff] }
 0x3ff   : > { %5913 = vmatprep.subr.bf16.mxu0 %v5912_v42  ;;  %v1936_v42 = vld [vmem:[#allocation6 + $0xea0] sm:$0xff] }
 0x400   : > { %v5946_v46 = vpack.c.bf16 %v1938_v43, %v1936_v42  ;;  %v1976_v43 = vld [vmem:[#allocation6 + $0xfe0] sm:$0xff] }
 0x402   : > { %5915 = vmatpush1.bf16.msra.mxu0 %v5914_v47  ;;  %v5948_v47 = vpack.c.bf16 %v1943_v45, %v1941_v44  ;;  %v1978_v44 = vld [vmem:[#allocation6 + $0xff0] sm:$0xff]  ;;  %v2071_v45 = vld [vmem:[#allocation6 + $0x1008] sm:$0xff] }
 0x403   : > { %5917 = vmatprep.subr.bf16.mxu0 %v5916_v48  ;;  %v1940_v48 = vld [vmem:[#allocation6 + $0xec0] sm:$0xff] }
 0x404   : > { %v5950_v52 = vpack.c.bf16 %v1942_v49, %v1940_v48  ;;  %v1913_v48 = vld [vmem:[#allocation2 + $0x10] sm:$0x3]  ;;  %v5986_v49 = vpack.c.bf16 %v1978_v44, %v1976_v43 }
 0x405   : > { %v1985_v56 = vrot.slane %v1913_v48, 2  ;;  %v2088_v43 = vld [vmem:[#allocation6 + $0x1090] sm:$0xff]  ;;  %v2091_v44 = vld [vmem:[#allocation6 + $0x10a8] sm:$0xff]  ;;  %v2090_v48 = vld [vmem:[#allocation6 + $0x10a0] sm:$0xff] }
 0x406   : > { %5919 = vmatpush1.bf16.msra.mxu0 %v5918_v53  ;;  %v5952_v53 = vpack.c.bf16 %v1947_v51, %v1945_v50  ;;  %v2066_v50 = vld [vmem:[#allocation2 + $0x8] sm:$0xf8]  ;;  %v2068_v51 = vld [vmem:[#allocation2 + $0x18] sm:$0x7] }
 0x407   : > { %5921 = vmatprep.subr.bf16.mxu0 %v5920_v54  ;;  %v1944_v54 = vld [vmem:[#allocation6 + $0xee0] sm:$0xff] }
 0x408   : > { %v5954_v58 = vpack.c.bf16 %v1946_v55, %v1944_v54  ;;  %v2072_v54 = vld [vmem:[#allocation6 + $0x1010] sm:$0xff] }
 0x40a   : > { %5923 = vmatpush1.bf16.msra.mxu0 %v5922_v61  ;;  %v1950_v61 = vld [vmem:[#allocation6 + $0xf10] sm:$0xff] }
 0x40b   : > { %5925 = vmatprep.subr.bf16.mxu0 %v5924_v0  ;;  %v5958_v0 = vpack.c.bf16 %v1950_v61, %v1948_v60  ;;  %v2142_v60 = vrot.slane %v2068_v51, 3  ;;  %v2097_v51 = vld [vmem:[#allocation6 + $0x10d8] sm:$0xff] }
 0x40d   : > { %1903 = vmatmul.mubr.f32.vlgmr.msra.gmra.mrb[2].mxu0 %v1832_v18 }
 0x40e   : > { %5927 = vmatpush1.bf16.msra.mxu0 %v5926_v14  ;;  %2056 = vmatprep.mubr.f32.mxu0 %v1989_v21  ;;  %v1958_v14 = vld [vmem:[#allocation6 + $0xf50] sm:$0xff]  ;;  %v1965_v21 = vld [vmem:[#allocation6 + $0xf88] sm:$0xff] }
 0x40f   : > { %5929 = vmatprep.subr.bf16.mxu0 %v5928_v15  ;;  %v1961_v15 = vld [vmem:[#allocation6 + $0xf68] sm:$0xff]  ;;  %v5966_v17 = vpack.c.bf16 %v1958_v14, %v1956_v13  ;;  %v2391_v14 = vld [vmem:[%s8248_s9] sm:$0xff] }
 0x410   : > { %v5968_v18 = vpack.c.bf16 %v1963_v16, %v1961_v15  ;;  %v2408_v13 = vld [vmem:[%s8248_s9 + $0x88] sm:$0xff] }
 0x412   : > { %5931 = vmatpush1.bf16.msra.mxu0 %v5930_v22  ;;  %v1967_v22 = vld [vmem:[#allocation6 + $0xf98] sm:$0xff] }
 0x413   : > { %5933 = vmatprep.subr.bf16.mxu0 %v5932_v23  ;;  %v5970_v23 = vpack.c.bf16 %v1962_v20, %v1960_v19  ;;  %v5972_v24 = vpack.c.bf16 %v1967_v22, %v1965_v21  ;;  %v2410_v19 = vld [vmem:[%s8248_s9 + $0x98] sm:$0xff]  ;;  %v5996_v20 = vpack.c.bf16 %v2081_v6, %v2079_v5  ;;  %v2102_v5 = vld [vmem:[#allocation6 + $0x1100] sm:$0xff] }
 0x414   : > { %v2104_v6 = vld [vmem:[#allocation6 + $0x1110] sm:$0xff] }
 0x416   : > { %5935 = vmatpush1.bf16.msra.mxu0 %v5934_v28  ;;  %v1971_v28 = vld [vmem:[#allocation6 + $0xfb8] sm:$0xff] }
 0x417   : > { %5937 = vmatprep.subr.bf16.mxu0 %v5936_v29  ;;  %v5974_v29 = vpack.c.bf16 %v1966_v26, %v1964_v25  ;;  %v5976_v30 = vpack.c.bf16 %v1971_v28, %v1969_v27  ;;  %v2411_v25 = vld [vmem:[%s8248_s9 + $0xa0] sm:$0xff]  ;;  %v2083_v26 = vld [vmem:[#allocation6 + $0x1068] sm:$0xff] }
 0x418   : > { %v2085_v27 = vld [vmem:[#allocation6 + $0x1078] sm:$0xff]  ;;  %v2412_v28 = vld [vmem:[%s8248_s9 + $0xa8] sm:$0xff] }
 0x41a   : > { %5939 = vmatpush1.bf16.msra.mxu0 %v5938_v34  ;;  %v1975_v34 = vld [vmem:[#allocation6 + $0xfd8] sm:$0xff] }
 0x41b   : > { %5941 = vmatprep.subr.bf16.mxu0 %v5940_v35  ;;  %v5978_v35 = vpack.c.bf16 %v1970_v32, %v1968_v31  ;;  %v5980_v36 = vpack.c.bf16 %v1975_v34, %v1973_v33  ;;  %v6124_v31 = vpack.c.bf16 %v2412_v28, %v2411_v25  ;;  %v2395_v32 = vld [vmem:[%s8248_s9 + $0x20] sm:$0xff]  ;;  %v2396_v33 = vld [vmem:[%s8248_s9 + $0x28] sm:$0xff]  ;;  %v6000_v34 = vpack.c.bf16 %v2085_v27, %v2083_v26  ;;  %v2116_v26 = vld [vmem:[#allocation6 + $0x1170] sm:$0xff] }
 0x41c   : > { %v2114_v25 = vld [vmem:[#allocation6 + $0x1160] sm:$0xff]  ;;  %v2119_v27 = vld [vmem:[#allocation6 + $0x1188] sm:$0xff]  ;;  %v2121_v28 = vld [vmem:[#allocation6 + $0x1198] sm:$0xff] }
 0x41e   : > { %5943 = vmatpush1.bf16.msra.mxu0 %v5942_v40  ;;  %v1979_v40 = vld [vmem:[#allocation6 + $0xff8] sm:$0xff] }
 0x41f   : > { %5945 = vmatprep.subr.bf16.mxu0 %v5944_v41  ;;  %v5982_v41 = vpack.c.bf16 %v1974_v38, %v1972_v37  ;;  %v5984_v42 = vpack.c.bf16 %v1979_v40, %v1977_v39  ;;  %v2087_v37 = vld [vmem:[#allocation6 + $0x1088] sm:$0xff]  ;;  %v2089_v38 = vld [vmem:[#allocation6 + $0x1098] sm:$0xff]  ;;  %v6126_v39 = vpack.c.bf16 %v2396_v33, %v2395_v32  ;;  %v2120_v32 = vld [vmem:[#allocation6 + $0x1190] sm:$0xff] }
 0x420   : > { %v2123_v33 = vld [vmem:[#allocation6 + $0x11a8] sm:$0xff] }
 0x422   : > { %5947 = vmatpush1.bf16.msra.mxu0 %v5946_v46  ;;  %v2073_v46 = vld [vmem:[#allocation6 + $0x1018] sm:$0xff] }
 0x423   : > { %5949 = vmatprep.subr.bf16.mxu0 %v5948_v47  ;;  %v1911_v47 = vld [vmem:[#allocation2] sm:$0xfc] }
 0x424   : > { %v1984_v55 = vrot.slane %v1911_v47, 2 }
 0x426   : > { %5951 = vmatpush1.bf16.msra.mxu0 %v5950_v52  ;;  %v5988_v52 = vpack.c.bf16 %v2073_v46, %v2071_v45  ;;  %v2093_v45 = vld [vmem:[#allocation6 + $0x10b8] sm:$0xff] }
 0x427   : > { %5953 = vmatprep.subr.bf16.mxu0 %v5952_v53  ;;  %v2070_v53 = vld [vmem:[#allocation6 + $0x1000] sm:$0xff]  ;;  %v6008_v47 = vpack.c.bf16 %v2093_v45, %v2091_v44  ;;  %v2128_v44 = vld [vmem:[#allocation6 + $0x11d0] sm:$0xff]  ;;  %v2131_v45 = vld [vmem:[#allocation6 + $0x11e8] sm:$0xff] }
 0x428   : > { %v5990_v61 = vpack.c.bf16 %v2072_v54, %v2070_v53  ;;  %v2094_v54 = vld [vmem:[#allocation6 + $0x10c0] sm:$0xff] }
 0x42a   : > { %5955 = vmatpush1.bf16.msra.mxu0 %v5954_v58  ;;  %v2077_v58 = vld [vmem:[#allocation6 + $0x1038] sm:$0xff] }
 0x42b   : > { %5957 = vmatprep.subr.bf16.mxu0 %v5956_v59  ;;  %v2141_v59 = vrot.slane %v2066_v50, 3  ;;  %v5992_v62 = vpack.c.bf16 %v2077_v58, %v2075_v57  ;;  %v2095_v50 = vld [vmem:[#allocation6 + $0x10c8] sm:$0xff]  ;;  %v2101_v57 = vld [vmem:[#allocation6 + $0x10f8] sm:$0xff] }
 0x42c   : > { %v6012_v53 = vpack.c.bf16 %v2097_v51, %v2095_v50  ;;  %v2132_v50 = vld [vmem:[#allocation6 + $0x11f0] sm:$0xff]  ;;  %v2225_v51 = vld [vmem:[#allocation6 + $0x1208] sm:$0xff] }
 0x42d   : > { %v2143_v7 = vsel %vm1351_vm3, %v2141_v59, %v2142_v60  ;;  %v2098_v60 = vld [vmem:[#allocation6 + $0x10e0] sm:$0xff] }
 0x42e   : > { %5959 = vmatpush1.bf16.msra.mxu0 %v5958_v0  ;;  %v2076_v0 = vld [vmem:[#allocation6 + $0x1030] sm:$0xff] }
 0x42f   : > { %5961 = vmatprep.subr.bf16.mxu0 %v5960_v3  ;;  %v1986_v3 = vsel %vm1196_vm2, %v1984_v55, %v1985_v56  ;;  %v5994_v15 = vpack.c.bf16 %v2076_v0, %v2074_v63  ;;  %v2096_v55 = vld [vmem:[#allocation6 + $0x10d0] sm:$0xff]  ;;  %v2099_v56 = vld [vmem:[#allocation6 + $0x10e8] sm:$0xff]  ;;  %v2105_v63 = vld [vmem:[#allocation6 + $0x1118] sm:$0xff] }
 0x430   : > { %v6014_v58 = vpack.c.bf16 %v2096_v55, %v2094_v54  ;;  %v6016_v59 = vpack.c.bf16 %v2101_v57, %v2099_v56  ;;  %v2067_v54 = vld [vmem:[#allocation2 + $0x10] sm:$0x7]  ;;  %v2220_v56 = vld [vmem:[#allocation2 + $0x8] sm:$0xf0]  ;;  %v2222_v57 = vld [vmem:[#allocation2 + $0x18] sm:$0xf] }
 0x432   : > { %5963 = vmatpush1.bf16.msra.mxu0 %v5962_v11  ;;  %v2080_v11 = vld [vmem:[#allocation6 + $0x1050] sm:$0xff] }
 0x433   : > { %5965 = vmatprep.subr.bf16.mxu0 %v5964_v12  ;;  %v2407_v12 = vld [vmem:[%s8248_s9 + $0x80] sm:$0xff] }
 0x434   : > { %v6116_v16 = vpack.c.bf16 %v2408_v13, %v2407_v12  ;;  %v2106_v13 = vld [vmem:[#allocation6 + $0x1120] sm:$0xff] }
 0x436   : > { %5967 = vmatpush1.bf16.msra.mxu0 %v5966_v17  ;;  %v2392_v17 = vld [vmem:[%s8248_s9 + $0x8] sm:$0xff]  ;;  %6117 = vmatprep.subr.bf16.mxu1 %v6116_v16  ;;  %v2113_v16 = vld [vmem:[#allocation6 + $0x1158] sm:$0xff] }
 0x437   : > { %5969 = vmatprep.subr.bf16.mxu0 %v5968_v18  ;;  %v2409_v18 = vld [vmem:[%s8248_s9 + $0x90] sm:$0xff]  ;;  %v6118_v21 = vpack.c.bf16 %v2392_v17, %v2391_v14 }
 0x438   : > { %v6120_v22 = vpack.c.bf16 %v2410_v19, %v2409_v18  ;;  %v2108_v14 = vld [vmem:[#allocation6 + $0x1130] sm:$0xff]  ;;  %v2110_v19 = vld [vmem:[#allocation6 + $0x1140] sm:$0xff] }
 0x439   : > { %6119 = vmatpush3.bf16.msra.mxu1 %v6118_v21  ;;  %v6026_v17 = vpack.c.bf16 %v2108_v14, %v2106_v13  ;;  %v2115_v21 = vld [vmem:[#allocation6 + $0x1168] sm:$0xff]  ;;  %v2235_v14 = vld [vmem:[#allocation6 + $0x1258] sm:$0xff] }
 0x43a   : > { %5971 = vmatpush1.bf16.msra.mxu0 %v5970_v23  ;;  %v2393_v23 = vld [vmem:[%s8248_s9 + $0x10] sm:$0xff]  ;;  %6121 = vmatprep.subr.bf16.mxu1 %v6120_v22  ;;  %v2117_v22 = vld [vmem:[#allocation6 + $0x1178] sm:$0xff] }
 0x43b   : > { %5973 = vmatprep.subr.bf16.mxu0 %v5972_v24  ;;  %v2394_v24 = vld [vmem:[%s8248_s9 + $0x18] sm:$0xff]  ;;  %v2233_v13 = vld [vmem:[#allocation6 + $0x1248] sm:$0xff] }
 0x43e   : > { %5975 = vmatpush1.bf16.msra.mxu0 %v5974_v29  ;;  %v6122_v29 = vpack.c.bf16 %v2394_v24, %v2393_v23  ;;  %v6032_v24 = vpack.c.bf16 %v2117_v22, %v2115_v21  ;;  %v2239_v21 = vld [vmem:[#allocation6 + $0x1278] sm:$0xff] }
 0x43f   : > { %5977 = vmatprep.subr.bf16.mxu0 %v5976_v30  ;;  %v5998_v30 = vpack.c.bf16 %v2080_v11, %v2078_v9  ;;  %v2109_v9 = vld [vmem:[#allocation6 + $0x1138] sm:$0xff]  ;;  %v6022_v11 = vpack.c.bf16 %v2104_v6, %v2102_v5  ;;  %v2296_v5 = vrot.slane %v2222_v57, 4 }
 0x440   : > { %6123 = vmatpush3.bf16.msra.mxu1 %v6122_v29  ;;  %v6034_v29 = vpack.c.bf16 %v2116_v26, %v2114_v25  ;;  %v2238_v25 = vld [vmem:[#allocation6 + $0x1270] sm:$0xff]  ;;  %v2241_v26 = vld [vmem:[#allocation6 + $0x1288] sm:$0xff]  ;;  %v2263_v57 = vld [vmem:[#allocation6 + $0x1338] sm:$0xff] }
 0x441   : > { %6125 = vmatprep.subr.bf16.mxu1 %v6124_v31  ;;  %v2118_v31 = vld [vmem:[#allocation6 + $0x1180] sm:$0xff] }
 0x442   : > { %5979 = vmatpush1.bf16.msra.mxu0 %v5978_v35  ;;  %v2082_v35 = vld [vmem:[#allocation6 + $0x1060] sm:$0xff] }
 0x443   : > { %5981 = vmatprep.subr.bf16.mxu0 %v5980_v36  ;;  %v2084_v36 = vld [vmem:[#allocation6 + $0x1070] sm:$0xff] }
 0x444   : > { %v6002_v40 = vpack.c.bf16 %v2084_v36, %v2082_v35  ;;  %6127 = vmatpush3.bf16.msra.mxu1 %v6126_v39  ;;  %v6038_v35 = vpack.c.bf16 %v2120_v32, %v2118_v31  ;;  %v2127_v39 = vld [vmem:[#allocation6 + $0x11c8] sm:$0xff]  ;;  %v2242_v31 = vld [vmem:[#allocation6 + $0x1290] sm:$0xff] }
 0x445   : > { %v2245_v32 = vld [vmem:[#allocation6 + $0x12a8] sm:$0xff] }
 0x446   : > { %5983 = vmatpush1.bf16.msra.mxu0 %v5982_v41  ;;  %v6004_v41 = vpack.c.bf16 %v2089_v38, %v2087_v37  ;;  %v2122_v37 = vld [vmem:[#allocation6 + $0x11a0] sm:$0xff]  ;;  %v2124_v38 = vld [vmem:[#allocation6 + $0x11b0] sm:$0xff] }
 0x447   : > { %5985 = vmatprep.subr.bf16.mxu0 %v5984_v42  ;;  %v2086_v42 = vld [vmem:[#allocation6 + $0x1080] sm:$0xff] }
 0x448   : > { %v6006_v46 = vpack.c.bf16 %v2088_v43, %v2086_v42  ;;  %v2126_v43 = vld [vmem:[#allocation6 + $0x11c0] sm:$0xff] }
 0x44a   : > { %5987 = vmatpush1.bf16.msra.mxu0 %v5986_v49  ;;  %v2092_v49 = vld [vmem:[#allocation6 + $0x10b0] sm:$0xff] }
 0x44b   : > { %5989 = vmatprep.subr.bf16.mxu0 %v5988_v52  ;;  %v6010_v52 = vpack.c.bf16 %v2092_v49, %v2090_v48  ;;  %v2130_v49 = vld [vmem:[#allocation6 + $0x11e0] sm:$0xff] }
 0x44c   : > { %v6050_v55 = vpack.c.bf16 %v2132_v50, %v2130_v49  ;;  %v2254_v49 = vld [vmem:[#allocation6 + $0x12f0] sm:$0xff]  ;;  %v2257_v50 = vld [vmem:[#allocation6 + $0x1308] sm:$0xff] }
 0x44d   : > { %2057 = vmatmul.mubr.f32.vlgmr.msra.gmra.mrb[2].mxu0 %v1986_v3 }
 0x44e   : > { %5991 = vmatpush1.bf16.msra.mxu0 %v5990_v61  ;;  %2210 = vmatprep.mubr.f32.mxu0 %v2143_v7  ;;  %v2100_v61 = vld [vmem:[#allocation6 + $0x10f0] sm:$0xff]  ;;  %v2107_v7 = vld [vmem:[#allocation6 + $0x1128] sm:$0xff] }
 0x44f   : > { %5993 = vmatprep.subr.bf16.mxu0 %v5992_v62  ;;  %v2103_v62 = vld [vmem:[#allocation6 + $0x1108] sm:$0xff]  ;;  %v6018_v0 = vpack.c.bf16 %v2100_v61, %v2098_v60  ;;  %v6024_v12 = vpack.c.bf16 %v2109_v9, %v2107_v7  ;;  %v2226_v60 = vld [vmem:[#allocation6 + $0x1210] sm:$0xff]  ;;  %v2228_v9 = vld [vmem:[#allocation6 + $0x1220] sm:$0xff] }
 0x450   : > { %v6020_v3 = vpack.c.bf16 %v2105_v63, %v2103_v62  ;;  %v2139_v62 = vrot.slane %v2067_v54, 3  ;;  %v2229_v63 = vld [vmem:[#allocation6 + $0x1228] sm:$0xff]  ;;  %v2256_v54 = vld [vmem:[#allocation6 + $0x1300] sm:$0xff] }
 0x452   : > { %5995 = vmatpush1.bf16.msra.mxu0 %v5994_v15  ;;  %v2111_v15 = vld [vmem:[#allocation6 + $0x1148] sm:$0xff] }
 0x453   : > { %5997 = vmatprep.subr.bf16.mxu0 %v5996_v20  ;;  %v6028_v18 = vpack.c.bf16 %v2113_v16, %v2111_v15  ;;  %v2112_v20 = vld [vmem:[#allocation6 + $0x1150] sm:$0xff] }
 0x454   : > { %v6030_v23 = vpack.c.bf16 %v2112_v20, %v2110_v19  ;;  %v2234_v19 = vld [vmem:[#allocation6 + $0x1250] sm:$0xff]  ;;  %v2237_v20 = vld [vmem:[#allocation6 + $0x1268] sm:$0xff] }
 0x456   : > { %5999 = vmatpush1.bf16.msra.mxu0 %v5998_v30  ;;  %v6036_v30 = vpack.c.bf16 %v2121_v28, %v2119_v27  ;;  %v2243_v27 = vld [vmem:[#allocation6 + $0x1298] sm:$0xff] }
 0x457   : > { %6001 = vmatprep.subr.bf16.mxu0 %v6000_v34  ;;  %v2125_v34 = vld [vmem:[#allocation6 + $0x11b8] sm:$0xff] }
 0x458   : > { %v6040_v36 = vpack.c.bf16 %v2125_v34, %v2123_v33  ;;  %v2247_v33 = vld [vmem:[#allocation6 + $0x12b8] sm:$0xff] }
 0x45a   : > { %6003 = vmatpush1.bf16.msra.mxu0 %v6002_v40  ;;  %v2129_v40 = vld [vmem:[#allocation6 + $0x11d8] sm:$0xff] }
 0x45b   : > { %6005 = vmatprep.subr.bf16.mxu0 %v6004_v41  ;;  %v6042_v41 = vpack.c.bf16 %v2124_v38, %v2122_v37  ;;  %v6044_v42 = vpack.c.bf16 %v2129_v40, %v2127_v39  ;;  %v2246_v37 = vld [vmem:[#allocation6 + $0x12b0] sm:$0xff]  ;;  %v2249_v38 = vld [vmem:[#allocation6 + $0x12c8] sm:$0xff]  ;;  %v2251_v39 = vld [vmem:[#allocation6 + $0x12d8] sm:$0xff] }
 0x45e   : > { %6007 = vmatpush1.bf16.msra.mxu0 %v6006_v46  ;;  %v2133_v46 = vld [vmem:[#allocation6 + $0x11f8] sm:$0xff] }
 0x45f   : > { %6009 = vmatprep.subr.bf16.mxu0 %v6008_v47  ;;  %v6046_v47 = vpack.c.bf16 %v2128_v44, %v2126_v43  ;;  %v6048_v48 = vpack.c.bf16 %v2133_v46, %v2131_v45  ;;  %v2250_v43 = vld [vmem:[#allocation6 + $0x12d0] sm:$0xff]  ;;  %v2253_v44 = vld [vmem:[#allocation6 + $0x12e8] sm:$0xff]  ;;  %v2255_v45 = vld [vmem:[#allocation6 + $0x12f8] sm:$0xff] }
 0x462   : > { %6011 = vmatpush1.bf16.msra.mxu0 %v6010_v52  ;;  %v2227_v52 = vld [vmem:[#allocation6 + $0x1218] sm:$0xff] }
 0x463   : > { %6013 = vmatprep.subr.bf16.mxu0 %v6012_v53  ;;  %v2065_v53 = vld [vmem:[#allocation2] sm:$0xf8] }
 0x464   : > { %v2138_v61 = vrot.slane %v2065_v53, 3 }
 0x466   : > { %6015 = vmatpush1.bf16.msra.mxu0 %v6014_v58  ;;  %v6052_v58 = vpack.c.bf16 %v2227_v52, %v2225_v51  ;;  %v2259_v51 = vld [vmem:[#allocation6 + $0x1318] sm:$0xff] }
 0x467   : > { %6017 = vmatprep.subr.bf16.mxu0 %v6016_v59  ;;  %v2224_v59 = vld [vmem:[#allocation6 + $0x1200] sm:$0xff]  ;;  %v6084_v53 = vpack.c.bf16 %v2259_v51, %v2257_v50 }
 0x468   : > { %v6054_v6 = vpack.c.bf16 %v2226_v60, %v2224_v59  ;;  %v2260_v60 = vld [vmem:[#allocation6 + $0x1320] sm:$0xff] }
 0x469   : > { %v2415_v51 = vld [vmem:[%s8248_s9 + $0xc0] sm:$0xff] }
 0x46a   : > { %6019 = vmatpush1.bf16.msra.mxu0 %v6018_v0  ;;  %v2231_v0 = vld [vmem:[#allocation6 + $0x1238] sm:$0xff] }
 0x46b   : > { %6021 = vmatprep.subr.bf16.mxu0 %v6020_v3  ;;  %v2295_v3 = vrot.slane %v2220_v56, 4  ;;  %v6056_v7 = vpack.c.bf16 %v2231_v0, %v2229_v63  ;;  %v2261_v56 = vld [vmem:[#allocation6 + $0x1328] sm:$0xff]  ;;  %v2267_v63 = vld [vmem:[#allocation6 + $0x1358] sm:$0xff] }
 0x46c   : > { %v6088_v59 = vpack.c.bf16 %v2263_v57, %v2261_v56  ;;  %v2417_v57 = vld [vmem:[%s8248_s9 + $0xd0] sm:$0xff] }
 0x46d   : > { %v2297_v15 = vsel %vm1506_vm4, %v2295_v3, %v2296_v5  ;;  %v2264_v5 = vld [vmem:[#allocation6 + $0x1340] sm:$0xff] }
 0x46e   : > { %6023 = vmatpush1.bf16.msra.mxu0 %v6022_v11  ;;  %v2230_v11 = vld [vmem:[#allocation6 + $0x1230] sm:$0xff] }
 0x46f   : > { %6025 = vmatprep.subr.bf16.mxu0 %v6024_v12  ;;  %v2140_v12 = vsel %vm1351_vm3, %v2138_v61, %v2139_v62  ;;  %v6058_v16 = vpack.c.bf16 %v2230_v11, %v2228_v9  ;;  %v2262_v61 = vld [vmem:[#allocation6 + $0x1330] sm:$0xff]  ;;  %v2265_v62 = vld [vmem:[#allocation6 + $0x1348] sm:$0xff]  ;;  %v2271_v9 = vld [vmem:[#allocation6 + $0x1378] sm:$0xff] }
 0x470   : > { %v6090_v0 = vpack.c.bf16 %v2262_v61, %v2260_v60  ;;  %v6092_v3 = vpack.c.bf16 %v2267_v63, %v2265_v62  ;;  %v2402_v61 = vld [vmem:[%s8248_s9 + $0x58] sm:$0xff]  ;;  %v2419_v62 = vld [vmem:[%s8248_s9 + $0xe0] sm:$0xff]  ;;  %v2420_v63 = vld [vmem:[%s8248_s9 + $0xe8] sm:$0xff] }
 0x472   : > { %6027 = vmatpush1.bf16.msra.mxu0 %v6026_v17  ;;  %v6060_v17 = vpack.c.bf16 %v2235_v14, %v2233_v13  ;;  %v2268_v13 = vld [vmem:[#allocation6 + $0x1360] sm:$0xff]  ;;  %v2270_v14 = vld [vmem:[#allocation6 + $0x1370] sm:$0xff] }
 0x473   : > { %6029 = vmatprep.subr.bf16.mxu0 %v6028_v18  ;;  %v2232_v18 = vld [vmem:[#allocation6 + $0x1240] sm:$0xff] }
 0x474   : > { %v6062_v22 = vpack.c.bf16 %v2234_v19, %v2232_v18  ;;  %v2272_v19 = vld [vmem:[#allocation6 + $0x1380] sm:$0xff] }
 0x476   : > { %6031 = vmatpush1.bf16.msra.mxu0 %v6030_v23  ;;  %v6064_v23 = vpack.c.bf16 %v2239_v21, %v2237_v20  ;;  %v2274_v20 = vld [vmem:[#allocation6 + $0x1390] sm:$0xff]  ;;  %v2277_v21 = vld [vmem:[#allocation6 + $0x13a8] sm:$0xff] }
 0x477   : > { %6033 = vmatprep.subr.bf16.mxu0 %v6032_v24  ;;  %v2236_v24 = vld [vmem:[#allocation6 + $0x1260] sm:$0xff] }
 0x478   : > { %v6066_v28 = vpack.c.bf16 %v2238_v25, %v2236_v24  ;;  %v2276_v25 = vld [vmem:[#allocation6 + $0x13a0] sm:$0xff] }
 0x47a   : > { %6035 = vmatpush1.bf16.msra.mxu0 %v6034_v29  ;;  %v6068_v29 = vpack.c.bf16 %v2243_v27, %v2241_v26  ;;  %v2278_v26 = vld [vmem:[#allocation6 + $0x13b0] sm:$0xff]  ;;  %v2281_v27 = vld [vmem:[#allocation6 + $0x13c8] sm:$0xff] }
 0x47b   : > { %6037 = vmatprep.subr.bf16.mxu0 %v6036_v30  ;;  %v2240_v30 = vld [vmem:[#allocation6 + $0x1280] sm:$0xff] }
 0x47c   : > { %v6070_v34 = vpack.c.bf16 %v2242_v31, %v2240_v30  ;;  %v2280_v31 = vld [vmem:[#allocation6 + $0x13c0] sm:$0xff] }
 0x47e   : > { %6039 = vmatpush1.bf16.msra.mxu0 %v6038_v35  ;;  %v6072_v35 = vpack.c.bf16 %v2247_v33, %v2245_v32  ;;  %v2282_v32 = vld [vmem:[#allocation6 + $0x13d0] sm:$0xff]  ;;  %v2285_v33 = vld [vmem:[#allocation6 + $0x13e8] sm:$0xff] }
 0x47f   : > { %6041 = vmatprep.subr.bf16.mxu0 %v6040_v36  ;;  %v2244_v36 = vld [vmem:[#allocation6 + $0x12a0] sm:$0xff] }
 0x480   : > { %v6074_v40 = vpack.c.bf16 %v2246_v37, %v2244_v36  ;;  %v2284_v37 = vld [vmem:[#allocation6 + $0x13e0] sm:$0xff] }
 0x482   : > { %6043 = vmatpush1.bf16.msra.mxu0 %v6042_v41  ;;  %v6076_v41 = vpack.c.bf16 %v2251_v39, %v2249_v38  ;;  %v2286_v38 = vld [vmem:[#allocation6 + $0x13f0] sm:$0xff]  ;;  %v2219_v39 = vld [vmem:[#allocation2] sm:$0xf0] }
 0x483   : > { %6045 = vmatprep.subr.bf16.mxu0 %v6044_v42  ;;  %v2248_v42 = vld [vmem:[#allocation6 + $0x12c0] sm:$0xff] }
 0x484   : > { %v6078_v46 = vpack.c.bf16 %v2250_v43, %v2248_v42  ;;  %v2292_v42 = vrot.slane %v2219_v39, 4 }
 0x486   : > { %6047 = vmatpush1.bf16.msra.mxu0 %v6046_v47  ;;  %v6080_v47 = vpack.c.bf16 %v2255_v45, %v2253_v44  ;;  %v2413_v45 = vld [vmem:[%s8248_s9 + $0xb0] sm:$0xff] }
 0x487   : > { %6049 = vmatprep.subr.bf16.mxu0 %v6048_v48  ;;  %v2252_v48 = vld [vmem:[#allocation6 + $0x12e0] sm:$0xff] }
 0x488   : > { %v6082_v52 = vpack.c.bf16 %v2254_v49, %v2252_v48  ;;  %v2397_v48 = vld [vmem:[%s8248_s9 + $0x30] sm:$0xff]  ;;  %v2398_v49 = vld [vmem:[%s8248_s9 + $0x38] sm:$0xff] }
 0x489   : > { %v6130_v50 = vpack.c.bf16 %v2398_v49, %v2397_v48  ;;  %v2573_v49 = vld [vmem:[#allocation11] sm:$0x3] }
 0x48a   : > { %6051 = vmatpush1.bf16.msra.mxu0 %v6050_v55  ;;  %v2258_v55 = vld [vmem:[#allocation6 + $0x1310] sm:$0xff] }
 0x48b   : > { %6053 = vmatprep.subr.bf16.mxu0 %v6052_v58  ;;  %v6086_v58 = vpack.c.bf16 %v2258_v55, %v2256_v54  ;;  %v2399_v54 = vld [vmem:[%s8248_s9 + $0x40] sm:$0xff]  ;;  %v2400_v55 = vld [vmem:[%s8248_s9 + $0x48] sm:$0xff] }
 0x48c   : > { %v6134_v56 = vpack.c.bf16 %v2400_v55, %v2399_v54  ;;  %v2660_v55 = vld [vmem:[#allocation14 + $0x8] sm:$0xff] }
 0x48d   : > { %2211 = vmatmul.mubr.f32.vlgmr.msra.gmra.mrb[2].mxu0 %v2140_v12 }
 0x48e   : > { %6055 = vmatpush1.bf16.msra.mxu0 %v6054_v6  ;;  %2364 = vmatprep.mubr.f32.mxu0 %v2297_v15  ;;  %v2266_v6 = vld [vmem:[#allocation6 + $0x1350] sm:$0xff]  ;;  %v2273_v15 = vld [vmem:[#allocation6 + $0x1388] sm:$0xff] }
 0x48f   : > { %6057 = vmatprep.subr.bf16.mxu0 %v6056_v7  ;;  %v2269_v7 = vld [vmem:[#allocation6 + $0x1368] sm:$0xff]  ;;  %v6094_v11 = vpack.c.bf16 %v2266_v6, %v2264_v5  ;;  %v2403_v5 = vld [vmem:[%s8248_s9 + $0x60] sm:$0xff] }
 0x490   : > { %v6096_v12 = vpack.c.bf16 %v2271_v9, %v2269_v7  ;;  %v2404_v6 = vld [vmem:[%s8248_s9 + $0x68] sm:$0xff]  ;;  %v2421_v7 = vld [vmem:[%s8248_s9 + $0xf0] sm:$0xff]  ;;  %v2422_v9 = vld [vmem:[%s8248_s9 + $0xf8] sm:$0xff] }
 0x492   : > { %6059 = vmatpush1.bf16.msra.mxu0 %v6058_v16  ;;  %v2275_v16 = vld [vmem:[#allocation6 + $0x1398] sm:$0xff] }
 0x493   : > { %6061 = vmatprep.subr.bf16.mxu0 %v6060_v17  ;;  %v6098_v17 = vpack.c.bf16 %v2270_v14, %v2268_v13  ;;  %v6100_v18 = vpack.c.bf16 %v2275_v16, %v2273_v15  ;;  %v2405_v13 = vld [vmem:[%s8248_s9 + $0x70] sm:$0xff]  ;;  %v2406_v14 = vld [vmem:[%s8248_s9 + $0x78] sm:$0xff]  ;;  %v2493_v15 = vld [vmem:[%s8244_s5] sm:$0xff] }
 0x494   : > { %v2494_v16 = vld [vmem:[%s8244_s5 + $0x8] sm:$0xff] }
 0x496   : > { %6063 = vmatpush1.bf16.msra.mxu0 %v6062_v22  ;;  %v2279_v22 = vld [vmem:[#allocation6 + $0x13b8] sm:$0xff] }
 0x497   : > { %6065 = vmatprep.subr.bf16.mxu0 %v6064_v23  ;;  %v6102_v23 = vpack.c.bf16 %v2274_v20, %v2272_v19  ;;  %v6104_v24 = vpack.c.bf16 %v2279_v22, %v2277_v21  ;;  %v6146_v19 = vpack.c.bf16 %v2406_v14, %v2405_v13  ;;  %v1605_v20 = vld [vmem:[#allocation8 + $0x2] sm:$0x3]  ;;  %v2790_v13 = vld [vmem:[#allocation6 + $0x1428] sm:$0xff]  ;;  %v2792_v14 = vld [vmem:[#allocation6 + $0x1438] sm:$0xff] }
 0x498   : > { %v1610_v21 = vrot.slane %v1605_v20, %v7743_v2  ;;  %v1614_v22 = vrot.slane %v1605_v20, %v7745_v4  ;;  %v2794_v20 = vld [vmem:[#allocation6 + $0x1448] sm:$0xff] }
 0x49a   : > { %6067 = vmatpush1.bf16.msra.mxu0 %v6066_v28  ;;  %v2283_v28 = vld [vmem:[#allocation6 + $0x13d8] sm:$0xff] }
 0x49b   : > { %6069 = vmatprep.subr.bf16.mxu0 %v6068_v29  ;;  %v6106_v29 = vpack.c.bf16 %v2278_v26, %v2276_v25  ;;  %v6108_v30 = vpack.c.bf16 %v2283_v28, %v2281_v27 }
 0x49e   : > { %6071 = vmatpush1.bf16.msra.mxu0 %v6070_v34  ;;  %v2287_v34 = vld [vmem:[#allocation6 + $0x13f8] sm:$0xff] }
 0x49f   : > { %6073 = vmatprep.subr.bf16.mxu0 %v6072_v35  ;;  %v6110_v35 = vpack.c.bf16 %v2282_v32, %v2280_v31  ;;  %v6112_v36 = vpack.c.bf16 %v2287_v34, %v2285_v33 }
 0x4a2   : > { %6075 = vmatpush1.bf16.msra.mxu0 %v6074_v40  ;;  %v2221_v40 = vld [vmem:[#allocation2 + $0x10] sm:$0xf] }
 0x4a3   : > { %6077 = vmatprep.subr.bf16.mxu0 %v6076_v41  ;;  %v6114_v41 = vpack.c.bf16 %v2286_v38, %v2284_v37  ;;  %v2293_v43 = vrot.slane %v2221_v40, 4 }
 0x4a5   : > { %v2294_v44 = vsel %vm1506_vm4, %v2292_v42, %v2293_v43  ;;  %v2495_v43 = vld [vmem:[%s8244_s5 + $0x10] sm:$0xff] }
 0x4a6   : > { %6079 = vmatpush1.bf16.msra.mxu0 %v6078_v46  ;;  %v2414_v46 = vld [vmem:[%s8248_s9 + $0xb8] sm:$0xff] }
 0x4a7   : > { %6081 = vmatprep.subr.bf16.mxu0 %v6080_v47  ;;  %v6128_v47 = vpack.c.bf16 %v2414_v46, %v2413_v45 }
 0x4a9   : > { %6129 = vmatprep.subr.bf16.mxu1 %v6128_v47 }
 0x4aa   : > { %6083 = vmatpush1.bf16.msra.mxu0 %v6082_v52  ;;  %6131 = vmatpush3.bf16.msra.mxu1 %v6130_v50  ;;  %v2416_v52 = vld [vmem:[%s8248_s9 + $0xc8] sm:$0xff] }
 0x4ab   : > { %6085 = vmatprep.subr.bf16.mxu0 %v6084_v53  ;;  %v6132_v53 = vpack.c.bf16 %v2416_v52, %v2415_v51  ;;  %v2497_v50 = vld [vmem:[#allocation9] sm:$0x1] }
 0x4ad   : > { %6133 = vmatprep.subr.bf16.mxu1 %v6132_v53 }
 0x4ae   : > { %6087 = vmatpush1.bf16.msra.mxu0 %v6086_v58  ;;  %v2418_v58 = vld [vmem:[%s8248_s9 + $0xd8] sm:$0xff]  ;;  %6135 = vmatpush3.bf16.msra.mxu1 %v6134_v56  ;;  %v2662_v56 = vld [vmem:[#allocation14 + $0x18] sm:$0xff] }
 0x4af   : > { %6089 = vmatprep.subr.bf16.mxu0 %v6088_v59  ;;  %v2401_v59 = vld [vmem:[%s8248_s9 + $0x50] sm:$0xff]  ;;  %v6136_v60 = vpack.c.bf16 %v2418_v58, %v2417_v57  ;;  %v6154_v58 = vpack.c.bf16 %v2662_v56, %v2660_v55  ;;  %v2813_v56 = vld [vmem:[#allocation6 + $0x14e0] sm:$0xff] }
 0x4b0   : > { %v2659_v57 = vld [vmem:[#allocation14] sm:$0xff] }
 0x4b1   : > { %6137 = vmatprep.subr.bf16.mxu1 %v6136_v60  ;;  %v2664_v60 = vld [vmem:[#allocation14 + $0x28] sm:$0xff] }
 0x4b2   : > { %6091 = vmatpush1.bf16.msra.mxu0 %v6090_v0  ;;  %v6138_v0 = vpack.c.bf16 %v2402_v61, %v2401_v59  ;;  %v2661_v59 = vld [vmem:[#allocation14 + $0x10] sm:$0xff]  ;;  %v2666_v61 = vld [vmem:[#allocation14 + $0x38] sm:$0xff] }
 0x4b3   : > { %6093 = vmatprep.subr.bf16.mxu0 %v6092_v3  ;;  %v6140_v3 = vpack.c.bf16 %v2420_v63, %v2419_v62  ;;  %v6156_v62 = vpack.c.bf16 %v2661_v59, %v2659_v57  ;;  %v6158_v63 = vpack.c.bf16 %v2666_v61, %v2664_v60  ;;  %v2815_v57 = vld [vmem:[#allocation6 + $0x14f0] sm:$0xff]  ;;  %v2820_v59 = vld [vmem:[#allocation6 + $0x1518] sm:$0xff] }
 0x4b4   : > { %6139 = vmatpush3.bf16.msra.mxu1 %v6138_v0  ;;  %v2663_v0 = vld [vmem:[#allocation14 + $0x20] sm:$0xff]  ;;  %v6192_v60 = vpack.c.bf16 %v2815_v57, %v2813_v56  ;;  %v2845_v56 = vld [vmem:[#allocation6 + $0x15e0] sm:$0xff] }
 0x4b5   : > { %6141 = vmatprep.subr.bf16.mxu1 %v6140_v3  ;;  %v2665_v3 = vld [vmem:[#allocation14 + $0x30] sm:$0xff]  ;;  %v2847_v57 = vld [vmem:[#allocation6 + $0x15f0] sm:$0xff] }
 0x4b6   : > { %6095 = vmatpush1.bf16.msra.mxu0 %v6094_v11  ;;  %v6142_v11 = vpack.c.bf16 %v2404_v6, %v2403_v5  ;;  %v6160_v5 = vpack.c.bf16 %v2665_v3, %v2663_v0  ;;  %v2786_v6 = vld [vmem:[#allocation6 + $0x1408] sm:$0xff]  ;;  %v2824_v3 = vld [vmem:[#allocation6 + $0x1538] sm:$0xff] }
 0x4b7   : > { %6097 = vmatprep.subr.bf16.mxu0 %v6096_v12  ;;  %v6144_v12 = vpack.c.bf16 %v2422_v9, %v2421_v7  ;;  %v2788_v7 = vld [vmem:[#allocation6 + $0x1418] sm:$0xff]  ;;  %v2785_v9 = vld [vmem:[#allocation6 + $0x1400] sm:$0xff]  ;;  %v2822_v0 = vld [vmem:[#allocation6 + $0x1528] sm:$0xff] }
 0x4b8   : > { %6143 = vmatpush3.bf16.msra.mxu1 %v6142_v11  ;;  %v6162_v11 = vpack.c.bf16 %v2788_v7, %v2786_v6  ;;  %v6198_v6 = vpack.c.bf16 %v2824_v3, %v2822_v0  ;;  %v2821_v7 = vld [vmem:[#allocation6 + $0x1520] sm:$0xff] }
 0x4b9   : > { %6145 = vmatprep.subr.bf16.mxu1 %v6144_v12  ;;  %v2787_v12 = vld [vmem:[#allocation6 + $0x1410] sm:$0xff] }
 0x4ba   : > { %6099 = vmatpush1.bf16.msra.mxu0 %v6098_v17  ;;  %v7374_v17 = vmov 0.0|0.0  }
 0x4bb   : > { %6101 = vmatprep.subr.bf16.mxu0 %v6100_v18  ;;  %v6149_v18 = vpack.c.bf16 %v2494_v16, %v2493_v15  ;;  %v6164_v15 = vpack.c.bf16 %v2787_v12, %v2785_v9  ;;  %v6166_v16 = vpack.c.bf16 %v2792_v14, %v2790_v13  ;;  %v2823_v9 = vld [vmem:[#allocation6 + $0x1530] sm:$0xff]  ;;  %v2828_v12 = vld [vmem:[#allocation6 + $0x1558] sm:$0xff] }
 0x4bc   : > { %6147 = vmatpush3.bf16.msra.mxu1 %v6146_v19  ;;  %v2791_v19 = vld [vmem:[#allocation6 + $0x1430] sm:$0xff]  ;;  %v6200_v13 = vpack.c.bf16 %v2823_v9, %v2821_v7 }
 0x4bd   : > { %6163 = vmatprep.subr.bf16.mxu1 %v6162_v11  ;;  %v2826_v11 = vld [vmem:[#allocation6 + $0x1548] sm:$0xff] }
 0x4be   : > { %6103 = vmatpush1.bf16.msra.mxu0 %v6102_v23  ;;  %v6202_v14 = vpack.c.bf16 %v2828_v12, %v2826_v11 }
 0x4bf   : > { %6105 = vmatprep.subr.bf16.mxu0 %v6104_v24 }
 0x4c2   : > { %6107 = vmatpush1.bf16.msra.mxu0 %v6106_v29 }
 0x4c3   : > { %6109 = vmatprep.subr.bf16.mxu0 %v6108_v30 }
 0x4c6   : > { %6111 = vmatpush1.bf16.msra.mxu0 %v6110_v35 }
 0x4c7   : > { %6113 = vmatprep.subr.bf16.mxu0 %v6112_v36 }
 0x4ca   : > { %6115 = vmatpush1.bf16.msra.mxu0 %v6114_v41 }
 0x4cb   : > { %6148 = vmatprep.subr.bf16.mxu0 %v7374_v17 }
 0x4cd   : > { %2365 = vmatmul.mubr.f32.vlgmr.msra.gmra.mrb[2].mxu0 %v2294_v44  ;;  %v2496_v44 = vld [vmem:[%s8244_s5 + $0x18] sm:$0xff] }
 0x4ce   : > { %6150 = vmatpush3.bf16.msra.mxu0 %v6149_v18  ;;  %v6152_v45 = vpack.c.bf16 %v2496_v44, %v2495_v43  ;;  %5425 = vmatprep.mubr.msk.f32.mxu0 %vm7375_vm9, %v7373_v1  ;;  %v2789_v18 = vld [vmem:[#allocation6 + $0x1420] sm:$0xff] }
 0x4cf   : > { %6151 = vmatprep.subr.bf16.mxu0 %v7374_v17  ;;  %v2805_v44 = vld [vmem:[#allocation6 + $0x14a0] sm:$0xff] }
 0x4d2   : > { %6153 = vmatpush3.bf16.msra.mxu0 %v6152_v45  ;;  %v2807_v45 = vld [vmem:[#allocation6 + $0x14b0] sm:$0xff] }
 0x4d3   : > { %5428 = vmatprep.subr.mxu0 %v7373_v1 }
 0x5a0   : > { %v2366_v23 = vpop.f32.mrb[2].mxu0 }
 0x5a1   : > { %v6920_v24 = vadd.f32 %v2366_v23, %v1610_v21  ;;  %v2368_v25 = vpop.f32.mrb[3].mxu0  ;;  %v2796_v21 = vld [vmem:[#allocation6 + $0x1458] sm:$0xff] }
 0x5a2   : > { %v6921_v26 = vadd.f32 %v2368_v25, %v1614_v22  ;;  %v6168_v22 = vpack.c.bf16 %v2791_v19, %v2789_v18  ;;  %v6170_v23 = vpack.c.bf16 %v2796_v21, %v2794_v20  ;;  %v2795_v25 = vld [vmem:[#allocation6 + $0x1450] sm:$0xff]  ;;  %v2574_v19 = vld [vmem:[#allocation12] sm:$0x1] }
 0x5a3   : > { %vm2373_vm7 = vcmp.gt.f32.partialorder %v6920_v24, 0.0  ;;  %v2375_v27 = vmul.f32 0.01, %v6920_v24 }
 0x5a4   : > { %vm2374_vm8 = vcmp.gt.f32.partialorder %v6921_v26, 0.0  ;;  %v2376_v28 = vmul.f32 0.01, %v6921_v26 }
 0x5a5   : > { %v7879_v29 = vsel %vm2373_vm7, %v6920_v24, %v2375_v27  ;;  %v2793_v24 = vld [vmem:[#allocation6 + $0x1440] sm:$0xff]  ;;  %v2800_v27 = vld [vmem:[#allocation6 + $0x1478] sm:$0xff]  ;;  %vm4834_vm7 = vcmask 457728  }
 0x5a6   : > { %v2379_v30 = vrot.slane %v7879_v29, 4  ;;  %v7882_v31 = vsel %vm2374_vm8, %v6921_v26, %v2376_v28  ;;  %v2798_v26 = vld [vmem:[#allocation6 + $0x1468] sm:$0xff]  ;;  %v6172_v28 = vpack.c.bf16 %v2795_v25, %v2793_v24 }
 0x5a7   : > { %v2385_v32 = vrot.slane %v7882_v31, 4 }
 0x5a8   : > { %v2380_v33 = vadd.f32 %v2379_v30, %v7879_v29  ;;  %v6174_v30 = vpack.c.bf16 %v2800_v27, %v2798_v26  ;;  %v2830_v27 = vld [vmem:[#allocation6 + $0x1568] sm:$0xff] }
 0x5a9   : > { %v2386_v34 = vadd.f32 %v2385_v32, %v7882_v31  ;;  %v2797_v32 = vld [vmem:[#allocation6 + $0x1460] sm:$0xff] }
 0x5aa   : > { %v2381_v35 = vrot.slane %v2380_v33, 2 }
 0x5ab   : > { %v2387_v36 = vrot.slane %v2386_v34, 2 }
 0x5ac   : > { %v2382_v37 = vadd.f32 %v2381_v35, %v2380_v33  ;;  %v2799_v33 = vld [vmem:[#allocation6 + $0x1470] sm:$0xff]  ;;  %v2804_v35 = vld [vmem:[#allocation6 + $0x1498] sm:$0xff] }
 0x5ad   : > { %v2388_v38 = vadd.f32 %v2387_v36, %v2386_v34  ;;  %v2802_v34 = vld [vmem:[#allocation6 + $0x1488] sm:$0xff]  ;;  %v6176_v36 = vpack.c.bf16 %v2799_v33, %v2797_v32  ;;  %v2829_v32 = vld [vmem:[#allocation6 + $0x1560] sm:$0xff]  ;;  %v2831_v33 = vld [vmem:[#allocation6 + $0x1570] sm:$0xff] }
 0x5ae   : > { %v2383_v39 = vrot.slane %v2382_v37, 1 }
 0x5af   : > { %v2389_v40 = vrot.slane %v2388_v38, 1 }
 0x5b0   : > { %v2384_v42 = vadd.f32 %v2383_v39, %v2382_v37  ;;  %v6178_v37 = vpack.c.bf16 %v2804_v35, %v2802_v34  ;;  %v2803_v39 = vld [vmem:[#allocation6 + $0x1490] sm:$0xff]  ;;  %v6208_v34 = vpack.c.bf16 %v2831_v33, %v2829_v32  ;;  %v2834_v35 = vld [vmem:[#allocation6 + $0x1588] sm:$0xff] }
 0x5b1   : > { %v2390_v41 = vadd.f32 %v2389_v40, %v2388_v38  ;;  %v2801_v38 = vld [vmem:[#allocation6 + $0x1480] sm:$0xff]  ;;  %v2806_v40 = vld [vmem:[#allocation6 + $0x14a8] sm:$0xff] }
 0x5b3   : > { %2487 = vmatprep.mubr.f32.mxu1 %v2390_v41  ;;  %v2808_v41 = vld [vmem:[#allocation6 + $0x14b8] sm:$0xff] }
 0x5b4   : > { %2488 = vmatmul.mubr.f32.vlgmr.msra.gmra.mrb[2].mxu1 %v2384_v42  ;;  %v6180_v42 = vpack.c.bf16 %v2803_v39, %v2801_v38  ;;  %v6182_v43 = vpack.c.bf16 %v2808_v41, %v2806_v40  ;;  %v2833_v38 = vld [vmem:[#allocation6 + $0x1580] sm:$0xff]  ;;  %v2835_v39 = vld [vmem:[#allocation6 + $0x1590] sm:$0xff]  ;;  %v2838_v41 = vld [vmem:[#allocation6 + $0x15a8] sm:$0xff] }
 0x5b5   : > { %6165 = vmatpush1.bf16.msra.mxu1 %v6164_v15  ;;  %v2825_v15 = vld [vmem:[#allocation6 + $0x1540] sm:$0xff]  ;;  %v6212_v40 = vpack.c.bf16 %v2835_v39, %v2833_v38  ;;  %v2942_v38 = vld [vmem:[#allocation6 + $0x1678] sm:$0xff] }
 0x5b6   : > { %6167 = vmatprep.subr.bf16.mxu1 %v6166_v16  ;;  %v2827_v16 = vld [vmem:[#allocation6 + $0x1550] sm:$0xff] }
 0x5b7   : > { %v6204_v18 = vpack.c.bf16 %v2827_v16, %v2825_v15 }
 0x5b9   : > { %6169 = vmatpush1.bf16.msra.mxu1 %v6168_v22 }
 0x5ba   : > { %6171 = vmatprep.subr.bf16.mxu1 %v6170_v23 }
 0x5bd   : > { %6173 = vmatpush1.bf16.msra.mxu1 %v6172_v28  ;;  %v2832_v28 = vld [vmem:[#allocation6 + $0x1578] sm:$0xff] }
 0x5be   : > { %6175 = vmatprep.subr.bf16.mxu1 %v6174_v30  ;;  %v6206_v30 = vpack.c.bf16 %v2832_v28, %v2830_v27  ;;  %v2936_v28 = vld [vmem:[#allocation6 + $0x1648] sm:$0xff] }
 0x5c1   : > { %6177 = vmatpush1.bf16.msra.mxu1 %v6176_v36  ;;  %v2836_v36 = vld [vmem:[#allocation6 + $0x1598] sm:$0xff] }
 0x5c2   : > { %6179 = vmatprep.subr.bf16.mxu1 %v6178_v37  ;;  %v6210_v37 = vpack.c.bf16 %v2836_v36, %v2834_v35  ;;  %v2935_v35 = vld [vmem:[#allocation6 + $0x1640] sm:$0xff]  ;;  %v2937_v36 = vld [vmem:[#allocation6 + $0x1650] sm:$0xff] }
 0x5c3   : > { %v6236_v39 = vpack.c.bf16 %v2937_v36, %v2935_v35 }
 0x5c5   : > { %6181 = vmatpush1.bf16.msra.mxu1 %v6180_v42  ;;  %v2840_v42 = vld [vmem:[#allocation6 + $0x15b8] sm:$0xff] }
 0x5c6   : > { %6183 = vmatprep.subr.bf16.mxu1 %v6182_v43  ;;  %v2837_v43 = vld [vmem:[#allocation6 + $0x15a0] sm:$0xff] }
 0x687   : > { %v5290_v46 = vpop.f32.mrb[2].mxu1 }
 0x688   : > { %v5291_v47 = vpop.f32.mrb[3].mxu1 }
 0x689   : > { %v5292_v48 = vadd.f32 %v5291_v47, %v5290_v46  ;;  %v2810_v46 = vld [vmem:[#allocation6 + $0x14c8] sm:$0xff]  ;;  %v2812_v47 = vld [vmem:[#allocation6 + $0x14d8] sm:$0xff] }
 0x68b   : > { %5426 = vmatmul.mubr.msk.f32.vlgmr.msra.gmra.mrb[4].mxu0 %vm2498_vm10, %v5292_v48  ;;  %v6184_v48 = vpack.c.bf16 %v2807_v45, %v2805_v44  ;;  %v6214_v44 = vpack.c.bf16 %v2840_v42, %v2838_v41  ;;  %v2839_v45 = vld [vmem:[#allocation6 + $0x15b0] sm:$0xff]  ;;  %v2939_v41 = vld [vmem:[#allocation6 + $0x1660] sm:$0xff] }
 0x68c   : > { %5430 = vmatprep.mubr.msk.f32.mxu0 %vm7375_vm9, %v7373_v1  ;;  %5429 = vmatpush3.msk.msra.mxu0 %vm2579_vm11, %v2573_v49  ;;  %v6186_v49 = vpack.c.bf16 %v2812_v47, %v2810_v46  ;;  %v2842_v46 = vld [vmem:[#allocation6 + $0x15c8] sm:$0xff]  ;;  %v2844_v47 = vld [vmem:[#allocation6 + $0x15d8] sm:$0xff]  ;;  %v2941_v42 = vld [vmem:[#allocation6 + $0x1670] sm:$0xff] }
 0x68d   : > { %6155 = vmatprep.subr.bf16.mxu0 %v6154_v58  ;;  %6185 = vmatpush1.bf16.msra.mxu1 %v6184_v48  ;;  %v2818_v58 = vld [vmem:[#allocation6 + $0x1508] sm:$0xff]  ;;  %v6216_v48 = vpack.c.bf16 %v2839_v45, %v2837_v43  ;;  %v6240_v45 = vpack.c.bf16 %v2941_v42, %v2939_v41 }
 0x68e   : > { %6187 = vmatprep.subr.bf16.mxu1 %v6186_v49  ;;  %v6194_v61 = vpack.c.bf16 %v2820_v59, %v2818_v58  ;;  %v6218_v49 = vpack.c.bf16 %v2844_v47, %v2842_v46  ;;  %v2928_v58 = vld [vmem:[#allocation6 + $0x1608] sm:$0xff]  ;;  %v2930_v59 = vld [vmem:[#allocation6 + $0x1618] sm:$0xff]  ;;  %v2943_v47 = vld [vmem:[#allocation6 + $0x1680] sm:$0xff] }
 0x68f   : > { %v2944_v43 = vld [vmem:[#allocation6 + $0x1688] sm:$0xff] }
 0x75e   : > { %v2568_v51 = vpop.f32.mrb[4].mxu0 }
 0x75f   : > { %v2569_v52 = vadd.f32 %v2568_v51, %v2497_v50  ;;  %v5427_v53 = vpop.f32.mrb[5].mxu0  ;;  %v2809_v50 = vld [vmem:[#allocation6 + $0x14c0] sm:$0xff]  ;;  %v2811_v51 = vld [vmem:[#allocation6 + $0x14d0] sm:$0xff] }
 0x760   : > { %v2816_v53 = vld [vmem:[#allocation6 + $0x14f8] sm:$0xff] }
 0x761   : > { %v2572_v54 = vmax.f32 %v2569_v52, 0.0  ;;  %v2814_v52 = vld [vmem:[#allocation6 + $0x14e8] sm:$0xff] }
 0x762   : > { %v6190_v55 = vpack.c.bf16 %v2816_v53, %v2814_v52  ;;  %v2846_v52 = vld [vmem:[#allocation6 + $0x15e8] sm:$0xff]  ;;  %v2848_v53 = vld [vmem:[#allocation6 + $0x15f8] sm:$0xff] }
 0x763   : > { %5431 = vmatmul.mubr.msk.f32.vlgmr.msra.gmra.mrb[6].mxu0 %vm2575_vm12, %v2572_v54  ;;  %v6188_v54 = vpack.c.bf16 %v2811_v51, %v2809_v50  ;;  %v2841_v50 = vld [vmem:[#allocation6 + $0x15c0] sm:$0xff]  ;;  %v2843_v51 = vld [vmem:[#allocation6 + $0x15d0] sm:$0xff] }
 0x764   : > { %2734 = vmatprep.mubr.f32.mxu0 %v7373_v1  ;;  %6157 = vmatpush1.bf16.msra.mxu0 %v6156_v62  ;;  %v2817_v62 = vld [vmem:[#allocation6 + $0x1500] sm:$0xff] }
 0x765   : > { %6159 = vmatprep.subr.bf16.mxu0 %v6158_v63  ;;  %6189 = vmatpush1.bf16.msra.mxu1 %v6188_v54  ;;  %v2819_v63 = vld [vmem:[#allocation6 + $0x1510] sm:$0xff]  ;;  %v6220_v54 = vpack.c.bf16 %v2843_v51, %v2841_v50  ;;  %v2950_v50 = vld [vmem:[#allocation6 + $0x16b8] sm:$0xff] }
 0x766   : > { %6191 = vmatprep.subr.bf16.mxu1 %v6190_v55  ;;  %v6222_v55 = vpack.c.bf16 %v2848_v53, %v2846_v52  ;;  %v2947_v53 = vld [vmem:[#allocation6 + $0x16a0] sm:$0xff] }
 0x768   : > { %6161 = vmatpush1.bf16.msra.mxu0 %v6160_v5  ;;  %v6196_v5 = vpack.c.bf16 %v2819_v63, %v2817_v62 }
 0x769   : > { %6193 = vmatpush1.bf16.msra.mxu1 %v6192_v60  ;;  %v6224_v60 = vpack.c.bf16 %v2847_v57, %v2845_v56  ;;  %v2954_v56 = vld [vmem:[#allocation6 + $0x16d8] sm:$0xff] }
 0x76a   : > { %6195 = vmatprep.subr.bf16.mxu1 %v6194_v61  ;;  %v6226_v61 = vpack.c.bf16 %v2930_v59, %v2928_v58  ;;  %v2951_v59 = vld [vmem:[#allocation6 + $0x16c0] sm:$0xff] }
 0x76d   : > { %6197 = vmatpush1.bf16.msra.mxu1 %v6196_v5 }
 0x76e   : > { %6199 = vmatprep.subr.bf16.mxu1 %v6198_v6 }
 0x771   : > { %6201 = vmatpush1.bf16.msra.mxu1 %v6200_v13 }
 0x772   : > { %6203 = vmatprep.subr.bf16.mxu1 %v6202_v14 }
 0x775   : > { %6205 = vmatpush1.bf16.msra.mxu1 %v6204_v18 }
 0x776   : > { %6207 = vmatprep.subr.bf16.mxu1 %v6206_v30  ;;  %v2938_v30 = vld [vmem:[#allocation6 + $0x1658] sm:$0xff] }
 0x779   : > { %6209 = vmatpush1.bf16.msra.mxu1 %v6208_v34  ;;  %v6234_v34 = vpack.c.bf16 %v2938_v30, %v2936_v28  ;;  %v2971_v30 = vld [vmem:[#allocation6 + $0x1760] sm:$0xff] }
 0x77a   : > { %6211 = vmatprep.subr.bf16.mxu1 %v6210_v37  ;;  %v2940_v37 = vld [vmem:[#allocation6 + $0x1668] sm:$0xff] }
 0x77d   : > { %6213 = vmatpush1.bf16.msra.mxu1 %v6212_v40  ;;  %v6238_v40 = vpack.c.bf16 %v2942_v38, %v2940_v37  ;;  %v2975_v37 = vld [vmem:[#allocation6 + $0x1780] sm:$0xff]  ;;  %v2977_v38 = vld [vmem:[#allocation6 + $0x1790] sm:$0xff] }
 0x77e   : > { %6215 = vmatprep.subr.bf16.mxu1 %v6214_v44  ;;  %v2946_v44 = vld [vmem:[#allocation6 + $0x1698] sm:$0xff]  ;;  %v6276_v41 = vpack.c.bf16 %v2977_v38, %v2975_v37  ;;  %v3097_v37 = vld [vmem:[#allocation6 + $0x1880] sm:$0xff]  ;;  %v3099_v38 = vld [vmem:[#allocation6 + $0x1890] sm:$0xff] }
 0x77f   : > { %v6242_v46 = vpack.c.bf16 %v2946_v44, %v2944_v43  ;;  %v2979_v43 = vld [vmem:[#allocation6 + $0x17a0] sm:$0xff]  ;;  %v2981_v44 = vld [vmem:[#allocation6 + $0x17b0] sm:$0xff] }
 0x781   : > { %6217 = vmatpush1.bf16.msra.mxu1 %v6216_v48  ;;  %v2945_v48 = vld [vmem:[#allocation6 + $0x1690] sm:$0xff] }
 0x782   : > { %6219 = vmatprep.subr.bf16.mxu1 %v6218_v49  ;;  %v2948_v49 = vld [vmem:[#allocation6 + $0x16a8] sm:$0xff]  ;;  %v6244_v51 = vpack.c.bf16 %v2945_v48, %v2943_v47  ;;  %v6280_v47 = vpack.c.bf16 %v2981_v44, %v2979_v43  ;;  %v3101_v43 = vld [vmem:[#allocation6 + $0x18a0] sm:$0xff]  ;;  %v3103_v44 = vld [vmem:[#allocation6 + $0x18b0] sm:$0xff] }
 0x783   : > { %v6246_v52 = vpack.c.bf16 %v2950_v50, %v2948_v49  ;;  %v2983_v49 = vld [vmem:[#allocation6 + $0x17c0] sm:$0xff]  ;;  %v2985_v50 = vld [vmem:[#allocation6 + $0x17d0] sm:$0xff] }
 0x785   : > { %6221 = vmatpush1.bf16.msra.mxu1 %v6220_v54  ;;  %v2949_v54 = vld [vmem:[#allocation6 + $0x16b0] sm:$0xff] }
 0x786   : > { %6223 = vmatprep.subr.bf16.mxu1 %v6222_v55  ;;  %v2952_v55 = vld [vmem:[#allocation6 + $0x16c8] sm:$0xff]  ;;  %v6248_v57 = vpack.c.bf16 %v2949_v54, %v2947_v53  ;;  %v6284_v53 = vpack.c.bf16 %v2985_v50, %v2983_v49  ;;  %v3105_v49 = vld [vmem:[#allocation6 + $0x18c0] sm:$0xff]  ;;  %v3107_v50 = vld [vmem:[#allocation6 + $0x18d0] sm:$0xff] }
 0x787   : > { %v6250_v58 = vpack.c.bf16 %v2954_v56, %v2952_v55  ;;  %v2987_v55 = vld [vmem:[#allocation6 + $0x17e0] sm:$0xff]  ;;  %v2989_v56 = vld [vmem:[#allocation6 + $0x17f0] sm:$0xff] }
 0x789   : > { %6225 = vmatpush1.bf16.msra.mxu1 %v6224_v60  ;;  %v2953_v60 = vld [vmem:[#allocation6 + $0x16d0] sm:$0xff] }
 0x78a   : > { %6227 = vmatprep.subr.bf16.mxu1 %v6226_v61  ;;  %v2956_v61 = vld [vmem:[#allocation6 + $0x16e8] sm:$0xff] }
 0x836   : > { %v2649_v20 = vpop.f32.mrb[6].mxu0 }
 0x837   : > { %v2650_v21 = vadd.f32 %v2649_v20, %v2574_v19  ;;  %v5432_v22 = vpop.f32.mrb[7].mxu0  ;;  %v2931_v19 = vld [vmem:[#allocation6 + $0x1620] sm:$0xff]  ;;  %v2933_v20 = vld [vmem:[#allocation6 + $0x1630] sm:$0xff] }
 0x838   : > { %v6232_v33 = vpack.c.bf16 %v2933_v20, %v2931_v19  ;;  %v2968_v19 = vld [vmem:[#allocation6 + $0x1748] sm:$0xff]  ;;  %v2970_v20 = vld [vmem:[#allocation6 + $0x1758] sm:$0xff] }
 0x839   : > { %v5242_v23 = vmul.f32 -1.442695, %v2650_v21 }
 0x83b   : > { %7067 = vpow2.f32 %v5242_v23 }
 0x845   : > { %v7068_v24 = vpop.eup %7067 }
 0x846   : > { %v2656_v25 = vadd.f32 1.0, %v7068_v24 }
 0x848   : > { %7069 = vrcp.f32 %v2656_v25 }
 0x852   : > { %v7070_v26 = vpop.eup %7069 }
 0x853   : > { %5243 = vmatmul.mubr.msk.f32.vlgmr.msra.gmra.mrb[8].mxu0 %vm2498_vm10, %v7070_v26 }
 0x926   : > { %v2736_v62 = vpop.f32.mrb[8].mxu0 }
 0x927   : > { %v2744_v63 = vrot.slane %v2736_v62, %v7743_v2  ;;  %v2738_v0 = vpop.f32.mrb[9].mxu0  ;;  %v2958_v62 = vld [vmem:[#allocation6 + $0x16f8] sm:$0xff] }
 0x928   : > { %v2748_v3 = vrot.slane %v2738_v0, %v7743_v2  ;;  %v6254_v0 = vpack.c.bf16 %v2958_v62, %v2956_v61  ;;  %v6288_v61 = vpack.c.bf16 %v2989_v56, %v2987_v55  ;;  %v3109_v55 = vld [vmem:[#allocation6 + $0x18e0] sm:$0xff]  ;;  %v3111_v56 = vld [vmem:[#allocation6 + $0x18f0] sm:$0xff] }
 0x929   : > { %v2749_v5 = vmul.f32 %v2744_v63, %v7879_v29  ;;  %v2927_v29 = vld [vmem:[#allocation6 + $0x1600] sm:$0xff]  ;;  %v6252_v63 = vpack.c.bf16 %v2953_v60, %v2951_v59 }
 0x92a   : > { %v2750_v6 = vmul.f32 %v2748_v3, %v7882_v31  ;;  %v2932_v31 = vld [vmem:[#allocation6 + $0x1628] sm:$0xff]  ;;  %v2955_v3 = vld [vmem:[#allocation6 + $0x16e0] sm:$0xff] }
 0x92b   : > { %v2751_v7 = vadd.f32 %v2749_v5, %v7749_v8  ;;  %v2929_v8 = vld [vmem:[#allocation6 + $0x1610] sm:$0xff] }
 0x92c   : > { %v2752_v9 = vadd.f32 %v2750_v6, %v7751_v10  ;;  %v2934_v10 = vld [vmem:[#allocation6 + $0x1638] sm:$0xff]  ;;  %v6228_v18 = vpack.c.bf16 %v2929_v8, %v2927_v29  ;;  %v2957_v5 = vld [vmem:[#allocation6 + $0x16f0] sm:$0xff]  ;;  %v2960_v6 = vld [vmem:[#allocation6 + $0x1708] sm:$0xff] }
 0x92d   : > { %vm2753_vm13 = vcmp.gt.f32.partialorder %v2751_v7, 0.0  ;;  %v2755_v11 = vmul.f32 0.01, %v2751_v7  ;;  %v6230_v24 = vpack.c.bf16 %v2934_v10, %v2932_v31  ;;  %v2966_v29 = vld [vmem:[#allocation6 + $0x1738] sm:$0xff]  ;;  %v2963_v10 = vld [vmem:[#allocation6 + $0x1720] sm:$0xff] }
 0x92e   : > { %vm2754_vm14 = vcmp.gt.f32.partialorder %v2752_v9, 0.0  ;;  %v2756_v12 = vmul.f32 0.01, %v2752_v9 }
 0x92f   : > { %v7909_v13 = vsel %vm2753_vm13, %v2751_v7, %v2755_v11  ;;  %v2962_v7 = vld [vmem:[#allocation6 + $0x1718] sm:$0xff] }
 0x930   : > { %v2761_v14 = vrot.slane %v7909_v13, 6  ;;  %v7912_v15 = vsel %vm2754_vm14, %v2752_v9, %v2756_v12  ;;  %v6256_v9 = vpack.c.bf16 %v2957_v5, %v2955_v3  ;;  %v6258_v11 = vpack.c.bf16 %v2962_v7, %v2960_v6  ;;  %v2959_v12 = vld [vmem:[#allocation6 + $0x1700] sm:$0xff]  ;;  %v3083_v5 = vld [vmem:[#allocation6 + $0x1810] sm:$0xff] }
 0x931   : > { %v2762_v16 = vrot.slane %v7912_v15, 6  ;;  %v3081_v3 = vld [vmem:[#allocation6 + $0x1800] sm:$0xff] }
 0x932   : > { %2765 = vst [vmem:[#allocation2] sm:$0xfc] %v2761_v14  ;;  %2767 = vst [vmem:[#allocation2 + $0x10] sm:$0x3] %v2761_v14  ;;  %v2961_v14 = vld [vmem:[#allocation6 + $0x1710] sm:$0xff] }
 0x933   : > { %2766 = vst [vmem:[#allocation2 + $0x8] sm:$0xfc] %v2762_v16  ;;  %2768 = vst [vmem:[#allocation2 + $0x18] sm:$0x3] %v2762_v16  ;;  %v2964_v16 = vld [vmem:[#allocation6 + $0x1728] sm:$0xff]  ;;  %v6260_v8 = vpack.c.bf16 %v2961_v14, %v2959_v12 }
 0x934   : > { %v6262_v31 = vpack.c.bf16 %v2966_v29, %v2964_v16  ;;  %v6292_v16 = vpack.c.bf16 %v3083_v5, %v3081_v3 }
 0x939   : > { %v2782_v25 = vld [vmem:[#allocation2] sm:$0xff]  ;;  %v2924_v60 = vld [vmem:[#allocation2 + $0x10] sm:$0x1] }
 0x93a   : > { %v2783_v21 = vld [vmem:[#allocation2 + $0x8] sm:$0xff]  ;;  %v2925_v23 = vld [vmem:[#allocation2 + $0x18] sm:$0x1]  ;;  %v2922_v59 = vld [vmem:[#allocation2] sm:$0xfe]  ;;  %v2996_v7 = vrot.slane %v2924_v60, 1 }
 0x93b   : > { %v2923_v22 = vld [vmem:[#allocation2 + $0x8] sm:$0xfe]  ;;  %2913 = vmatprep.mubr.f32.mxu1 %v2783_v21  ;;  %v2999_v27 = vrot.slane %v2925_v23, 1  ;;  %v2967_v23 = vld [vmem:[#allocation6 + $0x1740] sm:$0xff]  ;;  %v2995_v6 = vrot.slane %v2922_v59, 1  ;;  %v6320_v59 = vpack.c.bf16 %v3111_v56, %v3109_v55  ;;  %v3237_v56 = vld [vmem:[#allocation6 + $0x1a10] sm:$0xff] }
 0x93c   : > { %v2998_v26 = vrot.slane %v2923_v22, 1  ;;  %2914 = vmatmul.mubr.f32.vlgmr.msra.gmra.mrb[4].mxu1 %v2782_v25  ;;  %v6266_v22 = vpack.c.bf16 %v2970_v20, %v2968_v19  ;;  %v2972_v25 = vld [vmem:[#allocation6 + $0x1768] sm:$0xff]  ;;  %v3092_v19 = vld [vmem:[#allocation6 + $0x1858] sm:$0xff]  ;;  %v3235_v55 = vld [vmem:[#allocation6 + $0x1a00] sm:$0xff] }
 0x93d   : > { %6229 = vmatpush1.bf16.msra.mxu1 %v6228_v18  ;;  %v2965_v18 = vld [vmem:[#allocation6 + $0x1730] sm:$0xff]  ;;  %v3077_v62 = vld [vmem:[#allocation2 + $0x8] sm:$0xfc] }
 0x93e   : > { %v3000_v32 = vsel %vm1041_vm1, %v2998_v26, %v2999_v27  ;;  %6231 = vmatprep.subr.bf16.mxu1 %v6230_v24  ;;  %v6264_v21 = vpack.c.bf16 %v2965_v18, %v2963_v10  ;;  %v2969_v24 = vld [vmem:[#allocation6 + $0x1750] sm:$0xff]  ;;  %v2974_v26 = vld [vmem:[#allocation6 + $0x1778] sm:$0xff]  ;;  %v3152_v12 = vrot.slane %v3077_v62, 2  ;;  %v2997_v10 = vsel %vm1041_vm1, %v2995_v6, %v2996_v7  ;;  %v3090_v18 = vld [vmem:[#allocation6 + $0x1848] sm:$0xff] }
 0x93f   : > { %3067 = vmatprep.mubr.f32.mxu1 %v3000_v32  ;;  %v6268_v27 = vpack.c.bf16 %v2969_v24, %v2967_v23  ;;  %v6270_v28 = vpack.c.bf16 %v2974_v26, %v2972_v25  ;;  %v2973_v32 = vld [vmem:[#allocation6 + $0x1770] sm:$0xff]  ;;  %v3089_v23 = vld [vmem:[#allocation6 + $0x1840] sm:$0xff]  ;;  %v3094_v25 = vld [vmem:[#allocation6 + $0x1868] sm:$0xff] }
 0x940   : > { %v6272_v35 = vpack.c.bf16 %v2973_v32, %v2971_v30  ;;  %v3091_v24 = vld [vmem:[#allocation6 + $0x1850] sm:$0xff]  ;;  %v3096_v26 = vld [vmem:[#allocation6 + $0x1878] sm:$0xff]  ;;  %v3093_v30 = vld [vmem:[#allocation6 + $0x1860] sm:$0xff] }
 0x941   : > { %6233 = vmatpush1.bf16.msra.mxu1 %v6232_v33  ;;  %v2976_v33 = vld [vmem:[#allocation6 + $0x1788] sm:$0xff]  ;;  %v3095_v32 = vld [vmem:[#allocation6 + $0x1870] sm:$0xff]  ;;  %v3117_v6 = vld [vmem:[#allocation6 + $0x1920] sm:$0xff] }
 0x942   : > { %6235 = vmatprep.subr.bf16.mxu1 %v6234_v34  ;;  %v2978_v34 = vld [vmem:[#allocation6 + $0x1798] sm:$0xff]  ;;  %v3115_v62 = vld [vmem:[#allocation6 + $0x1910] sm:$0xff] }
 0x943   : > { %v6274_v36 = vpack.c.bf16 %v2978_v34, %v2976_v33  ;;  %v3098_v33 = vld [vmem:[#allocation6 + $0x1888] sm:$0xff]  ;;  %v3100_v34 = vld [vmem:[#allocation6 + $0x1898] sm:$0xff]  ;;  %v3119_v7 = vld [vmem:[#allocation6 + $0x1930] sm:$0xff] }
 0x945   : > { %6237 = vmatpush1.bf16.msra.mxu1 %v6236_v39  ;;  %v2980_v39 = vld [vmem:[#allocation6 + $0x17a8] sm:$0xff] }
 0x946   : > { %6239 = vmatprep.subr.bf16.mxu1 %v6238_v40  ;;  %v2982_v40 = vld [vmem:[#allocation6 + $0x17b8] sm:$0xff] }
 0x947   : > { %v6278_v42 = vpack.c.bf16 %v2982_v40, %v2980_v39  ;;  %v3102_v39 = vld [vmem:[#allocation6 + $0x18a8] sm:$0xff]  ;;  %v3104_v40 = vld [vmem:[#allocation6 + $0x18b8] sm:$0xff] }
 0x949   : > { %6241 = vmatpush1.bf16.msra.mxu1 %v6240_v45  ;;  %v2984_v45 = vld [vmem:[#allocation6 + $0x17c8] sm:$0xff] }
 0x94a   : > { %6243 = vmatprep.subr.bf16.mxu1 %v6242_v46  ;;  %v2986_v46 = vld [vmem:[#allocation6 + $0x17d8] sm:$0xff] }
 0x94b   : > { %v6282_v48 = vpack.c.bf16 %v2986_v46, %v2984_v45  ;;  %v3106_v45 = vld [vmem:[#allocation6 + $0x18c8] sm:$0xff]  ;;  %v3108_v46 = vld [vmem:[#allocation6 + $0x18d8] sm:$0xff] }
 0x94d   : > { %6245 = vmatpush1.bf16.msra.mxu1 %v6244_v51  ;;  %v2988_v51 = vld [vmem:[#allocation6 + $0x17e8] sm:$0xff] }
 0x94e   : > { %6247 = vmatprep.subr.bf16.mxu1 %v6246_v52  ;;  %v2990_v52 = vld [vmem:[#allocation6 + $0x17f8] sm:$0xff] }
 0x94f   : > { %v6286_v54 = vpack.c.bf16 %v2990_v52, %v2988_v51  ;;  %v3110_v51 = vld [vmem:[#allocation6 + $0x18e8] sm:$0xff]  ;;  %v3112_v52 = vld [vmem:[#allocation6 + $0x18f8] sm:$0xff] }
 0x951   : > { %6249 = vmatpush1.bf16.msra.mxu1 %v6248_v57  ;;  %v3082_v57 = vld [vmem:[#allocation6 + $0x1808] sm:$0xff] }
 0x952   : > { %6251 = vmatprep.subr.bf16.mxu1 %v6250_v58  ;;  %v3084_v58 = vld [vmem:[#allocation6 + $0x1818] sm:$0xff] }
 0x955   : > { %6253 = vmatpush1.bf16.msra.mxu1 %v6252_v63  ;;  %v3079_v63 = vld [vmem:[#allocation2 + $0x18] sm:$0x3] }
 0x956   : > { %6255 = vmatprep.subr.bf16.mxu1 %v6254_v0  ;;  %v6290_v0 = vpack.c.bf16 %v3084_v58, %v3082_v57  ;;  %v3153_v14 = vrot.slane %v3079_v63, 2  ;;  %v3114_v57 = vld [vmem:[#allocation6 + $0x1908] sm:$0xff]  ;;  %v3116_v58 = vld [vmem:[#allocation6 + $0x1918] sm:$0xff] }
 0x957   : > { %v6322_v60 = vpack.c.bf16 %v3116_v58, %v3114_v57  ;;  %v3118_v63 = vld [vmem:[#allocation6 + $0x1928] sm:$0xff] }
 0x958   : > { %v3154_v20 = vsel %vm1196_vm2, %v3152_v12, %v3153_v14  ;;  %v6328_v12 = vpack.c.bf16 %v3119_v7, %v3117_v6  ;;  %v3244_v7 = vld [vmem:[#allocation6 + $0x1a48] sm:$0xff] }
 0x959   : > { %6257 = vmatpush1.bf16.msra.mxu1 %v6256_v9  ;;  %v3086_v9 = vld [vmem:[#allocation6 + $0x1828] sm:$0xff] }
 0x95a   : > { %6259 = vmatprep.subr.bf16.mxu1 %v6258_v11  ;;  %v3088_v11 = vld [vmem:[#allocation6 + $0x1838] sm:$0xff] }
 0x95b   : > { %v6294_v29 = vpack.c.bf16 %v3088_v11, %v3086_v9  ;;  %v3122_v9 = vld [vmem:[#allocation6 + $0x1948] sm:$0xff]  ;;  %v3124_v11 = vld [vmem:[#allocation6 + $0x1958] sm:$0xff] }
 0x95c   : > { %v6330_v14 = vpack.c.bf16 %v3124_v11, %v3122_v9  ;;  %v3246_v9 = vld [vmem:[#allocation6 + $0x1a58] sm:$0xff] }
 0x95d   : > { %6261 = vmatpush1.bf16.msra.mxu1 %v6260_v8  ;;  %v3085_v8 = vld [vmem:[#allocation6 + $0x1820] sm:$0xff] }
 0x95e   : > { %6263 = vmatprep.subr.bf16.mxu1 %v6262_v31  ;;  %v3087_v31 = vld [vmem:[#allocation6 + $0x1830] sm:$0xff] }
 0x961   : > { %6265 = vmatpush1.bf16.msra.mxu1 %v6264_v21  ;;  %v6296_v21 = vpack.c.bf16 %v3087_v31, %v3085_v8  ;;  %v3126_v8 = vld [vmem:[#allocation6 + $0x1968] sm:$0xff]  ;;  %v3128_v31 = vld [vmem:[#allocation6 + $0x1978] sm:$0xff] }
 0x962   : > { %6267 = vmatprep.subr.bf16.mxu1 %v6266_v22  ;;  %v6298_v22 = vpack.c.bf16 %v3092_v19, %v3090_v18  ;;  %v6334_v18 = vpack.c.bf16 %v3128_v31, %v3126_v8  ;;  %v3125_v19 = vld [vmem:[#allocation6 + $0x1960] sm:$0xff] }
 0x963   : > { %v3570_v8 = vld [vmem:[#allocation6 + $0x1e00] sm:$0xff] }
 0x965   : > { %6269 = vmatpush1.bf16.msra.mxu1 %v6268_v27  ;;  %v6300_v27 = vpack.c.bf16 %v3091_v24, %v3089_v23 }
 0x966   : > { %6271 = vmatprep.subr.bf16.mxu1 %v6270_v28  ;;  %v6302_v28 = vpack.c.bf16 %v3096_v26, %v3094_v25  ;;  %v3129_v25 = vld [vmem:[#allocation6 + $0x1980] sm:$0xff]  ;;  %v3131_v26 = vld [vmem:[#allocation6 + $0x1990] sm:$0xff] }
 0x969   : > { %6273 = vmatpush1.bf16.msra.mxu1 %v6272_v35  ;;  %v6304_v35 = vpack.c.bf16 %v3095_v32, %v3093_v30  ;;  %v6340_v30 = vpack.c.bf16 %v3131_v26, %v3129_v25  ;;  %v3576_v25 = vld [vmem:[#allocation6 + $0x1e30] sm:$0xff]  ;;  %v3579_v26 = vld [vmem:[#allocation6 + $0x1e48] sm:$0xff] }
 0x96a   : > { %6275 = vmatprep.subr.bf16.mxu1 %v6274_v36  ;;  %v6306_v36 = vpack.c.bf16 %v3100_v34, %v3098_v33  ;;  %v3133_v33 = vld [vmem:[#allocation6 + $0x19a0] sm:$0xff]  ;;  %v3135_v34 = vld [vmem:[#allocation6 + $0x19b0] sm:$0xff] }
 0x96d   : > { %6277 = vmatpush1.bf16.msra.mxu1 %v6276_v41  ;;  %v6308_v41 = vpack.c.bf16 %v3099_v38, %v3097_v37  ;;  %v6344_v37 = vpack.c.bf16 %v3135_v34, %v3133_v33  ;;  %v3247_v34 = vld [vmem:[#allocation6 + $0x1a60] sm:$0xff] }
 0x96e   : > { %6279 = vmatprep.subr.bf16.mxu1 %v6278_v42  ;;  %v6310_v42 = vpack.c.bf16 %v3104_v40, %v3102_v39  ;;  %v3137_v39 = vld [vmem:[#allocation6 + $0x19c0] sm:$0xff]  ;;  %v3139_v40 = vld [vmem:[#allocation6 + $0x19d0] sm:$0xff] }
 0x971   : > { %6281 = vmatpush1.bf16.msra.mxu1 %v6280_v47  ;;  %v6312_v47 = vpack.c.bf16 %v3103_v44, %v3101_v43  ;;  %v6348_v43 = vpack.c.bf16 %v3139_v40, %v3137_v39  ;;  %v3249_v39 = vld [vmem:[#allocation6 + $0x1a70] sm:$0xff]  ;;  %v3583_v40 = vld [vmem:[#allocation6 + $0x1e68] sm:$0xff] }
 0x972   : > { %6283 = vmatprep.subr.bf16.mxu1 %v6282_v48  ;;  %v6314_v48 = vpack.c.bf16 %v3108_v46, %v3106_v45  ;;  %v3141_v45 = vld [vmem:[#allocation6 + $0x19e0] sm:$0xff]  ;;  %v3143_v46 = vld [vmem:[#allocation6 + $0x19f0] sm:$0xff] }
 0x975   : > { %6285 = vmatpush1.bf16.msra.mxu1 %v6284_v53  ;;  %v6316_v53 = vpack.c.bf16 %v3107_v50, %v3105_v49  ;;  %v3076_v49 = vld [vmem:[#allocation2] sm:$0xfc]  ;;  %v3078_v50 = vld [vmem:[#allocation2 + $0x10] sm:$0x3] }
 0x976   : > { %6287 = vmatprep.subr.bf16.mxu1 %v6286_v54  ;;  %v6318_v54 = vpack.c.bf16 %v3112_v52, %v3110_v51  ;;  %v6352_v51 = vpack.c.bf16 %v3143_v46, %v3141_v45  ;;  %v3231_v52 = vld [vmem:[#allocation2 + $0x8] sm:$0xf8]  ;;  %v3149_v57 = vrot.slane %v3076_v49, 2  ;;  %v3150_v58 = vrot.slane %v3078_v50, 2  ;;  %v3251_v46 = vld [vmem:[#allocation6 + $0x1a80] sm:$0xff]  ;;  %v3584_v49 = vld [vmem:[#allocation6 + $0x1e70] sm:$0xff] }
 0x977   : > { %v6368_v45 = vpack.c.bf16 %v3249_v39, %v3247_v34  ;;  %v3600_v39 = vld [vmem:[#allocation6 + $0x1ef0] sm:$0xff] }
 0x978   : > { %v3151_v6 = vsel %vm1196_vm2, %v3149_v57, %v3150_v58  ;;  %v3255_v58 = vld [vmem:[#allocation6 + $0x1aa0] sm:$0xff] }
 0x979   : > { %6289 = vmatpush1.bf16.msra.mxu1 %v6288_v61  ;;  %v3113_v61 = vld [vmem:[#allocation6 + $0x1900] sm:$0xff] }
 0x97a   : > { %6291 = vmatprep.subr.bf16.mxu1 %v6290_v0  ;;  %v3120_v0 = vld [vmem:[#allocation6 + $0x1938] sm:$0xff]  ;;  %v6324_v3 = vpack.c.bf16 %v3115_v62, %v3113_v61  ;;  %v3306_v61 = vrot.slane %v3231_v52, 3  ;;  %v3587_v52 = vld [vmem:[#allocation6 + $0x1e88] sm:$0xff] }
 0x97b   : > { %v6326_v5 = vpack.c.bf16 %v3120_v0, %v3118_v63  ;;  %v6356_v63 = vpack.c.bf16 %v3237_v56, %v3235_v55  ;;  %v3258_v55 = vld [vmem:[#allocation6 + $0x1ab8] sm:$0xff] }
 0x97c   : > { %3068 = vmatmul.mubr.f32.vlgmr.msra.gmra.mrb[4].mxu1 %v2997_v10 }
 0x97d   : > { %6293 = vmatpush1.bf16.msra.mxu1 %v6292_v16  ;;  %3221 = vmatprep.mubr.f32.mxu1 %v3154_v20  ;;  %v3121_v16 = vld [vmem:[#allocation6 + $0x1940] sm:$0xff]  ;;  %v3127_v20 = vld [vmem:[#allocation6 + $0x1970] sm:$0xff] }
 0x97e   : > { %6295 = vmatprep.subr.bf16.mxu1 %v6294_v29  ;;  %v3123_v29 = vld [vmem:[#allocation6 + $0x1950] sm:$0xff]  ;;  %v6336_v23 = vpack.c.bf16 %v3127_v20, %v3125_v19  ;;  %v3575_v19 = vld [vmem:[#allocation6 + $0x1e28] sm:$0xff]  ;;  %v3577_v20 = vld [vmem:[#allocation6 + $0x1e38] sm:$0xff] }
 0x97f   : > { %v6332_v10 = vpack.c.bf16 %v3123_v29, %v3121_v16  ;;  %v3571_v16 = vld [vmem:[#allocation6 + $0x1e08] sm:$0xff]  ;;  %v3573_v29 = vld [vmem:[#allocation6 + $0x1e18] sm:$0xff] }
 0x981   : > { %6297 = vmatpush1.bf16.msra.mxu1 %v6296_v21  ;;  %v3130_v21 = vld [vmem:[#allocation6 + $0x1988] sm:$0xff] }
 0x982   : > { %6299 = vmatprep.subr.bf16.mxu1 %v6298_v22  ;;  %v3132_v22 = vld [vmem:[#allocation6 + $0x1998] sm:$0xff] }
 0x983   : > { %v6338_v24 = vpack.c.bf16 %v3132_v22, %v3130_v21  ;;  %v6362_v21 = vpack.c.bf16 %v3246_v9, %v3244_v7 }
 0x985   : > { %6301 = vmatpush1.bf16.msra.mxu1 %v6300_v27  ;;  %v3134_v27 = vld [vmem:[#allocation6 + $0x19a8] sm:$0xff] }
 0x986   : > { %6303 = vmatprep.subr.bf16.mxu1 %v6302_v28  ;;  %v3136_v28 = vld [vmem:[#allocation6 + $0x19b8] sm:$0xff] }
 0x987   : > { %v6342_v32 = vpack.c.bf16 %v3136_v28, %v3134_v27  ;;  %v3248_v27 = vld [vmem:[#allocation6 + $0x1a68] sm:$0xff]  ;;  %v3250_v28 = vld [vmem:[#allocation6 + $0x1a78] sm:$0xff] }
 0x989   : > { %6305 = vmatpush1.bf16.msra.mxu1 %v6304_v35  ;;  %v3138_v35 = vld [vmem:[#allocation6 + $0x19c8] sm:$0xff] }
 0x98a   : > { %6307 = vmatprep.subr.bf16.mxu1 %v6306_v36  ;;  %v3140_v36 = vld [vmem:[#allocation6 + $0x19d8] sm:$0xff] }
 0x98b   : > { %v6346_v38 = vpack.c.bf16 %v3140_v36, %v3138_v35  ;;  %v3578_v36 = vld [vmem:[#allocation6 + $0x1e40] sm:$0xff] }
 0x98d   : > { %6309 = vmatpush1.bf16.msra.mxu1 %v6308_v41  ;;  %v3142_v41 = vld [vmem:[#allocation6 + $0x19e8] sm:$0xff] }
 0x98e   : > { %6311 = vmatprep.subr.bf16.mxu1 %v6310_v42  ;;  %v3144_v42 = vld [vmem:[#allocation6 + $0x19f8] sm:$0xff] }
 0x98f   : > { %v6350_v44 = vpack.c.bf16 %v3144_v42, %v3142_v41  ;;  %v3585_v41 = vld [vmem:[#allocation6 + $0x1e78] sm:$0xff]  ;;  %v3252_v42 = vld [vmem:[#allocation6 + $0x1a88] sm:$0xff] }
 0x991   : > { %6313 = vmatpush1.bf16.msra.mxu1 %v6312_v47  ;;  %v3236_v47 = vld [vmem:[#allocation6 + $0x1a08] sm:$0xff] }
 0x992   : > { %6315 = vmatprep.subr.bf16.mxu1 %v6314_v48  ;;  %v3238_v48 = vld [vmem:[#allocation6 + $0x1a18] sm:$0xff] }
 0x995   : > { %6317 = vmatpush1.bf16.msra.mxu1 %v6316_v53  ;;  %v3233_v53 = vld [vmem:[#allocation2 + $0x18] sm:$0x7] }
 0x996   : > { %6319 = vmatprep.subr.bf16.mxu1 %v6318_v54  ;;  %v6354_v54 = vpack.c.bf16 %v3238_v48, %v3236_v47  ;;  %v3307_v62 = vrot.slane %v3233_v53, 3  ;;  %v6494_v47 = vpack.c.bf16 %v3585_v41, %v3583_v40  ;;  %v3582_v48 = vld [vmem:[#allocation6 + $0x1e60] sm:$0xff]  ;;  %v3589_v53 = vld [vmem:[#allocation6 + $0x1e98] sm:$0xff]  ;;  %v3269_v41 = vld [vmem:[#allocation6 + $0x1b10] sm:$0xff] }
 0x997   : > { %v6496_v56 = vpack.c.bf16 %v3584_v49, %v3582_v48  ;;  %v3271_v48 = vld [vmem:[#allocation6 + $0x1b20] sm:$0xff] }
 0x998   : > { %v3308_v11 = vsel %vm1351_vm3, %v3306_v61, %v3307_v62  ;;  %v3588_v61 = vld [vmem:[#allocation6 + $0x1e90] sm:$0xff] }
 0x999   : > { %6321 = vmatpush1.bf16.msra.mxu1 %v6320_v59  ;;  %v3240_v59 = vld [vmem:[#allocation6 + $0x1a28] sm:$0xff] }
 0x99a   : > { %6323 = vmatprep.subr.bf16.mxu1 %v6322_v60  ;;  %v3242_v60 = vld [vmem:[#allocation6 + $0x1a38] sm:$0xff] }
 0x99b   : > { %v6358_v0 = vpack.c.bf16 %v3242_v60, %v3240_v59  ;;  %v6498_v59 = vpack.c.bf16 %v3589_v53, %v3587_v52  ;;  %v3586_v60 = vld [vmem:[#allocation6 + $0x1e80] sm:$0xff]  ;;  %v3273_v53 = vld [vmem:[#allocation6 + $0x1b30] sm:$0xff] }
 0x99c   : > { %v6500_v7 = vpack.c.bf16 %v3588_v61, %v3586_v60  ;;  %v3275_v60 = vld [vmem:[#allocation6 + $0x1b40] sm:$0xff] }
 0x99d   : > { %6325 = vmatpush1.bf16.msra.mxu1 %v6324_v3  ;;  %v3239_v3 = vld [vmem:[#allocation6 + $0x1a20] sm:$0xff] }
 0x99e   : > { %6327 = vmatprep.subr.bf16.mxu1 %v6326_v5  ;;  %v3241_v5 = vld [vmem:[#allocation6 + $0x1a30] sm:$0xff] }
 0x99f   : > { %v6360_v31 = vpack.c.bf16 %v3241_v5, %v3239_v3  ;;  %v3593_v3 = vld [vmem:[#allocation6 + $0x1eb8] sm:$0xff]  ;;  %v3260_v5 = vld [vmem:[#allocation6 + $0x1ac8] sm:$0xff] }
 0x9a1   : > { %6329 = vmatpush1.bf16.msra.mxu1 %v6328_v12  ;;  %v3243_v12 = vld [vmem:[#allocation6 + $0x1a40] sm:$0xff] }
 0x9a2   : > { %6331 = vmatprep.subr.bf16.mxu1 %v6330_v14  ;;  %v3245_v14 = vld [vmem:[#allocation6 + $0x1a50] sm:$0xff] }
 0x9a3   : > { %v6364_v33 = vpack.c.bf16 %v3245_v14, %v3243_v12  ;;  %v3590_v14 = vld [vmem:[#allocation6 + $0x1ea0] sm:$0xff] }
 0x9a5   : > { %6333 = vmatpush1.bf16.msra.mxu1 %v6332_v10  ;;  %v6482_v10 = vpack.c.bf16 %v3573_v29, %v3571_v16  ;;  %v3592_v16 = vld [vmem:[#allocation6 + $0x1eb0] sm:$0xff] }
 0x9a6   : > { %6335 = vmatprep.subr.bf16.mxu1 %v6334_v18  ;;  %v3572_v18 = vld [vmem:[#allocation6 + $0x1e10] sm:$0xff] }
 0x9a7   : > { %v6484_v22 = vpack.c.bf16 %v3572_v18, %v3570_v8  ;;  %6483 = vmatprep.subr.bf16.mxu0 %v6482_v10  ;;  %v3261_v8 = vld [vmem:[#allocation6 + $0x1ad0] sm:$0xff]  ;;  %v3597_v10 = vld [vmem:[#allocation6 + $0x1ed8] sm:$0xff]  ;;  %v3264_v18 = vld [vmem:[#allocation6 + $0x1ae8] sm:$0xff] }
 0x9a9   : > { %6337 = vmatpush1.bf16.msra.mxu1 %v6336_v23  ;;  %v6486_v23 = vpack.c.bf16 %v3577_v20, %v3575_v19  ;;  %6485 = vmatpush1.bf16.msra.mxu0 %v6484_v22  ;;  %v3266_v19 = vld [vmem:[#allocation6 + $0x1af8] sm:$0xff]  ;;  %v6504_v20 = vpack.c.bf16 %v3592_v16, %v3590_v14  ;;  %v3263_v22 = vld [vmem:[#allocation6 + $0x1ae0] sm:$0xff] }
 0x9aa   : > { %6339 = vmatprep.subr.bf16.mxu1 %v6338_v24  ;;  %v3574_v24 = vld [vmem:[#allocation6 + $0x1e20] sm:$0xff] }
 0x9ab   : > { %6487 = vmatprep.subr.bf16.mxu0 %v6486_v23  ;;  %v3279_v14 = vld [vmem:[#allocation6 + $0x1b60] sm:$0xff] }
 0x9ad   : > { %6341 = vmatpush1.bf16.msra.mxu1 %v6340_v30  ;;  %v3581_v30 = vld [vmem:[#allocation6 + $0x1e58] sm:$0xff] }
 0x9ae   : > { %6343 = vmatprep.subr.bf16.mxu1 %v6342_v32  ;;  %v6488_v32 = vpack.c.bf16 %v3576_v25, %v3574_v24  ;;  %v6490_v35 = vpack.c.bf16 %v3581_v30, %v3579_v26  ;;  %v3594_v24 = vld [vmem:[#allocation6 + $0x1ec0] sm:$0xff]  ;;  %v3596_v25 = vld [vmem:[#allocation6 + $0x1ed0] sm:$0xff]  ;;  %v6382_v26 = vpack.c.bf16 %v3266_v19, %v3264_v18  ;;  %v3601_v30 = vld [vmem:[#allocation6 + $0x1ef8] sm:$0xff] }
 0x9af   : > { %v6508_v34 = vpack.c.bf16 %v3596_v25, %v3594_v24  ;;  %v3615_v18 = vld [vmem:[#allocation6 + $0x1f68] sm:$0xff]  ;;  %v3617_v19 = vld [vmem:[#allocation6 + $0x1f78] sm:$0xff]  ;;  %v3614_v25 = vld [vmem:[#allocation6 + $0x1f60] sm:$0xff] }
 0x9b0   : > { %6489 = vmatpush1.bf16.msra.mxu0 %v6488_v32  ;;  %v3268_v32 = vld [vmem:[#allocation6 + $0x1b08] sm:$0xff]  ;;  %v6526_v24 = vpack.c.bf16 %v3617_v19, %v3615_v18  ;;  %v3399_v18 = vld [vmem:[#allocation6 + $0x1c50] sm:$0xff] }
 0x9b1   : > { %6345 = vmatpush1.bf16.msra.mxu1 %v6344_v37  ;;  %v3580_v37 = vld [vmem:[#allocation6 + $0x1e50] sm:$0xff]  ;;  %6491 = vmatprep.subr.bf16.mxu0 %v6490_v35  ;;  %v3402_v19 = vld [vmem:[#allocation6 + $0x1c68] sm:$0xff] }
 0x9b2   : > { %6347 = vmatprep.subr.bf16.mxu1 %v6346_v38  ;;  %v6366_v38 = vpack.c.bf16 %v3250_v28, %v3248_v27  ;;  %v3265_v27 = vld [vmem:[#allocation6 + $0x1af0] sm:$0xff]  ;;  %v3599_v28 = vld [vmem:[#allocation6 + $0x1ee8] sm:$0xff] }
 0x9b3   : > { %v6384_v35 = vpack.c.bf16 %v3265_v27, %v3263_v22 }
 0x9b5   : > { %6349 = vmatpush1.bf16.msra.mxu1 %v6348_v43  ;;  %v3254_v43 = vld [vmem:[#allocation6 + $0x1a98] sm:$0xff] }
 0x9b6   : > { %6351 = vmatprep.subr.bf16.mxu1 %v6350_v44  ;;  %v6492_v44 = vpack.c.bf16 %v3580_v37, %v3578_v36  ;;  %v6370_v50 = vpack.c.bf16 %v3254_v43, %v3252_v42  ;;  %v3267_v36 = vld [vmem:[#allocation6 + $0x1b00] sm:$0xff]  ;;  %v6510_v37 = vpack.c.bf16 %v3601_v30, %v3599_v28  ;;  %v3603_v42 = vld [vmem:[#allocation6 + $0x1f08] sm:$0xff]  ;;  %v3605_v43 = vld [vmem:[#allocation6 + $0x1f18] sm:$0xff] }
 0x9b7   : > { %v6514_v49 = vpack.c.bf16 %v3605_v43, %v3603_v42  ;;  %v3283_v28 = vld [vmem:[#allocation6 + $0x1b80] sm:$0xff]  ;;  %v3285_v30 = vld [vmem:[#allocation6 + $0x1b90] sm:$0xff] }
 0x9b8   : > { %6493 = vmatpush1.bf16.msra.mxu0 %v6492_v44  ;;  %v3272_v44 = vld [vmem:[#allocation6 + $0x1b28] sm:$0xff]  ;;  %v3291_v43 = vld [vmem:[#allocation6 + $0x1bc0] sm:$0xff] }
 0x9b9   : > { %6353 = vmatpush1.bf16.msra.mxu1 %v6352_v51  ;;  %v3253_v51 = vld [vmem:[#allocation6 + $0x1a90] sm:$0xff]  ;;  %6495 = vmatprep.subr.bf16.mxu0 %v6494_v47  ;;  %v6388_v47 = vpack.c.bf16 %v3269_v41, %v3267_v36 }
 0x9ba   : > { %6355 = vmatprep.subr.bf16.mxu1 %v6354_v54  ;;  %v3256_v54 = vld [vmem:[#allocation6 + $0x1aa8] sm:$0xff]  ;;  %v6372_v57 = vpack.c.bf16 %v3253_v51, %v3251_v46  ;;  %v3604_v51 = vld [vmem:[#allocation6 + $0x1f10] sm:$0xff] }
 0x9bb   : > { %v6374_v62 = vpack.c.bf16 %v3258_v55, %v3256_v54  ;;  %v3607_v54 = vld [vmem:[#allocation6 + $0x1f28] sm:$0xff]  ;;  %v3609_v55 = vld [vmem:[#allocation6 + $0x1f38] sm:$0xff] }
 0x9bc   : > { %3222 = vmatmul.mubr.f32.vlgmr.msra.gmra.mrb[4].mxu1 %v3151_v6  ;;  %v3262_v6 = vld [vmem:[#allocation6 + $0x1ad8] sm:$0xff]  ;;  %6497 = vmatpush1.bf16.msra.mxu0 %v6496_v56  ;;  %v3276_v56 = vld [vmem:[#allocation6 + $0x1b48] sm:$0xff]  ;;  %v6518_v61 = vpack.c.bf16 %v3609_v55, %v3607_v54 }
 0x9bd   : > { %6357 = vmatpush1.bf16.msra.mxu1 %v6356_v63  ;;  %3375 = vmatprep.mubr.f32.mxu1 %v3308_v11  ;;  %v3257_v63 = vld [vmem:[#allocation6 + $0x1ab0] sm:$0xff]  ;;  %v3259_v11 = vld [vmem:[#allocation6 + $0x1ac0] sm:$0xff]  ;;  %v6378_v29 = vpack.c.bf16 %v3262_v6, %v3260_v5  ;;  %v3611_v5 = vld [vmem:[#allocation6 + $0x1f48] sm:$0xff] }
 0x9be   : > { %6359 = vmatprep.subr.bf16.mxu1 %v6358_v0  ;;  %v3591_v0 = vld [vmem:[#allocation6 + $0x1ea8] sm:$0xff]  ;;  %v6376_v9 = vpack.c.bf16 %v3257_v63, %v3255_v58  ;;  %6499 = vmatprep.subr.bf16.mxu0 %v6498_v59  ;;  %v6392_v59 = vpack.c.bf16 %v3273_v53, %v3271_v48  ;;  %v3608_v63 = vld [vmem:[#allocation6 + $0x1f30] sm:$0xff]  ;;  %v3613_v6 = vld [vmem:[#allocation6 + $0x1f58] sm:$0xff] }
 0x9bf   : > { %v6502_v12 = vpack.c.bf16 %v3593_v3, %v3591_v0  ;;  %v3277_v3 = vld [vmem:[#allocation6 + $0x1b50] sm:$0xff]  ;;  %v6522_v16 = vpack.c.bf16 %v3613_v6, %v3611_v5  ;;  %v3230_v53 = vld [vmem:[#allocation2] sm:$0xf8] }
 0x9c0   : > { %6501 = vmatpush1.bf16.msra.mxu0 %v6500_v7  ;;  %v3280_v7 = vld [vmem:[#allocation6 + $0x1b68] sm:$0xff] }
 0x9c1   : > { %6361 = vmatpush1.bf16.msra.mxu1 %v6360_v31  ;;  %v3595_v31 = vld [vmem:[#allocation6 + $0x1ec8] sm:$0xff]  ;;  %6503 = vmatprep.subr.bf16.mxu0 %v6502_v12  ;;  %v6396_v12 = vpack.c.bf16 %v3277_v3, %v3275_v60  ;;  %v3391_v60 = vld [vmem:[#allocation6 + $0x1c10] sm:$0xff] }
 0x9c2   : > { %6363 = vmatprep.subr.bf16.mxu1 %v6362_v21  ;;  %v6380_v21 = vpack.c.bf16 %v3261_v8, %v3259_v11  ;;  %v6506_v23 = vpack.c.bf16 %v3597_v10, %v3595_v31  ;;  %v3612_v8 = vld [vmem:[#allocation6 + $0x1f50] sm:$0xff] }
 0x9c3   : > { %v3281_v10 = vld [vmem:[#allocation6 + $0x1b70] sm:$0xff] }
 0x9c4   : > { %6505 = vmatpush1.bf16.msra.mxu0 %v6504_v20  ;;  %v3284_v20 = vld [vmem:[#allocation6 + $0x1b88] sm:$0xff] }
 0x9c5   : > { %6365 = vmatpush1.bf16.msra.mxu1 %v6364_v33  ;;  %v3270_v33 = vld [vmem:[#allocation6 + $0x1b18] sm:$0xff]  ;;  %6507 = vmatprep.subr.bf16.mxu0 %v6506_v23  ;;  %v6400_v23 = vpack.c.bf16 %v3281_v10, %v3279_v14  ;;  %v3232_v54 = vld [vmem:[#allocation2 + $0x10] sm:$0x7]  ;;  %v3397_v10 = vld [vmem:[#allocation6 + $0x1c40] sm:$0xff] }
 0x9c6   : > { %6367 = vmatprep.subr.bf16.mxu1 %v6366_v38  ;;  %v3598_v38 = vld [vmem:[#allocation6 + $0x1ee0] sm:$0xff]  ;;  %v6386_v40 = vpack.c.bf16 %v3270_v33, %v3268_v32  ;;  %v3288_v32 = vld [vmem:[#allocation6 + $0x1ba8] sm:$0xff]  ;;  %v3290_v33 = vld [vmem:[#allocation6 + $0x1bb8] sm:$0xff] }
 0x9c7   : > { %v6512_v46 = vpack.c.bf16 %v3600_v39, %v3598_v38  ;;  %v6406_v36 = vpack.c.bf16 %v3290_v33, %v3288_v32  ;;  %v3289_v38 = vld [vmem:[#allocation6 + $0x1bb0] sm:$0xff]  ;;  %v3292_v39 = vld [vmem:[#allocation6 + $0x1bc8] sm:$0xff] }
 0x9c8   : > { %6509 = vmatpush1.bf16.msra.mxu0 %v6508_v34  ;;  %v3398_v14 = vld [vmem:[#allocation6 + $0x1c48] sm:$0xff]  ;;  %v3407_v32 = vld [vmem:[#allocation6 + $0x1c90] sm:$0xff] }
 0x9c9   : > { %6369 = vmatpush1.bf16.msra.mxu1 %v6368_v45  ;;  %v3274_v45 = vld [vmem:[#allocation6 + $0x1b38] sm:$0xff]  ;;  %6511 = vmatprep.subr.bf16.mxu0 %v6510_v37  ;;  %v3287_v37 = vld [vmem:[#allocation6 + $0x1ba0] sm:$0xff]  ;;  %v3410_v33 = vld [vmem:[#allocation6 + $0x1ca8] sm:$0xff] }
 0x9ca   : > { %6371 = vmatprep.subr.bf16.mxu1 %v6370_v50  ;;  %v3602_v50 = vld [vmem:[#allocation6 + $0x1f00] sm:$0xff]  ;;  %v6390_v52 = vpack.c.bf16 %v3274_v45, %v3272_v44  ;;  %v6408_v41 = vpack.c.bf16 %v3289_v38, %v3287_v37  ;;  %v3293_v44 = vld [vmem:[#allocation6 + $0x1bd0] sm:$0xff]  ;;  %v3296_v45 = vld [vmem:[#allocation6 + $0x1be8] sm:$0xff] }
 0x9cb   : > { %v6516_v58 = vpack.c.bf16 %v3604_v51, %v3602_v50  ;;  %v3297_v50 = vld [vmem:[#allocation6 + $0x1bf0] sm:$0xff]  ;;  %v3390_v51 = vld [vmem:[#allocation6 + $0x1c08] sm:$0xff]  ;;  %v3409_v37 = vld [vmem:[#allocation6 + $0x1ca0] sm:$0xff] }
 0x9cc   : > { %6513 = vmatpush1.bf16.msra.mxu0 %v6512_v46  ;;  %v3298_v46 = vld [vmem:[#allocation6 + $0x1bf8] sm:$0xff]  ;;  %v3411_v38 = vld [vmem:[#allocation6 + $0x1cb0] sm:$0xff] }
 0x9cd   : > { %6373 = vmatpush1.bf16.msra.mxu1 %v6372_v57  ;;  %v3278_v57 = vld [vmem:[#allocation6 + $0x1b58] sm:$0xff]  ;;  %6515 = vmatprep.subr.bf16.mxu0 %v6514_v49  ;;  %v6414_v48 = vpack.c.bf16 %v3298_v46, %v3296_v45  ;;  %v3295_v49 = vld [vmem:[#allocation6 + $0x1be0] sm:$0xff]  ;;  %v3418_v45 = vld [vmem:[#allocation6 + $0x1ce8] sm:$0xff] }
 0x9ce   : > { %6375 = vmatprep.subr.bf16.mxu1 %v6374_v62  ;;  %v3606_v62 = vld [vmem:[#allocation6 + $0x1f20] sm:$0xff]  ;;  %v6394_v0 = vpack.c.bf16 %v3278_v57, %v3276_v56  ;;  %v6416_v55 = vpack.c.bf16 %v3297_v50, %v3295_v49  ;;  %v3385_v56 = vld [vmem:[#allocation2 + $0x8] sm:$0xf0]  ;;  %v3387_v57 = vld [vmem:[#allocation2 + $0x18] sm:$0xf] }
 0x9cf   : > { %v6520_v11 = vpack.c.bf16 %v3608_v63, %v3606_v62  ;;  %v3304_v62 = vrot.slane %v3232_v54, 3  ;;  %v3394_v63 = vld [vmem:[#allocation6 + $0x1c28] sm:$0xff]  ;;  %v3460_v3 = vrot.slane %v3385_v56, 4  ;;  %v3461_v5 = vrot.slane %v3387_v57, 4  ;;  %v3420_v46 = vld [vmem:[#allocation6 + $0x1cf8] sm:$0xff]  ;;  %v3417_v49 = vld [vmem:[#allocation6 + $0x1ce0] sm:$0xff] }
 0x9d0   : > { %6517 = vmatpush1.bf16.msra.mxu0 %v6516_v58  ;;  %v3419_v50 = vld [vmem:[#allocation6 + $0x1cf0] sm:$0xff]  ;;  %v3426_v57 = vld [vmem:[#allocation6 + $0x1d28] sm:$0xff] }
 0x9d1   : > { %6377 = vmatpush1.bf16.msra.mxu1 %v6376_v9  ;;  %v3282_v9 = vld [vmem:[#allocation6 + $0x1b78] sm:$0xff]  ;;  %6519 = vmatprep.subr.bf16.mxu0 %v6518_v61  ;;  %v3303_v61 = vrot.slane %v3230_v53, 3  ;;  %v6448_v53 = vpack.c.bf16 %v3419_v50, %v3417_v49  ;;  %v3423_v56 = vld [vmem:[#allocation6 + $0x1d10] sm:$0xff]  ;;  %v3618_v50 = vld [vmem:[#allocation6 + $0x1f80] sm:$0xff] }
 0x9d2   : > { %6379 = vmatprep.subr.bf16.mxu1 %v6378_v29  ;;  %v3610_v29 = vld [vmem:[#allocation6 + $0x1f40] sm:$0xff]  ;;  %v6398_v31 = vpack.c.bf16 %v3282_v9, %v3280_v7 }
 0x9d3   : > { %v6524_v22 = vpack.c.bf16 %v3612_v8, %v3610_v29  ;;  %v3393_v9 = vld [vmem:[#allocation6 + $0x1c20] sm:$0xff]  ;;  %v3462_v29 = vsel %vm1506_vm4, %v3460_v3, %v3461_v5 }
 0x9d4   : > { %6521 = vmatpush1.bf16.msra.mxu0 %v6520_v11  ;;  %v3395_v11 = vld [vmem:[#allocation6 + $0x1c30] sm:$0xff] }
 0x9d5   : > { %6381 = vmatpush1.bf16.msra.mxu1 %v6380_v21  ;;  %v3286_v21 = vld [vmem:[#allocation6 + $0x1b98] sm:$0xff]  ;;  %6523 = vmatprep.subr.bf16.mxu0 %v6522_v16  ;;  %v6424_v8 = vpack.c.bf16 %v3395_v11, %v3393_v9  ;;  %v3434_v9 = vld [vmem:[#allocation6 + $0x1d68] sm:$0xff] }
 0x9d6   : > { %6383 = vmatprep.subr.bf16.mxu1 %v6382_v26  ;;  %v3616_v26 = vld [vmem:[#allocation6 + $0x1f70] sm:$0xff]  ;;  %v6402_v27 = vpack.c.bf16 %v3286_v21, %v3284_v20  ;;  %v3400_v16 = vld [vmem:[#allocation6 + $0x1c58] sm:$0xff]  ;;  %v6428_v21 = vpack.c.bf16 %v3399_v18, %v3397_v10 }
 0x9d7   : > { %v6528_v34 = vpack.c.bf16 %v3616_v26, %v3614_v25  ;;  %v3404_v20 = vld [vmem:[#allocation6 + $0x1c78] sm:$0xff]  ;;  %v3406_v25 = vld [vmem:[#allocation6 + $0x1c88] sm:$0xff] }
 0x9d8   : > { %6525 = vmatpush1.bf16.msra.mxu0 %v6524_v22  ;;  %v6430_v22 = vpack.c.bf16 %v3404_v20, %v3402_v19  ;;  %v3408_v26 = vld [vmem:[#allocation6 + $0x1c98] sm:$0xff]  ;;  %v3437_v19 = vld [vmem:[#allocation6 + $0x1d80] sm:$0xff]  ;;  %v3439_v20 = vld [vmem:[#allocation6 + $0x1d90] sm:$0xff] }
 0x9d9   : > { %6385 = vmatpush1.bf16.msra.mxu1 %v6384_v35  ;;  %v6404_v35 = vpack.c.bf16 %v3285_v30, %v3283_v28  ;;  %6527 = vmatprep.subr.bf16.mxu0 %v6526_v24  ;;  %v3403_v24 = vld [vmem:[#allocation6 + $0x1c70] sm:$0xff]  ;;  %v6434_v28 = vpack.c.bf16 %v3408_v26, %v3406_v25  ;;  %v3405_v30 = vld [vmem:[#allocation6 + $0x1c80] sm:$0xff]  ;;  %v3436_v11 = vld [vmem:[#allocation6 + $0x1d78] sm:$0xff] }
 0x9da   : > { %6387 = vmatprep.subr.bf16.mxu1 %v6386_v40  ;;  %v3294_v40 = vld [vmem:[#allocation6 + $0x1bd8] sm:$0xff]  ;;  %v3441_v25 = vld [vmem:[#allocation6 + $0x1da0] sm:$0xff]  ;;  %v3443_v26 = vld [vmem:[#allocation6 + $0x1db0] sm:$0xff] }
 0x9db   : > { %v6410_v42 = vpack.c.bf16 %v3294_v40, %v3292_v39  ;;  %v3414_v39 = vld [vmem:[#allocation6 + $0x1cc8] sm:$0xff]  ;;  %v3416_v40 = vld [vmem:[#allocation6 + $0x1cd8] sm:$0xff] }
 0x9dc   : > { %6529 = vmatpush1.bf16.msra.mxu0 %v6528_v34  ;;  %v3412_v34 = vld [vmem:[#allocation6 + $0x1cb8] sm:$0xff] }
 0x9dd   : > { %6389 = vmatpush1.bf16.msra.mxu1 %v6388_v47  ;;  %v6412_v47 = vpack.c.bf16 %v3293_v44, %v3291_v43  ;;  %v3413_v43 = vld [vmem:[#allocation6 + $0x1cc0] sm:$0xff]  ;;  %v3415_v44 = vld [vmem:[#allocation6 + $0x1cd0] sm:$0xff] }
 0x9de   : > { %6391 = vmatprep.subr.bf16.mxu1 %v6390_v52  ;;  %v3392_v52 = vld [vmem:[#allocation6 + $0x1c18] sm:$0xff] }
 0x9df   : > { %v6418_v58 = vpack.c.bf16 %v3392_v52, %v3390_v51  ;;  %v3422_v51 = vld [vmem:[#allocation6 + $0x1d08] sm:$0xff]  ;;  %v3424_v52 = vld [vmem:[#allocation6 + $0x1d18] sm:$0xff] }
 0x9e0   : > { %v6450_v54 = vpack.c.bf16 %v3424_v52, %v3422_v51  ;;  %v3620_v51 = vld [vmem:[#allocation6 + $0x1f90] sm:$0xff] }
 0x9e1   : > { %6393 = vmatpush1.bf16.msra.mxu1 %v6392_v59  ;;  %v3389_v59 = vld [vmem:[#allocation6 + $0x1c00] sm:$0xff]  ;;  %v6532_v52 = vpack.c.bf16 %v3620_v51, %v3618_v50  ;;  %v3725_v50 = vld [vmem:[#allocation6 + $0x2068] sm:$0xff]  ;;  %v3727_v51 = vld [vmem:[#allocation6 + $0x2078] sm:$0xff] }
 0x9e2   : > { %6395 = vmatprep.subr.bf16.mxu1 %v6394_v0  ;;  %v3396_v0 = vld [vmem:[#allocation6 + $0x1c38] sm:$0xff]  ;;  %v6420_v6 = vpack.c.bf16 %v3391_v60, %v3389_v59 }
 0x9e3   : > { %v6422_v7 = vpack.c.bf16 %v3396_v0, %v3394_v63  ;;  %v3430_v63 = vld [vmem:[#allocation6 + $0x1d48] sm:$0xff]  ;;  %v3432_v0 = vld [vmem:[#allocation6 + $0x1d58] sm:$0xff] }
 0x9e4   : > { %v6458_v5 = vpack.c.bf16 %v3432_v0, %v3430_v63  ;;  %v3628_v63 = vld [vmem:[#allocation6 + $0x1fd0] sm:$0xff]  ;;  %v3631_v0 = vld [vmem:[#allocation6 + $0x1fe8] sm:$0xff] }
 0x9e5   : > { %6397 = vmatpush1.bf16.msra.mxu1 %v6396_v12  ;;  %v3305_v12 = vsel %vm1351_vm3, %v3303_v61, %v3304_v62  ;;  %v3425_v61 = vld [vmem:[#allocation6 + $0x1d20] sm:$0xff]  ;;  %v3427_v62 = vld [vmem:[#allocation6 + $0x1d30] sm:$0xff] }
 0x9e6   : > { %6399 = vmatprep.subr.bf16.mxu1 %v6398_v31  ;;  %v6426_v31 = vpack.c.bf16 %v3400_v16, %v3398_v14  ;;  %v6456_v3 = vpack.c.bf16 %v3427_v62, %v3425_v61  ;;  %v6462_v14 = vpack.c.bf16 %v3436_v11, %v3434_v9  ;;  %v3433_v16 = vld [vmem:[#allocation6 + $0x1d60] sm:$0xff]  ;;  %v3632_v9 = vld [vmem:[#allocation6 + $0x1ff0] sm:$0xff]  ;;  %v3713_v11 = vld [vmem:[#allocation6 + $0x2008] sm:$0xff] }
 0x9e7   : > { %v3626_v62 = vld [vmem:[#allocation6 + $0x1fc0] sm:$0xff] }
 0x9e9   : > { %6401 = vmatpush1.bf16.msra.mxu1 %v6400_v23  ;;  %v3401_v23 = vld [vmem:[#allocation6 + $0x1c60] sm:$0xff] }
 0x9ea   : > { %6403 = vmatprep.subr.bf16.mxu1 %v6402_v27  ;;  %v6432_v27 = vpack.c.bf16 %v3403_v24, %v3401_v23  ;;  %v6468_v23 = vpack.c.bf16 %v3439_v20, %v3437_v19 }
 0x9ed   : > { %6405 = vmatpush1.bf16.msra.mxu1 %v6404_v35  ;;  %v6436_v35 = vpack.c.bf16 %v3407_v32, %v3405_v30  ;;  %v6472_v30 = vpack.c.bf16 %v3443_v26, %v3441_v25 }
 0x9ee   : > { %6407 = vmatprep.subr.bf16.mxu1 %v6406_v36  ;;  %v6438_v36 = vpack.c.bf16 %v3412_v34, %v3410_v33  ;;  %v3445_v33 = vld [vmem:[#allocation6 + $0x1dc0] sm:$0xff]  ;;  %v3447_v34 = vld [vmem:[#allocation6 + $0x1dd0] sm:$0xff] }
 0x9f1   : > { %6409 = vmatpush1.bf16.msra.mxu1 %v6408_v41  ;;  %v6440_v41 = vpack.c.bf16 %v3411_v38, %v3409_v37  ;;  %v6476_v37 = vpack.c.bf16 %v3447_v34, %v3445_v33  ;;  %v3716_v34 = vld [vmem:[#allocation6 + $0x2020] sm:$0xff] }
 0x9f2   : > { %6411 = vmatprep.subr.bf16.mxu1 %v6410_v42  ;;  %v6442_v42 = vpack.c.bf16 %v3416_v40, %v3414_v39  ;;  %v3449_v39 = vld [vmem:[#allocation6 + $0x1de0] sm:$0xff]  ;;  %v3451_v40 = vld [vmem:[#allocation6 + $0x1df0] sm:$0xff] }
 0x9f5   : > { %6413 = vmatpush1.bf16.msra.mxu1 %v6412_v47  ;;  %v6444_v47 = vpack.c.bf16 %v3415_v44, %v3413_v43  ;;  %v6480_v43 = vpack.c.bf16 %v3451_v40, %v3449_v39 }
 0x9f6   : > { %6415 = vmatprep.subr.bf16.mxu1 %v6414_v48  ;;  %v6446_v48 = vpack.c.bf16 %v3420_v46, %v3418_v45 }
 0x9f9   : > { %6417 = vmatpush1.bf16.msra.mxu1 %v6416_v55  ;;  %v3421_v55 = vld [vmem:[#allocation6 + $0x1d00] sm:$0xff] }
 0x9fa   : > { %6419 = vmatprep.subr.bf16.mxu1 %v6418_v58  ;;  %v3428_v58 = vld [vmem:[#allocation6 + $0x1d38] sm:$0xff]  ;;  %v6452_v59 = vpack.c.bf16 %v3423_v56, %v3421_v55  ;;  %v3622_v55 = vld [vmem:[#allocation6 + $0x1fa0] sm:$0xff] }
 0x9fb   : > { %v6454_v60 = vpack.c.bf16 %v3428_v58, %v3426_v57  ;;  %v3624_v57 = vld [vmem:[#allocation6 + $0x1fb0] sm:$0xff]  ;;  %v3627_v58 = vld [vmem:[#allocation6 + $0x1fc8] sm:$0xff] }
 0x9fc   : > { %3376 = vmatmul.mubr.f32.vlgmr.msra.gmra.mrb[4].mxu1 %v3305_v12 }
 0x9fd   : > { %6421 = vmatpush1.bf16.msra.mxu1 %v6420_v6  ;;  %3529 = vmatprep.mubr.f32.mxu1 %v3462_v29  ;;  %v3429_v6 = vld [vmem:[#allocation6 + $0x1d40] sm:$0xff]  ;;  %v3435_v29 = vld [vmem:[#allocation6 + $0x1d70] sm:$0xff] }
 0x9fe   : > { %6423 = vmatprep.subr.bf16.mxu1 %v6422_v7  ;;  %v3431_v7 = vld [vmem:[#allocation6 + $0x1d50] sm:$0xff]  ;;  %v6464_v10 = vpack.c.bf16 %v3435_v29, %v3433_v16  ;;  %v2770_v29 = vld [vmem:[#allocation8 + $0x4] sm:$0x3] }
 0x9ff   : > { %v6460_v12 = vpack.c.bf16 %v3431_v7, %v3429_v6  ;;  %v3630_v7 = vld [vmem:[#allocation6 + $0x1fe0] sm:$0xff] }
 0xa01   : > { %6425 = vmatpush1.bf16.msra.mxu1 %v6424_v8  ;;  %v3438_v8 = vld [vmem:[#allocation6 + $0x1d88] sm:$0xff] }
 0xa02   : > { %6427 = vmatprep.subr.bf16.mxu1 %v6426_v31  ;;  %v3440_v31 = vld [vmem:[#allocation6 + $0x1d98] sm:$0xff] }
 0xa03   : > { %v6466_v18 = vpack.c.bf16 %v3440_v31, %v3438_v8  ;;  %v2775_v8 = vrot.slane %v2770_v29, %v7743_v2  ;;  %v2779_v31 = vrot.slane %v2770_v29, %v7745_v4  ;;  %v3741_v29 = vld [vmem:[#allocation6 + $0x20e8] sm:$0xff] }
 0xa05   : > { %6429 = vmatpush1.bf16.msra.mxu1 %v6428_v21  ;;  %v3442_v21 = vld [vmem:[#allocation6 + $0x1da8] sm:$0xff] }
 0xa06   : > { %6431 = vmatprep.subr.bf16.mxu1 %v6430_v22  ;;  %v3444_v22 = vld [vmem:[#allocation6 + $0x1db8] sm:$0xff] }
 0xa07   : > { %v6470_v24 = vpack.c.bf16 %v3444_v22, %v3442_v21 }
 0xa09   : > { %6433 = vmatpush1.bf16.msra.mxu1 %v6432_v27  ;;  %v3446_v27 = vld [vmem:[#allocation6 + $0x1dc8] sm:$0xff] }
 0xa0a   : > { %6435 = vmatprep.subr.bf16.mxu1 %v6434_v28  ;;  %v3448_v28 = vld [vmem:[#allocation6 + $0x1dd8] sm:$0xff] }
 0xa0b   : > { %v6474_v32 = vpack.c.bf16 %v3448_v28, %v3446_v27  ;;  %v3712_v27 = vld [vmem:[#allocation6 + $0x2000] sm:$0xff]  ;;  %v3714_v28 = vld [vmem:[#allocation6 + $0x2010] sm:$0xff] }
 0xa0c   : > { %v6548_v33 = vpack.c.bf16 %v3714_v28, %v3712_v27  ;;  %v3751_v27 = vld [vmem:[#allocation6 + $0x2138] sm:$0xff] }
 0xa0d   : > { %6437 = vmatpush1.bf16.msra.mxu1 %v6436_v35  ;;  %v3450_v35 = vld [vmem:[#allocation6 + $0x1de8] sm:$0xff] }
 0xa0e   : > { %6439 = vmatprep.subr.bf16.mxu1 %v6438_v36  ;;  %v3452_v36 = vld [vmem:[#allocation6 + $0x1df8] sm:$0xff] }
 0xa0f   : > { %v6478_v38 = vpack.c.bf16 %v3452_v36, %v3450_v35  ;;  %v3718_v35 = vld [vmem:[#allocation6 + $0x2030] sm:$0xff] }
 0xa11   : > { %6441 = vmatpush1.bf16.msra.mxu1 %v6440_v41  ;;  %v3384_v41 = vld [vmem:[#allocation2] sm:$0xf0] }
 0xa12   : > { %6443 = vmatprep.subr.bf16.mxu1 %v6442_v42  ;;  %v3386_v42 = vld [vmem:[#allocation2 + $0x10] sm:$0xf]  ;;  %v3457_v44 = vrot.slane %v3384_v41, 4 }
 0xa13   : > { %v3458_v45 = vrot.slane %v3386_v42, 4 }
 0xa15   : > { %6445 = vmatpush1.bf16.msra.mxu1 %v6444_v47  ;;  %v3459_v46 = vsel %vm1506_vm4, %v3457_v44, %v3458_v45  ;;  %v3619_v47 = vld [vmem:[#allocation6 + $0x1f88] sm:$0xff]  ;;  %v3723_v44 = vld [vmem:[#allocation6 + $0x2058] sm:$0xff] }
 0xa16   : > { %6447 = vmatprep.subr.bf16.mxu1 %v6446_v48  ;;  %v3621_v48 = vld [vmem:[#allocation6 + $0x1f98] sm:$0xff] }
 0xa17   : > { %v6530_v49 = vpack.c.bf16 %v3621_v48, %v3619_v47  ;;  %v3720_v48 = vld [vmem:[#allocation6 + $0x2040] sm:$0xff] }
 0xa19   : > { %6449 = vmatpush1.bf16.msra.mxu1 %v6448_v53  ;;  %v3623_v53 = vld [vmem:[#allocation6 + $0x1fa8] sm:$0xff]  ;;  %6531 = vmatprep.subr.bf16.mxu0 %v6530_v49  ;;  %v3722_v49 = vld [vmem:[#allocation6 + $0x2050] sm:$0xff] }
 0xa1a   : > { %6451 = vmatprep.subr.bf16.mxu1 %v6450_v54  ;;  %v3625_v54 = vld [vmem:[#allocation6 + $0x1fb8] sm:$0xff]  ;;  %6533 = vmatpush1.bf16.msra.mxu0 %v6532_v52  ;;  %v6556_v52 = vpack.c.bf16 %v3722_v49, %v3720_v48 }
 0xa1b   : > { %v6534_v56 = vpack.c.bf16 %v3625_v54, %v3623_v53  ;;  %v6558_v53 = vpack.c.bf16 %v3727_v51, %v3725_v50  ;;  %v3724_v54 = vld [vmem:[#allocation6 + $0x2060] sm:$0xff]  ;;  %v3762_v51 = vld [vmem:[#allocation6 + $0x2190] sm:$0xff] }
 0xa1c   : > { %v3760_v50 = vld [vmem:[#allocation6 + $0x2180] sm:$0xff] }
 0xa1d   : > { %6453 = vmatpush1.bf16.msra.mxu1 %v6452_v59  ;;  %v3629_v59 = vld [vmem:[#allocation6 + $0x1fd8] sm:$0xff]  ;;  %6535 = vmatprep.subr.bf16.mxu0 %v6534_v56  ;;  %v3729_v56 = vld [vmem:[#allocation6 + $0x2088] sm:$0xff] }
 0xa1e   : > { %6455 = vmatprep.subr.bf16.mxu1 %v6454_v60  ;;  %v6536_v60 = vpack.c.bf16 %v3624_v57, %v3622_v55  ;;  %v6538_v61 = vpack.c.bf16 %v3629_v59, %v3627_v58  ;;  %v3726_v55 = vld [vmem:[#allocation6 + $0x2070] sm:$0xff]  ;;  %v3731_v57 = vld [vmem:[#allocation6 + $0x2098] sm:$0xff] }
 0xa1f   : > { %v6560_v58 = vpack.c.bf16 %v3726_v55, %v3724_v54  ;;  %v6562_v59 = vpack.c.bf16 %v3731_v57, %v3729_v56  ;;  %v6596_v54 = vpack.c.bf16 %v3762_v51, %v3760_v50  ;;  %v3764_v56 = vld [vmem:[#allocation6 + $0x21a0] sm:$0xff]  ;;  %v3766_v57 = vld [vmem:[#allocation6 + $0x21b0] sm:$0xff] }
 0xa20   : > { %6537 = vmatpush1.bf16.msra.mxu0 %v6536_v60  ;;  %v3728_v60 = vld [vmem:[#allocation6 + $0x2080] sm:$0xff]  ;;  %v3884_v51 = vld [vmem:[#allocation6 + $0x2290] sm:$0xff] }
 0xa21   : > { %6457 = vmatpush1.bf16.msra.mxu1 %v6456_v3  ;;  %v3633_v3 = vld [vmem:[#allocation6 + $0x1ff8] sm:$0xff]  ;;  %6539 = vmatprep.subr.bf16.mxu0 %v6538_v61  ;;  %v3730_v61 = vld [vmem:[#allocation6 + $0x2090] sm:$0xff]  ;;  %v3882_v50 = vld [vmem:[#allocation6 + $0x2280] sm:$0xff] }
 0xa22   : > { %6459 = vmatprep.subr.bf16.mxu1 %v6458_v5  ;;  %v6540_v5 = vpack.c.bf16 %v3628_v63, %v3626_v62  ;;  %v6542_v6 = vpack.c.bf16 %v3633_v3, %v3631_v0  ;;  %v3733_v62 = vld [vmem:[#allocation6 + $0x20a8] sm:$0xff]  ;;  %v3735_v63 = vld [vmem:[#allocation6 + $0x20b8] sm:$0xff]  ;;  %v6564_v0 = vpack.c.bf16 %v3730_v61, %v3728_v60  ;;  %v6600_v60 = vpack.c.bf16 %v3766_v57, %v3764_v56  ;;  %v3886_v56 = vld [vmem:[#allocation6 + $0x22a0] sm:$0xff] }
 0xa23   : > { %v6566_v3 = vpack.c.bf16 %v3735_v63, %v3733_v62  ;;  %v3768_v62 = vld [vmem:[#allocation6 + $0x21c0] sm:$0xff]  ;;  %v3770_v63 = vld [vmem:[#allocation6 + $0x21d0] sm:$0xff] }
 0xa24   : > { %6541 = vmatpush1.bf16.msra.mxu0 %v6540_v5  ;;  %v3732_v5 = vld [vmem:[#allocation6 + $0x20a0] sm:$0xff]  ;;  %v3888_v57 = vld [vmem:[#allocation6 + $0x22b0] sm:$0xff] }
 0xa25   : > { %6461 = vmatpush1.bf16.msra.mxu1 %v6460_v12  ;;  %v3715_v12 = vld [vmem:[#allocation6 + $0x2018] sm:$0xff]  ;;  %6543 = vmatprep.subr.bf16.mxu0 %v6542_v6  ;;  %v3734_v6 = vld [vmem:[#allocation6 + $0x20b0] sm:$0xff] }
 0xa26   : > { %6463 = vmatprep.subr.bf16.mxu1 %v6462_v14  ;;  %v6544_v14 = vpack.c.bf16 %v3632_v9, %v3630_v7  ;;  %v6546_v16 = vpack.c.bf16 %v3715_v12, %v3713_v11  ;;  %v3737_v7 = vld [vmem:[#allocation6 + $0x20c8] sm:$0xff]  ;;  %v3739_v9 = vld [vmem:[#allocation6 + $0x20d8] sm:$0xff]  ;;  %v6568_v11 = vpack.c.bf16 %v3734_v6, %v3732_v5  ;;  %v6604_v5 = vpack.c.bf16 %v3770_v63, %v3768_v62  ;;  %v3890_v62 = vld [vmem:[#allocation6 + $0x22c0] sm:$0xff] }
 0xa27   : > { %v6570_v12 = vpack.c.bf16 %v3739_v9, %v3737_v7  ;;  %v3772_v7 = vld [vmem:[#allocation6 + $0x21e0] sm:$0xff]  ;;  %v3774_v9 = vld [vmem:[#allocation6 + $0x21f0] sm:$0xff] }
 0xa28   : > { %6545 = vmatpush1.bf16.msra.mxu0 %v6544_v14  ;;  %v3736_v14 = vld [vmem:[#allocation6 + $0x20c0] sm:$0xff]  ;;  %v3892_v63 = vld [vmem:[#allocation6 + $0x22d0] sm:$0xff] }
 0xa29   : > { %6465 = vmatpush1.bf16.msra.mxu1 %v6464_v10  ;;  %6547 = vmatprep.subr.bf16.mxu0 %v6546_v16  ;;  %v3738_v16 = vld [vmem:[#allocation6 + $0x20d0] sm:$0xff] }
 0xa2a   : > { %6467 = vmatprep.subr.bf16.mxu1 %v6466_v18 }
 0xa2d   : > { %6469 = vmatpush1.bf16.msra.mxu1 %v6468_v23 }
 0xa2e   : > { %6471 = vmatprep.subr.bf16.mxu1 %v6470_v24 }
 0xa31   : > { %6473 = vmatpush1.bf16.msra.mxu1 %v6472_v30  ;;  %v3717_v30 = vld [vmem:[#allocation6 + $0x2028] sm:$0xff] }
 0xa32   : > { %6475 = vmatprep.subr.bf16.mxu1 %v6474_v32  ;;  %v3719_v32 = vld [vmem:[#allocation6 + $0x2038] sm:$0xff] }
 0xa33   : > { %v6550_v39 = vpack.c.bf16 %v3719_v32, %v3717_v30  ;;  %v3748_v32 = vld [vmem:[#allocation6 + $0x2120] sm:$0xff] }
 0xa35   : > { %6477 = vmatpush1.bf16.msra.mxu1 %v6476_v37 }
 0xa36   : > { %6479 = vmatprep.subr.bf16.mxu1 %v6478_v38 }
 0xa39   : > { %6481 = vmatpush1.bf16.msra.mxu1 %v6480_v43  ;;  %v3721_v43 = vld [vmem:[#allocation6 + $0x2048] sm:$0xff] }
 0xa3a   : > { %v6554_v47 = vpack.c.bf16 %v3723_v44, %v3721_v43  ;;  %v3756_v44 = vld [vmem:[#allocation6 + $0x2160] sm:$0xff] }
 0xa3c   : > { %3530 = vmatmul.mubr.f32.vlgmr.msra.gmra.mrb[4].mxu1 %v3459_v46  ;;  %v6552_v46 = vpack.c.bf16 %v3718_v35, %v3716_v34  ;;  %v3753_v34 = vld [vmem:[#allocation6 + $0x2148] sm:$0xff]  ;;  %v3755_v35 = vld [vmem:[#allocation6 + $0x2158] sm:$0xff] }
 0xb0f   : > { %v3531_v10 = vpop.f32.mrb[4].mxu1 }
 0xb10   : > { %v6922_v18 = vadd.f32 %v3531_v10, %v2775_v8  ;;  %v3533_v19 = vpop.f32.mrb[5].mxu1  ;;  %v3743_v8 = vld [vmem:[#allocation6 + $0x20f8] sm:$0xff] }
 0xb11   : > { %v6923_v20 = vadd.f32 %v3533_v19, %v2779_v31  ;;  %v6572_v31 = vpack.c.bf16 %v3738_v16, %v3736_v14  ;;  %v6574_v10 = vpack.c.bf16 %v3743_v8, %v3741_v29  ;;  %v3742_v19 = vld [vmem:[#allocation6 + $0x20f0] sm:$0xff]  ;;  %v6608_v29 = vpack.c.bf16 %v3774_v9, %v3772_v7  ;;  %v3894_v7 = vld [vmem:[#allocation6 + $0x22e0] sm:$0xff] }
 0xb12   : > { %vm3538_vm15 = vcmp.gt.f32.partialorder %v6922_v18, 0.0  ;;  %v3540_v21 = vmul.f32 0.01, %v6922_v18  ;;  %v3896_v9 = vld [vmem:[#allocation6 + $0x22f0] sm:$0xff] }
 0xb13   : > { %vm3539_vm0 = vcmp.gt.f32.partialorder %v6923_v20, 0.0  ;;  %v3541_v22 = vmul.f32 0.01, %v6923_v20 }
 0xb14   : > { %v3542_v23 = vsel %vm3538_vm15, %v6922_v18, %v3540_v21  ;;  %v3740_v18 = vld [vmem:[#allocation6 + $0x20e0] sm:$0xff]  ;;  %v3747_v21 = vld [vmem:[#allocation6 + $0x2118] sm:$0xff] }
 0xb15   : > { %v3546_v24 = vrot.slane %v3542_v23, 6  ;;  %v3543_v25 = vsel %vm3539_vm0, %v6923_v20, %v3541_v22  ;;  %v3745_v20 = vld [vmem:[#allocation6 + $0x2108] sm:$0xff]  ;;  %v6576_v22 = vpack.c.bf16 %v3742_v19, %v3740_v18  ;;  %v3866_v18 = vld [vmem:[#allocation6 + $0x2200] sm:$0xff]  ;;  %v3868_v19 = vld [vmem:[#allocation6 + $0x2210] sm:$0xff] }
 0xb16   : > { %v3547_v26 = vrot.slane %v3543_v25, 6  ;;  %v6578_v23 = vpack.c.bf16 %v3747_v21, %v3745_v20  ;;  %v3746_v25 = vld [vmem:[#allocation6 + $0x2110] sm:$0xff] }
 0xb17   : > { %3550 = vst [vmem:[#allocation2] sm:$0xfc] %v3546_v24  ;;  %3552 = vst [vmem:[#allocation2 + $0x10] sm:$0x3] %v3546_v24  ;;  %v3744_v24 = vld [vmem:[#allocation6 + $0x2100] sm:$0xff] }
 0xb18   : > { %3551 = vst [vmem:[#allocation2 + $0x8] sm:$0xfc] %v3547_v26  ;;  %3553 = vst [vmem:[#allocation2 + $0x18] sm:$0x3] %v3547_v26  ;;  %v3749_v26 = vld [vmem:[#allocation6 + $0x2128] sm:$0xff]  ;;  %v6580_v28 = vpack.c.bf16 %v3746_v25, %v3744_v24 }
 0xb19   : > { %v6582_v30 = vpack.c.bf16 %v3751_v27, %v3749_v26  ;;  %v6612_v26 = vpack.c.bf16 %v3868_v19, %v3866_v18 }
 0xb1e   : > { %v3567_v40 = vld [vmem:[#allocation2] sm:$0xff]  ;;  %v3709_v16 = vld [vmem:[#allocation2 + $0x10] sm:$0x1] }
 0xb1f   : > { %v3568_v36 = vld [vmem:[#allocation2 + $0x8] sm:$0xff]  ;;  %v3710_v38 = vld [vmem:[#allocation2 + $0x18] sm:$0x1]  ;;  %v3707_v14 = vld [vmem:[#allocation2] sm:$0xfe]  ;;  %v3781_v21 = vrot.slane %v3709_v16, 1 }
 0xb20   : > { %v3708_v37 = vld [vmem:[#allocation2 + $0x8] sm:$0xfe]  ;;  %3698 = vmatprep.mubr.f32.mxu0 %v3568_v36  ;;  %v3784_v42 = vrot.slane %v3710_v38, 1  ;;  %v3752_v38 = vld [vmem:[#allocation6 + $0x2140] sm:$0xff]  ;;  %v3780_v20 = vrot.slane %v3707_v14, 1  ;;  %v6640_v14 = vpack.c.bf16 %v3896_v9, %v3894_v7  ;;  %v4022_v9 = vld [vmem:[#allocation6 + $0x2410] sm:$0xff] }
 0xb21   : > { %v3783_v41 = vrot.slane %v3708_v37, 1  ;;  %3699 = vmatmul.mubr.f32.vlgmr.msra.gmra.mrb[10].mxu0 %v3567_v40  ;;  %v6586_v37 = vpack.c.bf16 %v3755_v35, %v3753_v34  ;;  %v3757_v40 = vld [vmem:[#allocation6 + $0x2168] sm:$0xff]  ;;  %v3877_v34 = vld [vmem:[#allocation6 + $0x2258] sm:$0xff]  ;;  %v4020_v7 = vld [vmem:[#allocation6 + $0x2400] sm:$0xff] }
 0xb22   : > { %6549 = vmatpush1.bf16.msra.mxu0 %v6548_v33  ;;  %v3750_v33 = vld [vmem:[#allocation6 + $0x2130] sm:$0xff]  ;;  %v3862_v8 = vld [vmem:[#allocation2 + $0x8] sm:$0xfc] }
 0xb23   : > { %v3785_v45 = vsel %vm1041_vm1, %v3783_v41, %v3784_v42  ;;  %6551 = vmatprep.subr.bf16.mxu0 %v6550_v39  ;;  %v6584_v36 = vpack.c.bf16 %v3750_v33, %v3748_v32  ;;  %v3754_v39 = vld [vmem:[#allocation6 + $0x2150] sm:$0xff]  ;;  %v3759_v41 = vld [vmem:[#allocation6 + $0x2178] sm:$0xff]  ;;  %v3937_v24 = vrot.slane %v3862_v8, 2  ;;  %v3782_v32 = vsel %vm1041_vm1, %v3780_v20, %v3781_v21  ;;  %v3875_v33 = vld [vmem:[#allocation6 + $0x2248] sm:$0xff] }
 0xb24   : > { %3852 = vmatprep.mubr.f32.mxu0 %v3785_v45  ;;  %v6588_v42 = vpack.c.bf16 %v3754_v39, %v3752_v38  ;;  %v6590_v43 = vpack.c.bf16 %v3759_v41, %v3757_v40  ;;  %v3758_v45 = vld [vmem:[#allocation6 + $0x2170] sm:$0xff]  ;;  %v3874_v38 = vld [vmem:[#allocation6 + $0x2240] sm:$0xff]  ;;  %v3879_v40 = vld [vmem:[#allocation6 + $0x2268] sm:$0xff] }
 0xb25   : > { %v6592_v48 = vpack.c.bf16 %v3758_v45, %v3756_v44  ;;  %v3876_v39 = vld [vmem:[#allocation6 + $0x2250] sm:$0xff]  ;;  %v3881_v41 = vld [vmem:[#allocation6 + $0x2278] sm:$0xff]  ;;  %v3878_v44 = vld [vmem:[#allocation6 + $0x2260] sm:$0xff] }
 0xb26   : > { %6553 = vmatpush1.bf16.msra.mxu0 %v6552_v46  ;;  %v3761_v46 = vld [vmem:[#allocation6 + $0x2188] sm:$0xff]  ;;  %v3880_v45 = vld [vmem:[#allocation6 + $0x2270] sm:$0xff]  ;;  %v3902_v20 = vld [vmem:[#allocation6 + $0x2320] sm:$0xff] }
 0xb27   : > { %6555 = vmatprep.subr.bf16.mxu0 %v6554_v47  ;;  %v3763_v47 = vld [vmem:[#allocation6 + $0x2198] sm:$0xff]  ;;  %v3900_v8 = vld [vmem:[#allocation6 + $0x2310] sm:$0xff] }
 0xb28   : > { %v6594_v49 = vpack.c.bf16 %v3763_v47, %v3761_v46  ;;  %v3883_v46 = vld [vmem:[#allocation6 + $0x2288] sm:$0xff]  ;;  %v3885_v47 = vld [vmem:[#allocation6 + $0x2298] sm:$0xff]  ;;  %v3904_v21 = vld [vmem:[#allocation6 + $0x2330] sm:$0xff] }
 0xb2a   : > { %6557 = vmatpush1.bf16.msra.mxu0 %v6556_v52  ;;  %v3765_v52 = vld [vmem:[#allocation6 + $0x21a8] sm:$0xff] }
 0xb2b   : > { %6559 = vmatprep.subr.bf16.mxu0 %v6558_v53  ;;  %v3767_v53 = vld [vmem:[#allocation6 + $0x21b8] sm:$0xff] }
 0xb2c   : > { %v6598_v55 = vpack.c.bf16 %v3767_v53, %v3765_v52  ;;  %v3887_v52 = vld [vmem:[#allocation6 + $0x22a8] sm:$0xff]  ;;  %v3889_v53 = vld [vmem:[#allocation6 + $0x22b8] sm:$0xff] }
 0xb2e   : > { %6561 = vmatpush1.bf16.msra.mxu0 %v6560_v58  ;;  %v3769_v58 = vld [vmem:[#allocation6 + $0x21c8] sm:$0xff] }
 0xb2f   : > { %6563 = vmatprep.subr.bf16.mxu0 %v6562_v59  ;;  %v3771_v59 = vld [vmem:[#allocation6 + $0x21d8] sm:$0xff] }
 0xb30   : > { %v6602_v61 = vpack.c.bf16 %v3771_v59, %v3769_v58  ;;  %v3891_v58 = vld [vmem:[#allocation6 + $0x22c8] sm:$0xff]  ;;  %v3893_v59 = vld [vmem:[#allocation6 + $0x22d8] sm:$0xff] }
 0xb32   : > { %6565 = vmatpush1.bf16.msra.mxu0 %v6564_v0  ;;  %v3773_v0 = vld [vmem:[#allocation6 + $0x21e8] sm:$0xff] }
 0xb33   : > { %6567 = vmatprep.subr.bf16.mxu0 %v6566_v3  ;;  %v3775_v3 = vld [vmem:[#allocation6 + $0x21f8] sm:$0xff] }
 0xb34   : > { %v6606_v6 = vpack.c.bf16 %v3775_v3, %v3773_v0  ;;  %v3895_v0 = vld [vmem:[#allocation6 + $0x22e8] sm:$0xff]  ;;  %v3897_v3 = vld [vmem:[#allocation6 + $0x22f8] sm:$0xff] }
 0xb36   : > { %6569 = vmatpush1.bf16.msra.mxu0 %v6568_v11  ;;  %v3867_v11 = vld [vmem:[#allocation6 + $0x2208] sm:$0xff] }
 0xb37   : > { %6571 = vmatprep.subr.bf16.mxu0 %v6570_v12  ;;  %v3869_v12 = vld [vmem:[#allocation6 + $0x2218] sm:$0xff] }
 0xb3a   : > { %6573 = vmatpush1.bf16.msra.mxu0 %v6572_v31  ;;  %v3864_v31 = vld [vmem:[#allocation2 + $0x18] sm:$0x3] }
 0xb3b   : > { %6575 = vmatprep.subr.bf16.mxu0 %v6574_v10  ;;  %v6610_v10 = vpack.c.bf16 %v3869_v12, %v3867_v11  ;;  %v3938_v25 = vrot.slane %v3864_v31, 2  ;;  %v3899_v11 = vld [vmem:[#allocation6 + $0x2308] sm:$0xff]  ;;  %v3901_v12 = vld [vmem:[#allocation6 + $0x2318] sm:$0xff] }
 0xb3c   : > { %v6642_v16 = vpack.c.bf16 %v3901_v12, %v3899_v11  ;;  %v3903_v31 = vld [vmem:[#allocation6 + $0x2328] sm:$0xff] }
 0xb3d   : > { %v3939_v35 = vsel %vm1196_vm2, %v3937_v24, %v3938_v25  ;;  %v6648_v24 = vpack.c.bf16 %v3904_v21, %v3902_v20  ;;  %v4029_v21 = vld [vmem:[#allocation6 + $0x2448] sm:$0xff] }
 0xb3e   : > { %6577 = vmatpush1.bf16.msra.mxu0 %v6576_v22  ;;  %v3871_v22 = vld [vmem:[#allocation6 + $0x2228] sm:$0xff] }
 0xb3f   : > { %6579 = vmatprep.subr.bf16.mxu0 %v6578_v23  ;;  %v3873_v23 = vld [vmem:[#allocation6 + $0x2238] sm:$0xff] }
 0xb40   : > { %v6614_v27 = vpack.c.bf16 %v3873_v23, %v3871_v22  ;;  %v3907_v22 = vld [vmem:[#allocation6 + $0x2348] sm:$0xff]  ;;  %v3909_v23 = vld [vmem:[#allocation6 + $0x2358] sm:$0xff] }
 0xb41   : > { %v6650_v25 = vpack.c.bf16 %v3909_v23, %v3907_v22  ;;  %v4031_v22 = vld [vmem:[#allocation6 + $0x2458] sm:$0xff] }
 0xb42   : > { %6581 = vmatpush1.bf16.msra.mxu0 %v6580_v28  ;;  %v3870_v28 = vld [vmem:[#allocation6 + $0x2220] sm:$0xff] }
 0xb43   : > { %6583 = vmatprep.subr.bf16.mxu0 %v6582_v30  ;;  %v3872_v30 = vld [vmem:[#allocation6 + $0x2230] sm:$0xff] }
 0xb46   : > { %6585 = vmatpush1.bf16.msra.mxu0 %v6584_v36  ;;  %v6616_v36 = vpack.c.bf16 %v3872_v30, %v3870_v28  ;;  %v3911_v28 = vld [vmem:[#allocation6 + $0x2368] sm:$0xff]  ;;  %v3913_v30 = vld [vmem:[#allocation6 + $0x2378] sm:$0xff] }
 0xb47   : > { %6587 = vmatprep.subr.bf16.mxu0 %v6586_v37  ;;  %v6618_v37 = vpack.c.bf16 %v3877_v34, %v3875_v33  ;;  %v6654_v33 = vpack.c.bf16 %v3913_v30, %v3911_v28  ;;  %v3910_v34 = vld [vmem:[#allocation6 + $0x2360] sm:$0xff] }
 0xb48   : > { %v4341_v28 = vld [vmem:[%s8248_s9] sm:$0xff] }
 0xb4a   : > { %6589 = vmatpush1.bf16.msra.mxu0 %v6588_v42  ;;  %v6620_v42 = vpack.c.bf16 %v3876_v39, %v3874_v38 }
 0xb4b   : > { %6591 = vmatprep.subr.bf16.mxu0 %v6590_v43  ;;  %v6622_v43 = vpack.c.bf16 %v3881_v41, %v3879_v40  ;;  %v3914_v40 = vld [vmem:[#allocation6 + $0x2380] sm:$0xff]  ;;  %v3916_v41 = vld [vmem:[#allocation6 + $0x2390] sm:$0xff] }
 0xb4e   : > { %6593 = vmatpush1.bf16.msra.mxu0 %v6592_v48  ;;  %v6624_v48 = vpack.c.bf16 %v3880_v45, %v3878_v44  ;;  %v6660_v44 = vpack.c.bf16 %v3916_v41, %v3914_v40  ;;  %v4344_v40 = vld [vmem:[%s8248_s9 + $0x18] sm:$0xff]  ;;  %v4361_v41 = vld [vmem:[%s8248_s9 + $0xa0] sm:$0xff] }
 0xb4f   : > { %6595 = vmatprep.subr.bf16.mxu0 %v6594_v49  ;;  %v6626_v49 = vpack.c.bf16 %v3885_v47, %v3883_v46  ;;  %v3918_v46 = vld [vmem:[#allocation6 + $0x23a0] sm:$0xff]  ;;  %v3920_v47 = vld [vmem:[#allocation6 + $0x23b0] sm:$0xff] }
 0xb52   : > { %6597 = vmatpush1.bf16.msra.mxu0 %v6596_v54  ;;  %v6628_v54 = vpack.c.bf16 %v3884_v51, %v3882_v50  ;;  %v6664_v50 = vpack.c.bf16 %v3920_v47, %v3918_v46 }
 0xb53   : > { %6599 = vmatprep.subr.bf16.mxu0 %v6598_v55  ;;  %v6630_v55 = vpack.c.bf16 %v3889_v53, %v3887_v52  ;;  %v3922_v52 = vld [vmem:[#allocation6 + $0x23c0] sm:$0xff]  ;;  %v3924_v53 = vld [vmem:[#allocation6 + $0x23d0] sm:$0xff] }
 0xb56   : > { %6601 = vmatpush1.bf16.msra.mxu0 %v6600_v60  ;;  %v6632_v60 = vpack.c.bf16 %v3888_v57, %v3886_v56  ;;  %v6668_v56 = vpack.c.bf16 %v3924_v53, %v3922_v52  ;;  %v4034_v52 = vld [vmem:[#allocation6 + $0x2470] sm:$0xff]  ;;  %v4037_v53 = vld [vmem:[#allocation6 + $0x2488] sm:$0xff] }
 0xb57   : > { %6603 = vmatprep.subr.bf16.mxu0 %v6602_v61  ;;  %v6634_v61 = vpack.c.bf16 %v3893_v59, %v3891_v58  ;;  %v3926_v58 = vld [vmem:[#allocation6 + $0x23e0] sm:$0xff]  ;;  %v3928_v59 = vld [vmem:[#allocation6 + $0x23f0] sm:$0xff] }
 0xb5a   : > { %6605 = vmatpush1.bf16.msra.mxu0 %v6604_v5  ;;  %v6636_v5 = vpack.c.bf16 %v3892_v63, %v3890_v62  ;;  %v3861_v62 = vld [vmem:[#allocation2] sm:$0xfc]  ;;  %v3863_v63 = vld [vmem:[#allocation2 + $0x10] sm:$0x3] }
 0xb5b   : > { %6607 = vmatprep.subr.bf16.mxu0 %v6606_v6  ;;  %v6638_v6 = vpack.c.bf16 %v3897_v3, %v3895_v0  ;;  %v6672_v0 = vpack.c.bf16 %v3928_v59, %v3926_v58  ;;  %v4016_v3 = vld [vmem:[#allocation2 + $0x8] sm:$0xf8]  ;;  %v3934_v11 = vrot.slane %v3861_v62, 2  ;;  %v3935_v12 = vrot.slane %v3863_v63, 2  ;;  %v4036_v58 = vld [vmem:[#allocation6 + $0x2480] sm:$0xff]  ;;  %v4038_v59 = vld [vmem:[#allocation6 + $0x2490] sm:$0xff] }
 0xb5c   : > { %v6692_v62 = vpack.c.bf16 %v4038_v59, %v4036_v58 }
 0xb5d   : > { %v3936_v20 = vsel %vm1196_vm2, %v3934_v11, %v3935_v12  ;;  %v4044_v11 = vld [vmem:[#allocation6 + $0x24c0] sm:$0xff]  ;;  %v4046_v12 = vld [vmem:[#allocation6 + $0x24d0] sm:$0xff] }
 0xb5e   : > { %6609 = vmatpush1.bf16.msra.mxu0 %v6608_v29  ;;  %v3898_v29 = vld [vmem:[#allocation6 + $0x2300] sm:$0xff] }
 0xb5f   : > { %6611 = vmatprep.subr.bf16.mxu0 %v6610_v10  ;;  %v3905_v10 = vld [vmem:[#allocation6 + $0x2338] sm:$0xff]  ;;  %v6644_v18 = vpack.c.bf16 %v3900_v8, %v3898_v29  ;;  %v4091_v29 = vrot.slane %v4016_v3, 3  ;;  %v4042_v3 = vld [vmem:[#allocation6 + $0x24b0] sm:$0xff] }
 0xb60   : > { %v6646_v19 = vpack.c.bf16 %v3905_v10, %v3903_v31  ;;  %v6676_v31 = vpack.c.bf16 %v4022_v9, %v4020_v7 }
 0xb61   : > { %3853 = vmatmul.mubr.f32.vlgmr.msra.gmra.mrb[10].mxu0 %v3782_v32 }
 0xb62   : > { %6613 = vmatpush1.bf16.msra.mxu0 %v6612_v26  ;;  %4006 = vmatprep.mubr.f32.mxu0 %v3939_v35  ;;  %v3906_v26 = vld [vmem:[#allocation6 + $0x2340] sm:$0xff]  ;;  %v3912_v35 = vld [vmem:[#allocation6 + $0x2370] sm:$0xff] }
 0xb63   : > { %6615 = vmatprep.subr.bf16.mxu0 %v6614_v27  ;;  %v3908_v27 = vld [vmem:[#allocation6 + $0x2350] sm:$0xff]  ;;  %v6656_v38 = vpack.c.bf16 %v3912_v35, %v3910_v34 }
 0xb64   : > { %v6652_v32 = vpack.c.bf16 %v3908_v27, %v3906_v26  ;;  %v4357_v26 = vld [vmem:[%s8248_s9 + $0x80] sm:$0xff]  ;;  %v4358_v27 = vld [vmem:[%s8248_s9 + $0x88] sm:$0xff]  ;;  %v4359_v34 = vld [vmem:[%s8248_s9 + $0x90] sm:$0xff] }
 0xb65   : > { %v4360_v35 = vld [vmem:[%s8248_s9 + $0x98] sm:$0xff] }
 0xb66   : > { %6617 = vmatpush1.bf16.msra.mxu0 %v6616_v36  ;;  %v3915_v36 = vld [vmem:[#allocation6 + $0x2388] sm:$0xff] }
 0xb67   : > { %6619 = vmatprep.subr.bf16.mxu0 %v6618_v37  ;;  %v3917_v37 = vld [vmem:[#allocation6 + $0x2398] sm:$0xff] }
 0xb68   : > { %v6658_v39 = vpack.c.bf16 %v3917_v37, %v3915_v36  ;;  %v6682_v36 = vpack.c.bf16 %v4031_v22, %v4029_v21  ;;  %v4052_v22 = vld [vmem:[#allocation6 + $0x2500] sm:$0xff] }
 0xb6a   : > { %6621 = vmatpush1.bf16.msra.mxu0 %v6620_v42  ;;  %v3919_v42 = vld [vmem:[#allocation6 + $0x23a8] sm:$0xff] }
 0xb6b   : > { %6623 = vmatprep.subr.bf16.mxu0 %v6622_v43  ;;  %v3921_v43 = vld [vmem:[#allocation6 + $0x23b8] sm:$0xff] }
 0xb6c   : > { %v6662_v45 = vpack.c.bf16 %v3921_v43, %v3919_v42  ;;  %v4033_v42 = vld [vmem:[#allocation6 + $0x2468] sm:$0xff]  ;;  %v4035_v43 = vld [vmem:[#allocation6 + $0x2478] sm:$0xff] }
 0xb6e   : > { %6625 = vmatpush1.bf16.msra.mxu0 %v6624_v48  ;;  %v3923_v48 = vld [vmem:[#allocation6 + $0x23c8] sm:$0xff] }
 0xb6f   : > { %6627 = vmatprep.subr.bf16.mxu0 %v6626_v49  ;;  %v3925_v49 = vld [vmem:[#allocation6 + $0x23d8] sm:$0xff] }
 0xb70   : > { %v6666_v51 = vpack.c.bf16 %v3925_v49, %v3923_v48  ;;  %v4345_v48 = vld [vmem:[%s8248_s9 + $0x20] sm:$0xff]  ;;  %v4346_v49 = vld [vmem:[%s8248_s9 + $0x28] sm:$0xff] }
 0xb72   : > { %6629 = vmatpush1.bf16.msra.mxu0 %v6628_v54  ;;  %v3927_v54 = vld [vmem:[#allocation6 + $0x23e8] sm:$0xff] }
 0xb73   : > { %6631 = vmatprep.subr.bf16.mxu0 %v6630_v55  ;;  %v3929_v55 = vld [vmem:[#allocation6 + $0x23f8] sm:$0xff] }
 0xb74   : > { %v6670_v57 = vpack.c.bf16 %v3929_v55, %v3927_v54  ;;  %v4039_v54 = vld [vmem:[#allocation6 + $0x2498] sm:$0xff]  ;;  %v7980_v55 = vpack.c.bf16 %v4346_v49, %v4345_v48  ;;  %v4066_v48 = vld [vmem:[#allocation6 + $0x2570] sm:$0xff]  ;;  %v4069_v49 = vld [vmem:[#allocation6 + $0x2588] sm:$0xff] }
 0xb76   : > { %6633 = vmatpush1.bf16.msra.mxu0 %v6632_v60  ;;  %v4021_v60 = vld [vmem:[#allocation6 + $0x2408] sm:$0xff] }
 0xb77   : > { %6635 = vmatprep.subr.bf16.mxu0 %v6634_v61  ;;  %v4023_v61 = vld [vmem:[#allocation6 + $0x2418] sm:$0xff] }
 0xb7a   : > { %6637 = vmatpush1.bf16.msra.mxu0 %v6636_v5  ;;  %v4018_v5 = vld [vmem:[#allocation2 + $0x18] sm:$0x7] }
 0xb7b   : > { %6639 = vmatprep.subr.bf16.mxu0 %v6638_v6  ;;  %v6674_v6 = vpack.c.bf16 %v4023_v61, %v4021_v60  ;;  %v4092_v8 = vrot.slane %v4018_v5, 3  ;;  %v4041_v60 = vld [vmem:[#allocation6 + $0x24a8] sm:$0xff]  ;;  %v4043_v61 = vld [vmem:[#allocation6 + $0x24b8] sm:$0xff] }
 0xb7c   : > { %v6694_v63 = vpack.c.bf16 %v4043_v61, %v4041_v60  ;;  %v4045_v5 = vld [vmem:[#allocation6 + $0x24c8] sm:$0xff]  ;;  %v4072_v60 = vld [vmem:[#allocation6 + $0x25a0] sm:$0xff]  ;;  %v4074_v61 = vld [vmem:[#allocation6 + $0x25b0] sm:$0xff] }
 0xb7d   : > { %v4093_v23 = vsel %vm1351_vm3, %v4091_v29, %v4092_v8  ;;  %v6700_v29 = vpack.c.bf16 %v4046_v12, %v4044_v11 }
 0xb7e   : > { %6641 = vmatpush1.bf16.msra.mxu0 %v6640_v14  ;;  %v4025_v14 = vld [vmem:[#allocation6 + $0x2428] sm:$0xff] }
 0xb7f   : > { %6643 = vmatprep.subr.bf16.mxu0 %v6642_v16  ;;  %v4027_v16 = vld [vmem:[#allocation6 + $0x2438] sm:$0xff] }
 0xb80   : > { %v6678_v10 = vpack.c.bf16 %v4027_v16, %v4025_v14  ;;  %v4049_v14 = vld [vmem:[#allocation6 + $0x24e8] sm:$0xff]  ;;  %v4051_v16 = vld [vmem:[#allocation6 + $0x24f8] sm:$0xff] }
 0xb81   : > { %v6702_v8 = vpack.c.bf16 %v4051_v16, %v4049_v14  ;;  %v4080_v14 = vld [vmem:[#allocation6 + $0x25e0] sm:$0xff]  ;;  %v4082_v16 = vld [vmem:[#allocation6 + $0x25f0] sm:$0xff] }
 0xb82   : > { %6645 = vmatpush1.bf16.msra.mxu0 %v6644_v18  ;;  %v4024_v18 = vld [vmem:[#allocation6 + $0x2420] sm:$0xff] }
 0xb83   : > { %6647 = vmatprep.subr.bf16.mxu0 %v6646_v19  ;;  %v4026_v19 = vld [vmem:[#allocation6 + $0x2430] sm:$0xff] }
 0xb84   : > { %v6680_v30 = vpack.c.bf16 %v4026_v19, %v4024_v18  ;;  %v4053_v18 = vld [vmem:[#allocation6 + $0x2508] sm:$0xff]  ;;  %v4055_v19 = vld [vmem:[#allocation6 + $0x2518] sm:$0xff] }
 0xb85   : > { %v6706_v21 = vpack.c.bf16 %v4055_v19, %v4053_v18  ;;  %v6736_v18 = vpack.c.bf16 %v4082_v16, %v4080_v14  ;;  %v4170_v19 = vld [vmem:[#allocation2 + $0x8] sm:$0xf0]  ;;  %v4198_v14 = vld [vmem:[#allocation6 + $0x26c0] sm:$0xff]  ;;  %v4200_v16 = vld [vmem:[#allocation6 + $0x26d0] sm:$0xff] }
 0xb86   : > { %6649 = vmatpush1.bf16.msra.mxu0 %v6648_v24  ;;  %v4028_v24 = vld [vmem:[#allocation6 + $0x2440] sm:$0xff] }
 0xb87   : > { %6651 = vmatprep.subr.bf16.mxu0 %v6650_v25  ;;  %v4030_v25 = vld [vmem:[#allocation6 + $0x2450] sm:$0xff] }
 0xb88   : > { %v6684_v46 = vpack.c.bf16 %v4030_v25, %v4028_v24  ;;  %v4057_v24 = vld [vmem:[#allocation6 + $0x2528] sm:$0xff]  ;;  %v4059_v25 = vld [vmem:[#allocation6 + $0x2538] sm:$0xff] }
 0xb8a   : > { %6653 = vmatpush1.bf16.msra.mxu0 %v6652_v32  ;;  %v7939_v32 = vpack.c.bf16 %v4358_v27, %v4357_v26  ;;  %v6710_v27 = vpack.c.bf16 %v4059_v25, %v4057_v24 }
 0xb8b   : > { %6655 = vmatprep.subr.bf16.mxu0 %v6654_v33  ;;  %v4342_v33 = vld [vmem:[%s8248_s9 + $0x8] sm:$0xff] }
 0xb8c   : > { %v7950_v37 = vpack.c.bf16 %v4342_v33, %v4341_v28  ;;  %6803 = vmatprep.subr.bf16.mxu1 %v7939_v32  ;;  %v4056_v28 = vld [vmem:[#allocation6 + $0x2520] sm:$0xff]  ;;  %v4061_v33 = vld [vmem:[#allocation6 + $0x2548] sm:$0xff] }
 0xb8e   : > { %6657 = vmatpush1.bf16.msra.mxu0 %v6656_v38  ;;  %v7952_v38 = vpack.c.bf16 %v4360_v35, %v4359_v34  ;;  %6805 = vmatpush3.bf16.msra.mxu1 %v7950_v37  ;;  %v4063_v34 = vld [vmem:[#allocation6 + $0x2558] sm:$0xff] }
 0xb8f   : > { %6659 = vmatprep.subr.bf16.mxu0 %v6658_v39  ;;  %v4343_v39 = vld [vmem:[%s8248_s9 + $0x10] sm:$0xff] }
 0xb90   : > { %6807 = vmatprep.subr.bf16.mxu1 %v7952_v38 }
 0xb92   : > { %6661 = vmatpush1.bf16.msra.mxu0 %v6660_v44  ;;  %v4362_v44 = vld [vmem:[%s8248_s9 + $0xa8] sm:$0xff] }
 0xb93   : > { %6663 = vmatprep.subr.bf16.mxu0 %v6662_v45  ;;  %v7968_v45 = vpack.c.bf16 %v4344_v40, %v4343_v39  ;;  %v7971_v47 = vpack.c.bf16 %v4362_v44, %v4361_v41  ;;  %v4060_v39 = vld [vmem:[#allocation6 + $0x2540] sm:$0xff]  ;;  %v4062_v40 = vld [vmem:[#allocation6 + $0x2550] sm:$0xff]  ;;  %v4065_v41 = vld [vmem:[#allocation6 + $0x2568] sm:$0xff] }
 0xb95   : > { %6809 = vmatpush3.bf16.msra.mxu1 %v7968_v45 }
 0xb96   : > { %6665 = vmatpush1.bf16.msra.mxu0 %v6664_v50  ;;  %v6686_v50 = vpack.c.bf16 %v4035_v43, %v4033_v42  ;;  %6811 = vmatprep.subr.bf16.mxu1 %v7971_v47  ;;  %v4067_v42 = vld [vmem:[#allocation6 + $0x2578] sm:$0xff]  ;;  %v6716_v43 = vpack.c.bf16 %v4062_v40, %v4060_v39  ;;  %v4183_v40 = vld [vmem:[#allocation6 + $0x2648] sm:$0xff] }
 0xb97   : > { %6667 = vmatprep.subr.bf16.mxu0 %v6666_v51  ;;  %v4032_v51 = vld [vmem:[#allocation6 + $0x2460] sm:$0xff]  ;;  %v6718_v44 = vpack.c.bf16 %v4067_v42, %v4065_v41  ;;  %v4185_v41 = vld [vmem:[#allocation6 + $0x2658] sm:$0xff] }
 0xb99   : > { %6813 = vmatpush3.bf16.msra.mxu1 %v7980_v55 }
 0xb9a   : > { %6669 = vmatpush1.bf16.msra.mxu0 %v6668_v56  ;;  %v6688_v56 = vpack.c.bf16 %v4034_v52, %v4032_v51 }
 0xb9b   : > { %6671 = vmatprep.subr.bf16.mxu0 %v6670_v57  ;;  %v6690_v57 = vpack.c.bf16 %v4039_v54, %v4037_v53  ;;  %v4068_v53 = vld [vmem:[#allocation6 + $0x2580] sm:$0xff]  ;;  %v4070_v54 = vld [vmem:[#allocation6 + $0x2590] sm:$0xff] }
 0xb9c   : > { %v6724_v58 = vpack.c.bf16 %v4070_v54, %v4068_v53  ;;  %v4186_v53 = vld [vmem:[#allocation6 + $0x2660] sm:$0xff]  ;;  %v4188_v54 = vld [vmem:[#allocation6 + $0x2670] sm:$0xff] }
 0xb9e   : > { %6673 = vmatpush1.bf16.msra.mxu0 %v6672_v0  ;;  %v4040_v0 = vld [vmem:[#allocation6 + $0x24a0] sm:$0xff] }
 0xb9f   : > { %6675 = vmatprep.subr.bf16.mxu0 %v6674_v6  ;;  %v4047_v6 = vld [vmem:[#allocation6 + $0x24d8] sm:$0xff]  ;;  %v6696_v7 = vpack.c.bf16 %v4042_v3, %v4040_v0  ;;  %v6728_v0 = vpack.c.bf16 %v4074_v61, %v4072_v60  ;;  %v4190_v60 = vld [vmem:[#allocation6 + $0x2680] sm:$0xff]  ;;  %v4192_v61 = vld [vmem:[#allocation6 + $0x2690] sm:$0xff] }
 0xba0   : > { %v6698_v9 = vpack.c.bf16 %v4047_v6, %v4045_v5  ;;  %v4076_v5 = vld [vmem:[#allocation6 + $0x25c0] sm:$0xff]  ;;  %v4078_v6 = vld [vmem:[#allocation6 + $0x25d0] sm:$0xff] }
 0xba1   : > { %4007 = vmatmul.mubr.f32.vlgmr.msra.gmra.mrb[10].mxu0 %v3936_v20  ;;  %v6732_v11 = vpack.c.bf16 %v4078_v6, %v4076_v5  ;;  %v4194_v5 = vld [vmem:[#allocation6 + $0x26a0] sm:$0xff]  ;;  %v4196_v6 = vld [vmem:[#allocation6 + $0x26b0] sm:$0xff] }
 0xba2   : > { %6677 = vmatpush1.bf16.msra.mxu0 %v6676_v31  ;;  %4160 = vmatprep.mubr.f32.mxu0 %v4093_v23  ;;  %v4048_v31 = vld [vmem:[#allocation6 + $0x24e0] sm:$0xff]  ;;  %v4054_v23 = vld [vmem:[#allocation6 + $0x2510] sm:$0xff] }
 0xba3   : > { %6679 = vmatprep.subr.bf16.mxu0 %v6678_v10  ;;  %v4050_v10 = vld [vmem:[#allocation6 + $0x24f0] sm:$0xff]  ;;  %v6708_v26 = vpack.c.bf16 %v4054_v23, %v4052_v22  ;;  %v4174_v22 = vld [vmem:[#allocation6 + $0x2600] sm:$0xff] }
 0xba4   : > { %v6704_v20 = vpack.c.bf16 %v4050_v10, %v4048_v31  ;;  %v4015_v31 = vld [vmem:[#allocation2] sm:$0xf8]  ;;  %v4017_v10 = vld [vmem:[#allocation2 + $0x10] sm:$0x7] }
 0xba5   : > { %v4176_v23 = vld [vmem:[#allocation6 + $0x2610] sm:$0xff]  ;;  %v4088_v24 = vrot.slane %v4015_v31, 3  ;;  %v4089_v25 = vrot.slane %v4017_v10, 3  ;;  %v6764_v31 = vpack.c.bf16 %v4200_v16, %v4198_v14 }
 0xba6   : > { %6681 = vmatpush1.bf16.msra.mxu0 %v6680_v30  ;;  %v4058_v30 = vld [vmem:[#allocation6 + $0x2530] sm:$0xff] }
 0xba7   : > { %6683 = vmatprep.subr.bf16.mxu0 %v6682_v36  ;;  %v6712_v35 = vpack.c.bf16 %v4058_v30, %v4056_v28  ;;  %v6714_v36 = vpack.c.bf16 %v4063_v34, %v4061_v33  ;;  %v4245_v28 = vrot.slane %v4170_v19, 4  ;;  %v6740_v33 = vpack.c.bf16 %v4176_v23, %v4174_v22  ;;  %v4204_v19 = vld [vmem:[#allocation6 + $0x26f0] sm:$0xff] }
 0xba8   : > { %v4090_v39 = vsel %vm1351_vm3, %v4088_v24, %v4089_v25  ;;  %v4206_v24 = vld [vmem:[#allocation6 + $0x2700] sm:$0xff]  ;;  %v4208_v25 = vld [vmem:[#allocation6 + $0x2710] sm:$0xff] }
 0xbaa   : > { %6685 = vmatpush1.bf16.msra.mxu0 %v6684_v46  ;;  %v4064_v46 = vld [vmem:[#allocation6 + $0x2560] sm:$0xff] }
 0xbab   : > { %6687 = vmatprep.subr.bf16.mxu0 %v6686_v50  ;;  %v4071_v50 = vld [vmem:[#allocation6 + $0x2598] sm:$0xff]  ;;  %v6720_v51 = vpack.c.bf16 %v4066_v48, %v4064_v46  ;;  %v4182_v46 = vld [vmem:[#allocation6 + $0x2640] sm:$0xff]  ;;  %v4184_v48 = vld [vmem:[#allocation6 + $0x2650] sm:$0xff] }
 0xbac   : > { %v6722_v52 = vpack.c.bf16 %v4071_v50, %v4069_v49  ;;  %v4187_v49 = vld [vmem:[#allocation6 + $0x2668] sm:$0xff]  ;;  %v4189_v50 = vld [vmem:[#allocation6 + $0x2678] sm:$0xff] }
 0xbae   : > { %6689 = vmatpush1.bf16.msra.mxu0 %v6688_v56  ;;  %v4073_v56 = vld [vmem:[#allocation6 + $0x25a8] sm:$0xff] }
 0xbaf   : > { %6691 = vmatprep.subr.bf16.mxu0 %v6690_v57  ;;  %v4075_v57 = vld [vmem:[#allocation6 + $0x25b8] sm:$0xff] }
 0xbb0   : > { %v6726_v59 = vpack.c.bf16 %v4075_v57, %v4073_v56  ;;  %v4191_v56 = vld [vmem:[#allocation6 + $0x2688] sm:$0xff]  ;;  %v4193_v57 = vld [vmem:[#allocation6 + $0x2698] sm:$0xff] }
 0xbb2   : > { %6693 = vmatpush1.bf16.msra.mxu0 %v6692_v62  ;;  %v4077_v62 = vld [vmem:[#allocation6 + $0x25c8] sm:$0xff] }
 0xbb3   : > { %6695 = vmatprep.subr.bf16.mxu0 %v6694_v63  ;;  %v4079_v63 = vld [vmem:[#allocation6 + $0x25d8] sm:$0xff] }
 0xbb4   : > { %v6730_v3 = vpack.c.bf16 %v4079_v63, %v4077_v62  ;;  %v4195_v62 = vld [vmem:[#allocation6 + $0x26a8] sm:$0xff]  ;;  %v4197_v63 = vld [vmem:[#allocation6 + $0x26b8] sm:$0xff] }
 0xbb6   : > { %6697 = vmatpush1.bf16.msra.mxu0 %v6696_v7  ;;  %v4081_v7 = vld [vmem:[#allocation6 + $0x25e8] sm:$0xff] }
 0xbb7   : > { %6699 = vmatprep.subr.bf16.mxu0 %v6698_v9  ;;  %v4083_v9 = vld [vmem:[#allocation6 + $0x25f8] sm:$0xff] }
 0xbb8   : > { %v6734_v12 = vpack.c.bf16 %v4083_v9, %v4081_v7  ;;  %v4199_v7 = vld [vmem:[#allocation6 + $0x26c8] sm:$0xff]  ;;  %v4201_v9 = vld [vmem:[#allocation6 + $0x26d8] sm:$0xff] }
 0xbba   : > { %6701 = vmatpush1.bf16.msra.mxu0 %v6700_v29  ;;  %v4175_v29 = vld [vmem:[#allocation6 + $0x2608] sm:$0xff] }
 0xbbb   : > { %6703 = vmatprep.subr.bf16.mxu0 %v6702_v8  ;;  %v4177_v8 = vld [vmem:[#allocation6 + $0x2618] sm:$0xff] }
 0xbbe   : > { %6705 = vmatpush1.bf16.msra.mxu0 %v6704_v20  ;;  %v4172_v20 = vld [vmem:[#allocation2 + $0x18] sm:$0xf] }
 0xbbf   : > { %6707 = vmatprep.subr.bf16.mxu0 %v6706_v21  ;;  %v6738_v21 = vpack.c.bf16 %v4177_v8, %v4175_v29  ;;  %v4246_v30 = vrot.slane %v4172_v20, 4  ;;  %v4203_v29 = vld [vmem:[#allocation6 + $0x26e8] sm:$0xff]  ;;  %v4205_v8 = vld [vmem:[#allocation6 + $0x26f8] sm:$0xff] }
 0xbc0   : > { %v6766_v10 = vpack.c.bf16 %v4205_v8, %v4203_v29  ;;  %v4207_v20 = vld [vmem:[#allocation6 + $0x2708] sm:$0xff]  ;;  %v4234_v29 = vld [vmem:[#allocation6 + $0x27e0] sm:$0xff]  ;;  %v4236_v8 = vld [vmem:[#allocation6 + $0x27f0] sm:$0xff] }
 0xbc1   : > { %v4247_v42 = vsel %vm1506_vm4, %v4245_v28, %v4246_v30  ;;  %v6772_v28 = vpack.c.bf16 %v4208_v25, %v4206_v24  ;;  %v4347_v25 = vld [vmem:[%s8248_s9 + $0x30] sm:$0xff] }
 0xbc2   : > { %6709 = vmatpush1.bf16.msra.mxu0 %v6708_v26  ;;  %v4179_v26 = vld [vmem:[#allocation6 + $0x2628] sm:$0xff] }
 0xbc3   : > { %6711 = vmatprep.subr.bf16.mxu0 %v6710_v27  ;;  %v4181_v27 = vld [vmem:[#allocation6 + $0x2638] sm:$0xff] }
 0xbc4   : > { %v6742_v34 = vpack.c.bf16 %v4181_v27, %v4179_v26  ;;  %v4211_v26 = vld [vmem:[#allocation6 + $0x2728] sm:$0xff]  ;;  %v4213_v27 = vld [vmem:[#allocation6 + $0x2738] sm:$0xff] }
 0xbc5   : > { %v6774_v30 = vpack.c.bf16 %v4213_v27, %v4211_v26  ;;  %v4348_v26 = vld [vmem:[%s8248_s9 + $0x38] sm:$0xff] }
 0xbc6   : > { %6713 = vmatpush1.bf16.msra.mxu0 %v6712_v35  ;;  %v4178_v35 = vld [vmem:[#allocation6 + $0x2620] sm:$0xff]  ;;  %v8004_v27 = vpack.c.bf16 %v4348_v26, %v4347_v25  ;;  %v4525_v25 = vld [vmem:[#allocation11 + $0x2] sm:$0x3]  ;;  %v4449_v26 = vld [vmem:[#allocation9 + $0x1] sm:$0x1] }
 0xbc7   : > { %6715 = vmatprep.subr.bf16.mxu0 %v6714_v36  ;;  %v4180_v36 = vld [vmem:[#allocation6 + $0x2630] sm:$0xff] }
 0xbca   : > { %6717 = vmatpush1.bf16.msra.mxu0 %v6716_v43  ;;  %v6744_v43 = vpack.c.bf16 %v4180_v36, %v4178_v35  ;;  %v4215_v35 = vld [vmem:[#allocation6 + $0x2748] sm:$0xff]  ;;  %v4217_v36 = vld [vmem:[#allocation6 + $0x2758] sm:$0xff] }
 0xbcb   : > { %6719 = vmatprep.subr.bf16.mxu0 %v6718_v44  ;;  %v6746_v44 = vpack.c.bf16 %v4185_v41, %v4183_v40  ;;  %v6778_v40 = vpack.c.bf16 %v4217_v36, %v4215_v35  ;;  %v4214_v41 = vld [vmem:[#allocation6 + $0x2740] sm:$0xff] }
 0xbcc   : > { %v4350_v35 = vld [vmem:[%s8248_s9 + $0x48] sm:$0xff] }
 0xbce   : > { %6721 = vmatpush1.bf16.msra.mxu0 %v6720_v51  ;;  %v6748_v51 = vpack.c.bf16 %v4184_v48, %v4182_v46 }
 0xbcf   : > { %6723 = vmatprep.subr.bf16.mxu0 %v6722_v52  ;;  %v6750_v52 = vpack.c.bf16 %v4189_v50, %v4187_v49  ;;  %v4218_v49 = vld [vmem:[#allocation6 + $0x2760] sm:$0xff]  ;;  %v4220_v50 = vld [vmem:[#allocation6 + $0x2770] sm:$0xff] }
 0xbd2   : > { %6725 = vmatpush1.bf16.msra.mxu0 %v6724_v58  ;;  %v6752_v58 = vpack.c.bf16 %v4188_v54, %v4186_v53  ;;  %v6784_v53 = vpack.c.bf16 %v4220_v50, %v4218_v49  ;;  %v4353_v50 = vld [vmem:[%s8248_s9 + $0x60] sm:$0xff] }
 0xbd3   : > { %6727 = vmatprep.subr.bf16.mxu0 %v6726_v59  ;;  %v6754_v59 = vpack.c.bf16 %v4193_v57, %v4191_v56  ;;  %v4222_v56 = vld [vmem:[#allocation6 + $0x2780] sm:$0xff]  ;;  %v4224_v57 = vld [vmem:[#allocation6 + $0x2790] sm:$0xff] }
 0xbd6   : > { %6729 = vmatpush1.bf16.msra.mxu0 %v6728_v0  ;;  %v6756_v0 = vpack.c.bf16 %v4192_v61, %v4190_v60  ;;  %v6788_v60 = vpack.c.bf16 %v4224_v57, %v4222_v56  ;;  %v4355_v57 = vld [vmem:[%s8248_s9 + $0x70] sm:$0xff] }
 0xbd7   : > { %6731 = vmatprep.subr.bf16.mxu0 %v6730_v3  ;;  %v6758_v3 = vpack.c.bf16 %v4197_v63, %v4195_v62  ;;  %v4226_v62 = vld [vmem:[#allocation6 + $0x27a0] sm:$0xff]  ;;  %v4228_v63 = vld [vmem:[#allocation6 + $0x27b0] sm:$0xff] }
 0xbda   : > { %6733 = vmatpush1.bf16.msra.mxu0 %v6732_v11  ;;  %v6760_v11 = vpack.c.bf16 %v4196_v6, %v4194_v5  ;;  %v6792_v5 = vpack.c.bf16 %v4228_v63, %v4226_v62  ;;  %v3555_v63 = vld [vmem:[#allocation8 + $0x6] sm:$0x3] }
 0xbdb   : > { %6735 = vmatprep.subr.bf16.mxu0 %v6734_v12  ;;  %v6762_v12 = vpack.c.bf16 %v4201_v9, %v4199_v7  ;;  %v4230_v7 = vld [vmem:[#allocation6 + $0x27c0] sm:$0xff]  ;;  %v4232_v9 = vld [vmem:[#allocation6 + $0x27d0] sm:$0xff] }
 0xbdc   : > { %v6796_v14 = vpack.c.bf16 %v4232_v9, %v4230_v7 }
 0xbde   : > { %6737 = vmatpush1.bf16.msra.mxu0 %v6736_v18  ;;  %v4202_v18 = vld [vmem:[#allocation6 + $0x26e0] sm:$0xff] }
 0xbdf   : > { %6739 = vmatprep.subr.bf16.mxu0 %v6738_v21  ;;  %v4209_v21 = vld [vmem:[#allocation6 + $0x2718] sm:$0xff]  ;;  %v6768_v22 = vpack.c.bf16 %v4204_v19, %v4202_v18  ;;  %v6800_v18 = vpack.c.bf16 %v4236_v8, %v4234_v29 }
 0xbe0   : > { %v6770_v23 = vpack.c.bf16 %v4209_v21, %v4207_v20 }
 0xbe1   : > { %4161 = vmatmul.mubr.f32.vlgmr.msra.gmra.mrb[10].mxu0 %v4090_v39 }
 0xbe2   : > { %6741 = vmatpush1.bf16.msra.mxu0 %v6740_v33  ;;  %4314 = vmatprep.mubr.f32.mxu0 %v4247_v42  ;;  %v4210_v33 = vld [vmem:[#allocation6 + $0x2720] sm:$0xff]  ;;  %v4216_v42 = vld [vmem:[#allocation6 + $0x2750] sm:$0xff] }
 0xbe3   : > { %6743 = vmatprep.subr.bf16.mxu0 %v6742_v34  ;;  %v4212_v34 = vld [vmem:[#allocation6 + $0x2730] sm:$0xff]  ;;  %v6780_v46 = vpack.c.bf16 %v4216_v42, %v4214_v41 }
 0xbe4   : > { %v6776_v39 = vpack.c.bf16 %v4212_v34, %v4210_v33  ;;  %v4349_v34 = vld [vmem:[%s8248_s9 + $0x40] sm:$0xff]  ;;  %v4351_v41 = vld [vmem:[%s8248_s9 + $0x50] sm:$0xff] }
 0xbe5   : > { %v8022_v36 = vpack.c.bf16 %v4350_v35, %v4349_v34  ;;  %v4611_v34 = vld [vmem:[#allocation14 + $0x8] sm:$0xff]  ;;  %v4613_v35 = vld [vmem:[#allocation14 + $0x18] sm:$0xff] }
 0xbe6   : > { %6745 = vmatpush1.bf16.msra.mxu0 %v6744_v43  ;;  %v4219_v43 = vld [vmem:[#allocation6 + $0x2768] sm:$0xff] }
 0xbe7   : > { %6747 = vmatprep.subr.bf16.mxu0 %v6746_v44  ;;  %v4221_v44 = vld [vmem:[#allocation6 + $0x2778] sm:$0xff] }
 0xbe8   : > { %v6782_v48 = vpack.c.bf16 %v4221_v44, %v4219_v43  ;;  %v4352_v43 = vld [vmem:[%s8248_s9 + $0x58] sm:$0xff]  ;;  %v4369_v44 = vld [vmem:[%s8248_s9 + $0xe0] sm:$0xff] }
 0xbea   : > { %6749 = vmatpush1.bf16.msra.mxu0 %v6748_v51  ;;  %v4223_v51 = vld [vmem:[#allocation6 + $0x2788] sm:$0xff] }
 0xbeb   : > { %6751 = vmatprep.subr.bf16.mxu0 %v6750_v52  ;;  %v4225_v52 = vld [vmem:[#allocation6 + $0x2798] sm:$0xff] }
 0xbec   : > { %v6786_v54 = vpack.c.bf16 %v4225_v52, %v4223_v51  ;;  %v4354_v51 = vld [vmem:[%s8248_s9 + $0x68] sm:$0xff]  ;;  %v4371_v52 = vld [vmem:[%s8248_s9 + $0xf0] sm:$0xff] }
 0xbee   : > { %6753 = vmatpush1.bf16.msra.mxu0 %v6752_v58  ;;  %v4227_v58 = vld [vmem:[#allocation6 + $0x27a8] sm:$0xff] }
 0xbef   : > { %6755 = vmatprep.subr.bf16.mxu0 %v6754_v59  ;;  %v4229_v59 = vld [vmem:[#allocation6 + $0x27b8] sm:$0xff] }
 0xbf0   : > { %v6790_v61 = vpack.c.bf16 %v4229_v59, %v4227_v58  ;;  %v4356_v58 = vld [vmem:[%s8248_s9 + $0x78] sm:$0xff]  ;;  %v5244_v59 = vld [vmem:[%s8244_s5 + $0x20] sm:$0xff] }
 0xbf1   : > { %v6832_v62 = vpack.c.bf16 %v4356_v58, %v4355_v57 }
 0xbf2   : > { %6757 = vmatpush1.bf16.msra.mxu0 %v6756_v0  ;;  %v4231_v0 = vld [vmem:[#allocation6 + $0x27c8] sm:$0xff] }
 0xbf3   : > { %6759 = vmatprep.subr.bf16.mxu0 %v6758_v3  ;;  %v4233_v3 = vld [vmem:[#allocation6 + $0x27d8] sm:$0xff] }
 0xbf4   : > { %v6794_v6 = vpack.c.bf16 %v4233_v3, %v4231_v0  ;;  %v3560_v0 = vrot.slane %v3555_v63, %v7743_v2  ;;  %v3564_v3 = vrot.slane %v3555_v63, %v7745_v4  ;;  %v4728_v63 = vld [vmem:[%s8250_s11 + $0x90] sm:$0xff] }
 0xbf6   : > { %6761 = vmatpush1.bf16.msra.mxu0 %v6760_v11  ;;  %v4235_v11 = vld [vmem:[#allocation6 + $0x27e8] sm:$0xff] }
 0xbf7   : > { %6763 = vmatprep.subr.bf16.mxu0 %v6762_v12  ;;  %v4237_v12 = vld [vmem:[#allocation6 + $0x27f8] sm:$0xff] }
 0xbf8   : > { %v6798_v16 = vpack.c.bf16 %v4237_v12, %v4235_v11 }
 0xbfa   : > { %6765 = vmatpush1.bf16.msra.mxu0 %v6764_v31  ;;  %v4169_v31 = vld [vmem:[#allocation2] sm:$0xf0] }
 0xbfb   : > { %6767 = vmatprep.subr.bf16.mxu0 %v6766_v10  ;;  %v4171_v10 = vld [vmem:[#allocation2 + $0x10] sm:$0xf]  ;;  %v4242_v19 = vrot.slane %v4169_v31, 4 }
 0xbfc   : > { %v4243_v20 = vrot.slane %v4171_v10, 4 }
 0xbfe   : > { %6769 = vmatpush1.bf16.msra.mxu0 %v6768_v22  ;;  %v4244_v21 = vsel %vm1506_vm4, %v4242_v19, %v4243_v20  ;;  %v4363_v22 = vld [vmem:[%s8248_s9 + $0xb0] sm:$0xff] }
 0xbff   : > { %6771 = vmatprep.subr.bf16.mxu0 %v6770_v23  ;;  %v4364_v23 = vld [vmem:[%s8248_s9 + $0xb8] sm:$0xff] }
 0xc00   : > { %v7996_v24 = vpack.c.bf16 %v4364_v23, %v4363_v22 }
 0xc02   : > { %6773 = vmatpush1.bf16.msra.mxu0 %v6772_v28  ;;  %6815 = vmatprep.subr.bf16.mxu1 %v7996_v24  ;;  %v4365_v28 = vld [vmem:[%s8248_s9 + $0xc0] sm:$0xff] }
 0xc03   : > { %6775 = vmatprep.subr.bf16.mxu0 %v6774_v30  ;;  %6817 = vmatpush3.bf16.msra.mxu1 %v8004_v27  ;;  %v4366_v30 = vld [vmem:[%s8248_s9 + $0xc8] sm:$0xff] }
 0xc04   : > { %v8014_v33 = vpack.c.bf16 %v4366_v30, %v4365_v28 }
 0xc06   : > { %6777 = vmatpush1.bf16.msra.mxu0 %v6776_v39  ;;  %v4367_v39 = vld [vmem:[%s8248_s9 + $0xd0] sm:$0xff]  ;;  %6819 = vmatprep.subr.bf16.mxu1 %v8014_v33 }
 0xc07   : > { %6779 = vmatprep.subr.bf16.mxu0 %v6778_v40  ;;  %v4368_v40 = vld [vmem:[%s8248_s9 + $0xd8] sm:$0xff]  ;;  %6821 = vmatpush3.bf16.msra.mxu1 %v8022_v36 }
 0xc08   : > { %v8034_v42 = vpack.c.bf16 %v4368_v40, %v4367_v39  ;;  %v6840_v39 = vpack.c.bf16 %v4613_v35, %v4611_v34  ;;  %v4612_v40 = vld [vmem:[#allocation14 + $0x10] sm:$0xff] }
 0xc09   : > { %v4739_v34 = vld [vmem:[%s8250_s11 + $0xe8] sm:$0xff]  ;;  %v4722_v35 = vld [vmem:[%s8250_s11 + $0x60] sm:$0xff] }
 0xc0a   : > { %6781 = vmatpush1.bf16.msra.mxu0 %v6780_v46  ;;  %v4370_v46 = vld [vmem:[%s8248_s9 + $0xe8] sm:$0xff]  ;;  %6823 = vmatprep.subr.bf16.mxu1 %v8034_v42 }
 0xc0b   : > { %6783 = vmatprep.subr.bf16.mxu0 %v6782_v48  ;;  %v6824_v48 = vpack.c.bf16 %v4352_v43, %v4351_v41  ;;  %v6826_v49 = vpack.c.bf16 %v4370_v46, %v4369_v44  ;;  %v4615_v41 = vld [vmem:[#allocation14 + $0x28] sm:$0xff]  ;;  %v4614_v46 = vld [vmem:[#allocation14 + $0x20] sm:$0xff] }
 0xc0d   : > { %6825 = vmatpush3.bf16.msra.mxu1 %v6824_v48 }
 0xc0e   : > { %6785 = vmatpush1.bf16.msra.mxu0 %v6784_v53  ;;  %v4372_v53 = vld [vmem:[%s8248_s9 + $0xf8] sm:$0xff]  ;;  %6827 = vmatprep.subr.bf16.mxu1 %v6826_v49 }
 0xc0f   : > { %6787 = vmatprep.subr.bf16.mxu0 %v6786_v54  ;;  %v6828_v54 = vpack.c.bf16 %v4354_v51, %v4353_v50  ;;  %v6830_v56 = vpack.c.bf16 %v4372_v53, %v4371_v52  ;;  %v4726_v50 = vld [vmem:[%s8250_s11 + $0x80] sm:$0xff]  ;;  %v4727_v51 = vld [vmem:[%s8250_s11 + $0x88] sm:$0xff]  ;;  %v4527_v53 = vld [vmem:[#allocation12 + $0x1] sm:$0x1] }
 0xc10   : > { %v6848_v52 = vpack.c.bf16 %v4727_v51, %v4726_v50 }
 0xc11   : > { %6829 = vmatpush3.bf16.msra.mxu1 %v6828_v54 }
 0xc12   : > { %6789 = vmatpush1.bf16.msra.mxu0 %v6788_v60  ;;  %v5245_v60 = vld [vmem:[%s8244_s5 + $0x28] sm:$0xff]  ;;  %6831 = vmatprep.subr.bf16.mxu1 %v6830_v56 }
 0xc13   : > { %6791 = vmatprep.subr.bf16.mxu0 %v6790_v61  ;;  %v6835_v61 = vpack.c.bf16 %v5245_v60, %v5244_v59 }
 0xc15   : > { %6833 = vmatpush3.bf16.msra.mxu1 %v6832_v62 }
 0xc16   : > { %6793 = vmatpush1.bf16.msra.mxu0 %v6792_v5  ;;  %6881 = vmatprep.subr.bf16.mxu1 %v7939_v32 }
 0xc17   : > { %6795 = vmatprep.subr.bf16.mxu0 %v6794_v6 }
 0xc1a   : > { %6797 = vmatpush1.bf16.msra.mxu0 %v6796_v14 }
 0xc1b   : > { %6799 = vmatprep.subr.bf16.mxu0 %v6798_v16 }
 0xc1e   : > { %6801 = vmatpush1.bf16.msra.mxu0 %v6800_v18 }
 0xc1f   : > { %6834 = vmatprep.subr.bf16.mxu0 %v7374_v17 }
 0xc21   : > { %4315 = vmatmul.mubr.f32.vlgmr.msra.gmra.mrb[10].mxu0 %v4244_v21 }
 0xc22   : > { %5441 = vmatprep.mubr.msk.f32.mxu0 %vm7375_vm9, %v7373_v1  ;;  %6836 = vmatpush3.bf16.msra.mxu0 %v6835_v61  ;;  %v4710_v61 = vld [vmem:[%s8250_s11] sm:$0xff] }
 0xc23   : > { %6837 = vmatprep.subr.bf16.mxu0 %v7374_v17 }
 0xcf4   : > { %v4316_v5 = vpop.f32.mrb[10].mxu0 }
 0xcf5   : > { %v6924_v6 = vadd.f32 %v4316_v5, %v3560_v0  ;;  %v4318_v7 = vpop.f32.mrb[11].mxu0  ;;  %v4729_v0 = vld [vmem:[%s8250_s11 + $0x98] sm:$0xff] }
 0xcf6   : > { %v6925_v9 = vadd.f32 %v4318_v7, %v3564_v3  ;;  %v6852_v5 = vpack.c.bf16 %v4729_v0, %v4728_v63  ;;  %v4713_v7 = vld [vmem:[%s8250_s11 + $0x18] sm:$0xff] }
 0xcf7   : > { %vm4323_vm1 = vcmp.gt.f32.partialorder %v6924_v6, 0.0  ;;  %v4325_v11 = vmul.f32 0.01, %v6924_v6 }
 0xcf8   : > { %vm4324_vm2 = vcmp.gt.f32.partialorder %v6925_v9, 0.0  ;;  %v4326_v12 = vmul.f32 0.01, %v6925_v9 }
 0xcf9   : > { %v8075_v14 = vsel %vm4323_vm1, %v6924_v6, %v4325_v11  ;;  %v4712_v6 = vld [vmem:[%s8250_s11 + $0x10] sm:$0xff]  ;;  %v4730_v11 = vld [vmem:[%s8250_s11 + $0xa0] sm:$0xff] }
 0xcfa   : > { %v4329_v16 = vrot.slane %v8075_v14, 4  ;;  %v8078_v29 = vsel %vm4324_vm2, %v6925_v9, %v4326_v12  ;;  %v4731_v12 = vld [vmem:[%s8250_s11 + $0xa8] sm:$0xff] }
 0xcfb   : > { %v4335_v32 = vrot.slane %v8078_v29, 4 }
 0xcfc   : > { %v4330_v8 = vadd.f32 %v4329_v16, %v8075_v14  ;;  %v6854_v16 = vpack.c.bf16 %v4713_v7, %v4712_v6 }
 0xcfd   : > { %v4336_v4 = vadd.f32 %v4335_v32, %v8078_v29  ;;  %v6856_v32 = vpack.c.bf16 %v4731_v12, %v4730_v11  ;;  %v4950_v11 = vld [vmem:[%s8253_s14] sm:$0xff]  ;;  %v4951_v12 = vld [vmem:[%s8253_s14 + $0x8] sm:$0xff] }
 0xcfe   : > { %v4331_v31 = vrot.slane %v4330_v8, 2 }
 0xcff   : > { %v4337_v10 = vrot.slane %v4336_v4, 2 }
 0xd00   : > { %v4332_v18 = vadd.f32 %v4331_v31, %v4330_v8  ;;  %v4714_v8 = vld [vmem:[%s8250_s11 + $0x20] sm:$0xff]  ;;  %v4732_v31 = vld [vmem:[%s8250_s11 + $0xb0] sm:$0xff] }
 0xd01   : > { %v4338_v19 = vadd.f32 %v4337_v10, %v4336_v4  ;;  %v4715_v4 = vld [vmem:[%s8250_s11 + $0x28] sm:$0xff]  ;;  %v4733_v10 = vld [vmem:[%s8250_s11 + $0xb8] sm:$0xff] }
 0xd02   : > { %v4333_v20 = vrot.slane %v4332_v18, 1 }
 0xd03   : > { %v4339_v21 = vrot.slane %v4338_v19, 1 }
 0xd04   : > { %v4334_v23 = vadd.f32 %v4333_v20, %v4332_v18  ;;  %v6858_v18 = vpack.c.bf16 %v4715_v4, %v4714_v8  ;;  %v4716_v20 = vld [vmem:[%s8250_s11 + $0x30] sm:$0xff]  ;;  %v7376_v4 = vmov 0  }
 0xd05   : > { %v4340_v22 = vadd.f32 %v4339_v21, %v4338_v19  ;;  %v6860_v19 = vpack.c.bf16 %v4733_v10, %v4732_v31  ;;  %v4717_v21 = vld [vmem:[%s8250_s11 + $0x38] sm:$0xff]  ;;  %7066 = vset.pattern.permute.xlu0 %v7376_v4  ;;  %v5253_v10 = vld [vmem:[#allocation15] ss:$0 sm:$0xff] }
 0xd07   : > { %4437 = vmatprep.mubr.f32.mxu1 %v4340_v22  ;;  %v4734_v22 = vld [vmem:[%s8250_s11 + $0xc0] sm:$0xff] }
 0xd08   : > { %4438 = vmatmul.mubr.f32.vlgmr.msra.gmra.mrb[6].mxu1 %v4334_v23  ;;  %v4735_v23 = vld [vmem:[%s8250_s11 + $0xc8] sm:$0xff] }
 0xd09   : > { %6883 = vmatpush3.bf16.msra.mxu1 %v7950_v37  ;;  %v5246_v37 = vld [vmem:[%s8244_s5 + $0x30] sm:$0xff] }
 0xd0a   : > { %6885 = vmatprep.subr.bf16.mxu1 %v7952_v38  ;;  %v5247_v38 = vld [vmem:[%s8244_s5 + $0x38] sm:$0xff] }
 0xd0d   : > { %6887 = vmatpush3.bf16.msra.mxu1 %v7968_v45  ;;  %v6838_v45 = vpack.c.bf16 %v5247_v38, %v5246_v37  ;;  %v6862_v37 = vpack.c.bf16 %v4717_v21, %v4716_v20  ;;  %v6864_v38 = vpack.c.bf16 %v4735_v23, %v4734_v22 }
 0xd0e   : > { %6889 = vmatprep.subr.bf16.mxu1 %v7971_v47 }
 0xd0f   : > { %6839 = vmatpush3.bf16.msra.mxu0 %v6838_v45  ;;  %v4718_v45 = vld [vmem:[%s8250_s11 + $0x40] sm:$0xff] }
 0xd10   : > { %5444 = vmatprep.subr.mxu0 %v7373_v1 }
 0xd11   : > { %6891 = vmatpush3.bf16.msra.mxu1 %v7980_v55 }
 0xd12   : > { %6893 = vmatprep.subr.bf16.mxu1 %v7996_v24 }
 0xd15   : > { %6895 = vmatpush3.bf16.msra.mxu1 %v8004_v27 }
 0xd16   : > { %6897 = vmatprep.subr.bf16.mxu1 %v8014_v33 }
 0xd19   : > { %6899 = vmatpush3.bf16.msra.mxu1 %v8022_v36  ;;  %v4610_v36 = vld [vmem:[#allocation14] sm:$0xff] }
 0xd1a   : > { %6901 = vmatprep.subr.bf16.mxu1 %v8034_v42  ;;  %v4617_v42 = vld [vmem:[#allocation14 + $0x38] sm:$0xff]  ;;  %v6842_v43 = vpack.c.bf16 %v4612_v40, %v4610_v36 }
 0xd1b   : > { %v6844_v44 = vpack.c.bf16 %v4617_v42, %v4615_v41  ;;  %v4723_v36 = vld [vmem:[%s8250_s11 + $0x68] sm:$0xff]  ;;  %v4740_v40 = vld [vmem:[%s8250_s11 + $0xf0] sm:$0xff]  ;;  %v4741_v41 = vld [vmem:[%s8250_s11 + $0xf8] sm:$0xff] }
 0xd1c   : > { %v6874_v42 = vpack.c.bf16 %v4723_v36, %v4722_v35 }
 0xd1d   : > { %6903 = vmatpush3.bf16.msra.mxu1 %v6824_v48  ;;  %v4616_v48 = vld [vmem:[#allocation14 + $0x30] sm:$0xff] }
 0xd1e   : > { %6905 = vmatprep.subr.bf16.mxu1 %v6826_v49  ;;  %v6846_v49 = vpack.c.bf16 %v4616_v48, %v4614_v46  ;;  %v4725_v46 = vld [vmem:[%s8250_s11 + $0x78] sm:$0xff] }
 0xd21   : > { %6907 = vmatpush3.bf16.msra.mxu1 %v6828_v54 }
 0xd22   : > { %6909 = vmatprep.subr.bf16.mxu1 %v6830_v56 }
 0xd25   : > { %6911 = vmatpush3.bf16.msra.mxu1 %v6832_v62  ;;  %v4711_v62 = vld [vmem:[%s8250_s11 + $0x8] sm:$0xff] }
 0xd26   : > { %v6850_v3 = vpack.c.bf16 %v4711_v62, %v4710_v61 }
 0xddb   : > { %v5332_v47 = vpop.f32.mrb[6].mxu1 }
 0xddc   : > { %v5333_v55 = vpop.f32.mrb[7].mxu1 }
 0xddd   : > { %v5334_v24 = vadd.f32 %v5333_v55, %v5332_v47  ;;  %v4719_v47 = vld [vmem:[%s8250_s11 + $0x48] sm:$0xff] }
 0xdde   : > { %v6866_v55 = vpack.c.bf16 %v4719_v47, %v4718_v45 }
 0xddf   : > { %5442 = vmatmul.mubr.msk.f32.vlgmr.msra.gmra.mrb[12].mxu0 %vm2498_vm10, %v5334_v24  ;;  %v4736_v24 = vld [vmem:[%s8250_s11 + $0xd0] sm:$0xff] }
 0xde0   : > { %5446 = vmatprep.mubr.msk.f32.mxu0 %vm7375_vm9, %v7373_v1  ;;  %5445 = vmatpush3.msk.msra.mxu0 %vm2579_vm11, %v4525_v25  ;;  %v4737_v25 = vld [vmem:[%s8250_s11 + $0xd8] sm:$0xff] }
 0xde1   : > { %6841 = vmatprep.subr.bf16.mxu0 %v6840_v39 }
 0xeb2   : > { %v4519_v27 = vpop.f32.mrb[12].mxu0 }
 0xeb3   : > { %v4520_v28 = vadd.f32 %v4519_v27, %v4449_v26  ;;  %v5443_v30 = vpop.f32.mrb[13].mxu0  ;;  %v6868_v26 = vpack.c.bf16 %v4737_v25, %v4736_v24  ;;  %v4720_v27 = vld [vmem:[%s8250_s11 + $0x50] sm:$0xff] }
 0xeb4   : > { %v4738_v30 = vld [vmem:[%s8250_s11 + $0xe0] sm:$0xff] }
 0xeb5   : > { %v4523_v33 = vmax.f32 %v4520_v28, 0.0  ;;  %v4721_v28 = vld [vmem:[%s8250_s11 + $0x58] sm:$0xff]  ;;  %v6872_v39 = vpack.c.bf16 %v4739_v34, %v4738_v30 }
 0xeb7   : > { %5447 = vmatmul.mubr.msk.f32.vlgmr.msra.gmra.mrb[14].mxu0 %vm2575_vm12, %v4523_v33  ;;  %v6870_v33 = vpack.c.bf16 %v4721_v28, %v4720_v27 }
 0xeb8   : > { %4685 = vmatprep.mubr.f32.mxu0 %v7373_v1  ;;  %6843 = vmatpush1.bf16.msra.mxu0 %v6842_v43  ;;  %v6876_v43 = vpack.c.bf16 %v4741_v41, %v4740_v40 }
 0xeb9   : > { %6845 = vmatprep.subr.bf16.mxu0 %v6844_v44  ;;  %v4724_v44 = vld [vmem:[%s8250_s11 + $0x70] sm:$0xff] }
 0xeba   : > { %v6878_v48 = vpack.c.bf16 %v4725_v46, %v4724_v44 }
 0xebc   : > { %6847 = vmatpush1.bf16.msra.mxu0 %v6846_v49 }
 0xebd   : > { %6849 = vmatprep.subr.bf16.mxu0 %v6848_v52 }
 0xf8a   : > { %v4600_v54 = vpop.f32.mrb[14].mxu0 }
 0xf8b   : > { %v4601_v56 = vadd.f32 %v4600_v54, %v4527_v53  ;;  %v5448_v57 = vpop.f32.mrb[15].mxu0 }
 0xf8d   : > { %v5251_v58 = vmul.f32 -1.442695, %v4601_v56 }
 0xf8f   : > { %7071 = vpow2.f32 %v5251_v58 }
 0xf99   : > { %v7072_v59 = vpop.eup %7071 }
 0xf9a   : > { %v4607_v60 = vadd.f32 1.0, %v7072_v59 }
 0xf9c   : > { %7073 = vrcp.f32 %v4607_v60 }
 0xfa6   : > { %v7074_v9 = vpop.eup %7073 }
 0xfa7   : > { %5252 = vmatmul.mubr.msk.f32.vlgmr.msra.gmra.mrb[16].mxu0 %vm2498_vm10, %v7074_v9 }
 0xfa8   : > { %6851 = vmatpush3.bf16.msra.mxu0 %v6850_v3 }
 0xfa9   : > { %6853 = vmatprep.subr.bf16.mxu0 %v6852_v5 }
 0xfac   : > { %6855 = vmatpush3.bf16.msra.mxu0 %v6854_v16  ;;  %v6913_v16 = vpack.c.bf16 %v4951_v12, %v4950_v11 }
 0xfad   : > { %6857 = vmatprep.subr.bf16.mxu0 %v6856_v32  ;;  %v4953_v32 = vld [vmem:[%s8253_s14 + $0x18] sm:$0xff] }
 0xfb0   : > { %6859 = vmatpush3.bf16.msra.mxu0 %v6858_v18 }
 0xfb1   : > { %6861 = vmatprep.subr.bf16.mxu0 %v6860_v19 }
 0xfb4   : > { %6863 = vmatpush3.bf16.msra.mxu0 %v6862_v37  ;;  %v4819_v37 = vld [vmem:[#allocation17] sm:$0x1] }
 0xfb5   : > { %6865 = vmatprep.subr.bf16.mxu0 %v6864_v38  ;;  %vm4820_vm5 = vcmp.gt.f32.partialorder %v4819_v37, 0.5 }
 0xfb6   : > { %v4827_v47 = vsel %vm4820_vm5, 1, %v7376_v4 }
 0xfb8   : > { %6867 = vmatpush3.bf16.msra.mxu0 %v6866_v55  ;;  %v4831_v55 = vrot.slane %v4827_v47, %v7743_v2 }
 0xfb9   : > { %6869 = vmatprep.subr.bf16.mxu0 %v6868_v26  ;;  %v4954_v26 = vld [vmem:[#allocation3] sm:$0x1] }
 0xfba   : > { %vm4832_vm6 = vcmp.eq.s32.totalorder %v4831_v55, 1 }
 0xfbc   : > { %6871 = vmatpush3.bf16.msra.mxu0 %v6870_v33 }
 0xfbd   : > { %6873 = vmatprep.subr.bf16.mxu0 %v6872_v39 }
 0xfc0   : > { %6875 = vmatpush3.bf16.msra.mxu0 %v6874_v42 }
 0xfc1   : > { %6877 = vmatprep.subr.bf16.mxu0 %v6876_v43 }
 0xfc4   : > { %6879 = vmatpush3.bf16.msra.mxu0 %v6878_v48 }
 0xfc5   : > { %6912 = vmatprep.subr.bf16.mxu0 %v7374_v17 }
0x107a   : > { %v4687_v49 = vpop.f32.mrb[16].mxu0 }
0x107b   : > { %v4695_v50 = vrot.slane %v4687_v49, %v7743_v2  ;;  %v4689_v51 = vpop.f32.mrb[17].mxu0 }
0x107c   : > { %v4699_v52 = vrot.slane %v4689_v51, %v7743_v2 }
0x107d   : > { %v4700_v53 = vmul.f32 %v4695_v50, %v8075_v14 }
0x107e   : > { %v4701_v54 = vmul.f32 %v4699_v52, %v8078_v29 }
0x107f   : > { %v4702_v56 = vadd.f32 %v4700_v53, %v7909_v13 }
0x1080   : > { %v4703_v57 = vadd.f32 %v4701_v54, %v7912_v15 }
0x1081   : > { %vm4704_vm3 = vcmp.gt.f32.partialorder %v4702_v56, 0.0  ;;  %v4706_v58 = vmul.f32 0.01, %v4702_v56 }
0x1082   : > { %vm4705_vm4 = vcmp.gt.f32.partialorder %v4703_v57, 0.0  ;;  %v4707_v59 = vmul.f32 0.01, %v4703_v57 }
0x1083   : > { %v4708_v60 = vsel %vm4704_vm3, %v4702_v56, %v4706_v58 }
0x1084   : > { %v4709_v61 = vsel %vm4705_vm4, %v4703_v57, %v4707_v59  ;;  %v4836_v62 = vrot.slane %v4708_v60, 4 }
0x1085   : > { %4813 = vmatprep.mubr.f32.mxu0 %v4709_v61  ;;  %v4842_v63 = vrot.slane %v4709_v61, 4 }
0x1086   : > { %4814 = vmatmul.mubr.f32.vlgmr.msra.gmra.mrb[18].mxu0 %v4708_v60  ;;  %v4837_v0 = vadd.f32 %v4836_v62, %v4708_v60 }
0x1087   : > { %v4843_v3 = vadd.f32 %v4842_v63, %v4709_v61  ;;  %5457 = vmatprep.mubr.msk.f32.mxu0 %vm7375_vm9, %v7373_v1  ;;  %6914 = vmatpush3.bf16.msra.mxu0 %v6913_v16  ;;  %v4952_v1 = vld [vmem:[%s8253_s14 + $0x10] sm:$0xff] }
0x1088   : > { %v4838_v14 = vrot.slane %v4837_v0, 2  ;;  %6915 = vmatprep.subr.bf16.mxu0 %v7374_v17  ;;  %v6916_v8 = vpack.c.bf16 %v4953_v32, %v4952_v1 }
0x1089   : > { %v4844_v29 = vrot.slane %v4843_v3, 2 }
0x108a   : > { %v4839_v13 = vadd.f32 %v4838_v14, %v4837_v0 }
0x108b   : > { %v4845_v5 = vadd.f32 %v4844_v29, %v4843_v3  ;;  %6917 = vmatpush3.bf16.msra.mxu0 %v6916_v8 }
0x108c   : > { %v4840_v15 = vrot.slane %v4839_v13, 1 }
0x108d   : > { %v4846_v6 = vrot.slane %v4845_v5, 1 }
0x108e   : > { %v4841_v9 = vadd.f32 %v4840_v15, %v4839_v13 }
0x108f   : > { %v4847_v7 = vadd.f32 %v4846_v6, %v4845_v5 }
0x1091   : > { %4944 = vmatprep.mubr.f32.mxu1 %v4847_v7 }
0x1092   : > { %4945 = vmatmul.mubr.f32.vlgmr.msra.gmra.mrb[8].mxu1 %v4841_v9 }
0x1159   : > { %v5374_v31 = vpop.f32.mrb[18].mxu0 }
0x115a   : > { %v5375_v18 = vpop.f32.mrb[19].mxu0 }
0x115b   : > { %v5376_v19 = vadd.f32 %v5375_v18, %v5374_v31 }
0x115d   : > { %v4816_v20 = vadd.f32 %v5376_v19, %v5253_v10 }
0x115f   : > { %v5254_v21 = vmul.f32 -1.442695, %v4816_v20 }
0x1161   : > { %7075 = vpow2.f32 %v5254_v21 }
0x1165   : > { %v5409_v17 = vpop.f32.mrb[8].mxu1 }
0x1166   : > { %v5410_v22 = vpop.f32.mrb[9].mxu1 }
0x1167   : > { %v5411_v23 = vadd.f32 %v5410_v22, %v5409_v17 }
0x1169   : > { %5458 = vmatmul.mubr.msk.f32.vlgmr.msra.gmra.mrb[20].mxu0 %vm2498_vm10, %v5411_v23 }
0x116b   : > { %v7076_v38 = vpop.eup %7075 }
0x116c   : > { %v4824_v45 = vadd.f32 1.0, %v7076_v38 }
0x116e   : > { %7077 = vrcp.f32 %v4824_v45 }
0x1178   : > { %v7078_v24 = vpop.eup %7077 }
0x1179   : > { %v4833_v25 = vsel %vm4832_vm6, %v7078_v24, %v4816_v20 }
0x117a   : > { %4835 = vst.msk [vmem:[%s695_s19] sm:$0xff] %vm4834_vm7, %v4833_v25 }
0x123c   : > { %v5024_v27 = vpop.f32.mrb[20].mxu0 }
0x123d   : > { %v5025_v28 = vadd.f32 %v5024_v27, %v4954_v26  ;;  %v5459_v30 = vpop.f32.mrb[21].mxu0 }
0x123f   : > { %5030 = vperm.xlu0 %7066, %v5025_v28  }
0x12be   : > { %v5031_v2 = vpop.permute.xlu0 %5030 }
0x12bf   : > { %5033 = vst [vmem:[%s698_s26] sm:$0x1] %v5031_v2 }
0x12c0 PF: > { %s8290_s17 = sld [smem:[#allocation23_spill]] }
0x12c6   : > { %s35_s26 = sadd.s32 1, %s8290_s17  }
0x12c7   : > { %p32_p11 = scmp.ge.s32.totalorder %s35_s26, 4  }
0x12c9   :  { %34 = sbr.rel (!%p32_p11) target bundleno = 11 (0xb), region = 192 }
0x12d0   :  { %5065 = vsyncpa [#allocation5], 1 }
0x12d1   :  { %5067 = vsyncpa [#allocation5 + $0x1], 1 }
0x12d2   :  { %5068 = vsyncpa [#allocation7], 1 }
0x12d3   :  { %5069 = vsyncpa [#allocation10], 1 }
0x12d4   :  { %5070 = vsyncpa [#allocation13], 1 }
0x12d5   :  { %5071 = vsyncpa [#allocation16], 1 }

</bundles_post_ra>
